<compile_context>
chip_gen: v6e
topology: v6e:2x2x1
jax: 0.10.0
libtpu: 0.0.40
codegen_flags: <defaults>
</compile_context>

<pallas_src>
import jax
import jax.numpy as jnp
from jax.experimental import pallas as pl
from jax.experimental.pallas import tpu as pltpu

# ----------------------------- small synthetic config -----------------------------
B = 2           # batch
C_IN = 16       # channels of z / x (the channel graph in the reference is 16x16)
HZ = WZ = 12    # template spatial
HX = WX = 24    # search spatial
C_MS = 16       # channels produced by cs_18/cs_16/cs_14 (== cs_MP width == C_IN)
PATCH = 4       # patch size (small stand-in for 16)
EMBED = 128     # embed dim  (small stand-in for 384)
GROUPS = 5      # split_channel -> 5 groups of 3 channels
# Token-tile cap for the fused patch-embed/LN matmul.  Production guidance:
#   v5e/v6e: 512-1024 rows (bf16), vmem_limit ~64-96 MiB;
#   v7x:     cap near 512-1024 and keep vmem_limit <= ~48 MiB (64 MiB physical VMEM).
TILE_N = 128

IM_MEAN = jnp.array([0.485, 0.456, 0.406], jnp.float32)
IM_STD = jnp.array([0.229, 0.224, 0.225], jnp.float32)

_PE_PARAMS = pltpu.CompilerParams(
    dimension_semantics=("parallel", "parallel", "arbitrary"),
    vmem_limit_bytes=48 * 1024 * 1024)


# --------------------------------- Pallas kernels ---------------------------------
def _ms_graph_kernel(xw_ref, xf_ref, zf_ref, wcs_ref, bcs_ref, wmp_ref, bmp_ref,
                     w_ref, xcg_ref, zcg_ref):
    """Single-invocation fused: the three 1x1 convs (cs_18/cs_16/cs_14), avg+max 3x3
    pooling, cs_MP, channel-correlation graph, and the channel reweighting of z / x,
    for all batches.  cm = ms^T @ ms is accumulated per scale, avoiding the sub-128-lane
    slices / lane-axis concatenate of the previous version (only 16 lanes are live)."""
    nb, taps, s, cin = xw_ref.shape
    nms = wmp_ref.shape[0]                                    # C_MS
    for b in range(nb):                                       # B tiny & static: unrolled
        xw = xw_ref[b].reshape(taps * s, cin)
        cm = jnp.zeros((nms, nms), jnp.float32)
        for k in range(3):                                    # cs_18 / cs_16 / cs_14
            # 1x1 conv in channels-last layout = one MXU matmul per scale.
            y = (jnp.dot(xw, wcs_ref[k], preferred_element_type=jnp.float32)
                 + bcs_ref[k]).reshape(taps, s, nms)
            # AvgPool2d(3,3)+MaxPool2d(3,3): a 1x1 conv commutes with per-tap
            # evaluation, so the tap reduction of conv(x) == pool(conv(x)).
            pooled = jnp.mean(y, axis=0) + jnp.max(y, axis=0)           # (s, nms)
            ms_k = jnp.dot(pooled, wmp_ref[...],
                           preferred_element_type=jnp.float32) + bmp_ref[...]
            # cs_MP is per-token, so cm = ms^T@ms over the concatenated tokens equals
            # the sum of the per-scale Gram matrices -- no concatenate needed.
            cm = cm + jax.lax.dot_general(ms_k, ms_k, (((0,), (0,)), ((), ())),
                                          preferred_element_type=jnp.float32)
        row = jax.lax.broadcasted_iota(jnp.int32, (nms, nms), 0)
        col = jax.lax.broadcasted_iota(jnp.int32, (nms, nms), 1)
        diag = row == col
        cm = jnp.where(diag, 0.0, cm)                         # cm[:, i, i] = 0
        l2 = jnp.sqrt(jnp.sum(cm * cm, axis=-1, keepdims=True))
        cm = cm / jnp.maximum(l2, 1e-12)                      # F.normalize(p=2), f32
        cm = jnp.where(diag, 0.0, cm)                         # cm[:, i, i] = 0
        w = jnp.sum(jnp.abs(cm), axis=-1, keepdims=True)      # L1 norm -> (C, 1)

        w_ref[b] = w
        xcg_ref[b] = xf_ref[b] * w      # x * w_reshape, flattened like .view(B, C, -1)
        zcg_ref[b] = zf_ref[b] * w


def ms_channel_graph(x_win, x_flat, z_flat, w_cs, b_cs, w_mp, b_mp):
    b, _, _, cin = x_win.shape
    nxf = x_flat.shape[-1]
    nzf = z_flat.shape[-1]
    # Whole-array (no grid) invocation: total working set is a few hundred KB, so one
    # step avoids per-grid-step overhead; forfeiting the 2-TC split is irrelevant here.
    return pl.pallas_call(
        _ms_graph_kernel,
        out_shape=(jax.ShapeDtypeStruct((b, cin, 1), jnp.float32),
                   jax.ShapeDtypeStruct((b, cin, nxf), jnp.float32),
                   jax.ShapeDtypeStruct((b, cin, nzf), jnp.float32)),
    )(x_win, x_flat, z_flat, w_cs, b_cs, w_mp, b_mp)


def _pe_sum_ln_kernel(a_ref, w_ref, b_ref, pos_ref, g_ref, beta_ref, o_ref, acc_ref):
    """Fused patch_embed (all GROUPS streams) + stream sum + pos_embed + LayerNorm.
    Grid = (batch, token_tile, group); group is the reduction axis."""
    g = pl.program_id(2)

    @pl.when(g == 0)
    def _():
        acc_ref[...] = jnp.zeros_like(acc_ref)

    # a_ref: (1, 1, tile_n, K) bf16 ; w_ref: (K, E) bf16 ; f32 MXU accumulation.
    acc_ref[...] += jnp.dot(a_ref[0, 0], w_ref[...],
                            preferred_element_type=jnp.float32)

    @pl.when(g == pl.num_programs(2) - 1)
    def _():
        # x = x0+x1+x2+x3+x4; each (identity-blocks) stream contributed '+bias' and
        # '+pos_embed', so the epilogue collapses to '+ GROUPS*(bias+pos)'.
        # recover_tokens('direct') is identity; LayerNorm eps=1e-6 per finetune_track.
        x = acc_ref[...] + float(GROUPS) * (b_ref[...] + pos_ref[0])     # f32
        mu = jnp.mean(x, axis=-1, keepdims=True)
        var = jnp.mean(jnp.square(x - mu), axis=-1, keepdims=True)
        xn = (x - mu) * jax.lax.rsqrt(var + 1e-6)
        o_ref[0] = (xn * g_ref[...] + beta_ref[...]).astype(o_ref.dtype)


def _pick_token_tile(ntok, cap=TILE_N):
    if ntok <= cap:
        return ntok
    for t in range(cap - cap % 8, 7, -8):      # largest multiple of 8 dividing ntok
        if ntok % t == 0:
            return t
    return ntok


def patch_embed_sum_layernorm(lhs, w_pe, b_pe, pos_all, gamma, beta):
    """lhs: (GROUPS, B, ntok, K) bf16.  Returns LayerNorm(sum_g lhs[g]@w_pe
    + GROUPS*(b_pe + pos_all)) as (B, ntok, E) f32 -- no intermediate in HBM."""
    groups, b, ntok, k = lhs.shape
    e = w_pe.shape[1]
    tile_n = _pick_token_tile(ntok)
    grid = (b, ntok // tile_n, groups)
    # TODO(synk): if profiling at production sizes shows exposed A-side DMA, add
    # pipeline_mode=pl.Buffered(3) on the lhs BlockSpec only (weight stays resident).
    return pl.pallas_call(
        _pe_sum_ln_kernel,
        out_shape=jax.ShapeDtypeStruct((b, ntok, e), jnp.float32),
        grid=grid,
        in_specs=[pl.BlockSpec((1, 1, tile_n, k), lambda bi, ti, gi: (gi, bi, ti, 0)),
                  pl.BlockSpec((k, e), lambda bi, ti, gi: (0, 0)),
                  pl.BlockSpec((1, e), lambda bi, ti, gi: (0, 0)),
                  pl.BlockSpec((1, tile_n, e), lambda bi, ti, gi: (0, ti, 0)),
                  pl.BlockSpec((1, e), lambda bi, ti, gi: (0, 0)),
                  pl.BlockSpec((1, e), lambda bi, ti, gi: (0, 0))],
        out_specs=pl.BlockSpec((1, tile_n, e), lambda bi, ti, gi: (bi, ti, 0)),
        scratch_shapes=[pltpu.VMEM((tile_n, e), jnp.float32)],
        compiler_params=_PE_PARAMS,
    )(lhs, w_pe, b_pe, pos_all, gamma, beta)


# ------------------------------------ glue ops ------------------------------------
def window_tap_layout(x):
    """NCHW -> (B, 9, (H/3)*(W/3), C): 3x3 pooling-window taps on a leading axis,
    output spatial row-major, channels last (feeds the fused 1x1-conv matmul)."""
    b, c, h, w = x.shape
    h3, w3 = h // 3, w // 3
    xw = x.reshape(b, c, h3, 3, w3, 3)
    xw = xw.transpose(0, 3, 5, 2, 4, 1)          # (b, dh, dw, h3, w3, c)
    return xw.reshape(b, 9, h3 * w3, c)


def patchify(img):
    """(B, 3, H, W) -> (B, (H/P)*(W/P), 3*P*P) with (c, ph, pw) flattened, c outermost."""
    b, c, h, w = img.shape
    gh, gw = h // PATCH, w // PATCH
    p = img.reshape(b, c, gh, PATCH, gw, PATCH)
    return p.transpose(0, 2, 4, 1, 3, 5).reshape(b, gh * gw, c * PATCH * PATCH)


def split_channel(img, order_idx):
    # TODO(synk): split_channel is defined outside this module; modeled as grouping the
    # top-sorted channels into 5 RGB-like groups of 3.
    groups = []
    for g in range(GROUPS):
        idx = order_idx[:, 3 * g: 3 * g + 3]                      # (B, 3)
        groups.append(jnp.take_along_axis(img, idx[:, :, None, None], axis=1))
    return groups


def init_params(key):
    ks = jax.random.split(key, 8)
    s = 0.02
    nz = (HZ // PATCH) * (WZ // PATCH)
    nx = (HX // PATCH) * (WX // PATCH)
    return {
        # TODO(synk): cs_18/cs_16/cs_14/cs_MP architectures are undefined in the base
        # class; modeled as deterministic 1x1 convs / a linear layer (stacked per scale).
        'w_cs': s * jax.random.normal(ks[0], (3, C_IN, C_MS), jnp.float32),
        'b_cs': jnp.zeros((3, 1, C_MS), jnp.float32),
        'w_mp': s * jax.random.normal(ks[3], (C_MS, C_MS), jnp.float32),
        'b_mp': jnp.zeros((1, C_MS), jnp.float32),
        'w_pe': s * jax.random.normal(ks[4], (3 * PATCH * PATCH, EMBED), jnp.float32),
        'b_pe': jnp.zeros((1, EMBED), jnp.float32),
        'pos_embed_z': s * jax.random.normal(ks[5], (1, nz, EMBED), jnp.float32),
        'pos_embed_x': s * jax.random.normal(ks[6], (1, nx, EMBED), jnp.float32),
        'ln_gamma': jnp.ones((1, EMBED), jnp.float32),
        'ln_beta': jnp.zeros((1, EMBED), jnp.float32),
    }


def base_backbone_forward(params, z, x):
    b = x.shape[0]

    # --- host-side layout prep (pure data movement) ---
    x_win = window_tap_layout(x)                   # (B, 9, 64, C_IN)
    x_flat = x.reshape(b, C_IN, HX * WX)
    z_flat = z.reshape(b, C_IN, HZ * WZ)

    # --- fused kernel 1: cs_* convs + avg/max pool + cs_MP + channel graph + reweight ---
    w_col, x_cg, z_cg = ms_channel_graph(
        x_win, x_flat, z_flat,
        params['w_cs'], params['b_cs'], params['w_mp'], params['b_mp'])
    w = w_col[:, :, 0]                             # (B, C_IN)
    cg_res = [z_flat, x_flat, z_cg, x_cg]

    # --- orderY = torch.sort(w, descending=True) (top_k tie-breaking may differ) ---
    order_vals, order_idx = jax.lax.top_k(w, C_IN)
    order_idx = order_idx.astype(jnp.int32)
    orderY = (order_vals, order_idx)

    # --- split channels into 5 groups and build the patch-embed lhs ---
    # TODO(synk): the take_along_axis gather + patchify transpose + stack below still
    # materialize the activation in HBM; the durable fix is to scalar-prefetch order_idx
    # (PrefetchScalarGridSpec) and express the channel gather + patchify in the A-operand
    # index_map / an in-kernel DMA from the NCHW image left in HBM (pl.ANY).
    x_groups = split_channel(x, order_idx)
    z_groups = split_channel(z, order_idx)

    # Fold the ImageNet mean/std normalization into the patch-embed weights (in f32),
    # then cast the MXU operands to bf16; accumulation / LN stay in f32 in the kernel.
    svec = jnp.repeat(IM_STD, PATCH * PATCH)                       # (3*P*P,)
    mvec = jnp.repeat(IM_MEAN, PATCH * PATCH)
    w_pe_fold = params['w_pe'] / svec[:, None]
    b_pe_fold = params['b_pe'] - mvec[None, :] @ w_pe_fold

    per_group = []
    for zg, xg in zip(z_groups, x_groups):
        # combine_tokens 'direct' == concat(z tokens, x tokens) along the token dim.
        per_group.append(jnp.concatenate([patchify(zg), patchify(xg)], axis=1))
    lhs = jnp.stack(per_group, axis=0).astype(jnp.bfloat16)        # (GROUPS, B, ntok, K)

    # TODO(synk): self.blocks (transformer stages), the HiViT-style '[..., 0, 0, :]'
    # squeeze and pos_drop are undefined / identity at inference; treated as identity,
    # so the per-stream pos_embed adds fold into '+ GROUPS*pos' inside the fused kernel.
    pos_all = jnp.concatenate([params['pos_embed_z'], params['pos_embed_x']], axis=1)

    # --- fused kernel 2: all 10 patch_embed matmuls + x0+..+x4 + pos + self.norm_ ---
    out = patch_embed_sum_layernorm(lhs, w_pe_fold.astype(jnp.bfloat16),
                                    b_pe_fold, pos_all,
                                    params['ln_gamma'], params['ln_beta'])

    aux_dict = {'attn': None}
    return out, aux_dict, cg_res, orderY


if __name__ == "__main__":
    key = jax.random.PRNGKey(0)
    kz, kx, kp = jax.random.split(key, 3)
    z = jax.random.uniform(kz, (B, C_IN, HZ, WZ), jnp.float32)
    x = jax.random.uniform(kx, (B, C_IN, HX, WX), jnp.float32)
    params = init_params(kp)

    fwd = jax.jit(base_backbone_forward)
    out, aux_dict, cg_res, orderY = fwd(params, z, x)
    jax.block_until_ready(out)
    jax.block_until_ready(cg_res)
    jax.block_until_ready(orderY)

    ntok = (HZ // PATCH) * (WZ // PATCH) + (HX // PATCH) * (WX // PATCH)
    assert out.shape == (B, ntok, EMBED)
    assert cg_res[3].shape == (B, C_IN, HX * WX)
    assert cg_res[2].shape == (B, C_IN, HZ * WZ)
    assert orderY[0].shape == (B, C_IN) and orderY[1].shape == (B, C_IN)
    print("KERNEL_OK")
</pallas_src>

<mosaic_0001>
module attributes {stable_mosaic.version = 11 : i64} {
  func.func @_ms_graph_kernel(%arg0: memref<2x9x64x16xf32, #tpu.memory_space<vmem>>, %arg1: memref<2x16x576xf32, #tpu.memory_space<vmem>>, %arg2: memref<2x16x144xf32, #tpu.memory_space<vmem>>, %arg3: memref<3x16x16xf32, #tpu.memory_space<vmem>>, %arg4: memref<3x1x16xf32, #tpu.memory_space<vmem>>, %arg5: memref<16x16xf32, #tpu.memory_space<vmem>>, %arg6: memref<1x16xf32, #tpu.memory_space<vmem>>, %arg7: memref<2x16x1xf32, #tpu.memory_space<vmem>>, %arg8: memref<2x16x576xf32, #tpu.memory_space<vmem>>, %arg9: memref<2x16x144xf32, #tpu.memory_space<vmem>>) attributes {dimension_semantics = [], scalar_prefetch = 0 : i64, scratch_operands = 0 : i64, tpu.core_type = #tpu.core_type<tc>} {
    %c0 = arith.constant 0 : index
    %c0_0 = arith.constant 0 : index
    %c0_1 = arith.constant 0 : index
    %c0_2 = arith.constant 0 : index
    %0 = vector.load %arg0[%c0, %c0_0, %c0_1, %c0_2] : memref<2x9x64x16xf32, #tpu.memory_space<vmem>>, vector<1x9x64x16xf32>
    %1 = vector.shape_cast %0 : vector<1x9x64x16xf32> to vector<9x64x16xf32>
    %2 = vector.shape_cast %1 : vector<9x64x16xf32> to vector<576x16xf32>
    %cst = arith.constant 0.000000e+00 : f32
    %3 = vector.broadcast %cst : f32 to vector<16x16xf32>
    %c0_3 = arith.constant 0 : index
    %c0_4 = arith.constant 0 : index
    %c0_5 = arith.constant 0 : index
    %4 = vector.load %arg3[%c0_3, %c0_4, %c0_5] : memref<3x16x16xf32, #tpu.memory_space<vmem>>, vector<1x16x16xf32>
    %5 = vector.shape_cast %4 : vector<1x16x16xf32> to vector<16x16xf32>
    %cst_6 = arith.constant dense<0.000000e+00> : vector<576x16xf32>
    %6 = tpu.matmul %2, %5, %cst_6 {dimension_numbers = #tpu.dot_dimension_numbers<[1], [0], [0], [1], [0, 0, 1, 1], [], []>} : vector<576x16xf32>, vector<16x16xf32>, vector<576x16xf32> -> vector<576x16xf32>
    %c0_7 = arith.constant 0 : index
    %c0_8 = arith.constant 0 : index
    %c0_9 = arith.constant 0 : index
    %7 = vector.load %arg4[%c0_7, %c0_8, %c0_9] : memref<3x1x16xf32, #tpu.memory_space<vmem>>, vector<1x1x16xf32>
    %8 = vector.shape_cast %7 : vector<1x1x16xf32> to vector<1x16xf32>
    %9 = vector.broadcast %8 : vector<1x16xf32> to vector<576x16xf32>
    %10 = arith.addf %6, %9 : vector<576x16xf32>
    %11 = vector.shape_cast %10 : vector<576x16xf32> to vector<9x64x16xf32>
    %cst_10 = arith.constant dense<0.000000e+00> : vector<64x16xf32>
    %12 = vector.multi_reduction <add>, %11, %cst_10 [0] : vector<9x64x16xf32> to vector<64x16xf32>
    %cst_11 = arith.constant 9.000000e+00 : f32
    %13 = vector.broadcast %cst_11 : f32 to vector<64x16xf32>
    %14 = arith.divf %12, %13 : vector<64x16xf32>
    %cst_12 = arith.constant dense<0xFF800000> : vector<64x16xf32>
    %15 = vector.multi_reduction <maximumf>, %11, %cst_12 [0] : vector<9x64x16xf32> to vector<64x16xf32>
    %16 = arith.addf %14, %15 : vector<64x16xf32>
    %c0_13 = arith.constant 0 : index
    %c0_14 = arith.constant 0 : index
    %17 = vector.load %arg5[%c0_13, %c0_14] : memref<16x16xf32, #tpu.memory_space<vmem>>, vector<16x16xf32>
    %cst_15 = arith.constant dense<0.000000e+00> : vector<64x16xf32>
    %18 = tpu.matmul %16, %17, %cst_15 {dimension_numbers = #tpu.dot_dimension_numbers<[1], [0], [0], [1], [0, 0, 1, 1], [], []>} : vector<64x16xf32>, vector<16x16xf32>, vector<64x16xf32> -> vector<64x16xf32>
    %c0_16 = arith.constant 0 : index
    %c0_17 = arith.constant 0 : index
    %19 = vector.load %arg6[%c0_16, %c0_17] : memref<1x16xf32, #tpu.memory_space<vmem>>, vector<1x16xf32>
    %20 = vector.broadcast %19 : vector<1x16xf32> to vector<64x16xf32>
    %21 = arith.addf %18, %20 : vector<64x16xf32>
    %cst_18 = arith.constant dense<0.000000e+00> : vector<16x16xf32>
    %22 = tpu.matmul %21, %21, %cst_18 {dimension_numbers = #tpu.dot_dimension_numbers<[0], [0], [1], [1], [0, 1, 1, 1], [], []>} : vector<64x16xf32>, vector<64x16xf32>, vector<16x16xf32> -> vector<16x16xf32>
    %23 = arith.addf %3, %22 : vector<16x16xf32>
    %c1 = arith.constant 1 : index
    %c0_19 = arith.constant 0 : index
    %c0_20 = arith.constant 0 : index
    %24 = vector.load %arg3[%c1, %c0_19, %c0_20] : memref<3x16x16xf32, #tpu.memory_space<vmem>>, vector<1x16x16xf32>
    %25 = vector.shape_cast %24 : vector<1x16x16xf32> to vector<16x16xf32>
    %cst_21 = arith.constant dense<0.000000e+00> : vector<576x16xf32>
    %26 = tpu.matmul %2, %25, %cst_21 {dimension_numbers = #tpu.dot_dimension_numbers<[1], [0], [0], [1], [0, 0, 1, 1], [], []>} : vector<576x16xf32>, vector<16x16xf32>, vector<576x16xf32> -> vector<576x16xf32>
    %c1_22 = arith.constant 1 : index
    %c0_23 = arith.constant 0 : index
    %c0_24 = arith.constant 0 : index
    %27 = vector.load %arg4[%c1_22, %c0_23, %c0_24] : memref<3x1x16xf32, #tpu.memory_space<vmem>>, vector<1x1x16xf32>
    %28 = vector.shape_cast %27 : vector<1x1x16xf32> to vector<1x16xf32>
    %29 = vector.broadcast %28 : vector<1x16xf32> to vector<576x16xf32>
    %30 = arith.addf %26, %29 : vector<576x16xf32>
    %31 = vector.shape_cast %30 : vector<576x16xf32> to vector<9x64x16xf32>
    %cst_25 = arith.constant dense<0.000000e+00> : vector<64x16xf32>
    %32 = vector.multi_reduction <add>, %31, %cst_25 [0] : vector<9x64x16xf32> to vector<64x16xf32>
    %cst_26 = arith.constant 9.000000e+00 : f32
    %33 = vector.broadcast %cst_26 : f32 to vector<64x16xf32>
    %34 = arith.divf %32, %33 : vector<64x16xf32>
    %cst_27 = arith.constant dense<0xFF800000> : vector<64x16xf32>
    %35 = vector.multi_reduction <maximumf>, %31, %cst_27 [0] : vector<9x64x16xf32> to vector<64x16xf32>
    %36 = arith.addf %34, %35 : vector<64x16xf32>
    %c0_28 = arith.constant 0 : index
    %c0_29 = arith.constant 0 : index
    %37 = vector.load %arg5[%c0_28, %c0_29] : memref<16x16xf32, #tpu.memory_space<vmem>>, vector<16x16xf32>
    %cst_30 = arith.constant dense<0.000000e+00> : vector<64x16xf32>
    %38 = tpu.matmul %36, %37, %cst_30 {dimension_numbers = #tpu.dot_dimension_numbers<[1], [0], [0], [1], [0, 0, 1, 1], [], []>} : vector<64x16xf32>, vector<16x16xf32>, vector<64x16xf32> -> vector<64x16xf32>
    %c0_31 = arith.constant 0 : index
    %c0_32 = arith.constant 0 : index
    %39 = vector.load %arg6[%c0_31, %c0_32] : memref<1x16xf32, #tpu.memory_space<vmem>>, vector<1x16xf32>
    %40 = vector.broadcast %39 : vector<1x16xf32> to vector<64x16xf32>
    %41 = arith.addf %38, %40 : vector<64x16xf32>
    %cst_33 = arith.constant dense<0.000000e+00> : vector<16x16xf32>
    %42 = tpu.matmul %41, %41, %cst_33 {dimension_numbers = #tpu.dot_dimension_numbers<[0], [0], [1], [1], [0, 1, 1, 1], [], []>} : vector<64x16xf32>, vector<64x16xf32>, vector<16x16xf32> -> vector<16x16xf32>
    %43 = arith.addf %23, %42 : vector<16x16xf32>
    %c2 = arith.constant 2 : index
    %c0_34 = arith.constant 0 : index
    %c0_35 = arith.constant 0 : index
    %44 = vector.load %arg3[%c2, %c0_34, %c0_35] : memref<3x16x16xf32, #tpu.memory_space<vmem>>, vector<1x16x16xf32>
    %45 = vector.shape_cast %44 : vector<1x16x16xf32> to vector<16x16xf32>
    %cst_36 = arith.constant dense<0.000000e+00> : vector<576x16xf32>
    %46 = tpu.matmul %2, %45, %cst_36 {dimension_numbers = #tpu.dot_dimension_numbers<[1], [0], [0], [1], [0, 0, 1, 1], [], []>} : vector<576x16xf32>, vector<16x16xf32>, vector<576x16xf32> -> vector<576x16xf32>
    %c2_37 = arith.constant 2 : index
    %c0_38 = arith.constant 0 : index
    %c0_39 = arith.constant 0 : index
    %47 = vector.load %arg4[%c2_37, %c0_38, %c0_39] : memref<3x1x16xf32, #tpu.memory_space<vmem>>, vector<1x1x16xf32>
    %48 = vector.shape_cast %47 : vector<1x1x16xf32> to vector<1x16xf32>
    %49 = vector.broadcast %48 : vector<1x16xf32> to vector<576x16xf32>
    %50 = arith.addf %46, %49 : vector<576x16xf32>
    %51 = vector.shape_cast %50 : vector<576x16xf32> to vector<9x64x16xf32>
    %cst_40 = arith.constant dense<0.000000e+00> : vector<64x16xf32>
    %52 = vector.multi_reduction <add>, %51, %cst_40 [0] : vector<9x64x16xf32> to vector<64x16xf32>
    %cst_41 = arith.constant 9.000000e+00 : f32
    %53 = vector.broadcast %cst_41 : f32 to vector<64x16xf32>
    %54 = arith.divf %52, %53 : vector<64x16xf32>
    %cst_42 = arith.constant dense<0xFF800000> : vector<64x16xf32>
    %55 = vector.multi_reduction <maximumf>, %51, %cst_42 [0] : vector<9x64x16xf32> to vector<64x16xf32>
    %56 = arith.addf %54, %55 : vector<64x16xf32>
    %c0_43 = arith.constant 0 : index
    %c0_44 = arith.constant 0 : index
    %57 = vector.load %arg5[%c0_43, %c0_44] : memref<16x16xf32, #tpu.memory_space<vmem>>, vector<16x16xf32>
    %cst_45 = arith.constant dense<0.000000e+00> : vector<64x16xf32>
    %58 = tpu.matmul %56, %57, %cst_45 {dimension_numbers = #tpu.dot_dimension_numbers<[1], [0], [0], [1], [0, 0, 1, 1], [], []>} : vector<64x16xf32>, vector<16x16xf32>, vector<64x16xf32> -> vector<64x16xf32>
    %c0_46 = arith.constant 0 : index
    %c0_47 = arith.constant 0 : index
    %59 = vector.load %arg6[%c0_46, %c0_47] : memref<1x16xf32, #tpu.memory_space<vmem>>, vector<1x16xf32>
    %60 = vector.broadcast %59 : vector<1x16xf32> to vector<64x16xf32>
    %61 = arith.addf %58, %60 : vector<64x16xf32>
    %cst_48 = arith.constant dense<0.000000e+00> : vector<16x16xf32>
    %62 = tpu.matmul %61, %61, %cst_48 {dimension_numbers = #tpu.dot_dimension_numbers<[0], [0], [1], [1], [0, 1, 1, 1], [], []>} : vector<64x16xf32>, vector<64x16xf32>, vector<16x16xf32> -> vector<16x16xf32>
    %63 = arith.addf %43, %62 : vector<16x16xf32>
    %64 = tpu.iota {dimensions = array<i32: 0>} : vector<16x16xi32>
    %65 = tpu.iota {dimensions = array<i32: 1>} : vector<16x16xi32>
    %66 = arith.cmpi eq, %64, %65 : vector<16x16xi32>
    %cst_49 = arith.constant 0.000000e+00 : f32
    %67 = vector.broadcast %cst_49 : f32 to vector<16x16xf32>
    %68 = arith.select %66, %67, %63 : vector<16x16xi1>, vector<16x16xf32>
    %69 = arith.mulf %68, %68 : vector<16x16xf32>
    %cst_50 = arith.constant dense<0.000000e+00> : vector<16xf32>
    %70 = vector.multi_reduction <add>, %69, %cst_50 [1] : vector<16x16xf32> to vector<16xf32>
    %71 = vector.shape_cast %70 : vector<16xf32> to vector<16x1xf32>
    %72 = math.sqrt %71 : vector<16x1xf32>
    %cst_51 = arith.constant 9.99999996E-13 : f32
    %73 = vector.broadcast %cst_51 : f32 to vector<16x1xf32>
    %74 = arith.maximumf %72, %73 : vector<16x1xf32>
    %75 = vector.broadcast %74 : vector<16x1xf32> to vector<16x16xf32>
    %76 = arith.divf %68, %75 : vector<16x16xf32>
    %cst_52 = arith.constant 0.000000e+00 : f32
    %77 = vector.broadcast %cst_52 : f32 to vector<16x16xf32>
    %78 = arith.select %66, %77, %76 : vector<16x16xi1>, vector<16x16xf32>
    %79 = math.absf %78 : vector<16x16xf32>
    %cst_53 = arith.constant dense<0.000000e+00> : vector<16xf32>
    %80 = vector.multi_reduction <add>, %79, %cst_53 [1] : vector<16x16xf32> to vector<16xf32>
    %81 = vector.shape_cast %80 : vector<16xf32> to vector<16x1xf32>
    %c0_54 = arith.constant 0 : index
    %c0_55 = arith.constant 0 : index
    %c0_56 = arith.constant 0 : index
    %82 = vector.load %arg7[%c0_54, %c0_55, %c0_56] : memref<2x16x1xf32, #tpu.memory_space<vmem>>, vector<1x16x1xf32>
    %83 = vector.shape_cast %82 : vector<1x16x1xf32> to vector<16x1xf32>
    %84 = vector.shape_cast %81 : vector<16x1xf32> to vector<1x16x1xf32>
    tpu.vector_store %arg7[%c0_54, %c0_55, %c0_56], %84 {strides = array<i32>} : memref<2x16x1xf32, #tpu.memory_space<vmem>>, vector<1x16x1xf32>,
    %c0_57 = arith.constant 0 : index
    %c0_58 = arith.constant 0 : index
    %c0_59 = arith.constant 0 : index
    %85 = vector.load %arg1[%c0_57, %c0_58, %c0_59] : memref<2x16x576xf32, #tpu.memory_space<vmem>>, vector<1x16x576xf32>
    %86 = vector.shape_cast %85 : vector<1x16x576xf32> to vector<16x576xf32>
    %87 = vector.broadcast %81 : vector<16x1xf32> to vector<16x576xf32>
    %88 = arith.mulf %86, %87 : vector<16x576xf32>
    %c0_60 = arith.constant 0 : index
    %c0_61 = arith.constant 0 : index
    %c0_62 = arith.constant 0 : index
    %89 = vector.load %arg8[%c0_60, %c0_61, %c0_62] : memref<2x16x576xf32, #tpu.memory_space<vmem>>, vector<1x16x576xf32>
    %90 = vector.shape_cast %89 : vector<1x16x576xf32> to vector<16x576xf32>
    %91 = vector.shape_cast %88 : vector<16x576xf32> to vector<1x16x576xf32>
    tpu.vector_store %arg8[%c0_60, %c0_61, %c0_62], %91 {strides = array<i32>} : memref<2x16x576xf32, #tpu.memory_space<vmem>>, vector<1x16x576xf32>,
    %c0_63 = arith.constant 0 : index
    %c0_64 = arith.constant 0 : index
    %c0_65 = arith.constant 0 : index
    %92 = vector.load %arg2[%c0_63, %c0_64, %c0_65] : memref<2x16x144xf32, #tpu.memory_space<vmem>>, vector<1x16x144xf32>
    %93 = vector.shape_cast %92 : vector<1x16x144xf32> to vector<16x144xf32>
    %94 = vector.broadcast %81 : vector<16x1xf32> to vector<16x144xf32>
    %95 = arith.mulf %93, %94 : vector<16x144xf32>
    %c0_66 = arith.constant 0 : index
    %c0_67 = arith.constant 0 : index
    %c0_68 = arith.constant 0 : index
    %96 = vector.load %arg9[%c0_66, %c0_67, %c0_68] : memref<2x16x144xf32, #tpu.memory_space<vmem>>, vector<1x16x144xf32>
    %97 = vector.shape_cast %96 : vector<1x16x144xf32> to vector<16x144xf32>
    %98 = vector.shape_cast %95 : vector<16x144xf32> to vector<1x16x144xf32>
    tpu.vector_store %arg9[%c0_66, %c0_67, %c0_68], %98 {strides = array<i32>} : memref<2x16x144xf32, #tpu.memory_space<vmem>>, vector<1x16x144xf32>,
    %c1_69 = arith.constant 1 : index
    %c0_70 = arith.constant 0 : index
    %c0_71 = arith.constant 0 : index
    %c0_72 = arith.constant 0 : index
    %99 = vector.load %arg0[%c1_69, %c0_70, %c0_71, %c0_72] : memref<2x9x64x16xf32, #tpu.memory_space<vmem>>, vector<1x9x64x16xf32>
    %100 = vector.shape_cast %99 : vector<1x9x64x16xf32> to vector<9x64x16xf32>
    %101 = vector.shape_cast %100 : vector<9x64x16xf32> to vector<576x16xf32>
    %cst_73 = arith.constant 0.000000e+00 : f32
    %102 = vector.broadcast %cst_73 : f32 to vector<16x16xf32>
    %c0_74 = arith.constant 0 : index
    %c0_75 = arith.constant 0 : index
    %c0_76 = arith.constant 0 : index
    %103 = vector.load %arg3[%c0_74, %c0_75, %c0_76] : memref<3x16x16xf32, #tpu.memory_space<vmem>>, vector<1x16x16xf32>
    %104 = vector.shape_cast %103 : vector<1x16x16xf32> to vector<16x16xf32>
    %cst_77 = arith.constant dense<0.000000e+00> : vector<576x16xf32>
    %105 = tpu.matmul %101, %104, %cst_77 {dimension_numbers = #tpu.dot_dimension_numbers<[1], [0], [0], [1], [0, 0, 1, 1], [], []>} : vector<576x16xf32>, vector<16x16xf32>, vector<576x16xf32> -> vector<576x16xf32>
    %c0_78 = arith.constant 0 : index
    %c0_79 = arith.constant 0 : index
    %c0_80 = arith.constant 0 : index
    %106 = vector.load %arg4[%c0_78, %c0_79, %c0_80] : memref<3x1x16xf32, #tpu.memory_space<vmem>>, vector<1x1x16xf32>
    %107 = vector.shape_cast %106 : vector<1x1x16xf32> to vector<1x16xf32>
    %108 = vector.broadcast %107 : vector<1x16xf32> to vector<576x16xf32>
    %109 = arith.addf %105, %108 : vector<576x16xf32>
    %110 = vector.shape_cast %109 : vector<576x16xf32> to vector<9x64x16xf32>
    %cst_81 = arith.constant dense<0.000000e+00> : vector<64x16xf32>
    %111 = vector.multi_reduction <add>, %110, %cst_81 [0] : vector<9x64x16xf32> to vector<64x16xf32>
    %cst_82 = arith.constant 9.000000e+00 : f32
    %112 = vector.broadcast %cst_82 : f32 to vector<64x16xf32>
    %113 = arith.divf %111, %112 : vector<64x16xf32>
    %cst_83 = arith.constant dense<0xFF800000> : vector<64x16xf32>
    %114 = vector.multi_reduction <maximumf>, %110, %cst_83 [0] : vector<9x64x16xf32> to vector<64x16xf32>
    %115 = arith.addf %113, %114 : vector<64x16xf32>
    %c0_84 = arith.constant 0 : index
    %c0_85 = arith.constant 0 : index
    %116 = vector.load %arg5[%c0_84, %c0_85] : memref<16x16xf32, #tpu.memory_space<vmem>>, vector<16x16xf32>
    %cst_86 = arith.constant dense<0.000000e+00> : vector<64x16xf32>
    %117 = tpu.matmul %115, %116, %cst_86 {dimension_numbers = #tpu.dot_dimension_numbers<[1], [0], [0], [1], [0, 0, 1, 1], [], []>} : vector<64x16xf32>, vector<16x16xf32>, vector<64x16xf32> -> vector<64x16xf32>
    %c0_87 = arith.constant 0 : index
    %c0_88 = arith.constant 0 : index
    %118 = vector.load %arg6[%c0_87, %c0_88] : memref<1x16xf32, #tpu.memory_space<vmem>>, vector<1x16xf32>
    %119 = vector.broadcast %118 : vector<1x16xf32> to vector<64x16xf32>
    %120 = arith.addf %117, %119 : vector<64x16xf32>
    %cst_89 = arith.constant dense<0.000000e+00> : vector<16x16xf32>
    %121 = tpu.matmul %120, %120, %cst_89 {dimension_numbers = #tpu.dot_dimension_numbers<[0], [0], [1], [1], [0, 1, 1, 1], [], []>} : vector<64x16xf32>, vector<64x16xf32>, vector<16x16xf32> -> vector<16x16xf32>
    %122 = arith.addf %102, %121 : vector<16x16xf32>
    %c1_90 = arith.constant 1 : index
    %c0_91 = arith.constant 0 : index
    %c0_92 = arith.constant 0 : index
    %123 = vector.load %arg3[%c1_90, %c0_91, %c0_92] : memref<3x16x16xf32, #tpu.memory_space<vmem>>, vector<1x16x16xf32>
    %124 = vector.shape_cast %123 : vector<1x16x16xf32> to vector<16x16xf32>
    %cst_93 = arith.constant dense<0.000000e+00> : vector<576x16xf32>
    %125 = tpu.matmul %101, %124, %cst_93 {dimension_numbers = #tpu.dot_dimension_numbers<[1], [0], [0], [1], [0, 0, 1, 1], [], []>} : vector<576x16xf32>, vector<16x16xf32>, vector<576x16xf32> -> vector<576x16xf32>
    %c1_94 = arith.constant 1 : index
    %c0_95 = arith.constant 0 : index
    %c0_96 = arith.constant 0 : index
    %126 = vector.load %arg4[%c1_94, %c0_95, %c0_96] : memref<3x1x16xf32, #tpu.memory_space<vmem>>, vector<1x1x16xf32>
    %127 = vector.shape_cast %126 : vector<1x1x16xf32> to vector<1x16xf32>
    %128 = vector.broadcast %127 : vector<1x16xf32> to vector<576x16xf32>
    %129 = arith.addf %125, %128 : vector<576x16xf32>
    %130 = vector.shape_cast %129 : vector<576x16xf32> to vector<9x64x16xf32>
    %cst_97 = arith.constant dense<0.000000e+00> : vector<64x16xf32>
    %131 = vector.multi_reduction <add>, %130, %cst_97 [0] : vector<9x64x16xf32> to vector<64x16xf32>
    %cst_98 = arith.constant 9.000000e+00 : f32
    %132 = vector.broadcast %cst_98 : f32 to vector<64x16xf32>
    %133 = arith.divf %131, %132 : vector<64x16xf32>
    %cst_99 = arith.constant dense<0xFF800000> : vector<64x16xf32>
    %134 = vector.multi_reduction <maximumf>, %130, %cst_99 [0] : vector<9x64x16xf32> to vector<64x16xf32>
    %135 = arith.addf %133, %134 : vector<64x16xf32>
    %c0_100 = arith.constant 0 : index
    %c0_101 = arith.constant 0 : index
    %136 = vector.load %arg5[%c0_100, %c0_101] : memref<16x16xf32, #tpu.memory_space<vmem>>, vector<16x16xf32>
    %cst_102 = arith.constant dense<0.000000e+00> : vector<64x16xf32>
    %137 = tpu.matmul %135, %136, %cst_102 {dimension_numbers = #tpu.dot_dimension_numbers<[1], [0], [0], [1], [0, 0, 1, 1], [], []>} : vector<64x16xf32>, vector<16x16xf32>, vector<64x16xf32> -> vector<64x16xf32>
    %c0_103 = arith.constant 0 : index
    %c0_104 = arith.constant 0 : index
    %138 = vector.load %arg6[%c0_103, %c0_104] : memref<1x16xf32, #tpu.memory_space<vmem>>, vector<1x16xf32>
    %139 = vector.broadcast %138 : vector<1x16xf32> to vector<64x16xf32>
    %140 = arith.addf %137, %139 : vector<64x16xf32>
    %cst_105 = arith.constant dense<0.000000e+00> : vector<16x16xf32>
    %141 = tpu.matmul %140, %140, %cst_105 {dimension_numbers = #tpu.dot_dimension_numbers<[0], [0], [1], [1], [0, 1, 1, 1], [], []>} : vector<64x16xf32>, vector<64x16xf32>, vector<16x16xf32> -> vector<16x16xf32>
    %142 = arith.addf %122, %141 : vector<16x16xf32>
    %c2_106 = arith.constant 2 : index
    %c0_107 = arith.constant 0 : index
    %c0_108 = arith.constant 0 : index
    %143 = vector.load %arg3[%c2_106, %c0_107, %c0_108] : memref<3x16x16xf32, #tpu.memory_space<vmem>>, vector<1x16x16xf32>
    %144 = vector.shape_cast %143 : vector<1x16x16xf32> to vector<16x16xf32>
    %cst_109 = arith.constant dense<0.000000e+00> : vector<576x16xf32>
    %145 = tpu.matmul %101, %144, %cst_109 {dimension_numbers = #tpu.dot_dimension_numbers<[1], [0], [0], [1], [0, 0, 1, 1], [], []>} : vector<576x16xf32>, vector<16x16xf32>, vector<576x16xf32> -> vector<576x16xf32>
    %c2_110 = arith.constant 2 : index
    %c0_111 = arith.constant 0 : index
    %c0_112 = arith.constant 0 : index
    %146 = vector.load %arg4[%c2_110, %c0_111, %c0_112] : memref<3x1x16xf32, #tpu.memory_space<vmem>>, vector<1x1x16xf32>
    %147 = vector.shape_cast %146 : vector<1x1x16xf32> to vector<1x16xf32>
    %148 = vector.broadcast %147 : vector<1x16xf32> to vector<576x16xf32>
    %149 = arith.addf %145, %148 : vector<576x16xf32>
    %150 = vector.shape_cast %149 : vector<576x16xf32> to vector<9x64x16xf32>
    %cst_113 = arith.constant dense<0.000000e+00> : vector<64x16xf32>
    %151 = vector.multi_reduction <add>, %150, %cst_113 [0] : vector<9x64x16xf32> to vector<64x16xf32>
    %cst_114 = arith.constant 9.000000e+00 : f32
    %152 = vector.broadcast %cst_114 : f32 to vector<64x16xf32>
    %153 = arith.divf %151, %152 : vector<64x16xf32>
    %cst_115 = arith.constant dense<0xFF800000> : vector<64x16xf32>
    %154 = vector.multi_reduction <maximumf>, %150, %cst_115 [0] : vector<9x64x16xf32> to vector<64x16xf32>
    %155 = arith.addf %153, %154 : vector<64x16xf32>
    %c0_116 = arith.constant 0 : index
    %c0_117 = arith.constant 0 : index
    %156 = vector.load %arg5[%c0_116, %c0_117] : memref<16x16xf32, #tpu.memory_space<vmem>>, vector<16x16xf32>
    %cst_118 = arith.constant dense<0.000000e+00> : vector<64x16xf32>
    %157 = tpu.matmul %155, %156, %cst_118 {dimension_numbers = #tpu.dot_dimension_numbers<[1], [0], [0], [1], [0, 0, 1, 1], [], []>} : vector<64x16xf32>, vector<16x16xf32>, vector<64x16xf32> -> vector<64x16xf32>
    %c0_119 = arith.constant 0 : index
    %c0_120 = arith.constant 0 : index
    %158 = vector.load %arg6[%c0_119, %c0_120] : memref<1x16xf32, #tpu.memory_space<vmem>>, vector<1x16xf32>
    %159 = vector.broadcast %158 : vector<1x16xf32> to vector<64x16xf32>
    %160 = arith.addf %157, %159 : vector<64x16xf32>
    %cst_121 = arith.constant dense<0.000000e+00> : vector<16x16xf32>
    %161 = tpu.matmul %160, %160, %cst_121 {dimension_numbers = #tpu.dot_dimension_numbers<[0], [0], [1], [1], [0, 1, 1, 1], [], []>} : vector<64x16xf32>, vector<64x16xf32>, vector<16x16xf32> -> vector<16x16xf32>
    %162 = arith.addf %142, %161 : vector<16x16xf32>
    %163 = tpu.iota {dimensions = array<i32: 0>} : vector<16x16xi32>
    %164 = tpu.iota {dimensions = array<i32: 1>} : vector<16x16xi32>
    %165 = arith.cmpi eq, %163, %164 : vector<16x16xi32>
    %cst_122 = arith.constant 0.000000e+00 : f32
    %166 = vector.broadcast %cst_122 : f32 to vector<16x16xf32>
    %167 = arith.select %165, %166, %162 : vector<16x16xi1>, vector<16x16xf32>
    %168 = arith.mulf %167, %167 : vector<16x16xf32>
    %cst_123 = arith.constant dense<0.000000e+00> : vector<16xf32>
    %169 = vector.multi_reduction <add>, %168, %cst_123 [1] : vector<16x16xf32> to vector<16xf32>
    %170 = vector.shape_cast %169 : vector<16xf32> to vector<16x1xf32>
    %171 = math.sqrt %170 : vector<16x1xf32>
    %cst_124 = arith.constant 9.99999996E-13 : f32
    %172 = vector.broadcast %cst_124 : f32 to vector<16x1xf32>
    %173 = arith.maximumf %171, %172 : vector<16x1xf32>
    %174 = vector.broadcast %173 : vector<16x1xf32> to vector<16x16xf32>
    %175 = arith.divf %167, %174 : vector<16x16xf32>
    %cst_125 = arith.constant 0.000000e+00 : f32
    %176 = vector.broadcast %cst_125 : f32 to vector<16x16xf32>
    %177 = arith.select %165, %176, %175 : vector<16x16xi1>, vector<16x16xf32>
    %178 = math.absf %177 : vector<16x16xf32>
    %cst_126 = arith.constant dense<0.000000e+00> : vector<16xf32>
    %179 = vector.multi_reduction <add>, %178, %cst_126 [1] : vector<16x16xf32> to vector<16xf32>
    %180 = vector.shape_cast %179 : vector<16xf32> to vector<16x1xf32>
    %c1_127 = arith.constant 1 : index
    %c0_128 = arith.constant 0 : index
    %c0_129 = arith.constant 0 : index
    %181 = vector.load %arg7[%c1_127, %c0_128, %c0_129] : memref<2x16x1xf32, #tpu.memory_space<vmem>>, vector<1x16x1xf32>
    %182 = vector.shape_cast %181 : vector<1x16x1xf32> to vector<16x1xf32>
    %183 = vector.shape_cast %180 : vector<16x1xf32> to vector<1x16x1xf32>
    tpu.vector_store %arg7[%c1_127, %c0_128, %c0_129], %183 {strides = array<i32>} : memref<2x16x1xf32, #tpu.memory_space<vmem>>, vector<1x16x1xf32>,
    %c1_130 = arith.constant 1 : index
    %c0_131 = arith.constant 0 : index
    %c0_132 = arith.constant 0 : index
    %184 = vector.load %arg1[%c1_130, %c0_131, %c0_132] : memref<2x16x576xf32, #tpu.memory_space<vmem>>, vector<1x16x576xf32>
    %185 = vector.shape_cast %184 : vector<1x16x576xf32> to vector<16x576xf32>
    %186 = vector.broadcast %180 : vector<16x1xf32> to vector<16x576xf32>
    %187 = arith.mulf %185, %186 : vector<16x576xf32>
    %c1_133 = arith.constant 1 : index
    %c0_134 = arith.constant 0 : index
    %c0_135 = arith.constant 0 : index
    %188 = vector.load %arg8[%c1_133, %c0_134, %c0_135] : memref<2x16x576xf32, #tpu.memory_space<vmem>>, vector<1x16x576xf32>
    %189 = vector.shape_cast %188 : vector<1x16x576xf32> to vector<16x576xf32>
    %190 = vector.shape_cast %187 : vector<16x576xf32> to vector<1x16x576xf32>
    tpu.vector_store %arg8[%c1_133, %c0_134, %c0_135], %190 {strides = array<i32>} : memref<2x16x576xf32, #tpu.memory_space<vmem>>, vector<1x16x576xf32>,
    %c1_136 = arith.constant 1 : index
    %c0_137 = arith.constant 0 : index
    %c0_138 = arith.constant 0 : index
    %191 = vector.load %arg2[%c1_136, %c0_137, %c0_138] : memref<2x16x144xf32, #tpu.memory_space<vmem>>, vector<1x16x144xf32>
    %192 = vector.shape_cast %191 : vector<1x16x144xf32> to vector<16x144xf32>
    %193 = vector.broadcast %180 : vector<16x1xf32> to vector<16x144xf32>
    %194 = arith.mulf %192, %193 : vector<16x144xf32>
    %c1_139 = arith.constant 1 : index
    %c0_140 = arith.constant 0 : index
    %c0_141 = arith.constant 0 : index
    %195 = vector.load %arg9[%c1_139, %c0_140, %c0_141] : memref<2x16x144xf32, #tpu.memory_space<vmem>>, vector<1x16x144xf32>
    %196 = vector.shape_cast %195 : vector<1x16x144xf32> to vector<16x144xf32>
    %197 = vector.shape_cast %194 : vector<16x144xf32> to vector<1x16x144xf32>
    tpu.vector_store %arg9[%c1_139, %c0_140, %c0_141], %197 {strides = array<i32>} : memref<2x16x144xf32, #tpu.memory_space<vmem>>, vector<1x16x144xf32>,
    return
  }
}

module attributes {stable_mosaic.version = 11 : i64} {
  func.func @_pe_sum_ln_kernel(%arg0: i32, %arg1: i32, %arg2: i32, %arg3: memref<1x1x45x48xbf16, #tpu.memory_space<vmem>>, %arg4: memref<48x128xbf16, #tpu.memory_space<vmem>>, %arg5: memref<1x128xf32, #tpu.memory_space<vmem>>, %arg6: memref<1x45x128xf32, #tpu.memory_space<vmem>>, %arg7: memref<1x128xf32, #tpu.memory_space<vmem>>, %arg8: memref<1x128xf32, #tpu.memory_space<vmem>>, %arg9: memref<1x45x128xf32, #tpu.memory_space<vmem>>, %arg10: memref<45x128xf32, #tpu.memory_space<vmem>>) attributes {dimension_semantics = [#tpu.dimension_semantics<parallel>, #tpu.dimension_semantics<parallel>, #tpu.dimension_semantics<arbitrary>], iteration_bounds = array<i64: 2, 1, 5>, scalar_prefetch = 0 : i64, scratch_operands = 1 : i64, tpu.core_type = #tpu.core_type<tc>, window_params = [{transform_indices = @transform_0, window_bounds = array<i64: 1, 1, 45, 48>}, {pipeline_mode = #tpu.pipeline_mode<synchronous>, transform_indices = @transform_1, window_bounds = array<i64: 48, 128>}, {pipeline_mode = #tpu.pipeline_mode<synchronous>, transform_indices = @transform_2, window_bounds = array<i64: 1, 128>}, {transform_indices = @transform_3, window_bounds = array<i64: 1, 45, 128>}, {pipeline_mode = #tpu.pipeline_mode<synchronous>, transform_indices = @transform_4, window_bounds = array<i64: 1, 128>}, {pipeline_mode = #tpu.pipeline_mode<synchronous>, transform_indices = @transform_5, window_bounds = array<i64: 1, 128>}, {transform_indices = @transform_6, window_bounds = array<i64: 1, 45, 128>}]} {
    %c0_i32 = arith.constant 0 : i32
    %0 = arith.cmpi eq, %arg2, %c0_i32 : i32
    %1 = arith.extui %0 : i1 to i32
    %c0_i32_0 = arith.constant 0 : i32
    %2 = arith.cmpi ne, %1, %c0_i32_0 : i32
    scf.if %2 {
      %cst_11 = arith.constant 0.000000e+00 : f32
      %13 = vector.broadcast %cst_11 : f32 to vector<45x128xf32>
      %c0_12 = arith.constant 0 : index
      %c0_13 = arith.constant 0 : index
      %14 = vector.load %arg10[%c0_12, %c0_13] : memref<45x128xf32, #tpu.memory_space<vmem>>, vector<45x128xf32>
      tpu.vector_store %arg10[%c0_12, %c0_13], %13 {strides = array<i32>} : memref<45x128xf32, #tpu.memory_space<vmem>>, vector<45x128xf32>,
    } else {
    }
    %c0 = arith.constant 0 : index
    %c0_1 = arith.constant 0 : index
    %3 = vector.load %arg10[%c0, %c0_1] : memref<45x128xf32, #tpu.memory_space<vmem>>, vector<45x128xf32>
    %c0_2 = arith.constant 0 : index
    %c0_3 = arith.constant 0 : index
    %c0_4 = arith.constant 0 : index
    %c0_5 = arith.constant 0 : index
    %4 = vector.load %arg3[%c0_2, %c0_3, %c0_4, %c0_5] : memref<1x1x45x48xbf16, #tpu.memory_space<vmem>>, vector<1x1x45x48xbf16>
    %5 = vector.shape_cast %4 : vector<1x1x45x48xbf16> to vector<45x48xbf16>
    %c0_6 = arith.constant 0 : index
    %c0_7 = arith.constant 0 : index
    %6 = vector.load %arg4[%c0_6, %c0_7] : memref<48x128xbf16, #tpu.memory_space<vmem>>, vector<48x128xbf16>
    %cst = arith.constant dense<0.000000e+00> : vector<45x128xf32>
    %7 = tpu.matmul %5, %6, %cst {dimension_numbers = #tpu.dot_dimension_numbers<[1], [0], [0], [1], [0, 0, 1, 1], [], []>} : vector<45x48xbf16>, vector<48x128xbf16>, vector<45x128xf32> -> vector<45x128xf32>
    %8 = arith.addf %3, %7 : vector<45x128xf32>
    %c0_8 = arith.constant 0 : index
    %c0_9 = arith.constant 0 : index
    %9 = vector.load %arg10[%c0_8, %c0_9] : memref<45x128xf32, #tpu.memory_space<vmem>>, vector<45x128xf32>
    tpu.vector_store %arg10[%c0_8, %c0_9], %8 {strides = array<i32>} : memref<45x128xf32, #tpu.memory_space<vmem>>, vector<45x128xf32>,
    %c4_i32 = arith.constant 4 : i32
    %10 = arith.cmpi eq, %arg2, %c4_i32 : i32
    %11 = arith.extui %10 : i1 to i32
    %c0_i32_10 = arith.constant 0 : i32
    %12 = arith.cmpi ne, %11, %c0_i32_10 : i32
    scf.if %12 {
      %c0_11 = arith.constant 0 : index
      %c0_12 = arith.constant 0 : index
      %13 = vector.load %arg10[%c0_11, %c0_12] : memref<45x128xf32, #tpu.memory_space<vmem>>, vector<45x128xf32>
      %c0_13 = arith.constant 0 : index
      %c0_14 = arith.constant 0 : index
      %14 = vector.load %arg5[%c0_13, %c0_14] : memref<1x128xf32, #tpu.memory_space<vmem>>, vector<1x128xf32>
      %c0_15 = arith.constant 0 : index
      %c0_16 = arith.constant 0 : index
      %c0_17 = arith.constant 0 : index
      %15 = vector.load %arg6[%c0_15, %c0_16, %c0_17] : memref<1x45x128xf32, #tpu.memory_space<vmem>>, vector<1x45x128xf32>
      %16 = vector.shape_cast %15 : vector<1x45x128xf32> to vector<45x128xf32>
      %17 = vector.broadcast %14 : vector<1x128xf32> to vector<45x128xf32>
      %18 = arith.addf %17, %16 : vector<45x128xf32>
      %cst_18 = arith.constant 5.000000e+00 : f32
      %19 = vector.broadcast %cst_18 : f32 to vector<45x128xf32>
      %20 = arith.mulf %19, %18 : vector<45x128xf32>
      %21 = arith.addf %13, %20 : vector<45x128xf32>
      %cst_19 = arith.constant dense<0.000000e+00> : vector<45xf32>
      %22 = vector.multi_reduction <add>, %21, %cst_19 [1] : vector<45x128xf32> to vector<45xf32>
      %23 = vector.shape_cast %22 : vector<45xf32> to vector<45x1xf32>
      %cst_20 = arith.constant 1.280000e+02 : f32
      %24 = vector.broadcast %cst_20 : f32 to vector<45x1xf32>
      %25 = arith.divf %23, %24 : vector<45x1xf32>
      %26 = vector.broadcast %25 : vector<45x1xf32> to vector<45x128xf32>
      %27 = arith.subf %21, %26 : vector<45x128xf32>
      %28 = arith.mulf %27, %27 : vector<45x128xf32>
      %cst_21 = arith.constant dense<0.000000e+00> : vector<45xf32>
      %29 = vector.multi_reduction <add>, %28, %cst_21 [1] : vector<45x128xf32> to vector<45xf32>
      %30 = vector.shape_cast %29 : vector<45xf32> to vector<45x1xf32>
      %cst_22 = arith.constant 1.280000e+02 : f32
      %31 = vector.broadcast %cst_22 : f32 to vector<45x1xf32>
      %32 = arith.divf %30, %31 : vector<45x1xf32>
      %33 = vector.broadcast %25 : vector<45x1xf32> to vector<45x128xf32>
      %34 = arith.subf %21, %33 : vector<45x128xf32>
      %cst_23 = arith.constant 9.99999997E-7 : f32
      %35 = vector.broadcast %cst_23 : f32 to vector<45x1xf32>
      %36 = arith.addf %32, %35 : vector<45x1xf32>
      %37 = math.rsqrt %36 : vector<45x1xf32>
      %38 = vector.broadcast %37 : vector<45x1xf32> to vector<45x128xf32>
      %39 = arith.mulf %34, %38 : vector<45x128xf32>
      %c0_24 = arith.constant 0 : index
      %c0_25 = arith.constant 0 : index
      %40 = vector.load %arg7[%c0_24, %c0_25] : memref<1x128xf32, #tpu.memory_space<vmem>>, vector<1x128xf32>
      %41 = vector.broadcast %40 : vector<1x128xf32> to vector<45x128xf32>
      %42 = arith.mulf %39, %41 : vector<45x128xf32>
      %c0_26 = arith.constant 0 : index
      %c0_27 = arith.constant 0 : index
      %43 = vector.load %arg8[%c0_26, %c0_27] : memref<1x128xf32, #tpu.memory_space<vmem>>, vector<1x128xf32>
      %44 = vector.broadcast %43 : vector<1x128xf32> to vector<45x128xf32>
      %45 = arith.addf %42, %44 : vector<45x128xf32>
      %c0_28 = arith.constant 0 : index
      %c0_29 = arith.constant 0 : index
      %c0_30 = arith.constant 0 : index
      %46 = vector.load %arg9[%c0_28, %c0_29, %c0_30] : memref<1x45x128xf32, #tpu.memory_space<vmem>>, vector<1x45x128xf32>
      %47 = vector.shape_cast %46 : vector<1x45x128xf32> to vector<45x128xf32>
      %48 = vector.shape_cast %45 : vector<45x128xf32> to vector<1x45x128xf32>
      tpu.vector_store %arg9[%c0_28, %c0_29, %c0_30], %48 {strides = array<i32>} : memref<1x45x128xf32, #tpu.memory_space<vmem>>, vector<1x45x128xf32>,
    } else {
    }
    return
  }
  func.func @transform_0(%arg0: i32, %arg1: i32, %arg2: i32) -> (i32, i32, i32, i32) {
    %c0_i32 = arith.constant 0 : i32
    %c0_i32_0 = arith.constant 0 : i32
    return %arg2, %arg0, %arg1, %c0_i32 : i32, i32, i32, i32
  }
  func.func @transform_1(%arg0: i32, %arg1: i32, %arg2: i32) -> (i32, i32) {
    %c0_i32 = arith.constant 0 : i32
    %c0_i32_0 = arith.constant 0 : i32
    %c0_i32_1 = arith.constant 0 : i32
    return %c0_i32, %c0_i32_0 : i32, i32
  }
  func.func @transform_2(%arg0: i32, %arg1: i32, %arg2: i32) -> (i32, i32) {
    %c0_i32 = arith.constant 0 : i32
    %c0_i32_0 = arith.constant 0 : i32
    %c0_i32_1 = arith.constant 0 : i32
    return %c0_i32, %c0_i32_0 : i32, i32
  }
  func.func @transform_3(%arg0: i32, %arg1: i32, %arg2: i32) -> (i32, i32, i32) {
    %c0_i32 = arith.constant 0 : i32
    %c0_i32_0 = arith.constant 0 : i32
    %c0_i32_1 = arith.constant 0 : i32
    return %c0_i32, %arg1, %c0_i32_0 : i32, i32, i32
  }
  func.func @transform_4(%arg0: i32, %arg1: i32, %arg2: i32) -> (i32, i32) {
    %c0_i32 = arith.constant 0 : i32
    %c0_i32_0 = arith.constant 0 : i32
    %c0_i32_1 = arith.constant 0 : i32
    return %c0_i32, %c0_i32_0 : i32, i32
  }
  func.func @transform_5(%arg0: i32, %arg1: i32, %arg2: i32) -> (i32, i32) {
    %c0_i32 = arith.constant 0 : i32
    %c0_i32_0 = arith.constant 0 : i32
    %c0_i32_1 = arith.constant 0 : i32
    return %c0_i32, %c0_i32_0 : i32, i32
  }
  func.func @transform_6(%arg0: i32, %arg1: i32, %arg2: i32) -> (i32, i32, i32) {
    %c0_i32 = arith.constant 0 : i32
    %c0_i32_0 = arith.constant 0 : i32
    return %arg0, %arg1, %c0_i32 : i32, i32, i32
  }
}

</mosaic_0001>

<bundles_post_ra>
// kernel: base_backbone_forward.3
= control target key start
LH: loop header
LB: loop body
LE: loop exit
PB: predicated region body
PF: predicated region fallthrough
CT: control target
= control target key end

     0   :  { %s928_s21 = smov 0   ;;  %s930_s22 = smov 0   ;;  %s1036_s0 = inlined_call_operand.vmem [shape: bf16[5,2,45,48], index: 0, kind: input, shape index: {}]   ;;  %s1037_s1 = inlined_call_operand.vmem [shape: bf16[48,128], index: 1, kind: input, shape index: {}]   ;;  %s1038_s2 = inlined_call_operand.vmem [shape: f32[1,128], index: 2, kind: input, shape index: {}]   ;;  %s1039_s3 = inlined_call_operand.vmem [shape: f32[1,45,128], index: 3, kind: input, shape index: {}]   ;;  %s1040_s4 = inlined_call_operand.vmem [shape: f32[1,128], index: 4, kind: input, shape index: {}]   ;;  %s1041_s5 = inlined_call_operand.vmem [shape: f32[1,128], index: 5, kind: input, shape index: {}]   ;;  %s1042_s6 = inlined_call_operand.vmem [shape: f32[2,45,128], index: 6, kind: output, shape index: {}]  }
   0x1   :  { %s932_s23 = smov 0   ;;  %s934_s24 = smov 0  }
   0x2   :  { %s936_s25 = smov 0  }
   0x3 LB: > { %s28_s26 = sadd.s32 1, %s880_s23  ;;  %s35_s27 = sadd.s32 1, %s884_s24  ;;  %s888_s25 = sphi %s936_s25, %s16_s25   ;;  %s884_s24 = sphi %s934_s24, %s1046_s24   ;;  %s880_s23 = sphi %s932_s23, %s1045_s23   ;;  %s876_s22 = sphi %s930_s22, %s1044_s22   ;;  %s872_s21 = sphi %s928_s21, %s1043_s21  }
   0x4   : > { %p29_p0 = scmp.ge.s32.totalorder %s28_s26, 5  ;;  %p737_p1 = scmp.ge.s32.totalorder %s888_s25, 1 }
   0x5   : > { %p257_p2 = scmp.lt.s32.totalorder %s888_s25, 11 }
   0x6   : > { %s1048_s26 = smov (%p29_p0, %s28_s26), 0  ;;  %s1050_s27 = smov (!%p29_p0, %s35_s27), %s884_s24 }
   0x7   : > { %p258_p3 = pnand %p737_p1, %p257_p2  ;;  %p37_p4 = scmp.ge.s32.totalorder %s1050_s27, 2 }
   0x8   : > { %p305_p5 = scmp.lt.s32.totalorder (!%p258_p3), %s872_s21, 4  ;;  %p307_p6 = scmp.lt.s32.totalorder (!%p258_p3), %s876_s22, 1 }
   0x9   : > { %s1052_s27 = smov (%p37_p4, %s1050_s27), 0  ;;  %261 = sbr.rel (%p258_p3) target bundleno = 576 (0x240), region = 44 }
   0xa   : > { %p740_p7 = scmp.ne.s32.totalorder (!%p258_p3), %s872_s21, 0 }
   0xe   : > { %s306_s28 = scalar_select %p305_p5, %s872_s21, 4 }
   0xf   : > { %s1054_s22 = smov (!%p307_p6, %s876_s22), 1 }
  0x10   : > { %s787_s29 = smul.u32 12, %s306_s28 }
  0x11   : > { %s786_s30 = smul.u32 6, %s1054_s22 }
  0x12   : > { %s788_s7 = smul.u32 48, %s1054_s22 }
  0x13   : > { %s314_s8 = sadd.s32 %s787_s29, %s786_s30  ;;  %338 = sbr.rel (%p740_p7) target bundleno = 28 (0x1c), region = 48 }
  0x14   : > { %s738_s9 = sshll.u32 %s314_s8, 2  ;;  %s965_s12 = scalar_lea.vmem %s1042_s6, %s788_s7 }
  0x15   : > { %s970_s15 = scalar_lea.vmem %s1036_s0, %s738_s9 }
  0x18   : > { %v890_v0 = vmov 0.0  }
  0x19   : > { %339 = vst [vmem:[#allocation2 + $0x28] sm:$0xff] %v890_v0  ;;  %340 = vst [vmem:[#allocation2 + $0x10] sm:$0xff] %v890_v0 }
  0x1a   : > { %341 = vst [vmem:[#allocation2 + $0x8] sm:$0xff] %v890_v0  ;;  %342 = vst [vmem:[#allocation2] sm:$0xff] %v890_v0 }
  0x1b   : > { %343 = vst [vmem:[#allocation2 + $0x18] sm:$0xff] %v890_v0  ;;  %344 = vst [vmem:[#allocation2 + $0x20] sm:$0x1f] %v890_v0 }
  0x1c PF: > { %v832_v1 = vld [vmem:[%s1037_s1 + $0x10] sm:$0xff]   ;;  %v891_v2 = vmov 0.0   ;;  %v833_v3 = vld [vmem:[%s1037_s1 + $0x8] sm:$0xff]   ;;  %vm892_vm0 = vmmov 0   ;;  %v834_v4 = vld [vmem:[%s1037_s1] sm:$0xff]   ;;  %vm396_vm1 = vcmask 392192  }
  0x1d   : > { %780 = vmatprep.subr.bf16.mxu1 %v891_v2  ;;  %762 = vmatprep.subr.bf16.mxu0 %v891_v2  ;;  %v835_v5 = vld [vmem:[%s970_s15 + $0x8] sm:$0xff]   ;;  %v836_v6 = vld [vmem:[%s970_s15] sm:$0xff]   ;;  %v837_v7 = vld [vmem:[%s970_s15 + $0x10] sm:$0x7f]   ;;  %p750_p8 = scmp.ne.s32.totalorder %s872_s21, 4 }
  0x1e   : > { %783 = vmatpush3.bf16.msra.mxu1 %v832_v1  ;;  %763 = vmatpush3.bf16.msra.mxu0 %v832_v1 }
  0x1f   : > { %781 = vmatprep.subr.bf16.mxu1 %v891_v2  ;;  %764 = vmatprep.subr.bf16.mxu0 %v891_v2 }
  0x20   : > { %772 = vmatprep.mubr.msk.bf16.mxu1 %vm892_vm0, %v891_v2  ;;  %768 = vmatprep.mubr.msk.bf16.mxu0 %vm892_vm0, %v891_v2  ;;  %v345_v9 = vld [vmem:[#allocation2 + $0x28] sm:$0xff]  ;;  %v346_v17 = vld [vmem:[#allocation2 + $0x10] sm:$0xff] }
  0x21   : > { %v347_v8 = vld [vmem:[#allocation2 + $0x8] sm:$0xff]  ;;  %v348_v16 = vld [vmem:[#allocation2] sm:$0xff] }
  0x22   : > { %784 = vmatpush3.bf16.msra.mxu1 %v833_v3  ;;  %765 = vmatpush3.bf16.msra.mxu0 %v833_v3  ;;  %v349_v24 = vld [vmem:[#allocation2 + $0x18] sm:$0xff]  ;;  %v350_v28 = vld [vmem:[#allocation2 + $0x20] sm:$0x1f] }
  0x23   : > { %782 = vmatprep.subr.bf16.mxu1 %v891_v2  ;;  %766 = vmatprep.subr.bf16.mxu0 %v891_v2 }
  0x26   : > { %785 = vmatpush3.bf16.msra.mxu1 %v834_v4  ;;  %767 = vmatpush3.bf16.msra.mxu0 %v834_v4 }
  0x29   : > { %773 = vmatmul.mubr.msk.bf16.vlgmr.msra.gmra.mxu1 %vm396_vm1, %v835_v5  ;;  %769 = vmatmul.mubr.msk.bf16.vlgmr.msra.gmra.mxu0 %vm396_vm1, %v836_v6 }
  0x2a   : > { %776 = vmatprep.mubr.msk.bf16.mxu1 %vm892_vm0, %v891_v2 }
  0x31   : > { %777 = vmatmul.mubr.msk.bf16.gmra.mxu1 %vm396_vm1, %v837_v7 }
  0xe9   : > { %v448_v10 = vpop.f32.mrf.mxu1  ;;  %v440_v11 = vpop.f32.mrf.mxu0 }
  0xea   : > { %v465_v12 = vadd.f32 %v448_v10, %v347_v8  ;;  %v463_v13 = vadd.f32 %v440_v11, %v345_v9 }
  0xeb   : > { %v774_v14 = vpop.f32.mrf.mxu1  ;;  %v770_v15 = vpop.f32.mrf.mxu0 }
  0xec   : > { %471 = vst [vmem:[#allocation2 + $0x8] sm:$0xff] %v465_v12  ;;  %469 = vst [vmem:[#allocation2 + $0x28] sm:$0xff] %v463_v13 }
  0xed   : > { %v451_v18 = vpop.f32.mrf.mxu1  ;;  %v443_v19 = vpop.f32.mrf.mxu0 }
  0xee   : > { %v466_v20 = vadd.f32 %v451_v18, %v348_v16  ;;  %v464_v21 = vadd.f32 %v443_v19, %v346_v17 }
  0xef   : > { %v775_v22 = vpop.f32.mrf.mxu1  ;;  %v771_v23 = vpop.f32.mrf.mxu0 }
  0xf0   : > { %472 = vst [vmem:[#allocation2] sm:$0xff] %v466_v20  ;;  %470 = vst [vmem:[#allocation2 + $0x10] sm:$0xff] %v464_v21 }
  0xf1   : > { %v456_v25 = vpop.f32.mrf.mxu1 }
  0xf2   : > { %v467_v26 = vadd.f32 %v456_v25, %v349_v24 }
  0xf3   : > { %v778_v27 = vpop.f32.mrf.mxu1 }
  0xf4   : > { %473 = vst [vmem:[#allocation2 + $0x18] sm:$0xff] %v467_v26  ;;  %478 = sbr.rel (%p750_p8) target bundleno = 576 (0x240), region = 52 }
  0xf5   : > { %v459_v29 = vpop.f32.mrf.mxu1 }
  0xf6   : > { %v468_v30 = vadd.f32 %v459_v29, %v350_v28 }
  0xf7   : > { %v779_v31 = vpop.f32.mrf.mxu1 }
  0xf8   : > { %474 = vst [vmem:[#allocation2 + $0x20] sm:$0x1f] %v468_v30 }
  0xf9   : > { %v751_v32 = vld [vmem:[%s1038_s2] ss:$0 sm:$0xff]  ;;  %v487_v33 = vld [vmem:[%s1039_s3 + $0x8] sm:$0xff]  ;;  %v480_v36 = vld [vmem:[#allocation2 + $0x10] sm:$0xff]  ;;  %vm526_vm2 = vcmask 1044480  }
  0xfa   : > { %v499_v34 = vadd.f32 %v751_v32, %v487_v33  ;;  %v486_v35 = vld [vmem:[%s1039_s3] sm:$0xff]  ;;  %v488_v38 = vld [vmem:[%s1039_s3 + $0x10] sm:$0xff]  ;;  %v491_v39 = vld [vmem:[%s1039_s3 + $0x28] sm:$0x1f] }
  0xfb   : > { %v498_v37 = vadd.f32 %v751_v32, %v486_v35  ;;  %v479_v41 = vld [vmem:[#allocation2 + $0x28] sm:$0xff]  ;;  %v500_v42 = vadd.f32 %v751_v32, %v488_v38  ;;  %v503_v43 = vadd.f32 %v751_v32, %v491_v39  ;;  %v490_v44 = vld [vmem:[%s1039_s3 + $0x20] sm:$0xff]  ;;  %v489_v49 = vld [vmem:[%s1039_s3 + $0x18] sm:$0xff] }
  0xfc   : > { %v505_v40 = vmul.f32 5.0, %v499_v34  ;;  %v481_v46 = vld [vmem:[#allocation2 + $0x8] sm:$0xff]  ;;  %v502_v48 = vadd.f32 %v751_v32, %v490_v44  ;;  %v501_v53 = vadd.f32 %v751_v32, %v489_v49  ;;  %v483_v58 = vld [vmem:[#allocation2 + $0x18] sm:$0xff]  ;;  %v482_v61 = vld [vmem:[#allocation2] sm:$0xff] }
  0xfd   : > { %v504_v45 = vmul.f32 5.0, %v498_v37  ;;  %v506_v51 = vmul.f32 5.0, %v500_v42  ;;  %v509_v52 = vmul.f32 5.0, %v503_v43  ;;  %v752_v44 = vld [vmem:[%s1040_s4] ss:$0 sm:$0xff] }
  0xfe   : > { %v511_v50 = vadd.f32 %v505_v40, %v480_v36  ;;  %v508_v57 = vmul.f32 5.0, %v502_v48  ;;  %v507_v59 = vmul.f32 5.0, %v501_v53 }
  0xff   : > { %v484_v47 = vld [vmem:[#allocation2 + $0x20] sm:$0x1f]  ;;  %v510_v54 = vadd.f32 %v504_v45, %v479_v41  ;;  %v512_v55 = vadd.f32 %v506_v51, %v481_v46 }
 0x100   : > { %518 = vadd.xlane.f32.xlu1 %v511_v50  ;;  %v515_v56 = vadd.f32 %v509_v52, %v484_v47  ;;  %v514_v62 = vadd.f32 %v508_v57, %v483_v58  ;;  %v513_v63 = vadd.f32 %v507_v59, %v482_v61  ;;  %v753_v47 = vld [vmem:[%s1041_s5] ss:$0 sm:$0xff] }
 0x101   : > { %516 = vadd.xlane.f32.xlu0 %v510_v54 }
 0x102   : > { %v527_v60 = vsel %vm526_vm2, %v515_v56, 0.0 }
 0x104   : > { %520 = vadd.xlane.f32.xlu1 %v512_v55 }
 0x105   : > { %528 = vadd.xlane.f32.xlu0 %v527_v60 }
 0x108   : > { %524 = vadd.xlane.f32.xlu1 %v514_v62 }
 0x109   : > { %522 = vadd.xlane.f32.xlu0 %v513_v63 }
 0x189   : > { %v519_v0 = vpop.xlane.xlu1 %518 }
 0x18a   : > { %v532_v1 = vmul.f32 0.0078125, %v519_v0  ;;  %v517_v2 = vpop.xlane.xlu0 %516 }
 0x18b   : > { %v531_v3 = vmul.f32 0.0078125, %v517_v2 }
 0x18c   : > { %v538_v4 = vsub.f32 %v511_v50, %v532_v1 }
 0x18d   : > { %v537_v5 = vsub.f32 %v510_v54, %v531_v3  ;;  %v521_v6 = vpop.xlane.xlu1 %520 }
 0x18e   : > { %v533_v7 = vmul.f32 0.0078125, %v521_v6  ;;  %v529_v8 = vpop.xlane.xlu0 %528  ;;  %v544_v9 = vmul.f32 %v538_v4, %v538_v4 }
 0x18f   : > { %v543_v10 = vmul.f32 %v537_v5, %v537_v5  ;;  %v536_v12 = vmul.f32 0.0078125, %v529_v8 }
 0x190   : > { %v539_v11 = vsub.f32 %v512_v55, %v533_v7  ;;  %551 = vadd.xlane.f32.xlu1 %v544_v9 }
 0x191   : > { %549 = vadd.xlane.f32.xlu0 %v543_v10  ;;  %v525_v13 = vpop.xlane.xlu1 %524  ;;  %v542_v18 = vsub.f32 %v515_v56, %v536_v12 }
 0x192   : > { %v535_v14 = vmul.f32 0.0078125, %v525_v13  ;;  %v523_v15 = vpop.xlane.xlu0 %522  ;;  %v545_v16 = vmul.f32 %v539_v11, %v539_v11 }
 0x193   : > { %v534_v17 = vmul.f32 0.0078125, %v523_v15  ;;  %v548_v23 = vmul.f32 %v542_v18, %v542_v18 }
 0x194   : > { %v541_v19 = vsub.f32 %v514_v62, %v535_v14 }
 0x195   : > { %v540_v20 = vsub.f32 %v513_v63, %v534_v17  ;;  %553 = vadd.xlane.f32.xlu0 %v545_v16  ;;  %v559_v24 = vsel %vm526_vm2, %v548_v23, 0.0 }
 0x196   : > { %v547_v21 = vmul.f32 %v541_v19, %v541_v19 }
 0x197   : > { %v546_v22 = vmul.f32 %v540_v20, %v540_v20 }
 0x199   : > { %557 = vadd.xlane.f32.xlu0 %v547_v21  ;;  %555 = vadd.xlane.f32.xlu1 %v546_v22 }
 0x19d   : > { %560 = vadd.xlane.f32.xlu1 %v559_v24 }
 0x219   : > { %v552_v25 = vpop.xlane.xlu1 %551 }
 0x21a   : > { %v563_v26 = vmul.f32 0.0078125, %v552_v25  ;;  %v550_v27 = vpop.xlane.xlu0 %549 }
 0x21b   : > { %v562_v28 = vmul.f32 0.0078125, %v550_v27 }
 0x21c   : > { %v569_v29 = vadd.f32 1e-06, %v563_v26 }
 0x21d   : > { %v568_v30 = vadd.f32 1e-06, %v562_v28 }
 0x21e   : > { %838 = vrsqrt.f32 %v569_v29  ;;  %v554_v31 = vpop.xlane.xlu0 %553 }
 0x21f   : > { %840 = vrsqrt.f32 %v568_v30  ;;  %v564_v32 = vmul.f32 0.0078125, %v554_v31 }
 0x221   : > { %v570_v33 = vadd.f32 1e-06, %v564_v32 }
 0x222   : > { %v556_v34 = vpop.xlane.xlu1 %555  ;;  %v558_v35 = vpop.xlane.xlu0 %557 }
 0x223   : > { %842 = vrsqrt.f32 %v570_v33  ;;  %v565_v36 = vmul.f32 0.0078125, %v556_v34  ;;  %v566_v37 = vmul.f32 0.0078125, %v558_v35 }
 0x225   : > { %v571_v38 = vadd.f32 1e-06, %v565_v36  ;;  %v572_v39 = vadd.f32 1e-06, %v566_v37 }
 0x226   : > { %v561_v40 = vpop.xlane.xlu1 %560 }
 0x227   : > { %844 = vrsqrt.f32 %v571_v38  ;;  %v567_v41 = vmul.f32 0.0078125, %v561_v40 }
 0x228   : > { %846 = vrsqrt.f32 %v572_v39 }
 0x229   : > { %v573_v42 = vadd.f32 1e-06, %v567_v41 }
 0x22b   : > { %v839_v43 = vpop.eup %838  ;;  %848 = vrsqrt.f32 %v573_v42 }
 0x22c   : > { %v841_v45 = vpop.eup %840  ;;  %v581_v46 = vmul.f32 %v839_v43, %v538_v4 }
 0x22d   : > { %v580_v48 = vmul.f32 %v841_v45, %v537_v5 }
 0x22e   : > { %v594_v49 = vmul.f32 %v752_v44, %v581_v46 }
 0x22f   : > { %v593_v50 = vmul.f32 %v752_v44, %v580_v48 }
 0x230   : > { %v843_v51 = vpop.eup %842  ;;  %v607_v52 = vadd.f32 %v753_v47, %v594_v49 }
 0x231   : > { %v606_v53 = vadd.f32 %v753_v47, %v593_v50  ;;  %v582_v54 = vmul.f32 %v843_v51, %v539_v11 }
 0x232   : > { %613 = vst [vmem:[%s965_s12 + $0x8] sm:$0xff] %v607_v52 }
 0x233   : > { %612 = vst [vmem:[%s965_s12] sm:$0xff] %v606_v53  ;;  %v595_v55 = vmul.f32 %v752_v44, %v582_v54 }
 0x234   : > { %v845_v56 = vpop.eup %844 }
 0x235   : > { %v847_v57 = vpop.eup %846  ;;  %v608_v58 = vadd.f32 %v753_v47, %v595_v55  ;;  %v583_v59 = vmul.f32 %v845_v56, %v540_v20 }
 0x236   : > { %v584_v60 = vmul.f32 %v847_v57, %v541_v19 }
 0x237   : > { %614 = vst [vmem:[%s965_s12 + $0x10] sm:$0xff] %v608_v58  ;;  %v596_v61 = vmul.f32 %v752_v44, %v583_v59 }
 0x238   : > { %v849_v62 = vpop.eup %848  ;;  %v597_v63 = vmul.f32 %v752_v44, %v584_v60 }
 0x239   : > { %v609_v0 = vadd.f32 %v753_v47, %v596_v61  ;;  %v585_v1 = vmul.f32 %v849_v62, %v542_v18 }
 0x23a   : > { %v610_v2 = vadd.f32 %v753_v47, %v597_v63 }
 0x23b   : > { %615 = vst [vmem:[%s965_s12 + $0x18] sm:$0xff] %v609_v0  ;;  %v598_v3 = vmul.f32 %v752_v44, %v585_v1 }
 0x23c   : > { %616 = vst [vmem:[%s965_s12 + $0x20] sm:$0xff] %v610_v2 }
 0x23d   : > { %v611_v4 = vadd.f32 %v753_v47, %v598_v3 }
 0x23f   : > { %617 = vst [vmem:[%s965_s12 + $0x28] sm:$0x1f] %v611_v4 }
 0x240 PF: > { %s16_s25 = sadd.s32 1, %s888_s25   ;;  %s1043_s21 = smov %s880_s23 }
 0x241   : > { %p13_p9 = scmp.ge.s32.totalorder %s16_s25, 12   ;;  %s1044_s22 = smov %s884_s24 }
 0x242   : > { %s1045_s23 = smov %s1048_s26  ;;  %s1046_s24 = smov %s1052_s27 }
 0x243   :  { %15 = sbr.rel (!%p13_p9) target bundleno = 3 (0x3), region = 85 }

// kernel: base_backbone_forward.2
= control target key start
LH: loop header
LB: loop body
LE: loop exit
PB: predicated region body
PF: predicated region fallthrough
CT: control target
= control target key end

     0   :  { %15 = vsyncpa [#allocation3], 0  ;;  %vm112_vm0 = vcmask 130048   ;;  %s13790_s0 = inlined_call_operand.vmem [shape: f32[2,9,64,16], index: 0, kind: input, shape index: {}]   ;;  %s13791_s1 = inlined_call_operand.vmem [shape: f32[2,16,576], index: 1, kind: input, shape index: {}]   ;;  %s13792_s2 = inlined_call_operand.vmem [shape: f32[2,16,144], index: 2, kind: input, shape index: {}]   ;;  %s13793_s3 = inlined_call_operand.vmem [shape: f32[3,16,16], index: 3, kind: input, shape index: {}]   ;;  %s13794_s4 = inlined_call_operand.vmem [shape: f32[3,1,16], index: 4, kind: input, shape index: {}]   ;;  %s13795_s5 = inlined_call_operand.vmem [shape: f32[16,16], index: 5, kind: input, shape index: {}]   ;;  %s13796_s6 = inlined_call_operand.vmem [shape: f32[1,16], index: 6, kind: input, shape index: {}]   ;;  %s13797_s7 = inlined_call_operand.vmem [shape: f32[2,16,1], index: 7, kind: output, shape index: {0}]   ;;  %s13798_s8 = inlined_call_operand.hbm [shape: f32[2,16,576], index: 8, kind: output, shape index: {1}]   ;;  %s13799_s9 = inlined_call_operand.hbm [shape: f32[2,16,144], index: 9, kind: output, shape index: {2}]  }
   0x1   :  { %v104_v0 = vld [vmem:[%s13793_s3 + $0x8] sm:$0xff]  ;;  %v103_v1 = vld [vmem:[%s13793_s3] sm:$0xff]  ;;  %v33_v4 = vld [vmem:[%s13790_s0 + $0x10] sm:$0xff] }
   0x2   :  { %v31_v2 = vld [vmem:[%s13790_s0] sm:$0xff]  ;;  %7802 = vmatprep.subr.mxu0 %v104_v0  ;;  %v32_v3 = vld [vmem:[%s13790_s0 + $0x8] sm:$0xff]  ;;  %v34_v5 = vld [vmem:[%s13790_s0 + $0x18] sm:$0xff] }
   0x3   :  { %7806 = vmatprep.mubr.msk.f32.mxu0 %vm112_vm0, %v31_v2  ;;  %7803 = vmatpush3.msra.mxu0 %v104_v0  ;;  %v35_v6 = vld [vmem:[%s13790_s0 + $0x20] sm:$0xff]  ;;  %v36_v7 = vld [vmem:[%s13790_s0 + $0x28] sm:$0xff]  ;;  %v37_v8 = vld [vmem:[%s13790_s0 + $0x30] sm:$0xff] }
   0x4   :  { %7804 = vmatprep.subr.mxu0 %v103_v1  ;;  %v38_v9 = vld [vmem:[%s13790_s0 + $0x38] sm:$0xff]  ;;  %v39_v10 = vld [vmem:[%s13790_s0 + $0x40] sm:$0xff]  ;;  %v40_v11 = vld [vmem:[%s13790_s0 + $0x48] sm:$0xff] }
   0x5   :  { %7805 = vmatpush3.msra.mxu0 %v103_v1  ;;  %v41_v12 = vld [vmem:[%s13790_s0 + $0x50] sm:$0xff]  ;;  %v42_v13 = vld [vmem:[%s13790_s0 + $0x58] sm:$0xff]  ;;  %v43_v14 = vld [vmem:[%s13790_s0 + $0x60] sm:$0xff] }
   0x6   :  { %7807 = vmatmul.mubr.msk.f32.vlgmr.msra.gmra.mxu0 %vm112_vm0, %v32_v3 }
   0x7   :  { %7809 = vmatprep.mubr.msk.f32.mxu0 %vm112_vm0, %v33_v4 }
   0xa   :  { %7810 = vmatmul.mubr.msk.f32.gmra.mxu0 %vm112_vm0, %v34_v5 }
   0xb   :  { %7812 = vmatprep.mubr.msk.f32.mxu0 %vm112_vm0, %v35_v6 }
   0xe   :  { %7813 = vmatmul.mubr.msk.f32.gmra.mxu0 %vm112_vm0, %v36_v7 }
   0xf   :  { %7815 = vmatprep.mubr.msk.f32.mxu0 %vm112_vm0, %v37_v8 }
  0x12   :  { %7816 = vmatmul.mubr.msk.f32.gmra.mxu0 %vm112_vm0, %v38_v9 }
  0x13   :  { %7818 = vmatprep.mubr.msk.f32.mxu0 %vm112_vm0, %v39_v10 }
  0x16   :  { %7819 = vmatmul.mubr.msk.f32.gmra.mxu0 %vm112_vm0, %v40_v11 }
  0x17   :  { %7821 = vmatprep.mubr.msk.f32.mxu0 %vm112_vm0, %v41_v12 }
  0x18   :  { %16 = vsyncpa [#allocation5], 0  ;;  %v44_v15 = vld [vmem:[%s13790_s0 + $0x68] sm:$0xff]  ;;  %v45_v16 = vld [vmem:[%s13790_s0 + $0x70] sm:$0xff]  ;;  %vm2066_vm1 = vcmask 523264   ;;  %vm3276_vm6 = vcmask 7168  }
  0x19   :  { %v46_v17 = vld [vmem:[%s13790_s0 + $0x78] sm:$0xff]  ;;  %v47_v18 = vld [vmem:[%s13790_s0 + $0x80] sm:$0xff]  ;;  %v48_v19 = vld [vmem:[%s13790_s0 + $0x88] sm:$0xff]  ;;  %s9047_s27 = smov [#allocation2]   ;;  %s9048_s13 = smov [#allocation4]  }
  0x1a   :  { %7822 = vmatmul.mubr.msk.f32.gmra.mxu0 %vm112_vm0, %v42_v13  ;;  %v49_v20 = vld [vmem:[%s13790_s0 + $0x90] sm:$0xff]  ;;  %v50_v21 = vld [vmem:[%s13790_s0 + $0x98] sm:$0xff]  ;;  %v51_v22 = vld [vmem:[%s13790_s0 + $0xa0] sm:$0xff]  ;;  %s6609_s28 = sshll.u32 %s9047_s27, 4  ;;  %s6621_s14 = sshll.u32 %s9048_s13, 4  ;;  %s6610_s28 = int_to_ptr.vmem [resolvable:$true] %s6609_s28  ;;  %s13775_s14 = int_to_ptr.vmem [resolvable:$true] %s6621_s14 }
  0x1b   :  { %7824 = vmatprep.mubr.msk.f32.mxu0 %vm112_vm0, %v43_v14  ;;  %v52_v23 = vld [vmem:[%s13790_s0 + $0xa8] sm:$0xff]  ;;  %v53_v24 = vld [vmem:[%s13790_s0 + $0xb0] sm:$0xff]  ;;  %v54_v25 = vld [vmem:[%s13790_s0 + $0xb8] sm:$0xff]  ;;  %p9008_p1 = scmp.lt.s32.totalorder %s6610_s28, %s6610_s28 }
  0x1c   :  { %v55_v26 = vld [vmem:[%s13790_s0 + $0xc0] sm:$0xff]  ;;  %v56_v27 = vld [vmem:[%s13790_s0 + $0xc8] sm:$0xff]  ;;  %v57_v28 = vld [vmem:[%s13790_s0 + $0xd0] sm:$0xff] }
  0x1d   :  { %v58_v29 = vld [vmem:[%s13790_s0 + $0xd8] sm:$0xff]  ;;  %v59_v30 = vld [vmem:[%s13790_s0 + $0xe0] sm:$0xff]  ;;  %v60_v31 = vld [vmem:[%s13790_s0 + $0xe8] sm:$0xff] }
  0x1e   :  { %7825 = vmatmul.mubr.msk.f32.gmra.mxu0 %vm112_vm0, %v44_v15  ;;  %v61_v32 = vld [vmem:[%s13790_s0 + $0xf0] sm:$0xff]  ;;  %v62_v33 = vld [vmem:[%s13790_s0 + $0xf8] sm:$0xff]  ;;  %v63_v34 = vld [vmem:[%s13790_s0 + $0x100] sm:$0xff] }
  0x1f   :  { %7827 = vmatprep.mubr.msk.f32.mxu0 %vm112_vm0, %v45_v16  ;;  %v64_v35 = vld [vmem:[%s13790_s0 + $0x108] sm:$0xff]  ;;  %v65_v36 = vld [vmem:[%s13790_s0 + $0x110] sm:$0xff]  ;;  %v66_v37 = vld [vmem:[%s13790_s0 + $0x118] sm:$0xff] }
  0x20   :  { %v67_v38 = vld [vmem:[%s13790_s0 + $0x120] sm:$0xff]  ;;  %v68_v39 = vld [vmem:[%s13790_s0 + $0x128] sm:$0xff]  ;;  %v69_v40 = vld [vmem:[%s13790_s0 + $0x130] sm:$0xff] }
  0x21   :  { %v70_v41 = vld [vmem:[%s13790_s0 + $0x138] sm:$0xff]  ;;  %v71_v42 = vld [vmem:[%s13790_s0 + $0x140] sm:$0xff]  ;;  %v72_v43 = vld [vmem:[%s13790_s0 + $0x148] sm:$0xff] }
  0x22   :  { %7828 = vmatmul.mubr.msk.f32.gmra.mxu0 %vm112_vm0, %v46_v17  ;;  %v73_v44 = vld [vmem:[%s13790_s0 + $0x150] sm:$0xff]  ;;  %v74_v45 = vld [vmem:[%s13790_s0 + $0x158] sm:$0xff]  ;;  %v75_v46 = vld [vmem:[%s13790_s0 + $0x160] sm:$0xff] }
  0x23   :  { %7830 = vmatprep.mubr.msk.f32.mxu0 %vm112_vm0, %v47_v18  ;;  %v76_v47 = vld [vmem:[%s13790_s0 + $0x168] sm:$0xff]  ;;  %v77_v48 = vld [vmem:[%s13790_s0 + $0x170] sm:$0xff]  ;;  %v78_v49 = vld [vmem:[%s13790_s0 + $0x178] sm:$0xff] }
  0x24   :  { %v79_v50 = vld [vmem:[%s13790_s0 + $0x180] sm:$0xff]  ;;  %v80_v51 = vld [vmem:[%s13790_s0 + $0x188] sm:$0xff]  ;;  %v81_v52 = vld [vmem:[%s13790_s0 + $0x190] sm:$0xff] }
  0x25   :  { %v82_v53 = vld [vmem:[%s13790_s0 + $0x198] sm:$0xff]  ;;  %v83_v54 = vld [vmem:[%s13790_s0 + $0x1a0] sm:$0xff]  ;;  %v84_v55 = vld [vmem:[%s13790_s0 + $0x1a8] sm:$0xff] }
  0x26   :  { %7831 = vmatmul.mubr.msk.f32.gmra.mxu0 %vm112_vm0, %v48_v19  ;;  %v85_v56 = vld [vmem:[%s13790_s0 + $0x1b0] sm:$0xff]  ;;  %v86_v57 = vld [vmem:[%s13790_s0 + $0x1b8] sm:$0xff]  ;;  %v87_v58 = vld [vmem:[%s13790_s0 + $0x1c0] sm:$0xff] }
  0x27   :  { %7833 = vmatprep.mubr.msk.f32.mxu0 %vm112_vm0, %v49_v20  ;;  %v88_v59 = vld [vmem:[%s13790_s0 + $0x1c8] sm:$0xff]  ;;  %v89_v60 = vld [vmem:[%s13790_s0 + $0x1d0] sm:$0xff]  ;;  %v90_v61 = vld [vmem:[%s13790_s0 + $0x1d8] sm:$0xff] }
  0x28   :  { %v91_v62 = vld [vmem:[%s13790_s0 + $0x1e0] sm:$0xff]  ;;  %v92_v63 = vld [vmem:[%s13790_s0 + $0x1e8] sm:$0xff]  ;;  %v93_v0 = vld [vmem:[%s13790_s0 + $0x1f0] sm:$0xff] }
  0x29   :  { %v94_v1 = vld [vmem:[%s13790_s0 + $0x1f8] sm:$0xff]  ;;  %v95_v2 = vld [vmem:[%s13790_s0 + $0x200] sm:$0xff]  ;;  %v96_v3 = vld [vmem:[%s13790_s0 + $0x208] sm:$0xff] }
  0x2a   :  { %7834 = vmatmul.mubr.msk.f32.gmra.mxu0 %vm112_vm0, %v50_v21  ;;  %v97_v4 = vld [vmem:[%s13790_s0 + $0x210] sm:$0xff]  ;;  %v98_v5 = vld [vmem:[%s13790_s0 + $0x218] sm:$0xff]  ;;  %v99_v6 = vld [vmem:[%s13790_s0 + $0x220] sm:$0xff] }
  0x2b   :  { %7836 = vmatprep.mubr.msk.f32.mxu0 %vm112_vm0, %v51_v22  ;;  %v100_v7 = vld [vmem:[%s13790_s0 + $0x228] sm:$0xff]  ;;  %v101_v8 = vld [vmem:[%s13790_s0 + $0x230] sm:$0xff]  ;;  %v102_v9 = vld [vmem:[%s13790_s0 + $0x238] sm:$0xff] }
  0x2c   :  { %v1044_v15 = vld [vmem:[%s13795_s5 + $0x8] sm:$0xff]  ;;  %v1043_v17 = vld [vmem:[%s13795_s5] sm:$0xff] }
  0x2d   :  { %7914 = vmatprep.subr.mxu1 %v1044_v15  ;;  %8042 = vmatprep.subr.mxu0 %v1044_v15  ;;  %v9412_v18 = vld [vmem:[%s13794_s4] ss:$0 sm:$0xff] }
  0x2e   :  { %7837 = vmatmul.mubr.msk.f32.gmra.mxu0 %vm112_vm0, %v52_v23  ;;  %7915 = vmatpush3.msra.mxu1 %v1044_v15 }
  0x2f   :  { %7839 = vmatprep.mubr.msk.f32.mxu0 %vm112_vm0, %v53_v24  ;;  %8043 = vmatpush3.msra.mxu0 %v1044_v15 }
  0x30   :  { %7916 = vmatprep.subr.mxu1 %v1043_v17  ;;  %8044 = vmatprep.subr.mxu0 %v1043_v17 }
  0x31   :  { %7917 = vmatpush3.msra.mxu1 %v1043_v17  ;;  %8045 = vmatpush3.msra.mxu0 %v1043_v17 }
  0x32   :  { %7840 = vmatmul.mubr.msk.f32.gmra.mxu0 %vm112_vm0, %v54_v25 }
  0x33   :  { %7842 = vmatprep.mubr.msk.f32.mxu0 %vm112_vm0, %v55_v26 }
  0x36   :  { %7843 = vmatmul.mubr.msk.f32.gmra.mxu0 %vm112_vm0, %v56_v27 }
  0x37   :  { %7845 = vmatprep.mubr.msk.f32.mxu0 %vm112_vm0, %v57_v28 }
  0x3a   :  { %7846 = vmatmul.mubr.msk.f32.gmra.mxu0 %vm112_vm0, %v58_v29 }
  0x3b   :  { %7848 = vmatprep.mubr.msk.f32.mxu0 %vm112_vm0, %v59_v30 }
  0x3e   :  { %7849 = vmatmul.mubr.msk.f32.gmra.mxu0 %vm112_vm0, %v60_v31 }
  0x3f   :  { %7851 = vmatprep.mubr.msk.f32.mxu0 %vm112_vm0, %v61_v32 }
  0x42   :  { %7852 = vmatmul.mubr.msk.f32.gmra.mxu0 %vm112_vm0, %v62_v33 }
  0x43   :  { %7854 = vmatprep.mubr.msk.f32.mxu0 %vm112_vm0, %v63_v34 }
  0x46   :  { %7855 = vmatmul.mubr.msk.f32.gmra.mxu0 %vm112_vm0, %v64_v35 }
  0x47   :  { %7857 = vmatprep.mubr.msk.f32.mxu0 %vm112_vm0, %v65_v36  ;;  %v9432_v36 = vld [vmem:[%s13793_s3 + $0x18] sm:$0xff] }
  0x48   :  { %7930 = vmatprep.subr.mxu1 %v9432_v36 }
  0x4a   :  { %7858 = vmatmul.mubr.msk.f32.gmra.mxu0 %vm112_vm0, %v66_v37 }
  0x4b   :  { %7860 = vmatprep.mubr.msk.f32.mxu0 %vm112_vm0, %v67_v38 }
  0x4e   :  { %7861 = vmatmul.mubr.msk.f32.gmra.mxu0 %vm112_vm0, %v68_v39 }
  0x4f   :  { %7863 = vmatprep.mubr.msk.f32.mxu0 %vm112_vm0, %v69_v40 }
  0x52   :  { %7864 = vmatmul.mubr.msk.f32.gmra.mxu0 %vm112_vm0, %v70_v41 }
  0x53   :  { %7866 = vmatprep.mubr.msk.f32.mxu0 %vm112_vm0, %v71_v42 }
  0x56   :  { %7867 = vmatmul.mubr.msk.f32.gmra.mxu0 %vm112_vm0, %v72_v43 }
  0x57   :  { %7869 = vmatprep.mubr.msk.f32.mxu0 %vm112_vm0, %v73_v44 }
  0x5a   :  { %7870 = vmatmul.mubr.msk.f32.gmra.mxu0 %vm112_vm0, %v74_v45 }
  0x5b   :  { %7872 = vmatprep.mubr.msk.f32.mxu0 %vm112_vm0, %v75_v46 }
  0x5e   :  { %7873 = vmatmul.mubr.msk.f32.gmra.mxu0 %vm112_vm0, %v76_v47 }
  0x5f   :  { %7875 = vmatprep.mubr.msk.f32.mxu0 %vm112_vm0, %v77_v48 }
  0x62   :  { %7876 = vmatmul.mubr.msk.f32.gmra.mxu0 %vm112_vm0, %v78_v49 }
  0x63   :  { %7878 = vmatprep.mubr.msk.f32.mxu0 %vm112_vm0, %v79_v50 }
  0x66   :  { %7879 = vmatmul.mubr.msk.f32.gmra.mxu0 %vm112_vm0, %v80_v51 }
  0x67   :  { %7881 = vmatprep.mubr.msk.f32.mxu0 %vm112_vm0, %v81_v52 }
  0x6a   :  { %7882 = vmatmul.mubr.msk.f32.gmra.mxu0 %vm112_vm0, %v82_v53 }
  0x6b   :  { %7884 = vmatprep.mubr.msk.f32.mxu0 %vm112_vm0, %v83_v54 }
  0x6e   :  { %7885 = vmatmul.mubr.msk.f32.gmra.mxu0 %vm112_vm0, %v84_v55 }
  0x6f   :  { %7887 = vmatprep.mubr.msk.f32.mxu0 %vm112_vm0, %v85_v56 }
  0x72   :  { %7888 = vmatmul.mubr.msk.f32.gmra.mxu0 %vm112_vm0, %v86_v57 }
  0x73   :  { %7890 = vmatprep.mubr.msk.f32.mxu0 %vm112_vm0, %v87_v58 }
  0x76   :  { %7891 = vmatmul.mubr.msk.f32.gmra.mxu0 %vm112_vm0, %v88_v59 }
  0x77   :  { %7893 = vmatprep.mubr.msk.f32.mxu0 %vm112_vm0, %v89_v60 }
  0x7a   :  { %7894 = vmatmul.mubr.msk.f32.gmra.mxu0 %vm112_vm0, %v90_v61 }
  0x7b   :  { %7896 = vmatprep.mubr.msk.f32.mxu0 %vm112_vm0, %v91_v62 }
  0x7e   :  { %7897 = vmatmul.mubr.msk.f32.gmra.mxu0 %vm112_vm0, %v92_v63 }
  0x7f   :  { %7899 = vmatprep.mubr.msk.f32.mxu0 %vm112_vm0, %v93_v0 }
  0x82   :  { %7900 = vmatmul.mubr.msk.f32.gmra.mxu0 %vm112_vm0, %v94_v1 }
  0x83   :  { %7902 = vmatprep.mubr.msk.f32.mxu0 %vm112_vm0, %v95_v2 }
  0x86   :  { %7903 = vmatmul.mubr.msk.f32.gmra.mxu0 %vm112_vm0, %v96_v3 }
  0x87   :  { %7905 = vmatprep.mubr.msk.f32.mxu0 %vm112_vm0, %v97_v4 }
  0x8a   :  { %7906 = vmatmul.mubr.msk.f32.gmra.mxu0 %vm112_vm0, %v98_v5 }
  0x8b   :  { %7908 = vmatprep.mubr.msk.f32.mxu0 %vm112_vm0, %v99_v6 }
  0x8e   :  { %7909 = vmatmul.mubr.msk.f32.gmra.mxu0 %vm112_vm0, %v100_v7 }
  0x8f   :  { %7911 = vmatprep.mubr.msk.f32.mxu0 %vm112_vm0, %v101_v8 }
  0x92   :  { %7912 = vmatmul.mubr.msk.f32.gmra.mxu0 %vm112_vm0, %v102_v9 }
  0xc6   :  { %v7808_v10 = vpop.f32.mrf.mxu0 }
  0xc7   :  { %v401_v20 = vadd.f32 %v7808_v10, %v9412_v18 }
  0xc8   :  { %v9397_v11 = vpop.f32.mrf.mxu0 }
  0xc9   :  { %v771_v24 = vsel %vm112_vm0, %v401_v20, 0.0  ;;  %v916_v26 = vsel %vm112_vm0, %v401_v20, -inf }
  0xca   :  { %v7811_v12 = vpop.f32.mrf.mxu0 }
  0xcb   :  { %v411_v27 = vadd.f32 %v7811_v12, %v9412_v18 }
  0xcc   :  { %v9399_v13 = vpop.f32.mrf.mxu0 }
  0xcd   :  { %v805_v37 = vsel %vm112_vm0, %v411_v27, 0.0  ;;  %v950_v38 = vsel %vm112_vm0, %v411_v27, -inf }
  0xce   :  { %v7814_v14 = vpop.f32.mrf.mxu0 }
  0xcf   :  { %v421_v34 = vadd.f32 %v7814_v14, %v9412_v18 }
  0xd0   :  { %v9404_v16 = vpop.f32.mrf.mxu0 }
  0xd1   :  { %v839_v45 = vsel %vm112_vm0, %v421_v34, 0.0  ;;  %v984_v47 = vsel %vm112_vm0, %v421_v34, -inf }
  0xd2   :  { %v7817_v19 = vpop.f32.mrf.mxu0 }
  0xd3   :  { %v431_v48 = vadd.f32 %v7817_v19, %v9412_v18 }
  0xd4   :  { %v9415_v21 = vpop.f32.mrf.mxu0 }
  0xd5   :  { %v873_v56 = vsel %vm112_vm0, %v431_v48, 0.0  ;;  %v1018_v57 = vsel %vm112_vm0, %v431_v48, -inf }
  0xd6   :  { %v7820_v22 = vpop.f32.mrf.mxu0 }
  0xd7   :  { %v441_v23 = vadd.f32 %v7820_v22, %v9412_v18 }
  0xd8   :  { %v9419_v25 = vpop.f32.mrf.mxu0 }
  0xd9   :  { %v772_v28 = vsel %vm112_vm0, %v441_v23, 0.0  ;;  %v917_v29 = vsel %vm112_vm0, %v441_v23, -inf }
  0xda   :  { %v773_v30 = vadd.f32 %v772_v28, %v771_v24  ;;  %v918_v31 = vmax.f32 %v916_v26, %v917_v29  ;;  %v7823_v32 = vpop.f32.mrf.mxu0 }
  0xdb   :  { %v451_v33 = vadd.f32 %v7823_v32, %v9412_v18 }
  0xdc   :  { %v9427_v35 = vpop.f32.mrf.mxu0 }
  0xdd   :  { %v806_v39 = vsel %vm112_vm0, %v451_v33, 0.0  ;;  %v951_v40 = vsel %vm112_vm0, %v451_v33, -inf }
  0xde   :  { %v807_v41 = vadd.f32 %v806_v39, %v805_v37  ;;  %v952_v42 = vmax.f32 %v950_v38, %v951_v40  ;;  %v7826_v43 = vpop.f32.mrf.mxu0 }
  0xdf   :  { %v461_v44 = vadd.f32 %v7826_v43, %v9412_v18 }
  0xe0   :  { %v9441_v46 = vpop.f32.mrf.mxu0 }
  0xe1   :  { %v840_v49 = vsel %vm112_vm0, %v461_v44, 0.0  ;;  %v985_v50 = vsel %vm112_vm0, %v461_v44, -inf }
  0xe2   :  { %v841_v51 = vadd.f32 %v840_v49, %v839_v45  ;;  %v986_v52 = vmax.f32 %v984_v47, %v985_v50  ;;  %v7829_v53 = vpop.f32.mrf.mxu0 }
  0xe3   :  { %v471_v54 = vadd.f32 %v7829_v53, %v9412_v18 }
  0xe4   :  { %v9448_v55 = vpop.f32.mrf.mxu0 }
  0xe5   :  { %v874_v58 = vsel %vm112_vm0, %v471_v54, 0.0  ;;  %v1019_v59 = vsel %vm112_vm0, %v471_v54, -inf }
  0xe6   :  { %v875_v60 = vadd.f32 %v874_v58, %v873_v56  ;;  %v1020_v61 = vmax.f32 %v1018_v57, %v1019_v59  ;;  %v7832_v62 = vpop.f32.mrf.mxu0 }
  0xe7   :  { %v481_v63 = vadd.f32 %v7832_v62, %v9412_v18 }
  0xe8   :  { %v9455_v0 = vpop.f32.mrf.mxu0 }
  0xe9   :  { %v774_v1 = vsel %vm112_vm0, %v481_v63, 0.0  ;;  %v919_v2 = vsel %vm112_vm0, %v481_v63, -inf }
  0xea   :  { %v775_v3 = vadd.f32 %v774_v1, %v773_v30  ;;  %v9459_v4 = vmax.f32 %v918_v31, %v919_v2  ;;  %v7835_v5 = vpop.f32.mrf.mxu0 }
  0xeb   :  { %v491_v6 = vadd.f32 %v7835_v5, %v9412_v18 }
  0xec   :  { %v9462_v7 = vpop.f32.mrf.mxu0 }
  0xed   :  { %v808_v8 = vsel %vm112_vm0, %v491_v6, 0.0  ;;  %v953_v9 = vsel %vm112_vm0, %v491_v6, -inf }
  0xee   :  { %v809_v10 = vadd.f32 %v808_v8, %v807_v41  ;;  %v9466_v12 = vmax.f32 %v952_v42, %v953_v9  ;;  %v7838_v14 = vpop.f32.mrf.mxu0  ;;  %v396_v8 = vadd.f32 %v9412_v18, %v9397_v11  ;;  %v436_v9 = vadd.f32 %v9412_v18, %v9419_v25 }
  0xef   :  { %v501_v15 = vadd.f32 %v7838_v14, %v9412_v18  ;;  %v406_v14 = vadd.f32 %v9412_v18, %v9399_v13  ;;  %v446_v25 = vadd.f32 %v9412_v18, %v9427_v35 }
  0xf0   :  { %v9469_v17 = vpop.f32.mrf.mxu0  ;;  %v755_v11 = vsel %vm112_vm0, %v436_v9, 0.0  ;;  %v899_v13 = vsel %vm112_vm0, %v396_v8, -inf }
  0xf1   :  { %v842_v19 = vsel %vm112_vm0, %v501_v15, 0.0  ;;  %v987_v20 = vsel %vm112_vm0, %v501_v15, -inf  ;;  %v416_v15 = vadd.f32 %v9412_v18, %v9404_v16  ;;  %v466_v16 = vadd.f32 %v9412_v18, %v9448_v55 }
  0xf2   :  { %v843_v22 = vadd.f32 %v842_v19, %v841_v51  ;;  %v9473_v23 = vmax.f32 %v986_v52, %v987_v20  ;;  %v7841_v24 = vpop.f32.mrf.mxu0  ;;  %v426_v19 = vadd.f32 %v9412_v18, %v9415_v21  ;;  %v476_v21 = vadd.f32 %v9412_v18, %v9455_v0 }
  0xf3   :  { %v511_v26 = vadd.f32 %v7841_v24, %v9412_v18  ;;  %v456_v24 = vadd.f32 %v9412_v18, %v9441_v46  ;;  %v822_v35 = vsel %vm112_vm0, %v416_v15, 0.0  ;;  %v486_v46 = vadd.f32 %v9412_v18, %v9462_v7 }
  0xf4   :  { %v9476_v27 = vpop.f32.mrf.mxu0  ;;  %v1001_v55 = vsel %vm112_vm0, %v426_v19, -inf  ;;  %v857_v7 = vsel %vm112_vm0, %v466_v16, 0.0 }
  0xf5   :  { %v876_v28 = vsel %vm112_vm0, %v511_v26, 0.0  ;;  %v1021_v29 = vsel %vm112_vm0, %v511_v26, -inf  ;;  %v900_v26 = vsel %vm112_vm0, %v436_v9, -inf  ;;  %v496_v9 = vadd.f32 %v9412_v18, %v9469_v17 }
  0xf6   :  { %v877_v30 = vadd.f32 %v876_v28, %v875_v60  ;;  %v9480_v31 = vmax.f32 %v1020_v61, %v1021_v29  ;;  %v7844_v32 = vpop.f32.mrf.mxu0  ;;  %v788_v29 = vsel %vm112_vm0, %v406_v14, 0.0  ;;  %v901_v0 = vmax.f32 %v899_v13, %v900_v26 }
  0xf7   :  { %v521_v33 = vadd.f32 %v7844_v32, %v9412_v18  ;;  %v967_v32 = vsel %vm112_vm0, %v416_v15, -inf  ;;  %v936_v26 = vsel %vm112_vm0, %v486_v46, -inf }
  0xf8   :  { %v9483_v34 = vpop.f32.mrf.mxu0 }
  0xf9   :  { %v776_v37 = vsel %vm112_vm0, %v521_v33, 0.0  ;;  %v9487_v38 = vsel %vm112_vm0, %v521_v33, -inf  ;;  %v856_v33 = vsel %vm112_vm0, %v426_v19, 0.0 }
  0xfa   :  { %v9489_v39 = vadd.f32 %v776_v37, %v775_v3  ;;  %v922_v40 = vmax.f32 %v9459_v4, %v9487_v38  ;;  %v7847_v41 = vpop.f32.mrf.mxu0  ;;  %v858_v13 = vadd.f32 %v857_v7, %v856_v33 }
  0xfb   :  { %v531_v42 = vadd.f32 %v7847_v41, %v9412_v18 }
  0xfc   :  { %v9494_v43 = vpop.f32.mrf.mxu0 }
  0xfd   :  { %v810_v44 = vsel %vm112_vm0, %v531_v42, 0.0  ;;  %v9498_v45 = vsel %vm112_vm0, %v531_v42, -inf  ;;  %v789_v42 = vsel %vm112_vm0, %v446_v25, 0.0 }
  0xfe   :  { %v9500_v47 = vadd.f32 %v810_v44, %v809_v10  ;;  %v956_v48 = vmax.f32 %v9466_v12, %v9498_v45  ;;  %v7850_v49 = vpop.f32.mrf.mxu0  ;;  %v934_v44 = vsel %vm112_vm0, %v446_v25, -inf  ;;  %v790_v15 = vadd.f32 %v789_v42, %v788_v29 }
  0xff   :  { %v541_v50 = vadd.f32 %v7850_v49, %v9412_v18  ;;  %v823_v49 = vsel %vm112_vm0, %v456_v24, 0.0  ;;  %v825_v29 = vsel %vm112_vm0, %v496_v9, 0.0 }
 0x100   :  { %v9505_v51 = vpop.f32.mrf.mxu0 }
 0x101   :  { %v844_v52 = vsel %vm112_vm0, %v541_v50, 0.0  ;;  %v9509_v53 = vsel %vm112_vm0, %v541_v50, -inf  ;;  %v968_v50 = vsel %vm112_vm0, %v456_v24, -inf }
 0x102   :  { %v9511_v54 = vadd.f32 %v844_v52, %v843_v22  ;;  %v7853_v57 = vpop.f32.mrf.mxu0  ;;  %v754_v22 = vsel %vm112_vm0, %v396_v8, 0.0  ;;  %v1002_v52 = vsel %vm112_vm0, %v466_v16, -inf  ;;  %v791_v8 = vsel %vm112_vm0, %v486_v46, 0.0 }
 0x103   :  { %v551_v58 = vadd.f32 %v7853_v57, %v9412_v18  ;;  %v756_v37 = vadd.f32 %v755_v11, %v754_v22  ;;  %v757_v57 = vsel %vm112_vm0, %v476_v21, 0.0  ;;  %v824_v22 = vadd.f32 %v823_v49, %v822_v35 }
 0x104   :  { %v9516_v59 = vpop.f32.mrf.mxu0  ;;  %v516_v11 = vadd.f32 %v9412_v18, %v9483_v34  ;;  %v969_v24 = vmax.f32 %v967_v32, %v968_v50  ;;  %v526_v16 = vadd.f32 %v9412_v18, %v9494_v43  ;;  %v792_v56 = vadd.f32 %v791_v8, %v790_v15 }
 0x105   :  { %v878_v60 = vsel %vm112_vm0, %v551_v58, 0.0  ;;  %v9520_v61 = vsel %vm112_vm0, %v551_v58, -inf  ;;  %v758_v17 = vadd.f32 %v757_v57, %v756_v37  ;;  %v536_v35 = vadd.f32 %v9412_v18, %v9505_v51 }
 0x106   :  { %v9522_v62 = vadd.f32 %v878_v60, %v877_v30  ;;  %v9526_v1 = vpop.f32.mrf.mxu0  ;;  %v933_v30 = vsel %vm112_vm0, %v406_v14, -inf  ;;  %v902_v60 = vsel %vm112_vm0, %v476_v21, -inf  ;;  %v506_v14 = vadd.f32 %v9412_v18, %v9476_v27 }
 0x107   :  { %v935_v19 = vmax.f32 %v933_v30, %v934_v44  ;;  %v1003_v21 = vmax.f32 %v1001_v55, %v1002_v52  ;;  %v903_v63 = vmax.f32 %v901_v0, %v902_v60  ;;  %v970_v30 = vsel %vm112_vm0, %v496_v9, -inf }
 0x108   :  { %v9528_v2 = vpop.f32.mrf.mxu0  ;;  %v859_v34 = vsel %vm112_vm0, %v506_v14, 0.0  ;;  %v1004_v46 = vsel %vm112_vm0, %v506_v14, -inf  ;;  %v759_v43 = vsel %vm112_vm0, %v516_v11, 0.0  ;;  %v904_v33 = vsel %vm112_vm0, %v516_v11, -inf }
 0x109   :  { %v9603_v32 = vmax.f32 %v935_v19, %v936_v26  ;;  %v793_v37 = vsel %vm112_vm0, %v526_v16, 0.0  ;;  %v938_v0 = vsel %vm112_vm0, %v526_v16, -inf  ;;  %v546_v42 = vadd.f32 %v9412_v18, %v9516_v59 }
 0x10a   :  { %v9530_v3 = vpop.f32.mrf.mxu0  ;;  %v561_v51 = vadd.f32 %v9526_v1, %v9412_v18  ;;  %v826_v44 = vadd.f32 %v825_v29, %v824_v22  ;;  %v971_v49 = vmax.f32 %v969_v24, %v970_v30  ;;  %v860_v50 = vadd.f32 %v859_v34, %v858_v13 }
 0x10b   :  { %v556_v7 = vadd.f32 %v9412_v18, %v9528_v2  ;;  %v9620_v57 = vmax.f32 %v1003_v21, %v1004_v46  ;;  %v827_v60 = vsel %vm112_vm0, %v536_v35, 0.0  ;;  %v972_v8 = vsel %vm112_vm0, %v536_v35, -inf }
 0x10c   :  { %v9532_v5 = vpop.f32.mrf.mxu0  ;;  %v571_v59 = vadd.f32 %v9530_v3, %v9412_v18  ;;  %v760_v9 = vadd.f32 %v759_v43, %v758_v17  ;;  %v905_v14 = vmax.f32 %v903_v63, %v904_v33  ;;  %v794_v1 = vadd.f32 %v793_v37, %v792_v56 }
 0x10d   :  { %v939_v15 = vmax.f32 %v9603_v32, %v938_v0  ;;  %v861_v2 = vsel %vm112_vm0, %v546_v42, 0.0  ;;  %v1006_v22 = vsel %vm112_vm0, %v546_v42, -inf  ;;  %v778_v11 = vsel %vm112_vm0, %v561_v51, 0.0 }
 0x10e   :  { %v9534_v6 = vpop.f32.mrf.mxu0  ;;  %v566_v24 = vadd.f32 %v9412_v18, %v9532_v5  ;;  %v828_v13 = vadd.f32 %v827_v60, %v826_v44  ;;  %v973_v26 = vmax.f32 %v971_v49, %v972_v8  ;;  %v923_v3 = vsel %vm112_vm0, %v561_v51, -inf }
 0x10f   :  { %v761_v63 = vsel %vm112_vm0, %v556_v7, 0.0  ;;  %v906_v16 = vsel %vm112_vm0, %v556_v7, -inf  ;;  %v812_v21 = vsel %vm112_vm0, %v571_v59, 0.0  ;;  %v581_v17 = vadd.f32 %v9534_v6, %v9412_v18 }
 0x110   :  { %v9540_v10 = vpop.f32.mrf.mxu0  ;;  %v862_v30 = vadd.f32 %v861_v2, %v860_v50  ;;  %v1007_v5 = vmax.f32 %v9620_v57, %v1006_v22  ;;  %v779_v34 = vadd.f32 %v778_v11, %v9489_v39  ;;  %v9649_v46 = vmax.f32 %v922_v40, %v923_v3 }
 0x111   :  { %v576_v29 = vadd.f32 %v9412_v18, %v9540_v10  ;;  %v957_v43 = vsel %vm112_vm0, %v571_v59, -inf  ;;  %v795_v6 = vsel %vm112_vm0, %v566_v24, 0.0  ;;  %v762_v33 = vadd.f32 %v761_v63, %v760_v9 }
 0x112   :  { %v9548_v20 = vpop.f32.mrf.mxu0  ;;  %v9655_v37 = vmax.f32 %v905_v14, %v906_v16  ;;  %v813_v39 = vadd.f32 %v812_v21, %v9500_v47  ;;  %v846_v42 = vsel %vm112_vm0, %v581_v17, 0.0  ;;  %v991_v4 = vsel %vm112_vm0, %v581_v17, -inf }
 0x113   :  { %v591_v35 = vadd.f32 %v9548_v20, %v9412_v18  ;;  %v940_v20 = vsel %vm112_vm0, %v566_v24, -inf  ;;  %v829_v38 = vsel %vm112_vm0, %v576_v29, 0.0  ;;  %v796_v51 = vadd.f32 %v795_v6, %v794_v1 }
 0x114   :  { %v9562_v28 = vpop.f32.mrf.mxu0  ;;  %v974_v47 = vsel %vm112_vm0, %v576_v29, -inf  ;;  %v9677_v60 = vmax.f32 %v939_v15, %v940_v20  ;;  %v847_v12 = vadd.f32 %v846_v42, %v9511_v54  ;;  %v13806_v45 = vmax.f32 %v9473_v23, %v9509_v53 }
 0x115   :  { %v586_v10 = vadd.f32 %v9412_v18, %v9562_v28  ;;  %v9667_v28 = vmax.f32 %v956_v48, %v957_v43  ;;  %v880_v44 = vsel %vm112_vm0, %v591_v35, 0.0  ;;  %v1025_v50 = vsel %vm112_vm0, %v591_v35, -inf }
 0x116   :  { %v9572_v41 = vpop.f32.mrf.mxu0  ;;  %v9683_v48 = vmax.f32 %v13806_v45, %v991_v4  ;;  %v830_v8 = vadd.f32 %v829_v38, %v828_v13  ;;  %v9685_v9 = vmax.f32 %v973_v26, %v974_v47  ;;  %v881_v1 = vadd.f32 %v880_v44, %v9522_v62 }
 0x117   :  { %v601_v40 = vadd.f32 %v9572_v41, %v9412_v18  ;;  %v863_v7 = vsel %vm112_vm0, %v586_v10, 0.0  ;;  %v1008_v14 = vsel %vm112_vm0, %v586_v10, -inf  ;;  %v13807_v54 = vmax.f32 %v9480_v31, %v9520_v61 }
 0x118   :  { %v9581_v58 = vpop.f32.mrf.mxu0  ;;  %v864_v23 = vadd.f32 %v863_v7, %v862_v30  ;;  %v9703_v13 = vmax.f32 %v1007_v5, %v1008_v14 }
 0x119   :  { %v596_v57 = vadd.f32 %v9412_v18, %v9581_v58  ;;  %v780_v58 = vsel %vm112_vm0, %v601_v40, 0.0  ;;  %v9695_v15 = vmax.f32 %v13807_v54, %v1025_v50  ;;  %v925_v53 = vsel %vm112_vm0, %v601_v40, -inf }
 0x11a   :  { %v9591_v25 = vpop.f32.mrf.mxu0  ;;  %v781_v62 = vadd.f32 %v780_v58, %v779_v34 }
 0x11b   :  { %v611_v41 = vadd.f32 %v9591_v25, %v9412_v18  ;;  %v763_v22 = vsel %vm112_vm0, %v596_v57, 0.0  ;;  %v908_v11 = vsel %vm112_vm0, %v596_v57, -inf }
 0x11c   :  { %v9596_v27 = vpop.f32.mrf.mxu0  ;;  %v764_v17 = vadd.f32 %v763_v22, %v762_v33  ;;  %v909_v29 = vmax.f32 %v9655_v37, %v908_v11 }
 0x11d   :  { %v606_v25 = vadd.f32 %v9412_v18, %v9596_v27  ;;  %v814_v24 = vsel %vm112_vm0, %v611_v41, 0.0  ;;  %v959_v31 = vsel %vm112_vm0, %v611_v41, -inf }
 0x11e   :  { %v9608_v55 = vpop.f32.mrf.mxu0  ;;  %v815_v30 = vadd.f32 %v814_v24, %v813_v39  ;;  %v960_v34 = vmax.f32 %v9667_v28, %v959_v31 }
 0x11f   :  { %v621_v27 = vadd.f32 %v9608_v55, %v9412_v18  ;;  %v797_v3 = vsel %vm112_vm0, %v606_v25, 0.0  ;;  %v942_v63 = vsel %vm112_vm0, %v606_v25, -inf  ;;  %v926_v55 = vmax.f32 %v9649_v46, %v925_v53 }
 0x120   :  { %v9618_v52 = vpop.f32.mrf.mxu0  ;;  %v798_v6 = vadd.f32 %v797_v3, %v796_v51 }
 0x121   :  { %v616_v61 = vadd.f32 %v9412_v18, %v9618_v52  ;;  %v848_v52 = vsel %vm112_vm0, %v621_v27, 0.0  ;;  %v993_v35 = vsel %vm112_vm0, %v621_v27, -inf }
 0x122   :  { %v9627_v19 = vpop.f32.mrf.mxu0  ;;  %v849_v42 = vadd.f32 %v848_v52, %v847_v12  ;;  %v994_v4 = vmax.f32 %v9683_v48, %v993_v35 }
 0x123   :  { %v631_v16 = vadd.f32 %v9627_v19, %v9412_v18  ;;  %v943_v19 = vmax.f32 %v9677_v60, %v942_v63  ;;  %v976_v46 = vsel %vm112_vm0, %v616_v61, -inf }
 0x124   :  { %v625_v56 = vpop.f32.mrf.mxu0  ;;  %v977_v50 = vmax.f32 %v9685_v9, %v976_v46 }
 0x125   :  { %v626_v21 = vadd.f32 %v9412_v18, %v625_v56  ;;  %v831_v56 = vsel %vm112_vm0, %v616_v61, 0.0  ;;  %v882_v33 = vsel %vm112_vm0, %v631_v16, 0.0  ;;  %v1027_v37 = vsel %vm112_vm0, %v631_v16, -inf }
 0x126   :  { %v7880_v32 = vpop.f32.mrf.mxu0  ;;  %v832_v28 = vadd.f32 %v831_v56, %v830_v8  ;;  %v883_v7 = vadd.f32 %v882_v33, %v881_v1 }
 0x127   :  { %v641_v43 = vadd.f32 %v7880_v32, %v9412_v18  ;;  %v865_v39 = vsel %vm112_vm0, %v626_v21, 0.0  ;;  %v1010_v32 = vsel %vm112_vm0, %v626_v21, -inf }
 0x128   :  { %v635_v0 = vpop.f32.mrf.mxu0  ;;  %v866_v57 = vadd.f32 %v865_v39, %v864_v23  ;;  %v1011_v60 = vmax.f32 %v9703_v13, %v1010_v32 }
 0x129   :  { %v636_v20 = vadd.f32 %v9412_v18, %v635_v0  ;;  %v782_v51 = vsel %vm112_vm0, %v641_v43, 0.0  ;;  %v1028_v0 = vmax.f32 %v9695_v15, %v1027_v37  ;;  %v927_v12 = vsel %vm112_vm0, %v641_v43, -inf }
 0x12a   :  { %v7883_v49 = vpop.f32.mrf.mxu0  ;;  %v783_v48 = vadd.f32 %v782_v51, %v781_v62  ;;  %v9745_v15 = vmax.f32 %v926_v55, %v927_v12 }
 0x12b   :  { %v651_v38 = vadd.f32 %v7883_v49, %v9412_v18  ;;  %v765_v49 = vsel %vm112_vm0, %v636_v20, 0.0  ;;  %v910_v45 = vsel %vm112_vm0, %v636_v20, -inf }
 0x12c   :  { %v645_v59 = vpop.f32.mrf.mxu0  ;;  %v766_v23 = vadd.f32 %v765_v49, %v764_v17  ;;  %v9747_v53 = vmax.f32 %v909_v29, %v910_v45 }
 0x12d   :  { %v646_v47 = vadd.f32 %v9412_v18, %v645_v59  ;;  %v816_v8 = vsel %vm112_vm0, %v651_v38, 0.0  ;;  %v961_v59 = vsel %vm112_vm0, %v651_v38, -inf }
 0x12e   :  { %v7886_v2 = vpop.f32.mrf.mxu0  ;;  %v817_v11 = vadd.f32 %v816_v8, %v815_v30  ;;  %v9750_v24 = vmax.f32 %v960_v34, %v961_v59 }
 0x12f   :  { %v661_v44 = vadd.f32 %v7886_v2, %v9412_v18  ;;  %v799_v58 = vsel %vm112_vm0, %v646_v47, 0.0  ;;  %v944_v25 = vsel %vm112_vm0, %v646_v47, -inf }
 0x130   :  { %v655_v26 = vpop.f32.mrf.mxu0  ;;  %v800_v62 = vadd.f32 %v799_v58, %v798_v6  ;;  %v9754_v31 = vmax.f32 %v943_v19, %v944_v25 }
 0x131   :  { %v656_v9 = vadd.f32 %v9412_v18, %v655_v26  ;;  %v850_v1 = vsel %vm112_vm0, %v661_v44, 0.0  ;;  %v995_v27 = vsel %vm112_vm0, %v661_v44, -inf }
 0x132   :  { %v7889_v5 = vpop.f32.mrf.mxu0  ;;  %v851_v61 = vadd.f32 %v850_v1, %v849_v42  ;;  %v9761_v17 = vmax.f32 %v994_v4, %v995_v27 }
 0x133   :  { %v671_v54 = vadd.f32 %v7889_v5, %v9412_v18  ;;  %v833_v26 = vsel %vm112_vm0, %v656_v9, 0.0  ;;  %v978_v63 = vsel %vm112_vm0, %v656_v9, -inf }
 0x134   :  { %v665_v10 = vpop.f32.mrf.mxu0  ;;  %v834_v19 = vadd.f32 %v833_v26, %v832_v28  ;;  %v9770_v56 = vmax.f32 %v977_v50, %v978_v63 }
 0x135   :  { %v666_v2 = vadd.f32 %v9412_v18, %v665_v10  ;;  %v884_v16 = vsel %vm112_vm0, %v671_v54, 0.0  ;;  %v1029_v21 = vsel %vm112_vm0, %v671_v54, -inf }
 0x136   :  { %v7892_v40 = vpop.f32.mrf.mxu0  ;;  %v885_v46 = vadd.f32 %v884_v16, %v883_v7  ;;  %v9772_v10 = vmax.f32 %v1028_v0, %v1029_v21 }
 0x137   :  { %v681_v13 = vadd.f32 %v7892_v40, %v9412_v18  ;;  %v867_v29 = vsel %vm112_vm0, %v666_v2, 0.0  ;;  %v1012_v30 = vsel %vm112_vm0, %v666_v2, -inf }
 0x138   :  { %v675_v41 = vpop.f32.mrf.mxu0  ;;  %v9774_v37 = vadd.f32 %v867_v29, %v866_v57  ;;  %v9779_v4 = vmax.f32 %v1011_v60, %v1012_v30 }
 0x139   :  { %v676_v55 = vadd.f32 %v9412_v18, %v675_v41  ;;  %v784_v52 = vsel %vm112_vm0, %v681_v13, 0.0  ;;  %v929_v35 = vsel %vm112_vm0, %v681_v13, -inf }
 0x13a   :  { %v7895_v14 = vpop.f32.mrf.mxu0  ;;  %v785_v32 = vadd.f32 %v784_v52, %v783_v48  ;;  %v930_v38 = vmax.f32 %v9745_v15, %v929_v35 }
 0x13b   :  { %v691_v5 = vadd.f32 %v7895_v14, %v9412_v18  ;;  %v767_v39 = vsel %vm112_vm0, %v676_v55, 0.0  ;;  %v912_v20 = vsel %vm112_vm0, %v676_v55, -inf }
 0x13c   :  { %v685_v22 = vpop.f32.mrf.mxu0  ;;  %v768_v7 = vadd.f32 %v767_v39, %v766_v23  ;;  %v913_v0 = vmax.f32 %v9747_v53, %v912_v20 }
 0x13d   :  { %v686_v43 = vadd.f32 %v9412_v18, %v685_v22  ;;  %v818_v40 = vsel %vm112_vm0, %v691_v5, 0.0  ;;  %v963_v51 = vsel %vm112_vm0, %v691_v5, -inf }
 0x13e   :  { %v7898_v3 = vpop.f32.mrf.mxu0  ;;  %v819_v12 = vadd.f32 %v818_v40, %v817_v11  ;;  %v964_v8 = vmax.f32 %v9750_v24, %v963_v51 }
 0x13f   :  { %v701_v6 = vadd.f32 %v7898_v3, %v9412_v18  ;;  %v801_v47 = vsel %vm112_vm0, %v686_v43, 0.0  ;;  %v946_v44 = vsel %vm112_vm0, %v686_v43, -inf }
 0x140   :  { %v695_v34 = vpop.f32.mrf.mxu0  ;;  %v802_v59 = vadd.f32 %v801_v47, %v800_v62  ;;  %v947_v9 = vmax.f32 %v9754_v31, %v946_v44 }
 0x141   :  { %v696_v42 = vadd.f32 %v9412_v18, %v695_v34  ;;  %v852_v50 = vsel %vm112_vm0, %v701_v6, 0.0  ;;  %v9789_v57 = vsel %vm112_vm0, %v701_v6, -inf }
 0x142   :  { %v7901_v33 = vpop.f32.mrf.mxu0  ;;  %v853_v14 = vadd.f32 %v852_v50, %v851_v61  ;;  %v998_v25 = vmax.f32 %v9761_v17, %v9789_v57  ;;  %v6720_v50 = vld [vmem:[%s13793_s3 + $0x10] sm:$0xff] }
 0x143   :  { %v711_v41 = vadd.f32 %v7901_v33, %v9412_v18  ;;  %v835_v49 = vsel %vm112_vm0, %v696_v42, 0.0  ;;  %v9794_v45 = vsel %vm112_vm0, %v696_v42, -inf }
 0x144   :  { %v705_v28 = vpop.f32.mrf.mxu0  ;;  %v836_v23 = vadd.f32 %v835_v49, %v834_v19  ;;  %v981_v53 = vmax.f32 %v9770_v56, %v9794_v45 }
 0x145   :  { %v886_v2 = vsel %vm112_vm0, %v711_v41, 0.0  ;;  %v9808_v24 = vsel %vm112_vm0, %v711_v41, -inf  ;;  %v706_v31 = vadd.f32 %v9412_v18, %v705_v28 }
 0x146   :  { %v7904_v60 = vpop.f32.mrf.mxu0  ;;  %v887_v16 = vadd.f32 %v886_v2, %v885_v46  ;;  %v1032_v35 = vmax.f32 %v9772_v10, %v9808_v24 }
 0x147   :  { %v721_v48 = vadd.f32 %v7904_v60, %v9412_v18  ;;  %v869_v42 = vsel %vm112_vm0, %v706_v31, 0.0 }
 0x148   :  { %v715_v58 = vpop.f32.mrf.mxu0 }
 0x149   :  { %v786_v1 = vsel %vm112_vm0, %v721_v48, 0.0  ;;  %v931_v54 = vsel %vm112_vm0, %v721_v48, -inf  ;;  %v716_v15 = vadd.f32 %v9412_v18, %v715_v58 }
 0x14a   :  { %v787_v22 = vadd.f32 %v786_v1, %v785_v32  ;;  %v7907_v11 = vpop.f32.mrf.mxu0  ;;  %v932_v26 = vmax.f32 %v930_v38, %v931_v54 }
 0x14b   :  { %v769_v27 = vsel %vm112_vm0, %v716_v15, 0.0  ;;  %v914_v13 = vsel %vm112_vm0, %v716_v15, -inf  ;;  %v731_v62 = vadd.f32 %v7907_v11, %v9412_v18 }
 0x14c   :  { %v892_v61 = vmul.f32 0.11111111, %v787_v22  ;;  %v725_v3 = vpop.f32.mrf.mxu0  ;;  %v770_v63 = vadd.f32 %v769_v27, %v768_v7  ;;  %v915_v52 = vmax.f32 %v913_v0, %v914_v13  ;;  %v1014_v7 = vsel %vm112_vm0, %v706_v31, -inf  ;;  %v8708_v13 = vld [vmem:[%s13790_s0 + $0x8] sm:$0xff]  ;;  %v8710_v31 = vld [vmem:[%s13790_s0 + $0x18] sm:$0xff] }
 0x14d   :  { %v820_v21 = vsel %vm112_vm0, %v731_v62, 0.0  ;;  %v965_v55 = vsel %vm112_vm0, %v731_v62, -inf  ;;  %v726_v17 = vadd.f32 %v9412_v18, %v725_v3  ;;  %v8709_v62 = vld [vmem:[%s13790_s0 + $0x10] sm:$0xff] }
 0x14e   :  { %v1036_v29 = vadd.f32 %v932_v26, %v892_v61  ;;  %v821_v30 = vadd.f32 %v820_v21, %v819_v12  ;;  %v7910_v5 = vpop.f32.mrf.mxu0  ;;  %v891_v34 = vmul.f32 0.11111111, %v770_v63  ;;  %v966_v46 = vmax.f32 %v964_v8, %v965_v55  ;;  %v8711_v61 = vld [vmem:[%s13790_s0 + $0x20] sm:$0xff]  ;;  %v8712_v26 = vld [vmem:[%s13790_s0 + $0x28] sm:$0xff]  ;;  %v8713_v3 = vld [vmem:[%s13790_s0 + $0x30] sm:$0xff] }
 0x14f   :  { %v803_v43 = vsel %vm112_vm0, %v726_v17, 0.0  ;;  %v948_v6 = vsel %vm112_vm0, %v726_v17, -inf  ;;  %v741_v19 = vadd.f32 %v7910_v5, %v9412_v18  ;;  %v870_v8 = vadd.f32 %v869_v42, %v9774_v37  ;;  %v8714_v63 = vld [vmem:[%s13790_s0 + $0x38] sm:$0xff]  ;;  %v8716_v21 = vld [vmem:[%s13790_s0 + $0x48] sm:$0xff]  ;;  %v8717_v55 = vld [vmem:[%s13790_s0 + $0x50] sm:$0xff] }
 0x150   :  { %v894_v56 = vmul.f32 0.11111111, %v821_v30  ;;  %v804_v33 = vadd.f32 %v803_v43, %v802_v59  ;;  %v735_v39 = vpop.f32.mrf.mxu0  ;;  %v1035_v20 = vadd.f32 %v915_v52, %v891_v34  ;;  %v949_v51 = vmax.f32 %v947_v9, %v948_v6  ;;  %v8718_v17 = vld [vmem:[%s13790_s0 + $0x58] sm:$0xff]  ;;  %v8720_v30 = vld [vmem:[%s13790_s0 + $0x68] sm:$0xff]  ;;  %v8721_v5 = vld [vmem:[%s13790_s0 + $0x70] sm:$0xff] }
 0x151   :  { %v854_v32 = vsel %vm112_vm0, %v741_v19, 0.0  ;;  %v999_v38 = vsel %vm112_vm0, %v741_v19, -inf  ;;  %v736_v40 = vadd.f32 %v9412_v18, %v735_v39  ;;  %v8722_v34 = vld [vmem:[%s13790_s0 + $0x78] sm:$0xff]  ;;  %v8723_v52 = vld [vmem:[%s13790_s0 + $0x80] sm:$0xff]  ;;  %v8725_v43 = vld [vmem:[%s13790_s0 + $0x90] sm:$0xff] }
 0x152   :  { %v1038_v10 = vadd.f32 %v966_v46, %v894_v56  ;;  %v893_v28 = vmul.f32 0.11111111, %v804_v33  ;;  %v855_v47 = vadd.f32 %v854_v32, %v853_v14  ;;  %v7913_v44 = vpop.f32.mrf.mxu0  ;;  %7918 = vmatprep.mubr.msk.f32.mxu1 %vm112_vm0, %v1035_v20  ;;  %v1000_v49 = vmax.f32 %v998_v25, %v999_v38  ;;  %v8726_v6 = vld [vmem:[%s13790_s0 + $0x98] sm:$0xff]  ;;  %v8727_v19 = vld [vmem:[%s13790_s0 + $0xa0] sm:$0xff]  ;;  %v8728_v56 = vld [vmem:[%s13790_s0 + $0xa8] sm:$0xff] }
 0x153   :  { %v837_v0 = vsel %vm112_vm0, %v736_v40, 0.0  ;;  %v982_v57 = vsel %vm112_vm0, %v736_v40, -inf  ;;  %v751_v41 = vadd.f32 %v7913_v44, %v9412_v18  ;;  %7919 = vmatmul.mubr.msk.f32.vlgmr.msra.gmra.mxu1 %vm112_vm0, %v1036_v29  ;;  %v1015_v25 = vmax.f32 %v9779_v4, %v1014_v7  ;;  %v8707_v4 = vld [vmem:[%s13790_s0] sm:$0xff]  ;;  %v8729_v46 = vld [vmem:[%s13790_s0 + $0xb0] sm:$0xff]  ;;  %v8730_v33 = vld [vmem:[%s13790_s0 + $0xb8] sm:$0xff] }
 0x154   :  { %v1037_v60 = vadd.f32 %v949_v51, %v893_v28  ;;  %v896_v12 = vmul.f32 0.11111111, %v855_v47  ;;  %v838_v45 = vadd.f32 %v837_v0, %v836_v23  ;;  %v745_v48 = vpop.f32.mrf.mxu0  ;;  %7931 = vmatpush3.msra.mxu1 %v9432_v36  ;;  %v983_v54 = vmax.f32 %v981_v53, %v982_v57  ;;  %v8719_v29 = vld [vmem:[%s13790_s0 + $0x60] sm:$0xff]  ;;  %v8732_v20 = vld [vmem:[%s13790_s0 + $0xc8] sm:$0xff]  ;;  %v8733_v42 = vld [vmem:[%s13790_s0 + $0xd0] sm:$0xff] }
 0x155   :  { %v888_v59 = vsel %vm112_vm0, %v751_v41, 0.0  ;;  %v1033_v9 = vsel %vm112_vm0, %v751_v41, -inf  ;;  %v746_v14 = vadd.f32 %v9412_v18, %v745_v48  ;;  %7932 = vmatprep.subr.mxu1 %v6720_v50  ;;  %v8731_v39 = vld [vmem:[%s13790_s0 + $0xc0] sm:$0xff]  ;;  %v8734_v32 = vld [vmem:[%s13790_s0 + $0xd8] sm:$0xff]  ;;  %v8736_v40 = vld [vmem:[%s13790_s0 + $0xe8] sm:$0xff] }
 0x156   :  { %v1040_v58 = vadd.f32 %v1000_v49, %v896_v12  ;;  %v895_v1 = vmul.f32 0.11111111, %v838_v45  ;;  %v889_v15 = vadd.f32 %v888_v59, %v887_v16  ;;  %7921 = vmatprep.mubr.msk.f32.mxu1 %vm112_vm0, %v1037_v60  ;;  %7933 = vmatpush3.msra.mxu1 %v6720_v50  ;;  %v1034_v22 = vmax.f32 %v1032_v35, %v1033_v9  ;;  %v8715_v16 = vld [vmem:[%s13790_s0 + $0x40] sm:$0xff]  ;;  %v8724_v35 = vld [vmem:[%s13790_s0 + $0x88] sm:$0xff]  ;;  %v8738_v28 = vld [vmem:[%s13790_s0 + $0xf8] sm:$0xff] }
 0x157   :  { %v871_v36 = vsel %vm112_vm0, %v746_v14, 0.0  ;;  %v1016_v37 = vsel %vm112_vm0, %v746_v14, -inf  ;;  %7922 = vmatmul.mubr.msk.f32.gmra.mxu1 %vm112_vm0, %v1038_v10  ;;  %v8735_v38 = vld [vmem:[%s13790_s0 + $0xe0] sm:$0xff]  ;;  %v8737_v10 = vld [vmem:[%s13790_s0 + $0xf0] sm:$0xff]  ;;  %v8740_v47 = vld [vmem:[%s13790_s0 + $0x108] sm:$0xff] }
 0x158   :  { %v1039_v23 = vadd.f32 %v983_v54, %v895_v1  ;;  %v898_v2 = vmul.f32 0.11111111, %v889_v15  ;;  %v872_v18 = vadd.f32 %v871_v36, %v870_v8  ;;  %v1017_v27 = vmax.f32 %v1015_v25, %v1016_v37  ;;  %v8739_v51 = vld [vmem:[%s13790_s0 + $0x100] sm:$0xff]  ;;  %v8741_v44 = vld [vmem:[%s13790_s0 + $0x110] sm:$0xff]  ;;  %v8742_v50 = vld [vmem:[%s13790_s0 + $0x118] sm:$0xff] }
 0x159   :  { %v8743_v7 = vld [vmem:[%s13790_s0 + $0x120] sm:$0xff]  ;;  %v8744_v0 = vld [vmem:[%s13790_s0 + $0x128] sm:$0xff]  ;;  %v8745_v57 = vld [vmem:[%s13790_s0 + $0x130] sm:$0xff] }
 0x15a   :  { %v1042_v11 = vadd.f32 %v1034_v22, %v898_v2  ;;  %v897_v24 = vmul.f32 0.11111111, %v872_v18  ;;  %7924 = vmatprep.mubr.msk.f32.mxu1 %vm112_vm0, %v1039_v23  ;;  %v8746_v41 = vld [vmem:[%s13790_s0 + $0x138] sm:$0xff]  ;;  %v8747_v60 = vld [vmem:[%s13790_s0 + $0x140] sm:$0xff]  ;;  %v8748_v12 = vld [vmem:[%s13790_s0 + $0x148] sm:$0xff] }
 0x15b   :  { %7925 = vmatmul.mubr.msk.f32.gmra.mxu1 %vm112_vm0, %v1040_v58  ;;  %v8749_v49 = vld [vmem:[%s13790_s0 + $0x150] sm:$0xff]  ;;  %v8750_v45 = vld [vmem:[%s13790_s0 + $0x158] sm:$0xff]  ;;  %v8751_v48 = vld [vmem:[%s13790_s0 + $0x160] sm:$0xff] }
 0x15c   :  { %v1041_v53 = vadd.f32 %v1017_v27, %v897_v24  ;;  %v8752_v8 = vld [vmem:[%s13790_s0 + $0x168] sm:$0xff]  ;;  %v8753_v59 = vld [vmem:[%s13790_s0 + $0x170] sm:$0xff]  ;;  %v8754_v9 = vld [vmem:[%s13790_s0 + $0x178] sm:$0xff] }
 0x15d   :  { %v8755_v14 = vld [vmem:[%s13790_s0 + $0x180] sm:$0xff]  ;;  %v8756_v58 = vld [vmem:[%s13790_s0 + $0x188] sm:$0xff]  ;;  %v8757_v1 = vld [vmem:[%s13790_s0 + $0x190] sm:$0xff] }
 0x15e   :  { %7927 = vmatprep.mubr.msk.f32.mxu1 %vm112_vm0, %v1041_v53  ;;  %v8758_v54 = vld [vmem:[%s13790_s0 + $0x198] sm:$0xff]  ;;  %v8759_v15 = vld [vmem:[%s13790_s0 + $0x1a0] sm:$0xff]  ;;  %v8760_v25 = vld [vmem:[%s13790_s0 + $0x1a8] sm:$0xff] }
 0x15f   :  { %7928 = vmatmul.mubr.msk.f32.gmra.mxu1 %vm112_vm0, %v1042_v11  ;;  %v8761_v36 = vld [vmem:[%s13790_s0 + $0x1b0] sm:$0xff]  ;;  %v8762_v37 = vld [vmem:[%s13790_s0 + $0x1b8] sm:$0xff]  ;;  %v8763_v23 = vld [vmem:[%s13790_s0 + $0x1c0] sm:$0xff] }
 0x160   :  { %7934 = vmatprep.mubr.msk.f32.mxu1 %vm112_vm0, %v8707_v4  ;;  %v8764_v2 = vld [vmem:[%s13790_s0 + $0x1c8] sm:$0xff]  ;;  %v8765_v22 = vld [vmem:[%s13790_s0 + $0x1d0] sm:$0xff]  ;;  %v8766_v18 = vld [vmem:[%s13790_s0 + $0x1d8] sm:$0xff] }
 0x161   :  { %v8767_v11 = vld [vmem:[%s13790_s0 + $0x1e0] sm:$0xff]  ;;  %v8768_v24 = vld [vmem:[%s13790_s0 + $0x1e8] sm:$0xff]  ;;  %v8769_v27 = vld [vmem:[%s13790_s0 + $0x1f0] sm:$0xff] }
 0x162   :  { %v8770_v53 = vld [vmem:[%s13790_s0 + $0x1f8] sm:$0xff]  ;;  %v8771_v4 = vld [vmem:[%s13790_s0 + $0x200] sm:$0xff] }
 0x163   :  { %7935 = vmatmul.mubr.msk.f32.vlgmr.msra.gmra.mxu1 %vm112_vm0, %v8708_v13  ;;  %v8772_v13 = vld [vmem:[%s13790_s0 + $0x208] sm:$0xff] }
 0x164   :  { %7937 = vmatprep.mubr.msk.f32.mxu1 %vm112_vm0, %v8709_v62  ;;  %v8773_v62 = vld [vmem:[%s13790_s0 + $0x210] sm:$0xff] }
 0x167   :  { %7938 = vmatmul.mubr.msk.f32.gmra.mxu1 %vm112_vm0, %v8710_v31  ;;  %v8774_v31 = vld [vmem:[%s13790_s0 + $0x218] sm:$0xff] }
 0x168   :  { %7940 = vmatprep.mubr.msk.f32.mxu1 %vm112_vm0, %v8711_v61  ;;  %v8775_v61 = vld [vmem:[%s13790_s0 + $0x220] sm:$0xff] }
 0x16b   :  { %7941 = vmatmul.mubr.msk.f32.gmra.mxu1 %vm112_vm0, %v8712_v26  ;;  %v8776_v26 = vld [vmem:[%s13790_s0 + $0x228] sm:$0xff] }
 0x16c   :  { %7943 = vmatprep.mubr.msk.f32.mxu1 %vm112_vm0, %v8713_v3  ;;  %v8777_v3 = vld [vmem:[%s13790_s0 + $0x230] sm:$0xff] }
 0x16f   :  { %7944 = vmatmul.mubr.msk.f32.gmra.mxu1 %vm112_vm0, %v8714_v63  ;;  %v8778_v63 = vld [vmem:[%s13790_s0 + $0x238] sm:$0xff] }
 0x170   :  { %7946 = vmatprep.mubr.msk.f32.mxu1 %vm112_vm0, %v8715_v16 }
 0x173   :  { %7947 = vmatmul.mubr.msk.f32.gmra.mxu1 %vm112_vm0, %v8716_v21  ;;  %v10140_v21 = vld [vmem:[%s13796_s6] ss:$0 sm:$0xff] }
 0x174   :  { %7949 = vmatprep.mubr.msk.f32.mxu1 %vm112_vm0, %v8717_v55 }
 0x177   :  { %7950 = vmatmul.mubr.msk.f32.gmra.mxu1 %vm112_vm0, %v8718_v17 }
 0x178   :  { %7952 = vmatprep.mubr.msk.f32.mxu1 %vm112_vm0, %v8719_v29 }
 0x17b   :  { %7953 = vmatmul.mubr.msk.f32.gmra.mxu1 %vm112_vm0, %v8720_v30 }
 0x17c   :  { %7955 = vmatprep.mubr.msk.f32.mxu1 %vm112_vm0, %v8721_v5 }
 0x17f   :  { %7956 = vmatmul.mubr.msk.f32.gmra.mxu1 %vm112_vm0, %v8722_v34 }
 0x180   :  { %7958 = vmatprep.mubr.msk.f32.mxu1 %vm112_vm0, %v8723_v52 }
 0x183   :  { %7959 = vmatmul.mubr.msk.f32.gmra.mxu1 %vm112_vm0, %v8724_v35 }
 0x184   :  { %7961 = vmatprep.mubr.msk.f32.mxu1 %vm112_vm0, %v8725_v43 }
 0x187   :  { %7962 = vmatmul.mubr.msk.f32.gmra.mxu1 %vm112_vm0, %v8726_v6 }
 0x188   :  { %7964 = vmatprep.mubr.msk.f32.mxu1 %vm112_vm0, %v8727_v19 }
 0x18b   :  { %7965 = vmatmul.mubr.msk.f32.gmra.mxu1 %vm112_vm0, %v8728_v56 }
 0x18c   :  { %7967 = vmatprep.mubr.msk.f32.mxu1 %vm112_vm0, %v8729_v46 }
 0x18f   :  { %7968 = vmatmul.mubr.msk.f32.gmra.mxu1 %vm112_vm0, %v8730_v33 }
 0x190   :  { %7970 = vmatprep.mubr.msk.f32.mxu1 %vm112_vm0, %v8731_v39 }
 0x193   :  { %7971 = vmatmul.mubr.msk.f32.gmra.mxu1 %vm112_vm0, %v8732_v20 }
 0x194   :  { %7973 = vmatprep.mubr.msk.f32.mxu1 %vm112_vm0, %v8733_v42 }
 0x197   :  { %7974 = vmatmul.mubr.msk.f32.gmra.mxu1 %vm112_vm0, %v8734_v32 }
 0x198   :  { %7976 = vmatprep.mubr.msk.f32.mxu1 %vm112_vm0, %v8735_v38 }
 0x19b   :  { %7977 = vmatmul.mubr.msk.f32.gmra.mxu1 %vm112_vm0, %v8736_v40 }
 0x19c   :  { %7979 = vmatprep.mubr.msk.f32.mxu1 %vm112_vm0, %v8737_v10 }
 0x19f   :  { %7980 = vmatmul.mubr.msk.f32.gmra.mxu1 %vm112_vm0, %v8738_v28  ;;  %v10159_v28 = vld [vmem:[%s13794_s4 + $0x1] ss:$0 sm:$0xff] }
 0x1a0   :  { %7982 = vmatprep.mubr.msk.f32.mxu1 %vm112_vm0, %v8739_v51 }
 0x1a3   :  { %7983 = vmatmul.mubr.msk.f32.gmra.mxu1 %vm112_vm0, %v8740_v47 }
 0x1a4   :  { %7985 = vmatprep.mubr.msk.f32.mxu1 %vm112_vm0, %v8741_v44 }
 0x1a7   :  { %7986 = vmatmul.mubr.msk.f32.gmra.mxu1 %vm112_vm0, %v8742_v50  ;;  %v10167_v50 = vld [vmem:[%s13795_s5 + $0x8] sm:$0xff] }
 0x1a8   :  { %7988 = vmatprep.mubr.msk.f32.mxu1 %vm112_vm0, %v8743_v7 }
 0x1ab   :  { %7989 = vmatmul.mubr.msk.f32.gmra.mxu1 %vm112_vm0, %v8744_v0 }
 0x1ac   :  { %7991 = vmatprep.mubr.msk.f32.mxu1 %vm112_vm0, %v8745_v57 }
 0x1af   :  { %7992 = vmatmul.mubr.msk.f32.gmra.mxu1 %vm112_vm0, %v8746_v41 }
 0x1b0   :  { %7994 = vmatprep.mubr.msk.f32.mxu1 %vm112_vm0, %v8747_v60 }
 0x1b3   :  { %7995 = vmatmul.mubr.msk.f32.gmra.mxu1 %vm112_vm0, %v8748_v12 }
 0x1b4   :  { %7997 = vmatprep.mubr.msk.f32.mxu1 %vm112_vm0, %v8749_v49 }
 0x1b7   :  { %7998 = vmatmul.mubr.msk.f32.gmra.mxu1 %vm112_vm0, %v8750_v45 }
 0x1b8   :  { %8000 = vmatprep.mubr.msk.f32.mxu1 %vm112_vm0, %v8751_v48 }
 0x1bb   :  { %8001 = vmatmul.mubr.msk.f32.gmra.mxu1 %vm112_vm0, %v8752_v8 }
 0x1bc   :  { %8003 = vmatprep.mubr.msk.f32.mxu1 %vm112_vm0, %v8753_v59 }
 0x1bf   :  { %8004 = vmatmul.mubr.msk.f32.gmra.mxu1 %vm112_vm0, %v8754_v9 }
 0x1c0   :  { %8006 = vmatprep.mubr.msk.f32.mxu1 %vm112_vm0, %v8755_v14 }
 0x1c3   :  { %8007 = vmatmul.mubr.msk.f32.gmra.mxu1 %vm112_vm0, %v8756_v58 }
 0x1c4   :  { %8009 = vmatprep.mubr.msk.f32.mxu1 %vm112_vm0, %v8757_v1 }
 0x1c7   :  { %8010 = vmatmul.mubr.msk.f32.gmra.mxu1 %vm112_vm0, %v8758_v54 }
 0x1c8   :  { %8012 = vmatprep.mubr.msk.f32.mxu1 %vm112_vm0, %v8759_v15 }
 0x1cb   :  { %8013 = vmatmul.mubr.msk.f32.gmra.mxu1 %vm112_vm0, %v8760_v25 }
 0x1cc   :  { %8015 = vmatprep.mubr.msk.f32.mxu1 %vm112_vm0, %v8761_v36 }
 0x1cf   :  { %8016 = vmatmul.mubr.msk.f32.gmra.mxu1 %vm112_vm0, %v8762_v37 }
 0x1d0   :  { %8018 = vmatprep.mubr.msk.f32.mxu1 %vm112_vm0, %v8763_v23 }
 0x1d3   :  { %8019 = vmatmul.mubr.msk.f32.gmra.mxu1 %vm112_vm0, %v8764_v2 }
 0x1d4   :  { %8021 = vmatprep.mubr.msk.f32.mxu1 %vm112_vm0, %v8765_v22 }
 0x1d7   :  { %8022 = vmatmul.mubr.msk.f32.gmra.mxu1 %vm112_vm0, %v8766_v18 }
 0x1d8   :  { %8024 = vmatprep.mubr.msk.f32.mxu1 %vm112_vm0, %v8767_v11 }
 0x1db   :  { %8025 = vmatmul.mubr.msk.f32.gmra.mxu1 %vm112_vm0, %v8768_v24 }
 0x1dc   :  { %8027 = vmatprep.mubr.msk.f32.mxu1 %vm112_vm0, %v8769_v27 }
 0x1df   :  { %8028 = vmatmul.mubr.msk.f32.gmra.mxu1 %vm112_vm0, %v8770_v53 }
 0x1e0   :  { %8030 = vmatprep.mubr.msk.f32.mxu1 %vm112_vm0, %v8771_v4 }
 0x1e3   :  { %8031 = vmatmul.mubr.msk.f32.gmra.mxu1 %vm112_vm0, %v8772_v13 }
 0x1e4   :  { %8033 = vmatprep.mubr.msk.f32.mxu1 %vm112_vm0, %v8773_v62 }
 0x1e7   :  { %8034 = vmatmul.mubr.msk.f32.gmra.mxu1 %vm112_vm0, %v8774_v31 }
 0x1e8   :  { %8036 = vmatprep.mubr.msk.f32.mxu1 %vm112_vm0, %v8775_v61 }
 0x1eb   :  { %8037 = vmatmul.mubr.msk.f32.gmra.mxu1 %vm112_vm0, %v8776_v26 }
 0x1ec   :  { %8039 = vmatprep.mubr.msk.f32.mxu1 %vm112_vm0, %v8777_v3 }
 0x1ef   :  { %8040 = vmatmul.mubr.msk.f32.gmra.mxu1 %vm112_vm0, %v8778_v63 }
 0x213   :  { %v7920_v16 = vpop.f32.mrf.mxu1 }
 0x214   :  { %v1148_v5 = vadd.f32 %v7920_v16, %v10140_v21 }
 0x215   :  { %v1142_v55 = vpop.f32.mrf.mxu1 }
 0x216   :  { %v1143_v17 = vadd.f32 %v10140_v21, %v1142_v55 }
 0x217   :  { %v7923_v29 = vpop.f32.mrf.mxu1 }
 0x218   :  { %2148 = vxpose.xlu1.b32.start [1/8] (short) (narrow) %v1143_v17, 16  ;;  %v1158_v56 = vadd.f32 %v7923_v29, %v10140_v21 }
 0x219   :  { %v1152_v30 = vpop.f32.mrf.mxu1 }
 0x21a   :  { %v1153_v35 = vadd.f32 %v10140_v21, %v1152_v30 }
 0x21b   :  { %v7926_v34 = vpop.f32.mrf.mxu1 }
 0x21c   :  { %2149 = vxpose.xlu1.b32.cont [2/8] (short) (narrow) %v1148_v5, 16  ;;  %v1168_v39 = vadd.f32 %v7926_v34, %v10140_v21 }
 0x21d   :  { %v1162_v52 = vpop.f32.mrf.mxu1 }
 0x21e   :  { %v1163_v42 = vadd.f32 %v10140_v21, %v1162_v52 }
 0x21f   :  { %v7929_v43 = vpop.f32.mrf.mxu1 }
 0x220   :  { %v1178_v6 = vadd.f32 %v7929_v43, %v10140_v21  ;;  %2150 = vxpose.xlu1.b32.cont [3/8] (short) (narrow) %v1153_v35, 16 }
 0x221   :  { %v1172_v19 = vpop.f32.mrf.mxu1 }
 0x222   :  { %v1173_v46 = vadd.f32 %v10140_v21, %v1172_v19  ;;  %8077 = vmatprep.subr.mxu1 %v1178_v6 }
 0x223   :  { %v7936_v33 = vpop.f32.mrf.mxu1  ;;  %8078 = vmatpush3.msra.mxu1 %v1178_v6 }
 0x224   :  { %8079 = vmatprep.subr.mxu1 %v1173_v46  ;;  %2151 = vxpose.xlu1.b32.cont [4/8] (short) (narrow) %v1158_v56, 16  ;;  %v1264_v47 = vadd.f32 %v7936_v33, %v10159_v28 }
 0x225   :  { %v10149_v20 = vpop.f32.mrf.mxu1  ;;  %8080 = vmatpush3.msra.mxu1 %v1173_v46 }
 0x226   :  { %8081 = vmatprep.subr.mxu1 %v1168_v39  ;;  %v1634_v57 = vsel %vm112_vm0, %v1264_v47, 0.0  ;;  %v1778_v60 = vsel %vm112_vm0, %v1264_v47, -inf }
 0x227   :  { %v7939_v32 = vpop.f32.mrf.mxu1  ;;  %8082 = vmatpush3.msra.mxu1 %v1168_v39 }
 0x228   :  { %8083 = vmatprep.subr.mxu1 %v1163_v42  ;;  %2152 = vxpose.xlu1.b32.cont [5/8] (short) (narrow) %v1163_v42, 16  ;;  %v1274_v12 = vadd.f32 %v7939_v32, %v10159_v28 }
 0x229   :  { %v10152_v38 = vpop.f32.mrf.mxu1  ;;  %8084 = vmatpush3.msra.mxu1 %v1163_v42 }
 0x22a   :  { %8085 = vmatprep.subr.mxu1 %v1158_v56  ;;  %v1668_v1 = vsel %vm112_vm0, %v1274_v12, 0.0  ;;  %v1812_v54 = vsel %vm112_vm0, %v1274_v12, -inf }
 0x22b   :  { %v7942_v40 = vpop.f32.mrf.mxu1  ;;  %8086 = vmatpush3.msra.mxu1 %v1158_v56 }
 0x22c   :  { %8087 = vmatprep.subr.mxu1 %v1153_v35  ;;  %2153 = vxpose.xlu1.b32.cont [6/8] (short) (narrow) %v1168_v39, 16  ;;  %v1284_v14 = vadd.f32 %v7942_v40, %v10159_v28 }
 0x22d   :  { %v10154_v10 = vpop.f32.mrf.mxu1  ;;  %8088 = vmatpush3.msra.mxu1 %v1153_v35 }
 0x22e   :  { %8089 = vmatprep.subr.mxu1 %v1148_v5  ;;  %v1702_v22 = vsel %vm112_vm0, %v1284_v14, 0.0  ;;  %v1846_v11 = vsel %vm112_vm0, %v1284_v14, -inf }
 0x22f   :  { %v7945_v51 = vpop.f32.mrf.mxu1  ;;  %8090 = vmatpush3.msra.mxu1 %v1148_v5 }
 0x230   :  { %2154 = vxpose.xlu1.b32.cont [7/8] (short) (narrow) %v1173_v46, 16  ;;  %8091 = vmatprep.subr.mxu1 %v1143_v17  ;;  %v1294_v24 = vadd.f32 %v7945_v51, %v10159_v28 }
 0x231   :  { %v10162_v44 = vpop.f32.mrf.mxu1  ;;  %8092 = vmatpush3.msra.mxu1 %v1143_v17 }
 0x232   :  { %8208 = vmatprep.subr.mxu1 %v10167_v50  ;;  %v1736_v26 = vsel %vm112_vm0, %v1294_v24, 0.0  ;;  %v1880_v3 = vsel %vm112_vm0, %v1294_v24, -inf }
 0x233   :  { %v7948_v7 = vpop.f32.mrf.mxu1 }
 0x234   :  { %v1304_v0 = vadd.f32 %v7948_v7, %v10159_v28  ;;  %2155 = vxpose.xlu1.b32.end [8/8] (short) (narrow) %v1178_v6, 16 }
 0x235   :  { %v10172_v41 = vpop.f32.mrf.mxu1 }
 0x236   :  { %v1635_v49 = vsel %vm112_vm0, %v1304_v0, 0.0  ;;  %v1779_v45 = vsel %vm112_vm0, %v1304_v0, -inf }
 0x237   :  { %v1636_v48 = vadd.f32 %v1635_v49, %v1634_v57  ;;  %v1780_v8 = vmax.f32 %v1778_v60, %v1779_v45  ;;  %v7951_v59 = vpop.f32.mrf.mxu1 }
 0x238   :  { %v1314_v9 = vadd.f32 %v7951_v59, %v10159_v28 }
 0x239   :  { %v10180_v58 = vpop.f32.mrf.mxu1 }
 0x23a   :  { %v1669_v15 = vsel %vm112_vm0, %v1314_v9, 0.0  ;;  %v1813_v25 = vsel %vm112_vm0, %v1314_v9, -inf }
 0x23b   :  { %v1670_v36 = vadd.f32 %v1669_v15, %v1668_v1  ;;  %v1814_v37 = vmax.f32 %v1812_v54, %v1813_v25  ;;  %v7954_v23 = vpop.f32.mrf.mxu1 }
 0x23c   :  { %v1324_v2 = vadd.f32 %v7954_v23, %v10159_v28 }
 0x23d   :  { %v10188_v18 = vpop.f32.mrf.mxu1 }
 0x23e   :  { %v1703_v27 = vsel %vm112_vm0, %v1324_v2, 0.0  ;;  %v1847_v53 = vsel %vm112_vm0, %v1324_v2, -inf }
 0x23f   :  { %v1704_v4 = vadd.f32 %v1703_v27, %v1702_v22  ;;  %v1848_v13 = vmax.f32 %v1846_v11, %v1847_v53  ;;  %v7957_v62 = vpop.f32.mrf.mxu1 }
 0x240   :  { %v1334_v31 = vadd.f32 %v7957_v62, %v10159_v28 }
 0x241   :  { %v10195_v61 = vpop.f32.mrf.mxu1 }
 0x242   :  { %v1737_v63 = vsel %vm112_vm0, %v1334_v31, 0.0  ;;  %v1881_v16 = vsel %vm112_vm0, %v1334_v31, -inf }
 0x243   :  { %v1738_v55 = vadd.f32 %v1737_v63, %v1736_v26  ;;  %v1882_v17 = vmax.f32 %v1880_v3, %v1881_v16  ;;  %v7960_v29 = vpop.f32.mrf.mxu1 }
 0x244   :  { %v1344_v30 = vadd.f32 %v7960_v29, %v10159_v28 }
 0x245   :  { %v10202_v5 = vpop.f32.mrf.mxu1 }
 0x246   :  { %v1637_v34 = vsel %vm112_vm0, %v1344_v30, 0.0  ;;  %v1781_v52 = vsel %vm112_vm0, %v1344_v30, -inf }
 0x247   :  { %v1638_v35 = vadd.f32 %v1637_v34, %v1636_v48  ;;  %v10206_v43 = vmax.f32 %v1780_v8, %v1781_v52  ;;  %v7963_v6 = vpop.f32.mrf.mxu1 }
 0x248   :  { %v1354_v19 = vadd.f32 %v7963_v6, %v10159_v28 }
 0x249   :  { %v10209_v56 = vpop.f32.mrf.mxu1 }
 0x24a   :  { %v1671_v46 = vsel %vm112_vm0, %v1354_v19, 0.0  ;;  %v1815_v33 = vsel %vm112_vm0, %v1354_v19, -inf }
 0x24b   :  { %v1672_v39 = vadd.f32 %v1671_v46, %v1670_v36  ;;  %v10213_v42 = vmax.f32 %v1814_v37, %v1815_v33  ;;  %v7966_v32 = vpop.f32.mrf.mxu1  ;;  %v1259_v33 = vadd.f32 %v10159_v28, %v10149_v20 }
 0x24c   :  { %v1364_v40 = vadd.f32 %v7966_v32, %v10159_v28 }
 0x24d   :  { %v10216_v51 = vpop.f32.mrf.mxu1 }
 0x24e   :  { %v1705_v47 = vsel %vm112_vm0, %v1364_v40, 0.0  ;;  %v1849_v7 = vsel %vm112_vm0, %v1364_v40, -inf  ;;  %v1269_v40 = vadd.f32 %v10159_v28, %v10152_v38  ;;  %v1761_v38 = vsel %vm112_vm0, %v1259_v33, -inf }
 0x24f   :  { %v1706_v0 = vadd.f32 %v1705_v47, %v1704_v4  ;;  %v10220_v57 = vmax.f32 %v1848_v13, %v1849_v7  ;;  %v7969_v60 = vpop.f32.mrf.mxu1  ;;  %v1279_v47 = vadd.f32 %v10159_v28, %v10154_v10  ;;  %v1289_v7 = vadd.f32 %v10159_v28, %v10162_v44 }
 0x250   :  { %v1374_v12 = vadd.f32 %v7969_v60, %v10159_v28  ;;  %v1617_v60 = vsel %vm112_vm0, %v1259_v33, 0.0  ;;  %v1329_v10 = vadd.f32 %v10159_v28, %v10195_v61  ;;  %v1339_v44 = vadd.f32 %v10159_v28, %v10202_v5 }
 0x251   :  { %v10223_v49 = vpop.f32.mrf.mxu1  ;;  %v1863_v61 = vsel %vm112_vm0, %v1289_v7, -inf }
 0x252   :  { %v1739_v45 = vsel %vm112_vm0, %v1374_v12, 0.0  ;;  %v1883_v48 = vsel %vm112_vm0, %v1374_v12, -inf  ;;  %v1319_v12 = vadd.f32 %v10159_v28, %v10188_v18  ;;  %v1349_v18 = vadd.f32 %v10159_v28, %v10209_v56 }
 0x253   :  { %v1740_v8 = vadd.f32 %v1739_v45, %v1738_v55  ;;  %v10227_v59 = vmax.f32 %v1882_v17, %v1883_v48  ;;  %v7972_v9 = vpop.f32.mrf.mxu1  ;;  %v1720_v56 = vsel %vm112_vm0, %v1329_v10, 0.0  ;;  %v1764_v33 = vsel %vm112_vm0, %v1339_v44, -inf }
 0x254   :  { %v1384_v14 = vadd.f32 %v7972_v9, %v10159_v28  ;;  %v1795_v9 = vsel %vm112_vm0, %v1269_v40, -inf }
 0x255   :  { %v10230_v1 = vpop.f32.mrf.mxu1 }
 0x256   :  { %v1639_v54 = vsel %vm112_vm0, %v1384_v14, 0.0  ;;  %v10234_v15 = vsel %vm112_vm0, %v1384_v14, -inf  ;;  %v1829_v14 = vsel %vm112_vm0, %v1279_v47, -inf }
 0x257   :  { %v10236_v25 = vadd.f32 %v1639_v54, %v1638_v35  ;;  %v1784_v36 = vmax.f32 %v10206_v43, %v10234_v15  ;;  %v7975_v37 = vpop.f32.mrf.mxu1  ;;  %v1719_v54 = vsel %vm112_vm0, %v1289_v7, 0.0 }
 0x258   :  { %v1394_v23 = vadd.f32 %v7975_v37, %v10159_v28 }
 0x259   :  { %v10241_v2 = vpop.f32.mrf.mxu1 }
 0x25a   :  { %v1673_v22 = vsel %vm112_vm0, %v1394_v23, 0.0  ;;  %v10245_v11 = vsel %vm112_vm0, %v1394_v23, -inf }
 0x25b   :  { %v10247_v24 = vadd.f32 %v1673_v22, %v1672_v39  ;;  %v7978_v53 = vpop.f32.mrf.mxu1  ;;  %v1299_v39 = vadd.f32 %v10159_v28, %v10172_v41  ;;  %v1309_v41 = vadd.f32 %v10159_v28, %v10180_v58  ;;  %v1685_v58 = vsel %vm112_vm0, %v1279_v47, 0.0 }
 0x25c   :  { %v1404_v4 = vadd.f32 %v7978_v53, %v10159_v28  ;;  %v1369_v47 = vadd.f32 %v10159_v28, %v10223_v49 }
 0x25d   :  { %v10252_v13 = vpop.f32.mrf.mxu1  ;;  %v1618_v20 = vsel %vm112_vm0, %v1299_v39, 0.0  ;;  %v1762_v45 = vsel %vm112_vm0, %v1299_v39, -inf  ;;  %v1652_v22 = vsel %vm112_vm0, %v1309_v41, 0.0  ;;  %v1796_v53 = vsel %vm112_vm0, %v1309_v41, -inf }
 0x25e   :  { %v1707_v62 = vsel %vm112_vm0, %v1404_v4, 0.0  ;;  %v10256_v31 = vsel %vm112_vm0, %v1404_v4, -inf  ;;  %v1619_v37 = vadd.f32 %v1618_v20, %v1617_v60  ;;  %v1763_v5 = vmax.f32 %v1761_v38, %v1762_v45 }
 0x25f   :  { %v10258_v26 = vadd.f32 %v1707_v62, %v1706_v0  ;;  %v7981_v63 = vpop.f32.mrf.mxu1  ;;  %v1686_v4 = vsel %vm112_vm0, %v1319_v12, 0.0  ;;  %v1830_v62 = vsel %vm112_vm0, %v1319_v12, -inf  ;;  %v1654_v39 = vsel %vm112_vm0, %v1349_v18, 0.0 }
 0x260   :  { %v1414_v16 = vadd.f32 %v7981_v63, %v10159_v28  ;;  %v1864_v63 = vsel %vm112_vm0, %v1329_v10, -inf  ;;  %v1797_v60 = vmax.f32 %v1795_v9, %v1796_v53  ;;  %v1687_v20 = vadd.f32 %v1686_v4, %v1685_v58 }
 0x261   :  { %v10263_v55 = vpop.f32.mrf.mxu1  ;;  %v1379_v41 = vadd.f32 %v10159_v28, %v10230_v1  ;;  %v1831_v38 = vmax.f32 %v1829_v14, %v1830_v62  ;;  %v1721_v45 = vadd.f32 %v1720_v56, %v1719_v54  ;;  %v1798_v10 = vsel %vm112_vm0, %v1349_v18, -inf }
 0x262   :  { %v1741_v17 = vsel %vm112_vm0, %v1414_v16, 0.0  ;;  %v10267_v29 = vsel %vm112_vm0, %v1414_v16, -inf  ;;  %v1620_v16 = vsel %vm112_vm0, %v1339_v44, 0.0  ;;  %v1389_v44 = vadd.f32 %v10159_v28, %v10241_v2 }
 0x263   :  { %v10269_v30 = vadd.f32 %v1741_v17, %v1740_v8  ;;  %v10273_v52 = vpop.f32.mrf.mxu1  ;;  %v1651_v8 = vsel %vm112_vm0, %v1269_v40, 0.0  ;;  %v1359_v40 = vadd.f32 %v10159_v28, %v10216_v51  ;;  %v1865_v34 = vmax.f32 %v1863_v61, %v1864_v63 }
 0x264   :  { %v1653_v7 = vadd.f32 %v1652_v22, %v1651_v8  ;;  %v1621_v51 = vadd.f32 %v1620_v16, %v1619_v37  ;;  %v1765_v3 = vmax.f32 %v1763_v5, %v1764_v33  ;;  %v1722_v1 = vsel %vm112_vm0, %v1369_v47, 0.0 }
 0x265   :  { %v10275_v35 = vpop.f32.mrf.mxu1  ;;  %v1688_v8 = vsel %vm112_vm0, %v1359_v40, 0.0  ;;  %v1832_v9 = vsel %vm112_vm0, %v1359_v40, -inf  ;;  %v1399_v58 = vadd.f32 %v10159_v28, %v10252_v13  ;;  %v10350_v14 = vmax.f32 %v1797_v60, %v1798_v10 }
 0x266   :  { %v1655_v27 = vadd.f32 %v1654_v39, %v1653_v7  ;;  %v1866_v18 = vsel %vm112_vm0, %v1369_v47, -inf  ;;  %v1622_v2 = vsel %vm112_vm0, %v1379_v41, 0.0  ;;  %v1766_v54 = vsel %vm112_vm0, %v1379_v41, -inf }
 0x267   :  { %v10277_v6 = vpop.f32.mrf.mxu1  ;;  %v1656_v37 = vsel %vm112_vm0, %v1389_v44, 0.0  ;;  %v1800_v5 = vsel %vm112_vm0, %v1389_v44, -inf  ;;  %v1409_v22 = vadd.f32 %v10159_v28, %v10263_v55  ;;  %v1424_v13 = vadd.f32 %v10273_v52, %v10159_v28 }
 0x268   :  { %v1689_v53 = vadd.f32 %v1688_v8, %v1687_v20  ;;  %v1833_v4 = vmax.f32 %v1831_v38, %v1832_v9  ;;  %v1723_v62 = vadd.f32 %v1722_v1, %v1721_v45  ;;  %v1419_v56 = vadd.f32 %v10159_v28, %v10275_v35 }
 0x269   :  { %v10279_v19 = vpop.f32.mrf.mxu1  ;;  %v10367_v16 = vmax.f32 %v1865_v34, %v1866_v18  ;;  %v1690_v33 = vsel %vm112_vm0, %v1399_v58, 0.0  ;;  %v1834_v39 = vsel %vm112_vm0, %v1399_v58, -inf  ;;  %v1434_v55 = vadd.f32 %v10277_v6, %v10159_v28 }
 0x26a   :  { %v1623_v40 = vadd.f32 %v1622_v2, %v1621_v51  ;;  %v1767_v47 = vmax.f32 %v1765_v3, %v1766_v54  ;;  %v1657_v52 = vadd.f32 %v1656_v37, %v1655_v27  ;;  %v1801_v7 = vmax.f32 %v10350_v14, %v1800_v5 }
 0x26b   :  { %v10281_v46 = vpop.f32.mrf.mxu1  ;;  %v1724_v35 = vsel %vm112_vm0, %v1409_v22, 0.0  ;;  %v1868_v20 = vsel %vm112_vm0, %v1409_v22, -inf  ;;  %v1641_v34 = vsel %vm112_vm0, %v1424_v13, 0.0  ;;  %v1429_v41 = vadd.f32 %v10159_v28, %v10279_v19 }
 0x26c   :  { %v1691_v38 = vadd.f32 %v1690_v33, %v1689_v53  ;;  %v1835_v45 = vmax.f32 %v1833_v4, %v1834_v39  ;;  %v1785_v6 = vsel %vm112_vm0, %v1424_v13, -inf  ;;  %v1624_v3 = vsel %vm112_vm0, %v1419_v56, 0.0 }
 0x26d   :  { %v10287_v32 = vpop.f32.mrf.mxu1  ;;  %v1768_v10 = vsel %vm112_vm0, %v1419_v56, -inf  ;;  %v1675_v44 = vsel %vm112_vm0, %v1434_v55, 0.0  ;;  %v1444_v51 = vadd.f32 %v10281_v46, %v10159_v28  ;;  %v1725_v9 = vadd.f32 %v1724_v35, %v1723_v62 }
 0x26e   :  { %v1439_v8 = vadd.f32 %v10159_v28, %v10287_v32  ;;  %v1869_v19 = vmax.f32 %v10367_v16, %v1868_v20  ;;  %v1642_v1 = vadd.f32 %v1641_v34, %v10236_v25  ;;  %v10396_v18 = vmax.f32 %v1784_v36, %v1785_v6 }
 0x26f   :  { %v10295_v0 = vpop.f32.mrf.mxu1  ;;  %v1819_v2 = vsel %vm112_vm0, %v1434_v55, -inf  ;;  %v1658_v46 = vsel %vm112_vm0, %v1429_v41, 0.0  ;;  %v1625_v54 = vadd.f32 %v1624_v3, %v1623_v40  ;;  %v10402_v37 = vmax.f32 %v1767_v47, %v1768_v10 }
 0x270   :  { %v1454_v58 = vadd.f32 %v10295_v0, %v10159_v28  ;;  %v1676_v25 = vadd.f32 %v1675_v44, %v10247_v24  ;;  %v1802_v0 = vsel %vm112_vm0, %v1429_v41, -inf  ;;  %v1709_v22 = vsel %vm112_vm0, %v1444_v51, 0.0 }
 0x271   :  { %v10309_v48 = vpop.f32.mrf.mxu1  ;;  %v1853_v43 = vsel %vm112_vm0, %v1444_v51, -inf  ;;  %v1692_v15 = vsel %vm112_vm0, %v1439_v8, 0.0  ;;  %v1659_v53 = vadd.f32 %v1658_v46, %v1657_v52  ;;  %v1836_v24 = vsel %vm112_vm0, %v1439_v8, -inf }
 0x272   :  { %v1449_v32 = vadd.f32 %v10159_v28, %v10309_v48  ;;  %v13808_v48 = vmax.f32 %v10213_v42, %v10245_v11  ;;  %v1743_v4 = vsel %vm112_vm0, %v1454_v58, 0.0  ;;  %v1887_v56 = vsel %vm112_vm0, %v1454_v58, -inf }
 0x273   :  { %v10319_v23 = vpop.f32.mrf.mxu1  ;;  %v10424_v39 = vmax.f32 %v1801_v7, %v1802_v0  ;;  %v1710_v42 = vadd.f32 %v1709_v22, %v10258_v26  ;;  %v13809_v11 = vmax.f32 %v10220_v57, %v10256_v31  ;;  %v1693_v40 = vadd.f32 %v1692_v15, %v1691_v38 }
 0x274   :  { %v1464_v36 = vadd.f32 %v10319_v23, %v10159_v28  ;;  %v10414_v13 = vmax.f32 %v13808_v48, %v1819_v2  ;;  %v1726_v16 = vsel %vm112_vm0, %v1449_v32, 0.0  ;;  %v10432_v52 = vmax.f32 %v1835_v45, %v1836_v24 }
 0x275   :  { %v10328_v17 = vpop.f32.mrf.mxu1  ;;  %v10430_v55 = vmax.f32 %v13809_v11, %v1853_v43  ;;  %v1870_v35 = vsel %vm112_vm0, %v1449_v32, -inf  ;;  %v1744_v7 = vadd.f32 %v1743_v4, %v10269_v30  ;;  %v13810_v26 = vmax.f32 %v10227_v59, %v10267_v29 }
 0x276   :  { %v1459_v33 = vadd.f32 %v10159_v28, %v10328_v17  ;;  %v1643_v17 = vsel %vm112_vm0, %v1464_v36, 0.0  ;;  %v1727_v57 = vadd.f32 %v1726_v16, %v1725_v9  ;;  %v1787_v31 = vsel %vm112_vm0, %v1464_v36, -inf }
 0x277   :  { %v10338_v12 = vpop.f32.mrf.mxu1  ;;  %v10442_v20 = vmax.f32 %v13810_v26, %v1887_v56  ;;  %v10450_v6 = vmax.f32 %v1869_v19, %v1870_v35  ;;  %v1644_v30 = vadd.f32 %v1643_v17, %v1642_v1 }
 0x278   :  { %v1474_v23 = vadd.f32 %v10338_v12, %v10159_v28  ;;  %v1626_v41 = vsel %vm112_vm0, %v1459_v33, 0.0  ;;  %v1770_v38 = vsel %vm112_vm0, %v1459_v33, -inf }
 0x279   :  { %v10343_v49 = vpop.f32.mrf.mxu1  ;;  %v1627_v9 = vadd.f32 %v1626_v41, %v1625_v54  ;;  %v1771_v19 = vmax.f32 %v10402_v37, %v1770_v38 }
 0x27a   :  { %v1469_v12 = vadd.f32 %v10159_v28, %v10343_v49  ;;  %v1677_v45 = vsel %vm112_vm0, %v1474_v23, 0.0  ;;  %v1821_v59 = vsel %vm112_vm0, %v1474_v23, -inf }
 0x27b   :  { %v10355_v61 = vpop.f32.mrf.mxu1  ;;  %v1678_v1 = vadd.f32 %v1677_v45, %v1676_v25  ;;  %v1822_v2 = vmax.f32 %v10414_v13, %v1821_v59 }
 0x27c   :  { %v1484_v49 = vadd.f32 %v10355_v61, %v10159_v28  ;;  %v1660_v10 = vsel %vm112_vm0, %v1469_v12, 0.0  ;;  %v1804_v44 = vsel %vm112_vm0, %v1469_v12, -inf  ;;  %v1788_v61 = vmax.f32 %v10396_v18, %v1787_v31 }
 0x27d   :  { %v10365_v63 = vpop.f32.mrf.mxu1  ;;  %v1661_v0 = vadd.f32 %v1660_v10, %v1659_v53 }
 0x27e   :  { %v1479_v29 = vadd.f32 %v10159_v28, %v10365_v63  ;;  %v1711_v63 = vsel %vm112_vm0, %v1484_v49, 0.0  ;;  %v1855_v46 = vsel %vm112_vm0, %v1484_v49, -inf }
 0x27f   :  { %v10374_v60 = vpop.f32.mrf.mxu1  ;;  %v1712_v15 = vadd.f32 %v1711_v63, %v1710_v42  ;;  %v1856_v36 = vmax.f32 %v10430_v55, %v1855_v46 }
 0x280   :  { %v1494_v51 = vadd.f32 %v10374_v60, %v10159_v28  ;;  %v1805_v60 = vmax.f32 %v10424_v39, %v1804_v44  ;;  %v1838_v18 = vsel %vm112_vm0, %v1479_v29, -inf }
 0x281   :  { %v1488_v27 = vpop.f32.mrf.mxu1  ;;  %v1839_v16 = vmax.f32 %v10432_v52, %v1838_v18 }
 0x282   :  { %v1489_v8 = vadd.f32 %v10159_v28, %v1488_v27  ;;  %v1694_v27 = vsel %vm112_vm0, %v1479_v29, 0.0  ;;  %v1745_v37 = vsel %vm112_vm0, %v1494_v51, 0.0  ;;  %v1889_v25 = vsel %vm112_vm0, %v1494_v51, -inf }
 0x283   :  { %v8008_v14 = vpop.f32.mrf.mxu1  ;;  %v1695_v53 = vadd.f32 %v1694_v27, %v1693_v40  ;;  %v1746_v33 = vadd.f32 %v1745_v37, %v1744_v7 }
 0x284   :  { %v1504_v32 = vadd.f32 %v8008_v14, %v10159_v28  ;;  %v1728_v22 = vsel %vm112_vm0, %v1489_v8, 0.0  ;;  %v1872_v14 = vsel %vm112_vm0, %v1489_v8, -inf }
 0x285   :  { %v1498_v5 = vpop.f32.mrf.mxu1  ;;  %v1729_v23 = vadd.f32 %v1728_v22, %v1727_v57  ;;  %v1873_v42 = vmax.f32 %v10450_v6, %v1872_v14 }
 0x286   :  { %v1499_v43 = vadd.f32 %v10159_v28, %v1498_v5  ;;  %v1645_v24 = vsel %vm112_vm0, %v1504_v32, 0.0  ;;  %v1890_v5 = vmax.f32 %v10442_v20, %v1889_v25  ;;  %v1789_v11 = vsel %vm112_vm0, %v1504_v32, -inf }
 0x287   :  { %v8011_v62 = vpop.f32.mrf.mxu1  ;;  %v1646_v40 = vadd.f32 %v1645_v24, %v1644_v30  ;;  %v10492_v57 = vmax.f32 %v1788_v61, %v1789_v11 }
 0x288   :  { %v1514_v48 = vadd.f32 %v8011_v62, %v10159_v28  ;;  %v1628_v62 = vsel %vm112_vm0, %v1499_v43, 0.0  ;;  %v1772_v55 = vsel %vm112_vm0, %v1499_v43, -inf }
 0x289   :  { %v1508_v47 = vpop.f32.mrf.mxu1  ;;  %v1629_v31 = vadd.f32 %v1628_v62, %v1627_v9 }
 0x28a   :  { %v1509_v4 = vadd.f32 %v10159_v28, %v1508_v47  ;;  %v1679_v47 = vsel %vm112_vm0, %v1514_v48, 0.0  ;;  %v1823_v35 = vsel %vm112_vm0, %v1514_v48, -inf }
 0x28b   :  { %v8014_v34 = vpop.f32.mrf.mxu1  ;;  %v1680_v45 = vadd.f32 %v1679_v47, %v1678_v1  ;;  %v10497_v49 = vmax.f32 %v1822_v2, %v1823_v35 }
 0x28c   :  { %v1524_v56 = vadd.f32 %v8014_v34, %v10159_v28  ;;  %v1662_v12 = vsel %vm112_vm0, %v1509_v4, 0.0  ;;  %v1806_v7 = vsel %vm112_vm0, %v1509_v4, -inf  ;;  %v10494_v34 = vmax.f32 %v1771_v19, %v1772_v55 }
 0x28d   :  { %v1518_v3 = vpop.f32.mrf.mxu1  ;;  %v1663_v59 = vadd.f32 %v1662_v12, %v1661_v0  ;;  %v10501_v29 = vmax.f32 %v1805_v60, %v1806_v7 }
 0x28e   :  { %v1519_v52 = vadd.f32 %v10159_v28, %v1518_v3  ;;  %v1713_v26 = vsel %vm112_vm0, %v1524_v56, 0.0  ;;  %v1857_v6 = vsel %vm112_vm0, %v1524_v56, -inf }
 0x28f   :  { %v8017_v58 = vpop.f32.mrf.mxu1  ;;  %v1714_v3 = vadd.f32 %v1713_v26, %v1712_v15  ;;  %v10508_v19 = vmax.f32 %v1856_v36, %v1857_v6 }
 0x290   :  { %v1534_v20 = vadd.f32 %v8017_v58, %v10159_v28  ;;  %v1696_v10 = vsel %vm112_vm0, %v1519_v52, 0.0  ;;  %v1840_v51 = vsel %vm112_vm0, %v1519_v52, -inf }
 0x291   :  { %v1528_v54 = vpop.f32.mrf.mxu1  ;;  %v1697_v27 = vadd.f32 %v1696_v10, %v1695_v53  ;;  %v10517_v18 = vmax.f32 %v1839_v16, %v1840_v51 }
 0x292   :  { %v1529_v41 = vadd.f32 %v10159_v28, %v1528_v54  ;;  %v1747_v8 = vsel %vm112_vm0, %v1534_v20, 0.0  ;;  %v1891_v61 = vsel %vm112_vm0, %v1534_v20, -inf }
 0x293   :  { %v8020_v13 = vpop.f32.mrf.mxu1  ;;  %v1748_v54 = vadd.f32 %v1747_v8, %v1746_v33  ;;  %v10519_v37 = vmax.f32 %v1890_v5, %v1891_v61 }
 0x294   :  { %v1544_v30 = vadd.f32 %v8020_v13, %v10159_v28  ;;  %v1730_v1 = vsel %vm112_vm0, %v1529_v41, 0.0  ;;  %v1874_v58 = vsel %vm112_vm0, %v1529_v41, -inf }
 0x295   :  { %v1538_v39 = vpop.f32.mrf.mxu1  ;;  %v10521_v22 = vadd.f32 %v1730_v1, %v1729_v23  ;;  %v10526_v14 = vmax.f32 %v1873_v42, %v1874_v58 }
 0x296   :  { %v1539_v9 = vadd.f32 %v10159_v28, %v1538_v39  ;;  %v1647_v46 = vsel %vm112_vm0, %v1544_v30, 0.0  ;;  %v1791_v32 = vsel %vm112_vm0, %v1544_v30, -inf }
 0x297   :  { %v8023_v17 = vpop.f32.mrf.mxu1  ;;  %v1648_v48 = vadd.f32 %v1647_v46, %v1646_v40  ;;  %v1792_v13 = vmax.f32 %v10492_v57, %v1791_v32 }
 0x298   :  { %v1554_v2 = vadd.f32 %v8023_v17, %v10159_v28  ;;  %v1630_v43 = vsel %vm112_vm0, %v1539_v9, 0.0  ;;  %v1774_v15 = vsel %vm112_vm0, %v1539_v9, -inf }
 0x299   :  { %v1548_v38 = vpop.f32.mrf.mxu1  ;;  %v1631_v5 = vadd.f32 %v1630_v43, %v1629_v31  ;;  %v1775_v23 = vmax.f32 %v10494_v34, %v1774_v15 }
 0x29a   :  { %v1549_v0 = vadd.f32 %v10159_v28, %v1548_v38  ;;  %v1681_v53 = vsel %vm112_vm0, %v1554_v2, 0.0  ;;  %v1825_v4 = vsel %vm112_vm0, %v1554_v2, -inf }
 0x29b   :  { %v8026_v44 = vpop.f32.mrf.mxu1  ;;  %v1682_v62 = vadd.f32 %v1681_v53, %v1680_v45  ;;  %v1826_v35 = vmax.f32 %v10497_v49, %v1825_v4 }
 0x29c   :  { %v1564_v60 = vadd.f32 %v8026_v44, %v10159_v28  ;;  %v1664_v56 = vsel %vm112_vm0, %v1549_v0, 0.0  ;;  %v1808_v16 = vsel %vm112_vm0, %v1549_v0, -inf }
 0x29d   :  { %v1558_v63 = vpop.f32.mrf.mxu1  ;;  %v1665_v52 = vadd.f32 %v1664_v56, %v1663_v59  ;;  %v1809_v17 = vmax.f32 %v10501_v29, %v1808_v16 }
 0x29e   :  { %v1559_v36 = vadd.f32 %v10159_v28, %v1558_v63  ;;  %v1715_v33 = vsel %vm112_vm0, %v1564_v60, 0.0  ;;  %v10536_v39 = vsel %vm112_vm0, %v1564_v60, -inf }
 0x29f   :  { %v8029_v25 = vpop.f32.mrf.mxu1  ;;  %v1716_v12 = vadd.f32 %v1715_v33, %v1714_v3  ;;  %v1860_v26 = vmax.f32 %v10508_v19, %v10536_v39 }
 0x2a0   :  { %v1574_v42 = vadd.f32 %v8029_v25, %v10159_v28  ;;  %v1698_v55 = vsel %vm112_vm0, %v1559_v36, 0.0  ;;  %v10541_v40 = vsel %vm112_vm0, %v1559_v36, -inf }
 0x2a1   :  { %v1568_v24 = vpop.f32.mrf.mxu1  ;;  %v1699_v34 = vadd.f32 %v1698_v55, %v1697_v27  ;;  %v1843_v41 = vmax.f32 %v10517_v18, %v10541_v40 }
 0x2a2   :  { %v1749_v38 = vsel %vm112_vm0, %v1574_v42, 0.0  ;;  %v10555_v6 = vsel %vm112_vm0, %v1574_v42, -inf  ;;  %v1569_v3 = vadd.f32 %v10159_v28, %v1568_v24 }
 0x2a3   :  { %v8032_v11 = vpop.f32.mrf.mxu1  ;;  %v1750_v61 = vadd.f32 %v1749_v38, %v1748_v54  ;;  %v1894_v0 = vmax.f32 %v10519_v37, %v10555_v6 }
 0x2a4   :  { %v1584_v47 = vadd.f32 %v8032_v11, %v10159_v28 }
 0x2a5   :  { %v1578_v7 = vpop.f32.mrf.mxu1 }
 0x2a6   :  { %v1649_v20 = vsel %vm112_vm0, %v1584_v47, 0.0  ;;  %v1793_v57 = vsel %vm112_vm0, %v1584_v47, -inf  ;;  %v1579_v31 = vadd.f32 %v10159_v28, %v1578_v7 }
 0x2a7   :  { %v1650_v45 = vadd.f32 %v1649_v20, %v1648_v48  ;;  %v8035_v49 = vpop.f32.mrf.mxu1  ;;  %v1794_v44 = vmax.f32 %v1792_v13, %v1793_v57  ;;  %v1732_v48 = vsel %vm112_vm0, %v1569_v3, 0.0 }
 0x2a8   :  { %v1632_v30 = vsel %vm112_vm0, %v1579_v31, 0.0  ;;  %v1776_v59 = vsel %vm112_vm0, %v1579_v31, -inf  ;;  %v1594_v29 = vadd.f32 %v8035_v49, %v10159_v28 }
 0x2a9   :  { %v1754_v10 = vmul.f32 0.11111111, %v1650_v45  ;;  %v1633_v51 = vadd.f32 %v1632_v30, %v1631_v5  ;;  %v1588_v8 = vpop.f32.mrf.mxu1  ;;  %v1777_v63 = vmax.f32 %v1775_v23, %v1776_v59  ;;  %v1876_v5 = vsel %vm112_vm0, %v1569_v3, -inf }
 0x2aa   :  { %v1683_v9 = vsel %vm112_vm0, %v1594_v29, 0.0  ;;  %v1827_v19 = vsel %vm112_vm0, %v1594_v29, -inf  ;;  %v1589_v1 = vadd.f32 %v10159_v28, %v1588_v8  ;;  %v1877_v38 = vmax.f32 %v10526_v14, %v1876_v5  ;;  %v2164_v29 = vpop.trf.xlu1  ;;  %v8794_v5 = vld [vmem:[%s13790_s0 + $0x60] sm:$0xff] }
 0x2ab   :  { %v1898_v58 = vadd.f32 %v1794_v44, %v1754_v10  ;;  %v1753_v2 = vmul.f32 0.11111111, %v1633_v51  ;;  %v1684_v46 = vadd.f32 %v1683_v9, %v1682_v62  ;;  %v8038_v32 = vpop.f32.mrf.mxu1  ;;  %v1828_v43 = vmax.f32 %v1826_v35, %v1827_v19  ;;  %8093 = vmatprep.mubr.msk.f32.mxu1 %vm2066_vm1, %v2164_v29  ;;  %v8780_v19 = vld [vmem:[%s13795_s5] sm:$0xff]  ;;  %v8823_v29 = vld [vmem:[%s13790_s0 + $0x148] sm:$0xff] }
 0x2ac   :  { %v1666_v60 = vsel %vm112_vm0, %v1589_v1, 0.0  ;;  %v1810_v27 = vsel %vm112_vm0, %v1589_v1, -inf  ;;  %v1604_v18 = vadd.f32 %v8038_v32, %v10159_v28  ;;  %v1733_v35 = vadd.f32 %v1732_v48, %v10521_v22  ;;  %v8785_v48 = vld [vmem:[%s13790_s0 + $0x18] sm:$0xff] }
 0x2ad   :  { %v1897_v54 = vadd.f32 %v1777_v63, %v1753_v2  ;;  %v1756_v25 = vmul.f32 0.11111111, %v1684_v46  ;;  %v1667_v15 = vadd.f32 %v1666_v60, %v1665_v52  ;;  %v1598_v36 = vpop.f32.mrf.mxu1  ;;  %v1811_v56 = vmax.f32 %v1809_v17, %v1810_v27  ;;  %v8781_v60 = vld [vmem:[%s13796_s6] ss:$0 sm:$0xff] }
 0x2ae   :  { %v1717_v13 = vsel %vm112_vm0, %v1604_v18, 0.0  ;;  %v1861_v53 = vsel %vm112_vm0, %v1604_v18, -inf  ;;  %v1599_v24 = vadd.f32 %v10159_v28, %v1598_v36  ;;  %v2165_v51 = vpop.trf.xlu1  ;;  %v8784_v36 = vld [vmem:[%s13790_s0 + $0x10] sm:$0xff] }
 0x2af   :  { %v1900_v37 = vadd.f32 %v1828_v43, %v1756_v25  ;;  %v1755_v4 = vmul.f32 0.11111111, %v1667_v15  ;;  %v1718_v16 = vadd.f32 %v1717_v13, %v1716_v12  ;;  %v8041_v33 = vpop.f32.mrf.mxu1  ;;  %8046 = vmatprep.mubr.msk.f32.mxu0 %vm112_vm0, %v1897_v54  ;;  %v1862_v55 = vmax.f32 %v1860_v26, %v1861_v53  ;;  %8094 = vmatmul.mubr.msk.f32.vlgmr.msra.gmra.mxu1 %vm2066_vm1, %v2165_v51  ;;  %v6808_v25 = vld [vmem:[%s13793_s3 + $0x20] sm:$0xff]  ;;  %v8783_v15 = vld [vmem:[%s13790_s0 + $0x8] sm:$0xff] }
 0x2b0   :  { %v1700_v23 = vsel %vm112_vm0, %v1599_v24, 0.0  ;;  %v1844_v39 = vsel %vm112_vm0, %v1599_v24, -inf  ;;  %v1614_v42 = vadd.f32 %v8041_v33, %v10159_v28  ;;  %8047 = vmatmul.mubr.msk.f32.vlgmr.msra.gmra.mxu0 %vm112_vm0, %v1898_v58  ;;  %8209 = vmatpush3.msra.mxu1 %v10167_v50  ;;  %v8782_v43 = vld [vmem:[%s13790_s0] sm:$0xff]  ;;  %v8787_v53 = vld [vmem:[%s13790_s0 + $0x28] sm:$0xff]  ;;  %v8788_v24 = vld [vmem:[%s13790_s0 + $0x30] sm:$0xff] }
 0x2b1   :  { %v1899_v11 = vadd.f32 %v1811_v56, %v1755_v4  ;;  %v1758_v62 = vmul.f32 0.11111111, %v1718_v16  ;;  %v1701_v40 = vadd.f32 %v1700_v23, %v1699_v34  ;;  %v1608_v47 = vpop.f32.mrf.mxu1  ;;  %v1845_v57 = vmax.f32 %v1843_v41, %v1844_v39  ;;  %8210 = vmatprep.subr.mxu1 %v8780_v19  ;;  %v8786_v13 = vld [vmem:[%s13790_s0 + $0x20] sm:$0xff]  ;;  %v8791_v56 = vld [vmem:[%s13790_s0 + $0x48] sm:$0xff]  ;;  %v8792_v16 = vld [vmem:[%s13790_s0 + $0x50] sm:$0xff] }
 0x2b2   :  { %v1751_v52 = vsel %vm112_vm0, %v1614_v42, 0.0  ;;  %v1895_v17 = vsel %vm112_vm0, %v1614_v42, -inf  ;;  %v1609_v12 = vadd.f32 %v10159_v28, %v1608_v47  ;;  %8211 = vmatpush3.msra.mxu1 %v8780_v19  ;;  %v8790_v4 = vld [vmem:[%s13790_s0 + $0x40] sm:$0xff]  ;;  %v8793_v33 = vld [vmem:[%s13790_s0 + $0x58] sm:$0xff]  ;;  %v8795_v23 = vld [vmem:[%s13790_s0 + $0x68] sm:$0xff] }
 0x2b3   :  { %v1902_v7 = vadd.f32 %v1862_v55, %v1758_v62  ;;  %v1757_v20 = vmul.f32 0.11111111, %v1701_v40  ;;  %v1752_v31 = vadd.f32 %v1751_v52, %v1750_v61  ;;  %8049 = vmatprep.mubr.msk.f32.mxu0 %vm112_vm0, %v1899_v11  ;;  %v1896_v49 = vmax.f32 %v1894_v0, %v1895_v17  ;;  %v8796_v39 = vld [vmem:[%s13790_s0 + $0x70] sm:$0xff]  ;;  %v8797_v42 = vld [vmem:[%s13790_s0 + $0x78] sm:$0xff]  ;;  %v8798_v11 = vld [vmem:[%s13790_s0 + $0x80] sm:$0xff] }
 0x2b4   :  { %v1734_v26 = vsel %vm112_vm0, %v1609_v12, 0.0  ;;  %v1878_v34 = vsel %vm112_vm0, %v1609_v12, -inf  ;;  %8050 = vmatmul.mubr.msk.f32.gmra.mxu0 %vm112_vm0, %v1900_v37  ;;  %v8789_v37 = vld [vmem:[%s13790_s0 + $0x38] sm:$0xff]  ;;  %v8799_v62 = vld [vmem:[%s13790_s0 + $0x88] sm:$0xff]  ;;  %v8800_v55 = vld [vmem:[%s13790_s0 + $0x90] sm:$0xff] }
 0x2b5   :  { %v1901_v22 = vadd.f32 %v1845_v57, %v1757_v20  ;;  %v1760_v45 = vmul.f32 0.11111111, %v1752_v31  ;;  %v1735_v6 = vadd.f32 %v1734_v26, %v1733_v35  ;;  %v1879_v59 = vmax.f32 %v1877_v38, %v1878_v34  ;;  %v8801_v40 = vld [vmem:[%s13790_s0 + $0x98] sm:$0xff]  ;;  %v8802_v47 = vld [vmem:[%s13790_s0 + $0xa0] sm:$0xff]  ;;  %v8803_v35 = vld [vmem:[%s13790_s0 + $0xa8] sm:$0xff] }
 0x2b6   :  { %v8804_v52 = vld [vmem:[%s13790_s0 + $0xb0] sm:$0xff]  ;;  %v8805_v17 = vld [vmem:[%s13790_s0 + $0xb8] sm:$0xff]  ;;  %v8806_v12 = vld [vmem:[%s13790_s0 + $0xc0] sm:$0xff] }
 0x2b7   :  { %v1904_v30 = vadd.f32 %v1896_v49, %v1760_v45  ;;  %v1759_v28 = vmul.f32 0.11111111, %v1735_v6  ;;  %8052 = vmatprep.mubr.msk.f32.mxu0 %vm112_vm0, %v1901_v22  ;;  %v8808_v20 = vld [vmem:[%s13790_s0 + $0xd0] sm:$0xff]  ;;  %v8809_v57 = vld [vmem:[%s13790_s0 + $0xd8] sm:$0xff]  ;;  %v8810_v31 = vld [vmem:[%s13790_s0 + $0xe0] sm:$0xff] }
 0x2b8   :  { %8053 = vmatmul.mubr.msk.f32.gmra.mxu0 %vm112_vm0, %v1902_v7  ;;  %v8807_v7 = vld [vmem:[%s13790_s0 + $0xc8] sm:$0xff]  ;;  %v8812_v26 = vld [vmem:[%s13790_s0 + $0xf0] sm:$0xff]  ;;  %v8813_v34 = vld [vmem:[%s13790_s0 + $0xf8] sm:$0xff] }
 0x2b9   :  { %v1903_v41 = vadd.f32 %v1879_v59, %v1759_v28  ;;  %v8811_v38 = vld [vmem:[%s13790_s0 + $0xe8] sm:$0xff]  ;;  %v8814_v22 = vld [vmem:[%s13790_s0 + $0x100] sm:$0xff]  ;;  %v8816_v49 = vld [vmem:[%s13790_s0 + $0x110] sm:$0xff] }
 0x2ba   :  { %v8815_v45 = vld [vmem:[%s13790_s0 + $0x108] sm:$0xff]  ;;  %v8817_v6 = vld [vmem:[%s13790_s0 + $0x118] sm:$0xff]  ;;  %v8820_v59 = vld [vmem:[%s13790_s0 + $0x130] sm:$0xff] }
 0x2bb   :  { %8055 = vmatprep.mubr.msk.f32.mxu0 %vm112_vm0, %v1903_v41  ;;  %v8819_v28 = vld [vmem:[%s13790_s0 + $0x128] sm:$0xff]  ;;  %v8821_v41 = vld [vmem:[%s13790_s0 + $0x138] sm:$0xff] }
 0x2bc   :  { %8056 = vmatmul.mubr.msk.f32.gmra.mxu0 %vm112_vm0, %v1904_v30  ;;  %v8818_v30 = vld [vmem:[%s13790_s0 + $0x120] sm:$0xff]  ;;  %v8827_v51 = vld [vmem:[%s13790_s0 + $0x168] sm:$0xff] }
 0x2bd   :  { %v8831_v19 = vld [vmem:[%s13790_s0 + $0x188] sm:$0xff] }
 0x370   :  { %v8048_v14 = vpop.f32.mrf.mxu0 }
 0x371   :  { %v2001_v61 = vadd.f32 %v8048_v14, %v10140_v21  ;;  %v8822_v14 = vld [vmem:[%s13790_s0 + $0x140] sm:$0xff] }
 0x372   :  { %v1995_v3 = vpop.f32.mrf.mxu0 }
 0x373   :  { %v1996_v10 = vadd.f32 %v10140_v21, %v1995_v3  ;;  %v8824_v3 = vld [vmem:[%s13790_s0 + $0x150] sm:$0xff] }
 0x374   :  { %v8051_v44 = vpop.f32.mrf.mxu0 }
 0x375   :  { %2034 = vxpose.xlu0.b32.start [1/8] (short) (narrow) %v1996_v10, 16  ;;  %v2011_v32 = vadd.f32 %v8051_v44, %v10140_v21  ;;  %v8826_v44 = vld [vmem:[%s13790_s0 + $0x160] sm:$0xff] }
 0x376   :  { %v2005_v8 = vpop.f32.mrf.mxu0 }
 0x377   :  { %v2006_v58 = vadd.f32 %v10140_v21, %v2005_v8  ;;  %v8828_v8 = vld [vmem:[%s13790_s0 + $0x170] sm:$0xff] }
 0x378   :  { %v8054_v9 = vpop.f32.mrf.mxu0 }
 0x379   :  { %2035 = vxpose.xlu0.b32.cont [2/8] (short) (narrow) %v2001_v61, 16  ;;  %v2021_v0 = vadd.f32 %v8054_v9, %v10140_v21  ;;  %v8830_v9 = vld [vmem:[%s13790_s0 + $0x180] sm:$0xff] }
 0x37a   :  { %v2015_v1 = vpop.f32.mrf.mxu0 }
 0x37b   :  { %v2016_v27 = vadd.f32 %v8781_v60, %v2015_v1  ;;  %v8832_v1 = vld [vmem:[%s13790_s0 + $0x190] sm:$0xff] }
 0x37c   :  { %v8057_v2 = vpop.f32.mrf.mxu0  ;;  %v8840_v60 = vld [vmem:[%s13790_s0 + $0x1d0] sm:$0xff] }
 0x37d   :  { %v2031_v63 = vadd.f32 %v8057_v2, %v10140_v21  ;;  %2036 = vxpose.xlu0.b32.cont [3/8] (short) (narrow) %v2006_v58, 16  ;;  %v8834_v2 = vld [vmem:[%s13790_s0 + $0x1a0] sm:$0xff] }
 0x37e   :  { %v2025_v46 = vpop.f32.mrf.mxu0 }
 0x37f   :  { %v2026_v50 = vadd.f32 %v10140_v21, %v2025_v46  ;;  %8058 = vmatprep.subr.mxu0 %v2031_v63  ;;  %v6809_v21 = vld [vmem:[%s13793_s3 + $0x28] sm:$0xff]  ;;  %v8836_v46 = vld [vmem:[%s13790_s0 + $0x1b0] sm:$0xff] }
 0x380   :  { %8059 = vmatpush3.msra.mxu0 %v2031_v63 }
 0x381   :  { %8060 = vmatprep.subr.mxu0 %v2026_v50  ;;  %2037 = vxpose.xlu0.b32.cont [4/8] (short) (narrow) %v2011_v32, 16 }
 0x382   :  { %8061 = vmatpush3.msra.mxu0 %v2026_v50 }
 0x383   :  { %8062 = vmatprep.subr.mxu0 %v2021_v0 }
 0x384   :  { %8063 = vmatpush3.msra.mxu0 %v2021_v0 }
 0x385   :  { %8064 = vmatprep.subr.mxu0 %v2016_v27  ;;  %2038 = vxpose.xlu0.b32.cont [5/8] (short) (narrow) %v2016_v27, 16 }
 0x386   :  { %8065 = vmatpush3.msra.mxu0 %v2016_v27  ;;  %v8841_v27 = vld [vmem:[%s13790_s0 + $0x1d8] sm:$0xff] }
 0x387   :  { %8066 = vmatprep.subr.mxu0 %v2011_v32 }
 0x388   :  { %8067 = vmatpush3.msra.mxu0 %v2011_v32  ;;  %v8837_v32 = vld [vmem:[%s13790_s0 + $0x1b8] sm:$0xff] }
 0x389   :  { %8068 = vmatprep.subr.mxu0 %v2006_v58  ;;  %2039 = vxpose.xlu0.b32.cont [6/8] (short) (narrow) %v2021_v0, 16  ;;  %v8839_v0 = vld [vmem:[%s13790_s0 + $0x1c8] sm:$0xff] }
 0x38a   :  { %8069 = vmatpush3.msra.mxu0 %v2006_v58  ;;  %v8833_v58 = vld [vmem:[%s13790_s0 + $0x198] sm:$0xff] }
 0x38b   :  { %8070 = vmatprep.subr.mxu0 %v2001_v61 }
 0x38c   :  { %8071 = vmatpush3.msra.mxu0 %v2001_v61  ;;  %v8829_v61 = vld [vmem:[%s13790_s0 + $0x178] sm:$0xff] }
 0x38d   :  { %2040 = vxpose.xlu0.b32.cont [7/8] (short) (narrow) %v2026_v50, 16  ;;  %8072 = vmatprep.subr.mxu0 %v1996_v10  ;;  %v8838_v50 = vld [vmem:[%s13790_s0 + $0x1c0] sm:$0xff] }
 0x38e   :  { %8073 = vmatpush3.msra.mxu0 %v1996_v10  ;;  %v8825_v10 = vld [vmem:[%s13790_s0 + $0x158] sm:$0xff] }
 0x38f   :  { %8096 = vmatprep.subr.mxu0 %v6809_v21 }
 0x391   :  { %2041 = vxpose.xlu0.b32.end [8/8] (short) (narrow) %v2031_v63, 16  ;;  %v8835_v63 = vld [vmem:[%s13790_s0 + $0x1a8] sm:$0xff] }
 0x3f1   :  { %v2050_v18 = vpop.trf.xlu0 }
 0x3f2   :  { %8074 = vmatprep.mubr.msk.f32.mxu0 %vm2066_vm1, %v2050_v18  ;;  %v8843_v18 = vld [vmem:[%s13790_s0 + $0x1e8] sm:$0xff] }
 0x3f5   :  { %v2051_v54 = vpop.trf.xlu0 }
 0x3f6   :  { %8075 = vmatmul.mubr.msk.f32.vlgmr.msra.gmra.mxu0 %vm2066_vm1, %v2051_v54  ;;  %v8844_v54 = vld [vmem:[%s13790_s0 + $0x1f0] sm:$0xff] }
 0x3f7   :  { %8097 = vmatpush3.msra.mxu0 %v6809_v21  ;;  %8100 = vmatprep.mubr.msk.f32.mxu0 %vm112_vm0, %v8782_v43  ;;  %v8842_v21 = vld [vmem:[%s13790_s0 + $0x1e0] sm:$0xff] }
 0x3f8   :  { %8098 = vmatprep.subr.mxu0 %v6808_v25  ;;  %v8846_v43 = vld [vmem:[%s13790_s0 + $0x200] sm:$0xff] }
 0x3f9   :  { %8099 = vmatpush3.msra.mxu0 %v6808_v25  ;;  %v8845_v25 = vld [vmem:[%s13790_s0 + $0x1f8] sm:$0xff] }
 0x3fa   :  { %8101 = vmatmul.mubr.msk.f32.vlgmr.msra.gmra.mxu0 %vm112_vm0, %v8783_v15  ;;  %v8847_v15 = vld [vmem:[%s13790_s0 + $0x208] sm:$0xff] }
 0x3fb   :  { %8103 = vmatprep.mubr.msk.f32.mxu0 %vm112_vm0, %v8784_v36  ;;  %v8848_v36 = vld [vmem:[%s13790_s0 + $0x210] sm:$0xff] }
 0x3fe   :  { %8104 = vmatmul.mubr.msk.f32.gmra.mxu0 %vm112_vm0, %v8785_v48  ;;  %v8849_v48 = vld [vmem:[%s13790_s0 + $0x218] sm:$0xff] }
 0x3ff   :  { %8106 = vmatprep.mubr.msk.f32.mxu0 %vm112_vm0, %v8786_v13  ;;  %v8850_v13 = vld [vmem:[%s13790_s0 + $0x220] sm:$0xff] }
 0x402   :  { %8107 = vmatmul.mubr.msk.f32.gmra.mxu0 %vm112_vm0, %v8787_v53  ;;  %v8851_v53 = vld [vmem:[%s13790_s0 + $0x228] sm:$0xff] }
 0x403   :  { %8109 = vmatprep.mubr.msk.f32.mxu0 %vm112_vm0, %v8788_v24  ;;  %v8852_v24 = vld [vmem:[%s13790_s0 + $0x230] sm:$0xff] }
 0x406   :  { %8110 = vmatmul.mubr.msk.f32.gmra.mxu0 %vm112_vm0, %v8789_v37  ;;  %v8853_v37 = vld [vmem:[%s13790_s0 + $0x238] sm:$0xff] }
 0x407   :  { %8112 = vmatprep.mubr.msk.f32.mxu0 %vm112_vm0, %v8790_v4 }
 0x40a   :  { %8113 = vmatmul.mubr.msk.f32.gmra.mxu0 %vm112_vm0, %v8791_v56 }
 0x40b   :  { %8115 = vmatprep.mubr.msk.f32.mxu0 %vm112_vm0, %v8792_v16 }
 0x40e   :  { %8116 = vmatmul.mubr.msk.f32.gmra.mxu0 %vm112_vm0, %v8793_v33 }
 0x40f   :  { %8118 = vmatprep.mubr.msk.f32.mxu0 %vm112_vm0, %v8794_v5 }
 0x412   :  { %8119 = vmatmul.mubr.msk.f32.gmra.mxu0 %vm112_vm0, %v8795_v23 }
 0x413   :  { %8121 = vmatprep.mubr.msk.f32.mxu0 %vm112_vm0, %v8796_v39 }
 0x416   :  { %8122 = vmatmul.mubr.msk.f32.gmra.mxu0 %vm112_vm0, %v8797_v42 }
 0x417   :  { %8124 = vmatprep.mubr.msk.f32.mxu0 %vm112_vm0, %v8798_v11  ;;  %v10917_v11 = vld [vmem:[%s13794_s4 + $0x2] ss:$0 sm:$0xff] }
 0x41a   :  { %8125 = vmatmul.mubr.msk.f32.gmra.mxu0 %vm112_vm0, %v8799_v62 }
 0x41b   :  { %8127 = vmatprep.mubr.msk.f32.mxu0 %vm112_vm0, %v8800_v55 }
 0x41e   :  { %8128 = vmatmul.mubr.msk.f32.gmra.mxu0 %vm112_vm0, %v8801_v40 }
 0x41f   :  { %8130 = vmatprep.mubr.msk.f32.mxu0 %vm112_vm0, %v8802_v47 }
 0x422   :  { %8131 = vmatmul.mubr.msk.f32.gmra.mxu0 %vm112_vm0, %v8803_v35 }
 0x423   :  { %8133 = vmatprep.mubr.msk.f32.mxu0 %vm112_vm0, %v8804_v52 }
 0x426   :  { %8134 = vmatmul.mubr.msk.f32.gmra.mxu0 %vm112_vm0, %v8805_v17 }
 0x427   :  { %8136 = vmatprep.mubr.msk.f32.mxu0 %vm112_vm0, %v8806_v12 }
 0x42a   :  { %8137 = vmatmul.mubr.msk.f32.gmra.mxu0 %vm112_vm0, %v8807_v7 }
 0x42b   :  { %8139 = vmatprep.mubr.msk.f32.mxu0 %vm112_vm0, %v8808_v20 }
 0x42e   :  { %8140 = vmatmul.mubr.msk.f32.gmra.mxu0 %vm112_vm0, %v8809_v57 }
 0x42f   :  { %8142 = vmatprep.mubr.msk.f32.mxu0 %vm112_vm0, %v8810_v31 }
 0x432   :  { %8143 = vmatmul.mubr.msk.f32.gmra.mxu0 %vm112_vm0, %v8811_v38 }
 0x433   :  { %8145 = vmatprep.mubr.msk.f32.mxu0 %vm112_vm0, %v8812_v26 }
 0x436   :  { %8146 = vmatmul.mubr.msk.f32.gmra.mxu0 %vm112_vm0, %v8813_v34 }
 0x437   :  { %8148 = vmatprep.mubr.msk.f32.mxu0 %vm112_vm0, %v8814_v22 }
 0x43a   :  { %8149 = vmatmul.mubr.msk.f32.gmra.mxu0 %vm112_vm0, %v8815_v45 }
 0x43b   :  { %8151 = vmatprep.mubr.msk.f32.mxu0 %vm112_vm0, %v8816_v49 }
 0x43e   :  { %8152 = vmatmul.mubr.msk.f32.gmra.mxu0 %vm112_vm0, %v8817_v6 }
 0x43f   :  { %8154 = vmatprep.mubr.msk.f32.mxu0 %vm112_vm0, %v8818_v30 }
 0x442   :  { %8155 = vmatmul.mubr.msk.f32.gmra.mxu0 %vm112_vm0, %v8819_v28 }
 0x443   :  { %8157 = vmatprep.mubr.msk.f32.mxu0 %vm112_vm0, %v8820_v59 }
 0x446   :  { %8158 = vmatmul.mubr.msk.f32.gmra.mxu0 %vm112_vm0, %v8821_v41 }
 0x447   :  { %8160 = vmatprep.mubr.msk.f32.mxu0 %vm112_vm0, %v8822_v14 }
 0x44a   :  { %8161 = vmatmul.mubr.msk.f32.gmra.mxu0 %vm112_vm0, %v8823_v29 }
 0x44b   :  { %8163 = vmatprep.mubr.msk.f32.mxu0 %vm112_vm0, %v8824_v3 }
 0x44e   :  { %8164 = vmatmul.mubr.msk.f32.gmra.mxu0 %vm112_vm0, %v8825_v10 }
 0x44f   :  { %8166 = vmatprep.mubr.msk.f32.mxu0 %vm112_vm0, %v8826_v44 }
 0x452   :  { %8167 = vmatmul.mubr.msk.f32.gmra.mxu0 %vm112_vm0, %v8827_v51 }
 0x453   :  { %8169 = vmatprep.mubr.msk.f32.mxu0 %vm112_vm0, %v8828_v8 }
 0x456   :  { %8170 = vmatmul.mubr.msk.f32.gmra.mxu0 %vm112_vm0, %v8829_v61 }
 0x457   :  { %8172 = vmatprep.mubr.msk.f32.mxu0 %vm112_vm0, %v8830_v9 }
 0x45a   :  { %8173 = vmatmul.mubr.msk.f32.gmra.mxu0 %vm112_vm0, %v8831_v19 }
 0x45b   :  { %8175 = vmatprep.mubr.msk.f32.mxu0 %vm112_vm0, %v8832_v1 }
 0x45e   :  { %8176 = vmatmul.mubr.msk.f32.gmra.mxu0 %vm112_vm0, %v8833_v58 }
 0x45f   :  { %8178 = vmatprep.mubr.msk.f32.mxu0 %vm112_vm0, %v8834_v2 }
 0x462   :  { %8179 = vmatmul.mubr.msk.f32.gmra.mxu0 %vm112_vm0, %v8835_v63 }
 0x463   :  { %8181 = vmatprep.mubr.msk.f32.mxu0 %vm112_vm0, %v8836_v46 }
 0x466   :  { %8182 = vmatmul.mubr.msk.f32.gmra.mxu0 %vm112_vm0, %v8837_v32 }
 0x467   :  { %8184 = vmatprep.mubr.msk.f32.mxu0 %vm112_vm0, %v8838_v50 }
 0x46a   :  { %8185 = vmatmul.mubr.msk.f32.gmra.mxu0 %vm112_vm0, %v8839_v0 }
 0x46b   :  { %8187 = vmatprep.mubr.msk.f32.mxu0 %vm112_vm0, %v8840_v60 }
 0x46e   :  { %8188 = vmatmul.mubr.msk.f32.gmra.mxu0 %vm112_vm0, %v8841_v27 }
 0x46f   :  { %8190 = vmatprep.mubr.msk.f32.mxu0 %vm112_vm0, %v8842_v21 }
 0x472   :  { %8191 = vmatmul.mubr.msk.f32.gmra.mxu0 %vm112_vm0, %v8843_v18 }
 0x473   :  { %8193 = vmatprep.mubr.msk.f32.mxu0 %vm112_vm0, %v8844_v54 }
 0x476   :  { %8194 = vmatmul.mubr.msk.f32.gmra.mxu0 %vm112_vm0, %v8845_v25 }
 0x477   :  { %8196 = vmatprep.mubr.msk.f32.mxu0 %vm112_vm0, %v8846_v43 }
 0x47a   :  { %8197 = vmatmul.mubr.msk.f32.gmra.mxu0 %vm112_vm0, %v8847_v15 }
 0x47b   :  { %8199 = vmatprep.mubr.msk.f32.mxu0 %vm112_vm0, %v8848_v36 }
 0x47e   :  { %8200 = vmatmul.mubr.msk.f32.gmra.mxu0 %vm112_vm0, %v8849_v48 }
 0x47f   :  { %8202 = vmatprep.mubr.msk.f32.mxu0 %vm112_vm0, %v8850_v13 }
 0x482   :  { %8203 = vmatmul.mubr.msk.f32.gmra.mxu0 %vm112_vm0, %v8851_v53 }
 0x483   :  { %8205 = vmatprep.mubr.msk.f32.mxu0 %vm112_vm0, %v8852_v24 }
 0x486   :  { %8206 = vmatmul.mubr.msk.f32.gmra.mxu0 %vm112_vm0, %v8853_v37 }
 0x4b6   :  { %v10904_v4 = vpop.f32.mrf.mxu0 }
 0x4b8   :  { %v10906_v56 = vpop.f32.mrf.mxu0 }
 0x4ba   :  { %v8102_v16 = vpop.f32.mrf.mxu0 }
 0x4bb   :  { %v2344_v55 = vadd.f32 %v8102_v16, %v10917_v11 }
 0x4bc   :  { %v10908_v33 = vpop.f32.mrf.mxu0 }
 0x4bd   :  { %v2714_v52 = vsel %vm112_vm0, %v2344_v55, 0.0  ;;  %v2858_v12 = vsel %vm112_vm0, %v2344_v55, -inf }
 0x4be   :  { %v8105_v5 = vpop.f32.mrf.mxu0 }
 0x4bf   :  { %v2354_v7 = vadd.f32 %v8105_v5, %v10917_v11 }
 0x4c0   :  { %v10910_v23 = vpop.f32.mrf.mxu0 }
 0x4c1   :  { %v2748_v49 = vsel %vm112_vm0, %v2354_v7, 0.0  ;;  %v2892_v6 = vsel %vm112_vm0, %v2354_v7, -inf }
 0x4c2   :  { %v8108_v39 = vpop.f32.mrf.mxu0 }
 0x4c3   :  { %v2364_v22 = vadd.f32 %v8108_v39, %v10917_v11 }
 0x4c4   :  { %v10912_v42 = vpop.f32.mrf.mxu0 }
 0x4c5   :  { %v2782_v3 = vsel %vm112_vm0, %v2364_v22, 0.0  ;;  %v2926_v44 = vsel %vm112_vm0, %v2364_v22, -inf }
 0x4c6   :  { %v8111_v62 = vpop.f32.mrf.mxu0 }
 0x4c7   :  { %v2374_v51 = vadd.f32 %v8111_v62, %v10917_v11 }
 0x4c8   :  { %v10920_v40 = vpop.f32.mrf.mxu0 }
 0x4c9   :  { %v2816_v63 = vsel %vm112_vm0, %v2374_v51, 0.0  ;;  %v2960_v46 = vsel %vm112_vm0, %v2374_v51, -inf }
 0x4ca   :  { %v8114_v47 = vpop.f32.mrf.mxu0 }
 0x4cb   :  { %v2384_v35 = vadd.f32 %v8114_v47, %v10917_v11 }
 0x4cc   :  { %v10924_v17 = vpop.f32.mrf.mxu0 }
 0x4cd   :  { %v2715_v20 = vsel %vm112_vm0, %v2384_v35, 0.0  ;;  %v2859_v57 = vsel %vm112_vm0, %v2384_v35, -inf }
 0x4ce   :  { %v2716_v31 = vadd.f32 %v2715_v20, %v2714_v52  ;;  %v2860_v38 = vmax.f32 %v2858_v12, %v2859_v57  ;;  %v8117_v26 = vpop.f32.mrf.mxu0 }
 0x4cf   :  { %v2394_v34 = vadd.f32 %v8117_v26, %v10917_v11 }
 0x4d0   :  { %v10932_v45 = vpop.f32.mrf.mxu0 }
 0x4d1   :  { %v2749_v30 = vsel %vm112_vm0, %v2394_v34, 0.0  ;;  %v2893_v28 = vsel %vm112_vm0, %v2394_v34, -inf }
 0x4d2   :  { %v2750_v59 = vadd.f32 %v2749_v30, %v2748_v49  ;;  %v2894_v41 = vmax.f32 %v2892_v6, %v2893_v28  ;;  %v8120_v14 = vpop.f32.mrf.mxu0 }
 0x4d3   :  { %v2404_v29 = vadd.f32 %v8120_v14, %v10917_v11 }
 0x4d4   :  { %v10940_v10 = vpop.f32.mrf.mxu0 }
 0x4d5   :  { %v2783_v8 = vsel %vm112_vm0, %v2404_v29, 0.0  ;;  %v2927_v61 = vsel %vm112_vm0, %v2404_v29, -inf }
 0x4d6   :  { %v2784_v9 = vadd.f32 %v2783_v8, %v2782_v3  ;;  %v2928_v19 = vmax.f32 %v2926_v44, %v2927_v61  ;;  %v8123_v1 = vpop.f32.mrf.mxu0 }
 0x4d7   :  { %v2414_v58 = vadd.f32 %v8123_v1, %v10917_v11 }
 0x4d8   :  { %v10947_v2 = vpop.f32.mrf.mxu0 }
 0x4d9   :  { %v2817_v32 = vsel %vm112_vm0, %v2414_v58, 0.0  ;;  %v2961_v50 = vsel %vm112_vm0, %v2414_v58, -inf }
 0x4da   :  { %v2818_v0 = vadd.f32 %v2817_v32, %v2816_v63  ;;  %v2962_v60 = vmax.f32 %v2960_v46, %v2961_v50  ;;  %v8126_v27 = vpop.f32.mrf.mxu0 }
 0x4db   :  { %v2424_v21 = vadd.f32 %v8126_v27, %v10917_v11 }
 0x4dc   :  { %v10954_v18 = vpop.f32.mrf.mxu0 }
 0x4dd   :  { %v2717_v54 = vsel %vm112_vm0, %v2424_v21, 0.0  ;;  %v2861_v25 = vsel %vm112_vm0, %v2424_v21, -inf }
 0x4de   :  { %v2718_v43 = vadd.f32 %v2717_v54, %v2716_v31  ;;  %v10958_v15 = vmax.f32 %v2860_v38, %v2861_v25  ;;  %v8129_v36 = vpop.f32.mrf.mxu0 }
 0x4df   :  { %v2434_v48 = vadd.f32 %v8129_v36, %v10917_v11 }
 0x4e0   :  { %v10961_v13 = vpop.f32.mrf.mxu0 }
 0x4e1   :  { %v2751_v53 = vsel %vm112_vm0, %v2434_v48, 0.0  ;;  %v2895_v24 = vsel %vm112_vm0, %v2434_v48, -inf }
 0x4e2   :  { %v2752_v37 = vadd.f32 %v2751_v53, %v2750_v59  ;;  %v10965_v16 = vmax.f32 %v2894_v41, %v2895_v24  ;;  %v8132_v5 = vpop.f32.mrf.mxu0  ;;  %v2339_v24 = vadd.f32 %v10917_v11, %v10908_v33 }
 0x4e3   :  { %v2444_v39 = vadd.f32 %v8132_v5, %v10917_v11 }
 0x4e4   :  { %v10968_v62 = vpop.f32.mrf.mxu0 }
 0x4e5   :  { %v2785_v55 = vsel %vm112_vm0, %v2444_v39, 0.0  ;;  %v2929_v47 = vsel %vm112_vm0, %v2444_v39, -inf  ;;  %v2349_v39 = vadd.f32 %v10917_v11, %v10910_v23  ;;  %v2841_v23 = vsel %vm112_vm0, %v2339_v24, -inf }
 0x4e6   :  { %v2786_v35 = vadd.f32 %v2785_v55, %v2784_v9  ;;  %v10972_v52 = vmax.f32 %v2928_v19, %v2929_v47  ;;  %v8135_v12 = vpop.f32.mrf.mxu0  ;;  %v2359_v55 = vadd.f32 %v10917_v11, %v10912_v42  ;;  %v2369_v47 = vadd.f32 %v10917_v11, %v10920_v40 }
 0x4e7   :  { %v2454_v7 = vadd.f32 %v8135_v12, %v10917_v11  ;;  %v2697_v12 = vsel %vm112_vm0, %v2339_v24, 0.0  ;;  %v2409_v42 = vadd.f32 %v10917_v11, %v10947_v2  ;;  %v2419_v40 = vadd.f32 %v10917_v11, %v10954_v18 }
 0x4e8   :  { %v10975_v20 = vpop.f32.mrf.mxu0  ;;  %v2943_v2 = vsel %vm112_vm0, %v2369_v47, -inf }
 0x4e9   :  { %v2819_v57 = vsel %vm112_vm0, %v2454_v7, 0.0  ;;  %v2963_v31 = vsel %vm112_vm0, %v2454_v7, -inf  ;;  %v2399_v7 = vadd.f32 %v10917_v11, %v10940_v10  ;;  %v2429_v10 = vadd.f32 %v10917_v11, %v10961_v13 }
 0x4ea   :  { %v2820_v38 = vadd.f32 %v2819_v57, %v2818_v0  ;;  %v10979_v26 = vmax.f32 %v2962_v60, %v2963_v31  ;;  %v8138_v34 = vpop.f32.mrf.mxu0  ;;  %v2800_v13 = vsel %vm112_vm0, %v2409_v42, 0.0  ;;  %v2844_v24 = vsel %vm112_vm0, %v2419_v40, -inf }
 0x4eb   :  { %v2464_v22 = vadd.f32 %v8138_v34, %v10917_v11  ;;  %v2875_v34 = vsel %vm112_vm0, %v2349_v39, -inf }
 0x4ec   :  { %v10982_v49 = vpop.f32.mrf.mxu0 }
 0x4ed   :  { %v2719_v6 = vsel %vm112_vm0, %v2464_v22, 0.0  ;;  %v10986_v30 = vsel %vm112_vm0, %v2464_v22, -inf  ;;  %v2909_v22 = vsel %vm112_vm0, %v2359_v55, -inf }
 0x4ee   :  { %v10988_v28 = vadd.f32 %v2719_v6, %v2718_v43  ;;  %v2864_v59 = vmax.f32 %v10958_v15, %v10986_v30  ;;  %v8141_v41 = vpop.f32.mrf.mxu0  ;;  %v2799_v6 = vsel %vm112_vm0, %v2369_v47, 0.0 }
 0x4ef   :  { %v2474_v14 = vadd.f32 %v8141_v41, %v10917_v11 }
 0x4f0   :  { %v10993_v29 = vpop.f32.mrf.mxu0 }
 0x4f1   :  { %v2753_v3 = vsel %vm112_vm0, %v2474_v14, 0.0  ;;  %v10997_v44 = vsel %vm112_vm0, %v2474_v14, -inf }
 0x4f2   :  { %v10999_v51 = vadd.f32 %v2753_v3, %v2752_v37  ;;  %v8144_v61 = vpop.f32.mrf.mxu0  ;;  %v2379_v37 = vadd.f32 %v10917_v11, %v10924_v17  ;;  %v2389_v17 = vadd.f32 %v10917_v11, %v10932_v45  ;;  %v2765_v45 = vsel %vm112_vm0, %v2359_v55, 0.0 }
 0x4f3   :  { %v2484_v9 = vadd.f32 %v8144_v61, %v10917_v11  ;;  %v2449_v55 = vadd.f32 %v10917_v11, %v10975_v20 }
 0x4f4   :  { %v11004_v19 = vpop.f32.mrf.mxu0  ;;  %v2698_v33 = vsel %vm112_vm0, %v2379_v37, 0.0  ;;  %v2842_v57 = vsel %vm112_vm0, %v2379_v37, -inf  ;;  %v2732_v3 = vsel %vm112_vm0, %v2389_v17, 0.0  ;;  %v2876_v61 = vsel %vm112_vm0, %v2389_v17, -inf }
 0x4f5   :  { %v2787_v1 = vsel %vm112_vm0, %v2484_v9, 0.0  ;;  %v11008_v58 = vsel %vm112_vm0, %v2484_v9, -inf  ;;  %v2699_v41 = vadd.f32 %v2698_v33, %v2697_v12  ;;  %v2843_v18 = vmax.f32 %v2841_v23, %v2842_v57 }
 0x4f6   :  { %v11010_v63 = vadd.f32 %v2787_v1, %v2786_v35  ;;  %v8147_v32 = vpop.f32.mrf.mxu0  ;;  %v2766_v9 = vsel %vm112_vm0, %v2399_v7, 0.0  ;;  %v2910_v1 = vsel %vm112_vm0, %v2399_v7, -inf  ;;  %v2734_v37 = vsel %vm112_vm0, %v2429_v10, 0.0 }
 0x4f7   :  { %v2494_v50 = vadd.f32 %v8147_v32, %v10917_v11  ;;  %v2944_v32 = vsel %vm112_vm0, %v2409_v42, -inf  ;;  %v2877_v12 = vmax.f32 %v2875_v34, %v2876_v61  ;;  %v2767_v33 = vadd.f32 %v2766_v9, %v2765_v45 }
 0x4f8   :  { %v11015_v0 = vpop.f32.mrf.mxu0  ;;  %v2459_v17 = vadd.f32 %v10917_v11, %v10982_v49  ;;  %v2911_v23 = vmax.f32 %v2909_v22, %v2910_v1  ;;  %v2801_v57 = vadd.f32 %v2800_v13, %v2799_v6  ;;  %v2878_v42 = vsel %vm112_vm0, %v2429_v10, -inf }
 0x4f9   :  { %v2821_v60 = vsel %vm112_vm0, %v2494_v50, 0.0  ;;  %v11019_v27 = vsel %vm112_vm0, %v2494_v50, -inf  ;;  %v2700_v50 = vsel %vm112_vm0, %v2419_v40, 0.0  ;;  %v2469_v40 = vadd.f32 %v10917_v11, %v10993_v29 }
 0x4fa   :  { %v11021_v21 = vadd.f32 %v2821_v60, %v2820_v38  ;;  %v11025_v25 = vpop.f32.mrf.mxu0  ;;  %v2731_v38 = vsel %vm112_vm0, %v2349_v39, 0.0  ;;  %v2439_v39 = vadd.f32 %v10917_v11, %v10968_v62  ;;  %v2945_v54 = vmax.f32 %v2943_v2, %v2944_v32 }
 0x4fb   :  { %v2733_v47 = vadd.f32 %v2732_v3, %v2731_v38  ;;  %v2701_v62 = vadd.f32 %v2700_v50, %v2699_v41  ;;  %v2845_v46 = vmax.f32 %v2843_v18, %v2844_v24  ;;  %v2802_v49 = vsel %vm112_vm0, %v2449_v55, 0.0 }
 0x4fc   :  { %v11027_v43 = vpop.f32.mrf.mxu0  ;;  %v2768_v38 = vsel %vm112_vm0, %v2439_v39, 0.0  ;;  %v2912_v34 = vsel %vm112_vm0, %v2439_v39, -inf  ;;  %v2479_v45 = vadd.f32 %v10917_v11, %v11004_v19  ;;  %v11102_v22 = vmax.f32 %v2877_v12, %v2878_v42 }
 0x4fd   :  { %v2735_v8 = vadd.f32 %v2734_v37, %v2733_v47  ;;  %v2946_v10 = vsel %vm112_vm0, %v2449_v55, -inf  ;;  %v2702_v29 = vsel %vm112_vm0, %v2459_v17, 0.0  ;;  %v2846_v6 = vsel %vm112_vm0, %v2459_v17, -inf }
 0x4fe   :  { %v11029_v36 = vpop.f32.mrf.mxu0  ;;  %v2736_v41 = vsel %vm112_vm0, %v2469_v40, 0.0  ;;  %v2880_v18 = vsel %vm112_vm0, %v2469_v40, -inf  ;;  %v2489_v3 = vadd.f32 %v10917_v11, %v11015_v0  ;;  %v2504_v19 = vadd.f32 %v11025_v25, %v10917_v11 }
 0x4ff   :  { %v2769_v61 = vadd.f32 %v2768_v38, %v2767_v33  ;;  %v2913_v9 = vmax.f32 %v2911_v23, %v2912_v34  ;;  %v2803_v1 = vadd.f32 %v2802_v49, %v2801_v57  ;;  %v2499_v13 = vadd.f32 %v10917_v11, %v11027_v43 }
 0x500   :  { %v11031_v48 = vpop.f32.mrf.mxu0  ;;  %v11119_v50 = vmax.f32 %v2945_v54, %v2946_v10  ;;  %v2770_v24 = vsel %vm112_vm0, %v2479_v45, 0.0  ;;  %v2914_v37 = vsel %vm112_vm0, %v2479_v45, -inf  ;;  %v2514_v0 = vadd.f32 %v11029_v36, %v10917_v11 }
 0x501   :  { %v2703_v39 = vadd.f32 %v2702_v29, %v2701_v62  ;;  %v2847_v55 = vmax.f32 %v2845_v46, %v2846_v6  ;;  %v2737_v25 = vadd.f32 %v2736_v41, %v2735_v8  ;;  %v2881_v47 = vmax.f32 %v11102_v22, %v2880_v18 }
 0x502   :  { %v11033_v53 = vpop.f32.mrf.mxu0  ;;  %v2804_v43 = vsel %vm112_vm0, %v2489_v3, 0.0  ;;  %v2948_v33 = vsel %vm112_vm0, %v2489_v3, -inf  ;;  %v2721_v54 = vsel %vm112_vm0, %v2504_v19, 0.0  ;;  %v2509_v17 = vadd.f32 %v10917_v11, %v11031_v48 }
 0x503   :  { %v2771_v23 = vadd.f32 %v2770_v24, %v2769_v61  ;;  %v2915_v57 = vmax.f32 %v2913_v9, %v2914_v37  ;;  %v2865_v36 = vsel %vm112_vm0, %v2504_v19, -inf  ;;  %v2704_v46 = vsel %vm112_vm0, %v2499_v13, 0.0 }
 0x504   :  { %v11039_v5 = vpop.f32.mrf.mxu0  ;;  %v2848_v42 = vsel %vm112_vm0, %v2499_v13, -inf  ;;  %v2755_v40 = vsel %vm112_vm0, %v2514_v0, 0.0  ;;  %v2524_v62 = vadd.f32 %v11033_v53, %v10917_v11  ;;  %v2805_v34 = vadd.f32 %v2804_v43, %v2803_v1 }
 0x505   :  { %v2519_v38 = vadd.f32 %v10917_v11, %v11039_v5  ;;  %v2949_v48 = vmax.f32 %v11119_v50, %v2948_v33  ;;  %v2722_v49 = vadd.f32 %v2721_v54, %v10988_v28  ;;  %v11148_v10 = vmax.f32 %v2864_v59, %v2865_v36 }
 0x506   :  { %v11047_v35 = vpop.f32.mrf.mxu0  ;;  %v2899_v29 = vsel %vm112_vm0, %v2514_v0, -inf  ;;  %v2738_v53 = vsel %vm112_vm0, %v2509_v17, 0.0  ;;  %v2705_v6 = vadd.f32 %v2704_v46, %v2703_v39  ;;  %v11154_v41 = vmax.f32 %v2847_v55, %v2848_v42 }
 0x507   :  { %v2534_v45 = vadd.f32 %v11047_v35, %v10917_v11  ;;  %v2756_v28 = vadd.f32 %v2755_v40, %v10999_v51  ;;  %v2882_v35 = vsel %vm112_vm0, %v2509_v17, -inf  ;;  %v2789_v3 = vsel %vm112_vm0, %v2524_v62, 0.0 }
 0x508   :  { %v11061_v31 = vpop.f32.mrf.mxu0  ;;  %v2933_v15 = vsel %vm112_vm0, %v2524_v62, -inf  ;;  %v2772_v30 = vsel %vm112_vm0, %v2519_v38, 0.0  ;;  %v2739_v61 = vadd.f32 %v2738_v53, %v2737_v25  ;;  %v2916_v51 = vsel %vm112_vm0, %v2519_v38, -inf }
 0x509   :  { %v2529_v5 = vadd.f32 %v10917_v11, %v11061_v31  ;;  %v13811_v31 = vmax.f32 %v10965_v16, %v10997_v44  ;;  %v2823_v9 = vsel %vm112_vm0, %v2534_v45, 0.0  ;;  %v2967_v13 = vsel %vm112_vm0, %v2534_v45, -inf }
 0x50a   :  { %v11071_v14 = vpop.f32.mrf.mxu0  ;;  %v11176_v37 = vmax.f32 %v2881_v47, %v2882_v35  ;;  %v2790_v16 = vadd.f32 %v2789_v3, %v11010_v63  ;;  %v13812_v44 = vmax.f32 %v10972_v52, %v11008_v58  ;;  %v2773_v39 = vadd.f32 %v2772_v30, %v2771_v23 }
 0x50b   :  { %v2544_v59 = vadd.f32 %v11071_v14, %v10917_v11  ;;  %v11166_v19 = vmax.f32 %v13811_v31, %v2899_v29  ;;  %v2806_v50 = vsel %vm112_vm0, %v2529_v5, 0.0  ;;  %v11184_v25 = vmax.f32 %v2915_v57, %v2916_v51 }
 0x50c   :  { %v11080_v60 = vpop.f32.mrf.mxu0  ;;  %v11182_v0 = vmax.f32 %v13812_v44, %v2933_v15  ;;  %v2950_v43 = vsel %vm112_vm0, %v2529_v5, -inf  ;;  %v2824_v47 = vadd.f32 %v2823_v9, %v11021_v21  ;;  %v13813_v63 = vmax.f32 %v10979_v26, %v11019_v27 }
 0x50d   :  { %v2539_v24 = vadd.f32 %v10917_v11, %v11080_v60  ;;  %v2723_v60 = vsel %vm112_vm0, %v2544_v59, 0.0  ;;  %v2807_v52 = vadd.f32 %v2806_v50, %v2805_v34  ;;  %v2867_v58 = vsel %vm112_vm0, %v2544_v59, -inf }
 0x50e   :  { %v11090_v7 = vpop.f32.mrf.mxu0  ;;  %v11194_v33 = vmax.f32 %v13813_v63, %v2967_v13  ;;  %v11202_v36 = vmax.f32 %v2949_v48, %v2950_v43  ;;  %v2724_v21 = vadd.f32 %v2723_v60, %v2722_v49 }
 0x50f   :  { %v2554_v14 = vadd.f32 %v11090_v7, %v10917_v11  ;;  %v2706_v17 = vsel %vm112_vm0, %v2539_v24, 0.0  ;;  %v2850_v23 = vsel %vm112_vm0, %v2539_v24, -inf }
 0x510   :  { %v11095_v20 = vpop.f32.mrf.mxu0  ;;  %v2707_v34 = vadd.f32 %v2706_v17, %v2705_v6  ;;  %v2851_v48 = vmax.f32 %v11154_v41, %v2850_v23 }
 0x511   :  { %v2549_v7 = vadd.f32 %v10917_v11, %v11095_v20  ;;  %v2757_v57 = vsel %vm112_vm0, %v2554_v14, 0.0  ;;  %v2901_v26 = vsel %vm112_vm0, %v2554_v14, -inf }
 0x512   :  { %v11107_v2 = vpop.f32.mrf.mxu0  ;;  %v2758_v49 = vadd.f32 %v2757_v57, %v2756_v28  ;;  %v2902_v29 = vmax.f32 %v11166_v19, %v2901_v26 }
 0x513   :  { %v2564_v20 = vadd.f32 %v11107_v2, %v10917_v11  ;;  %v2740_v42 = vsel %vm112_vm0, %v2549_v7, 0.0  ;;  %v2884_v40 = vsel %vm112_vm0, %v2549_v7, -inf  ;;  %v2868_v2 = vmax.f32 %v11148_v10, %v2867_v58 }
 0x514   :  { %v11117_v32 = vpop.f32.mrf.mxu0  ;;  %v2741_v35 = vadd.f32 %v2740_v42, %v2739_v61 }
 0x515   :  { %v2559_v27 = vadd.f32 %v10917_v11, %v11117_v32  ;;  %v2791_v32 = vsel %vm112_vm0, %v2564_v20, 0.0  ;;  %v2935_v53 = vsel %vm112_vm0, %v2564_v20, -inf }
 0x516   :  { %v11126_v12 = vpop.f32.mrf.mxu0  ;;  %v2792_v30 = vadd.f32 %v2791_v32, %v2790_v16  ;;  %v2936_v59 = vmax.f32 %v11182_v0, %v2935_v53 }
 0x517   :  { %v2574_v62 = vadd.f32 %v11126_v12, %v10917_v11  ;;  %v2885_v12 = vmax.f32 %v11176_v37, %v2884_v40  ;;  %v2918_v10 = vsel %vm112_vm0, %v2559_v27, -inf }
 0x518   :  { %v2568_v8 = vpop.f32.mrf.mxu0  ;;  %v2919_v50 = vmax.f32 %v11184_v25, %v2918_v10 }
 0x519   :  { %v2569_v38 = vadd.f32 %v10917_v11, %v2568_v8  ;;  %v2774_v8 = vsel %vm112_vm0, %v2559_v27, 0.0  ;;  %v2825_v41 = vsel %vm112_vm0, %v2574_v62, 0.0  ;;  %v2969_v28 = vsel %vm112_vm0, %v2574_v62, -inf }
 0x51a   :  { %v8174_v22 = vpop.f32.mrf.mxu0  ;;  %v2775_v61 = vadd.f32 %v2774_v8, %v2773_v39  ;;  %v2826_v24 = vadd.f32 %v2825_v41, %v2824_v47 }
 0x51b   :  { %v2584_v5 = vadd.f32 %v8174_v22, %v10917_v11  ;;  %v2808_v3 = vsel %vm112_vm0, %v2569_v38, 0.0  ;;  %v2952_v22 = vsel %vm112_vm0, %v2569_v38, -inf }
 0x51c   :  { %v2578_v18 = vpop.f32.mrf.mxu0  ;;  %v2809_v14 = vadd.f32 %v2808_v3, %v2807_v52  ;;  %v2953_v16 = vmax.f32 %v11202_v36, %v2952_v22 }
 0x51d   :  { %v2579_v15 = vadd.f32 %v10917_v11, %v2578_v18  ;;  %v2725_v51 = vsel %vm112_vm0, %v2584_v5, 0.0  ;;  %v2970_v18 = vmax.f32 %v11194_v33, %v2969_v28  ;;  %v2869_v44 = vsel %vm112_vm0, %v2584_v5, -inf }
 0x51e   :  { %v8177_v1 = vpop.f32.mrf.mxu0  ;;  %v2726_v39 = vadd.f32 %v2725_v51, %v2724_v21  ;;  %v11244_v52 = vmax.f32 %v2868_v2, %v2869_v44 }
 0x51f   :  { %v2594_v31 = vadd.f32 %v8177_v1, %v10917_v11  ;;  %v2708_v1 = vsel %vm112_vm0, %v2579_v15, 0.0  ;;  %v2852_v0 = vsel %vm112_vm0, %v2579_v15, -inf }
 0x520   :  { %v2588_v55 = vpop.f32.mrf.mxu0  ;;  %v2709_v58 = vadd.f32 %v2708_v1, %v2707_v34 }
 0x521   :  { %v2589_v9 = vadd.f32 %v10917_v11, %v2588_v55  ;;  %v2759_v55 = vsel %vm112_vm0, %v2594_v31, 0.0  ;;  %v2903_v43 = vsel %vm112_vm0, %v2594_v31, -inf }
 0x522   :  { %v8180_v54 = vpop.f32.mrf.mxu0  ;;  %v2760_v57 = vadd.f32 %v2759_v55, %v2758_v49  ;;  %v11249_v20 = vmax.f32 %v2902_v29, %v2903_v43 }
 0x523   :  { %v2604_v13 = vadd.f32 %v8180_v54, %v10917_v11  ;;  %v2742_v7 = vsel %vm112_vm0, %v2589_v9, 0.0  ;;  %v2886_v47 = vsel %vm112_vm0, %v2589_v9, -inf  ;;  %v11246_v54 = vmax.f32 %v2851_v48, %v2852_v0 }
 0x524   :  { %v2598_v46 = vpop.f32.mrf.mxu0  ;;  %v2743_v26 = vadd.f32 %v2742_v7, %v2741_v35  ;;  %v11253_v27 = vmax.f32 %v2885_v12, %v2886_v47 }
 0x525   :  { %v2599_v25 = vadd.f32 %v10917_v11, %v2598_v46  ;;  %v2793_v63 = vsel %vm112_vm0, %v2604_v13, 0.0  ;;  %v2937_v36 = vsel %vm112_vm0, %v2604_v13, -inf }
 0x526   :  { %v8183_v45 = vpop.f32.mrf.mxu0  ;;  %v2794_v46 = vadd.f32 %v2793_v63, %v2792_v30  ;;  %v11260_v48 = vmax.f32 %v2936_v59, %v2937_v36 }
 0x527   :  { %v2614_v33 = vadd.f32 %v8183_v45, %v10917_v11  ;;  %v2776_v42 = vsel %vm112_vm0, %v2599_v25, 0.0  ;;  %v2920_v62 = vsel %vm112_vm0, %v2599_v25, -inf }
 0x528   :  { %v2608_v6 = vpop.f32.mrf.mxu0  ;;  %v2777_v8 = vadd.f32 %v2776_v42, %v2775_v61  ;;  %v11269_v10 = vmax.f32 %v2919_v50, %v2920_v62 }
 0x529   :  { %v2609_v17 = vadd.f32 %v10917_v11, %v2608_v6  ;;  %v2827_v38 = vsel %vm112_vm0, %v2614_v33, 0.0  ;;  %v2971_v2 = vsel %vm112_vm0, %v2614_v33, -inf }
 0x52a   :  { %v8186_v19 = vpop.f32.mrf.mxu0  ;;  %v2828_v6 = vadd.f32 %v2827_v38, %v2826_v24  ;;  %v11271_v41 = vmax.f32 %v2970_v18, %v2971_v2 }
 0x52b   :  { %v2624_v21 = vadd.f32 %v8186_v19, %v10917_v11  ;;  %v2810_v49 = vsel %vm112_vm0, %v2609_v17, 0.0  ;;  %v2954_v45 = vsel %vm112_vm0, %v2609_v17, -inf }
 0x52c   :  { %v2618_v37 = vpop.f32.mrf.mxu0  ;;  %v11273_v3 = vadd.f32 %v2810_v49, %v2809_v14  ;;  %v11278_v22 = vmax.f32 %v2953_v16, %v2954_v45 }
 0x52d   :  { %v2619_v34 = vadd.f32 %v10917_v11, %v2618_v37  ;;  %v2727_v53 = vsel %vm112_vm0, %v2624_v21, 0.0  ;;  %v2871_v5 = vsel %vm112_vm0, %v2624_v21, -inf }
 0x52e   :  { %v8189_v60 = vpop.f32.mrf.mxu0  ;;  %v2728_v31 = vadd.f32 %v2727_v53, %v2726_v39  ;;  %v2872_v19 = vmax.f32 %v11244_v52, %v2871_v5 }
 0x52f   :  { %v2634_v29 = vadd.f32 %v8189_v60, %v10917_v11  ;;  %v2710_v15 = vsel %vm112_vm0, %v2619_v34, 0.0  ;;  %v2854_v30 = vsel %vm112_vm0, %v2619_v34, -inf }
 0x530   :  { %v2628_v23 = vpop.f32.mrf.mxu0  ;;  %v2711_v18 = vadd.f32 %v2710_v15, %v2709_v58  ;;  %v2855_v14 = vmax.f32 %v11246_v54, %v2854_v30 }
 0x531   :  { %v2629_v35 = vadd.f32 %v10917_v11, %v2628_v23  ;;  %v2761_v61 = vsel %vm112_vm0, %v2634_v29, 0.0  ;;  %v2905_v9 = vsel %vm112_vm0, %v2634_v29, -inf }
 0x532   :  { %v8192_v40 = vpop.f32.mrf.mxu0  ;;  %v2762_v1 = vadd.f32 %v2761_v61, %v2760_v57  ;;  %v2906_v43 = vmax.f32 %v11249_v20, %v2905_v9 }
 0x533   :  { %v2644_v12 = vadd.f32 %v8192_v40, %v10917_v11  ;;  %v2744_v13 = vsel %vm112_vm0, %v2629_v35, 0.0  ;;  %v2888_v50 = vsel %vm112_vm0, %v2629_v35, -inf }
 0x534   :  { %v2638_v32 = vpop.f32.mrf.mxu0  ;;  %v2745_v25 = vadd.f32 %v2744_v13, %v2743_v26  ;;  %v2889_v60 = vmax.f32 %v11253_v27, %v2888_v50 }
 0x535   :  { %v2639_v59 = vadd.f32 %v10917_v11, %v2638_v32  ;;  %v2795_v24 = vsel %vm112_vm0, %v2644_v12, 0.0  ;;  %v11288_v37 = vsel %vm112_vm0, %v2644_v12, -inf }
 0x536   :  { %v8195_v28 = vpop.f32.mrf.mxu0  ;;  %v2796_v7 = vadd.f32 %v2795_v24, %v2794_v46  ;;  %v2940_v63 = vmax.f32 %v11260_v48, %v11288_v37 }
 0x537   :  { %v2654_v16 = vadd.f32 %v8195_v28, %v10917_v11  ;;  %v2778_v0 = vsel %vm112_vm0, %v2639_v59, 0.0  ;;  %v11293_v39 = vsel %vm112_vm0, %v2639_v59, -inf }
 0x538   :  { %v2648_v51 = vpop.f32.mrf.mxu0  ;;  %v2779_v54 = vadd.f32 %v2778_v0, %v2777_v8  ;;  %v2923_v17 = vmax.f32 %v11269_v10, %v11293_v39 }
 0x539   :  { %v2829_v23 = vsel %vm112_vm0, %v2654_v16, 0.0  ;;  %v11307_v36 = vsel %vm112_vm0, %v2654_v16, -inf  ;;  %v2649_v46 = vadd.f32 %v10917_v11, %v2648_v51 }
 0x53a   :  { %v8198_v44 = vpop.f32.mrf.mxu0  ;;  %v2830_v2 = vadd.f32 %v2829_v23, %v2828_v6  ;;  %v2974_v35 = vmax.f32 %v11271_v41, %v11307_v36 }
 0x53b   :  { %v2664_v55 = vadd.f32 %v8198_v44, %v10917_v11 }
 0x53c   :  { %v2658_v47 = vpop.f32.mrf.mxu0 }
 0x53d   :  { %v2729_v33 = vsel %vm112_vm0, %v2664_v55, 0.0  ;;  %v2873_v52 = vsel %vm112_vm0, %v2664_v55, -inf  ;;  %v2659_v58 = vadd.f32 %v10917_v11, %v2658_v47 }
 0x53e   :  { %v2730_v57 = vadd.f32 %v2729_v33, %v2728_v31  ;;  %v8201_v20 = vpop.f32.mrf.mxu0  ;;  %v2874_v40 = vmax.f32 %v2872_v19, %v2873_v52  ;;  %v2812_v31 = vsel %vm112_vm0, %v2649_v46, 0.0 }
 0x53f   :  { %v2712_v21 = vsel %vm112_vm0, %v2659_v58, 0.0  ;;  %v2856_v26 = vsel %vm112_vm0, %v2659_v58, -inf  ;;  %v2674_v27 = vadd.f32 %v8201_v20, %v10917_v11 }
 0x540   :  { %v2834_v42 = vmul.f32 0.11111111, %v2730_v57  ;;  %v2713_v62 = vadd.f32 %v2712_v21, %v2711_v18  ;;  %v2668_v38 = vpop.f32.mrf.mxu0  ;;  %v2857_v32 = vmax.f32 %v2855_v14, %v2856_v26  ;;  %v2956_v18 = vsel %vm112_vm0, %v2649_v46, -inf }
 0x541   :  { %v2763_v34 = vsel %vm112_vm0, %v2674_v27, 0.0  ;;  %v2907_v48 = vsel %vm112_vm0, %v2674_v27, -inf  ;;  %v2669_v49 = vadd.f32 %v10917_v11, %v2668_v38  ;;  %v2957_v23 = vmax.f32 %v11278_v22, %v2956_v18  ;;  %v11344_v22 = vpop.f32.mrf.mxu1  ;;  %v6905_v18 = vld [vmem:[%s13790_s0 + $0x298] sm:$0xff] }
 0x542   :  { %v2978_v45 = vadd.f32 %v2874_v40, %v2834_v42  ;;  %v2833_v29 = vmul.f32 0.11111111, %v2713_v62  ;;  %v2764_v53 = vadd.f32 %v2763_v34, %v2762_v1  ;;  %v8204_v5 = vpop.f32.mrf.mxu0  ;;  %v2908_v15 = vmax.f32 %v2906_v43, %v2907_v48  ;;  %v8854_v40 = vld [vmem:[%s13796_s6] ss:$0 sm:$0xff] }
 0x543   :  { %v2746_v12 = vsel %vm112_vm0, %v2669_v49, 0.0  ;;  %v2890_v8 = vsel %vm112_vm0, %v2669_v49, -inf  ;;  %v2684_v10 = vadd.f32 %v8204_v5, %v10917_v11  ;;  %v2813_v43 = vadd.f32 %v2812_v31, %v11273_v3  ;;  %v11346_v27 = vpop.f32.mrf.mxu1  ;;  %v6896_v31 = vld [vmem:[%s13790_s0 + $0x250] sm:$0xff] }
 0x544   :  { %v2977_v6 = vadd.f32 %v2857_v32, %v2833_v29  ;;  %v2836_v28 = vmul.f32 0.11111111, %v2764_v53  ;;  %v2747_v30 = vadd.f32 %v2746_v12, %v2745_v25  ;;  %v2678_v59 = vpop.f32.mrf.mxu0  ;;  %v2891_v13 = vmax.f32 %v2889_v60, %v2890_v8 }
 0x545   :  { %v2797_v19 = vsel %vm112_vm0, %v2684_v10, 0.0  ;;  %v2941_v61 = vsel %vm112_vm0, %v2684_v10, -inf  ;;  %v2679_v51 = vadd.f32 %v10917_v11, %v2678_v59  ;;  %v3395_v10 = vld [vmem:[%s13793_s3 + $0x8] sm:$0xff] }
 0x546   :  { %v2980_v41 = vadd.f32 %v2908_v15, %v2836_v28  ;;  %v2835_v9 = vmul.f32 0.11111111, %v2747_v30  ;;  %v2798_v50 = vadd.f32 %v2797_v19, %v2796_v7  ;;  %v8207_v24 = vpop.f32.mrf.mxu0  ;;  %8212 = vmatprep.mubr.msk.f32.mxu1 %vm112_vm0, %v2977_v6  ;;  %v2942_v0 = vmax.f32 %v2940_v63, %v2941_v61  ;;  %v6894_v28 = vld [vmem:[%s13790_s0 + $0x240] sm:$0xff]  ;;  %v6895_v59 = vld [vmem:[%s13790_s0 + $0x248] sm:$0xff]  ;;  %v6897_v19 = vld [vmem:[%s13790_s0 + $0x258] sm:$0xff] }
 0x547   :  { %v2780_v14 = vsel %vm112_vm0, %v2679_v51, 0.0  ;;  %v2924_v37 = vsel %vm112_vm0, %v2679_v51, -inf  ;;  %v2694_v16 = vadd.f32 %v8207_v24, %v10917_v11  ;;  %8213 = vmatmul.mubr.msk.f32.vlgmr.msra.gmra.mxu1 %vm112_vm0, %v2978_v45  ;;  %v3394_v30 = vld [vmem:[%s13793_s3] sm:$0xff]  ;;  %v6899_v51 = vld [vmem:[%s13790_s0 + $0x268] sm:$0xff]  ;;  %v6904_v24 = vld [vmem:[%s13790_s0 + $0x290] sm:$0xff] }
 0x548   :  { %v2979_v44 = vadd.f32 %v2891_v13, %v2835_v9  ;;  %v2838_v1 = vmul.f32 0.11111111, %v2798_v50  ;;  %v2781_v39 = vadd.f32 %v2780_v14, %v2779_v54  ;;  %v2688_v55 = vpop.f32.mrf.mxu0  ;;  %v2925_v52 = vmax.f32 %v2923_v17, %v2924_v37  ;;  %v6898_v61 = vld [vmem:[%s13790_s0 + $0x260] sm:$0xff]  ;;  %v6901_v9 = vld [vmem:[%s13790_s0 + $0x278] sm:$0xff]  ;;  %v6903_v50 = vld [vmem:[%s13790_s0 + $0x288] sm:$0xff] }
 0x549   :  { %v2831_v25 = vsel %vm112_vm0, %v2694_v16, 0.0  ;;  %v2975_v60 = vsel %vm112_vm0, %v2694_v16, -inf  ;;  %v2689_v7 = vadd.f32 %v10917_v11, %v2688_v55  ;;  %v6902_v13 = vld [vmem:[%s13790_s0 + $0x280] sm:$0xff]  ;;  %v6907_v37 = vld [vmem:[%s13790_s0 + $0x2a8] sm:$0xff]  ;;  %v6908_v16 = vld [vmem:[%s13790_s0 + $0x2b0] sm:$0xff] }
 0x54a   :  { %v2982_v47 = vadd.f32 %v2942_v0, %v2838_v1  ;;  %v2837_v33 = vmul.f32 0.11111111, %v2781_v39  ;;  %v2832_v58 = vadd.f32 %v2831_v25, %v2830_v2  ;;  %8215 = vmatprep.mubr.msk.f32.mxu1 %vm112_vm0, %v2979_v44  ;;  %v2976_v20 = vmax.f32 %v2974_v35, %v2975_v60  ;;  %v6906_v14 = vld [vmem:[%s13790_s0 + $0x2a0] sm:$0xff]  ;;  %v6909_v44 = vld [vmem:[%s13790_s0 + $0x2b8] sm:$0xff]  ;;  %v6911_v0 = vld [vmem:[%s13790_s0 + $0x2c8] sm:$0xff] }
 0x54b   :  { %v2814_v63 = vsel %vm112_vm0, %v2689_v7, 0.0  ;;  %v2958_v54 = vsel %vm112_vm0, %v2689_v7, -inf  ;;  %8216 = vmatmul.mubr.msk.f32.gmra.mxu1 %vm112_vm0, %v2980_v41  ;;  %v6900_v41 = vld [vmem:[%s13790_s0 + $0x270] sm:$0xff]  ;;  %v6910_v1 = vld [vmem:[%s13790_s0 + $0x2c0] sm:$0xff]  ;;  %v6913_v55 = vld [vmem:[%s13790_s0 + $0x2d8] sm:$0xff] }
 0x54c   :  { %v2981_v3 = vadd.f32 %v2925_v52, %v2837_v33  ;;  %v2840_v57 = vmul.f32 0.11111111, %v2832_v58  ;;  %v2815_v36 = vadd.f32 %v2814_v63, %v2813_v43  ;;  %v2959_v26 = vmax.f32 %v2957_v23, %v2958_v54  ;;  %v6912_v39 = vld [vmem:[%s13790_s0 + $0x2d0] sm:$0xff]  ;;  %v6914_v43 = vld [vmem:[%s13790_s0 + $0x2e0] sm:$0xff]  ;;  %v6915_v25 = vld [vmem:[%s13790_s0 + $0x2e8] sm:$0xff] }
 0x54d   :  { %v6916_v60 = vld [vmem:[%s13790_s0 + $0x2f0] sm:$0xff]  ;;  %v6917_v7 = vld [vmem:[%s13790_s0 + $0x2f8] sm:$0xff]  ;;  %v6919_v33 = vld [vmem:[%s13790_s0 + $0x308] sm:$0xff] }
 0x54e   :  { %v2984_v21 = vadd.f32 %v2976_v20, %v2840_v57  ;;  %v2839_v11 = vmul.f32 0.11111111, %v2815_v36  ;;  %8218 = vmatprep.mubr.msk.f32.mxu1 %vm112_vm0, %v2981_v3  ;;  %v6920_v52 = vld [vmem:[%s13790_s0 + $0x310] sm:$0xff]  ;;  %v6921_v58 = vld [vmem:[%s13790_s0 + $0x318] sm:$0xff]  ;;  %v6922_v23 = vld [vmem:[%s13790_s0 + $0x320] sm:$0xff]  ;;  %v3229_v3 = vlaneseq }
 0x54f   :  { %8219 = vmatmul.mubr.msk.f32.gmra.mxu1 %vm112_vm0, %v2982_v47  ;;  %v6918_v47 = vld [vmem:[%s13790_s0 + $0x300] sm:$0xff]  ;;  %v6923_v63 = vld [vmem:[%s13790_s0 + $0x328] sm:$0xff]  ;;  %v6924_v54 = vld [vmem:[%s13790_s0 + $0x330] sm:$0xff] }
 0x550   :  { %v2983_v17 = vadd.f32 %v2959_v26, %v2839_v11  ;;  %v6925_v57 = vld [vmem:[%s13790_s0 + $0x338] sm:$0xff]  ;;  %v6926_v20 = vld [vmem:[%s13790_s0 + $0x340] sm:$0xff]  ;;  %v11489_v36 = vshrl.u32 %v3229_v3, 7  ;;  %v11495_v11 = vand.u32 127, %v3229_v3  ;;  %v6927_v26 = vld [vmem:[%s13790_s0 + $0x348] sm:$0xff] }
 0x552   :  { %8221 = vmatprep.mubr.msk.f32.mxu1 %vm112_vm0, %v2983_v17  ;;  %13814 = vst [vmem:[#allocation8_spill] sm:$0xff] %v11489_v36  ;;  %13816 = vst [vmem:[#allocation10_spill] sm:$0xff] %v11495_v11  ;;  %v6928_v17 = vld [vmem:[%s13790_s0 + $0x350] sm:$0xff] }
 0x553   :  { %8222 = vmatmul.mubr.msk.f32.gmra.mxu1 %vm112_vm0, %v2984_v21  ;;  %v11493_v21 = vadd.s32 8, %v11489_v36 }
 0x555   :  { %13815 = vst [vmem:[#allocation9_spill] sm:$0xff] %v11493_v21  ;;  %vm3235_vm2 = vcmp.eq.s32.totalorder %v11493_v21, %v11495_v11 }
 0x607   :  { %v8214_v46 = vpop.f32.mrf.mxu1 }
 0x608   :  { %v3081_v34 = vadd.f32 %v8854_v40, %v8214_v46  ;;  %v4333_v46 = vld [vmem:[%s13795_s5 + $0x8] sm:$0xff] }
 0x609   :  { %v3075_v42 = vpop.f32.mrf.mxu1  ;;  %8355 = vmatprep.subr.mxu0 %v4333_v46 }
 0x60a   :  { %v3076_v62 = vadd.f32 %v8854_v40, %v3075_v42  ;;  %v6929_v42 = vld [vmem:[%s13790_s0 + $0x358] sm:$0xff]  ;;  %8356 = vmatpush3.msra.mxu0 %v4333_v46 }
 0x60b   :  { %v8217_v38 = vpop.f32.mrf.mxu1 }
 0x60c   :  { %3114 = vxpose.xlu0.b32.start [1/8] (short) (narrow) %v3076_v62, 16  ;;  %v3091_v5 = vadd.f32 %v8854_v40, %v8217_v38  ;;  %v6932_v38 = vld [vmem:[%s13790_s0 + $0x370] sm:$0xff] }
 0x60d   :  { %v3085_v2 = vpop.f32.mrf.mxu1 }
 0x60e   :  { %v3086_v45 = vadd.f32 %v8854_v40, %v3085_v2  ;;  %v6933_v2 = vld [vmem:[%s13790_s0 + $0x378] sm:$0xff] }
 0x60f   :  { %v8220_v48 = vpop.f32.mrf.mxu1 }
 0x610   :  { %3115 = vxpose.xlu0.b32.cont [2/8] (short) (narrow) %v3081_v34, 16  ;;  %v3101_v12 = vadd.f32 %v8854_v40, %v8220_v48  ;;  %v6935_v48 = vld [vmem:[%s13790_s0 + $0x388] sm:$0xff] }
 0x611   :  { %v3095_v49 = vpop.f32.mrf.mxu1 }
 0x612   :  { %v3096_v8 = vadd.f32 %v8854_v40, %v3095_v49  ;;  %v6936_v49 = vld [vmem:[%s13790_s0 + $0x390] sm:$0xff] }
 0x613   :  { %v8223_v29 = vpop.f32.mrf.mxu1 }
 0x614   :  { %v3111_v32 = vadd.f32 %v8854_v40, %v8223_v29  ;;  %3116 = vxpose.xlu0.b32.cont [3/8] (short) (narrow) %v3086_v45, 16  ;;  %v6938_v29 = vld [vmem:[%s13790_s0 + $0x3a0] sm:$0xff] }
 0x615   :  { %v3105_v53 = vpop.f32.mrf.mxu1 }
 0x616   :  { %v3106_v35 = vadd.f32 %v8854_v40, %v3105_v53  ;;  %8224 = vmatprep.subr.mxu1 %v3111_v32  ;;  %v6930_v40 = vld [vmem:[%s13790_s0 + $0x360] sm:$0xff]  ;;  %v6940_v53 = vld [vmem:[%s13790_s0 + $0x3b0] sm:$0xff] }
 0x617   :  { %8225 = vmatpush3.msra.mxu1 %v3111_v32 }
 0x618   :  { %8226 = vmatprep.subr.mxu1 %v3106_v35  ;;  %3117 = vxpose.xlu0.b32.cont [4/8] (short) (narrow) %v3091_v5, 16 }
 0x619   :  { %8227 = vmatpush3.msra.mxu1 %v3106_v35 }
 0x61a   :  { %8228 = vmatprep.subr.mxu1 %v3101_v12 }
 0x61b   :  { %8229 = vmatpush3.msra.mxu1 %v3101_v12 }
 0x61c   :  { %8230 = vmatprep.subr.mxu1 %v3096_v8  ;;  %3118 = vxpose.xlu0.b32.cont [5/8] (short) (narrow) %v3096_v8, 16 }
 0x61d   :  { %8231 = vmatpush3.msra.mxu1 %v3096_v8  ;;  %v6944_v8 = vld [vmem:[%s13790_s0 + $0x3d0] sm:$0xff] }
 0x61e   :  { %8232 = vmatprep.subr.mxu1 %v3091_v5 }
 0x61f   :  { %8233 = vmatpush3.msra.mxu1 %v3091_v5  ;;  %v6941_v5 = vld [vmem:[%s13790_s0 + $0x3b8] sm:$0xff] }
 0x620   :  { %8234 = vmatprep.subr.mxu1 %v3086_v45  ;;  %3119 = vxpose.xlu0.b32.cont [6/8] (short) (narrow) %v3101_v12, 16  ;;  %v6943_v12 = vld [vmem:[%s13790_s0 + $0x3c8] sm:$0xff] }
 0x621   :  { %8235 = vmatpush3.msra.mxu1 %v3086_v45  ;;  %v6937_v45 = vld [vmem:[%s13790_s0 + $0x398] sm:$0xff] }
 0x622   :  { %8236 = vmatprep.subr.mxu1 %v3081_v34 }
 0x623   :  { %8237 = vmatpush3.msra.mxu1 %v3081_v34  ;;  %v6934_v34 = vld [vmem:[%s13790_s0 + $0x380] sm:$0xff] }
 0x624   :  { %3120 = vxpose.xlu0.b32.cont [7/8] (short) (narrow) %v3106_v35, 16  ;;  %8238 = vmatprep.subr.mxu1 %v3076_v62  ;;  %v6942_v35 = vld [vmem:[%s13790_s0 + $0x3c0] sm:$0xff] }
 0x625   :  { %8239 = vmatpush3.msra.mxu1 %v3076_v62  ;;  %v6931_v62 = vld [vmem:[%s13790_s0 + $0x368] sm:$0xff] }
 0x626   :  { %8243 = vmatprep.subr.mxu1 %v3395_v10 }
 0x628   :  { %3121 = vxpose.xlu0.b32.end [8/8] (short) (narrow) %v3111_v32, 16  ;;  %v6939_v32 = vld [vmem:[%s13790_s0 + $0x3a8] sm:$0xff] }
 0x688   :  { %v3130_v6 = vpop.trf.xlu0 }
 0x689   :  { %8240 = vmatprep.mubr.msk.f32.mxu1 %vm2066_vm1, %v3130_v6  ;;  %v6946_v6 = vld [vmem:[%s13790_s0 + $0x3e0] sm:$0xff] }
 0x68c   :  { %v3131_v15 = vpop.trf.xlu0 }
 0x68d   :  { %8241 = vmatmul.mubr.msk.f32.vlgmr.msra.gmra.mxu1 %vm2066_vm1, %v3131_v15  ;;  %v6948_v15 = vld [vmem:[%s13790_s0 + $0x3f0] sm:$0xff] }
 0x68e   :  { %8244 = vmatpush3.msra.mxu1 %v3395_v10  ;;  %8247 = vmatprep.mubr.msk.f32.mxu1 %vm112_vm0, %v6894_v28  ;;  %v6945_v10 = vld [vmem:[%s13790_s0 + $0x3d8] sm:$0xff]  ;;  %v6947_v28 = vld [vmem:[%s13790_s0 + $0x3e8] sm:$0xff] }
 0x68f   :  { %8245 = vmatprep.subr.mxu1 %v3394_v30 }
 0x690   :  { %8246 = vmatpush3.msra.mxu1 %v3394_v30  ;;  %v6949_v30 = vld [vmem:[%s13790_s0 + $0x3f8] sm:$0xff] }
 0x691   :  { %8248 = vmatmul.mubr.msk.f32.vlgmr.msra.gmra.mxu1 %vm112_vm0, %v6895_v59  ;;  %8483 = vmatprep.subr.mxu1 %v4333_v46  ;;  %v6950_v59 = vld [vmem:[%s13790_s0 + $0x400] sm:$0xff] }
 0x692   :  { %8250 = vmatprep.mubr.msk.f32.mxu1 %vm112_vm0, %v6896_v31  ;;  %8484 = vmatpush3.msra.mxu1 %v4333_v46  ;;  %v6951_v31 = vld [vmem:[%s13790_s0 + $0x408] sm:$0xff] }
 0x695   :  { %8251 = vmatmul.mubr.msk.f32.gmra.mxu1 %vm112_vm0, %v6897_v19  ;;  %v6952_v19 = vld [vmem:[%s13790_s0 + $0x410] sm:$0xff] }
 0x696   :  { %8253 = vmatprep.mubr.msk.f32.mxu1 %vm112_vm0, %v6898_v61  ;;  %v6953_v61 = vld [vmem:[%s13790_s0 + $0x418] sm:$0xff] }
 0x699   :  { %8254 = vmatmul.mubr.msk.f32.gmra.mxu1 %vm112_vm0, %v6899_v51  ;;  %v6954_v51 = vld [vmem:[%s13790_s0 + $0x420] sm:$0xff] }
 0x69a   :  { %8256 = vmatprep.mubr.msk.f32.mxu1 %vm112_vm0, %v6900_v41  ;;  %v6955_v41 = vld [vmem:[%s13790_s0 + $0x428] sm:$0xff] }
 0x69d   :  { %8257 = vmatmul.mubr.msk.f32.gmra.mxu1 %vm112_vm0, %v6901_v9  ;;  %v6956_v9 = vld [vmem:[%s13790_s0 + $0x430] sm:$0xff] }
 0x69e   :  { %8259 = vmatprep.mubr.msk.f32.mxu1 %vm112_vm0, %v6902_v13  ;;  %v6957_v13 = vld [vmem:[%s13790_s0 + $0x438] sm:$0xff] }
 0x6a1   :  { %8260 = vmatmul.mubr.msk.f32.gmra.mxu1 %vm112_vm0, %v6903_v50  ;;  %v6958_v50 = vld [vmem:[%s13790_s0 + $0x440] sm:$0xff] }
 0x6a2   :  { %8262 = vmatprep.mubr.msk.f32.mxu1 %vm112_vm0, %v6904_v24  ;;  %v6959_v24 = vld [vmem:[%s13790_s0 + $0x448] sm:$0xff] }
 0x6a5   :  { %8263 = vmatmul.mubr.msk.f32.gmra.mxu1 %vm112_vm0, %v6905_v18  ;;  %v6960_v18 = vld [vmem:[%s13790_s0 + $0x450] sm:$0xff] }
 0x6a6   :  { %8265 = vmatprep.mubr.msk.f32.mxu1 %vm112_vm0, %v6906_v14  ;;  %v6961_v14 = vld [vmem:[%s13790_s0 + $0x458] sm:$0xff] }
 0x6a9   :  { %8266 = vmatmul.mubr.msk.f32.gmra.mxu1 %vm112_vm0, %v6907_v37  ;;  %v6962_v37 = vld [vmem:[%s13790_s0 + $0x460] sm:$0xff] }
 0x6aa   :  { %8268 = vmatprep.mubr.msk.f32.mxu1 %vm112_vm0, %v6908_v16  ;;  %v6963_v16 = vld [vmem:[%s13790_s0 + $0x468] sm:$0xff] }
 0x6ad   :  { %8269 = vmatmul.mubr.msk.f32.gmra.mxu1 %vm112_vm0, %v6909_v44  ;;  %v6964_v44 = vld [vmem:[%s13790_s0 + $0x470] sm:$0xff] }
 0x6ae   :  { %8271 = vmatprep.mubr.msk.f32.mxu1 %vm112_vm0, %v6910_v1  ;;  %v6965_v1 = vld [vmem:[%s13790_s0 + $0x478] sm:$0xff] }
 0x6b1   :  { %8272 = vmatmul.mubr.msk.f32.gmra.mxu1 %vm112_vm0, %v6911_v0  ;;  %v4332_v0 = vld [vmem:[%s13795_s5] sm:$0xff] }
 0x6b2   :  { %8274 = vmatprep.mubr.msk.f32.mxu1 %vm112_vm0, %v6912_v39  ;;  %8357 = vmatprep.subr.mxu0 %v4332_v0  ;;  %v2258_v39 = vadd.f32 %v11344_v22, %v10904_v4 }
 0x6b3   :  { %8485 = vmatprep.subr.mxu1 %v4332_v0  ;;  %8358 = vmatpush3.msra.mxu0 %v4332_v0 }
 0x6b4   :  { %8486 = vmatpush3.msra.mxu1 %v4332_v0 }
 0x6b5   :  { %8275 = vmatmul.mubr.msk.f32.gmra.mxu1 %vm112_vm0, %v6913_v55 }
 0x6b6   :  { %8277 = vmatprep.mubr.msk.f32.mxu1 %vm112_vm0, %v6914_v43 }
 0x6b9   :  { %8278 = vmatmul.mubr.msk.f32.gmra.mxu1 %vm112_vm0, %v6915_v25 }
 0x6ba   :  { %8280 = vmatprep.mubr.msk.f32.mxu1 %vm112_vm0, %v6916_v60 }
 0x6bd   :  { %8281 = vmatmul.mubr.msk.f32.gmra.mxu1 %vm112_vm0, %v6917_v7 }
 0x6be   :  { %8283 = vmatprep.mubr.msk.f32.mxu1 %vm112_vm0, %v6918_v47 }
 0x6c1   :  { %8284 = vmatmul.mubr.msk.f32.gmra.mxu1 %vm112_vm0, %v6919_v33 }
 0x6c2   :  { %8286 = vmatprep.mubr.msk.f32.mxu1 %vm112_vm0, %v6920_v52 }
 0x6c5   :  { %8287 = vmatmul.mubr.msk.f32.gmra.mxu1 %vm112_vm0, %v6921_v58 }
 0x6c6   :  { %8289 = vmatprep.mubr.msk.f32.mxu1 %vm112_vm0, %v6922_v23  ;;  %v11677_v23 = vld [vmem:[%s13794_s4] ss:$0 sm:$0xff] }
 0x6c9   :  { %8290 = vmatmul.mubr.msk.f32.gmra.mxu1 %vm112_vm0, %v6923_v63 }
 0x6ca   :  { %8292 = vmatprep.mubr.msk.f32.mxu1 %vm112_vm0, %v6924_v54 }
 0x6cd   :  { %8293 = vmatmul.mubr.msk.f32.gmra.mxu1 %vm112_vm0, %v6925_v57 }
 0x6ce   :  { %8295 = vmatprep.mubr.msk.f32.mxu1 %vm112_vm0, %v6926_v20 }
 0x6d1   :  { %8296 = vmatmul.mubr.msk.f32.gmra.mxu1 %vm112_vm0, %v6927_v26 }
 0x6d2   :  { %8298 = vmatprep.mubr.msk.f32.mxu1 %vm112_vm0, %v6928_v17 }
 0x6d5   :  { %8299 = vmatmul.mubr.msk.f32.gmra.mxu1 %vm112_vm0, %v6929_v42 }
 0x6d6   :  { %8301 = vmatprep.mubr.msk.f32.mxu1 %vm112_vm0, %v6930_v40 }
 0x6d9   :  { %8302 = vmatmul.mubr.msk.f32.gmra.mxu1 %vm112_vm0, %v6931_v62 }
 0x6da   :  { %8304 = vmatprep.mubr.msk.f32.mxu1 %vm112_vm0, %v6932_v38 }
 0x6dd   :  { %8305 = vmatmul.mubr.msk.f32.gmra.mxu1 %vm112_vm0, %v6933_v2 }
 0x6de   :  { %8307 = vmatprep.mubr.msk.f32.mxu1 %vm112_vm0, %v6934_v34 }
 0x6e1   :  { %8308 = vmatmul.mubr.msk.f32.gmra.mxu1 %vm112_vm0, %v6935_v48 }
 0x6e2   :  { %8310 = vmatprep.mubr.msk.f32.mxu1 %vm112_vm0, %v6936_v49  ;;  %v11697_v49 = vld [vmem:[%s13793_s3 + $0x18] sm:$0xff] }
 0x6e3   :  { %8371 = vmatprep.subr.mxu0 %v11697_v49 }
 0x6e5   :  { %8311 = vmatmul.mubr.msk.f32.gmra.mxu1 %vm112_vm0, %v6937_v45 }
 0x6e6   :  { %8313 = vmatprep.mubr.msk.f32.mxu1 %vm112_vm0, %v6938_v29 }
 0x6e9   :  { %8314 = vmatmul.mubr.msk.f32.gmra.mxu1 %vm112_vm0, %v6939_v32 }
 0x6ea   :  { %8316 = vmatprep.mubr.msk.f32.mxu1 %vm112_vm0, %v6940_v53 }
 0x6ed   :  { %8317 = vmatmul.mubr.msk.f32.gmra.mxu1 %vm112_vm0, %v6941_v5 }
 0x6ee   :  { %8319 = vmatprep.mubr.msk.f32.mxu1 %vm112_vm0, %v6942_v35 }
 0x6f1   :  { %8320 = vmatmul.mubr.msk.f32.gmra.mxu1 %vm112_vm0, %v6943_v12 }
 0x6f2   :  { %8322 = vmatprep.mubr.msk.f32.mxu1 %vm112_vm0, %v6944_v8 }
 0x6f5   :  { %8323 = vmatmul.mubr.msk.f32.gmra.mxu1 %vm112_vm0, %v6945_v10 }
 0x6f6   :  { %8325 = vmatprep.mubr.msk.f32.mxu1 %vm112_vm0, %v6946_v6 }
 0x6f9   :  { %8326 = vmatmul.mubr.msk.f32.gmra.mxu1 %vm112_vm0, %v6947_v28 }
 0x6fa   :  { %8328 = vmatprep.mubr.msk.f32.mxu1 %vm112_vm0, %v6948_v15 }
 0x6fd   :  { %8329 = vmatmul.mubr.msk.f32.gmra.mxu1 %vm112_vm0, %v6949_v30 }
 0x6fe   :  { %8331 = vmatprep.mubr.msk.f32.mxu1 %vm112_vm0, %v6950_v59 }
 0x701   :  { %8332 = vmatmul.mubr.msk.f32.gmra.mxu1 %vm112_vm0, %v6951_v31 }
 0x702   :  { %8334 = vmatprep.mubr.msk.f32.mxu1 %vm112_vm0, %v6952_v19 }
 0x705   :  { %8335 = vmatmul.mubr.msk.f32.gmra.mxu1 %vm112_vm0, %v6953_v61 }
 0x706   :  { %8337 = vmatprep.mubr.msk.f32.mxu1 %vm112_vm0, %v6954_v51 }
 0x709   :  { %8338 = vmatmul.mubr.msk.f32.gmra.mxu1 %vm112_vm0, %v6955_v41 }
 0x70a   :  { %8340 = vmatprep.mubr.msk.f32.mxu1 %vm112_vm0, %v6956_v9 }
 0x70d   :  { %8341 = vmatmul.mubr.msk.f32.gmra.mxu1 %vm112_vm0, %v6957_v13 }
 0x70e   :  { %8343 = vmatprep.mubr.msk.f32.mxu1 %vm112_vm0, %v6958_v50 }
 0x711   :  { %8344 = vmatmul.mubr.msk.f32.gmra.mxu1 %vm112_vm0, %v6959_v24 }
 0x712   :  { %8346 = vmatprep.mubr.msk.f32.mxu1 %vm112_vm0, %v6960_v18 }
 0x715   :  { %8347 = vmatmul.mubr.msk.f32.gmra.mxu1 %vm112_vm0, %v6961_v14 }
 0x716   :  { %8349 = vmatprep.mubr.msk.f32.mxu1 %vm112_vm0, %v6962_v37 }
 0x719   :  { %8350 = vmatmul.mubr.msk.f32.gmra.mxu1 %vm112_vm0, %v6963_v16 }
 0x71a   :  { %8352 = vmatprep.mubr.msk.f32.mxu1 %vm112_vm0, %v6964_v44 }
 0x71d   :  { %8353 = vmatmul.mubr.msk.f32.gmra.mxu1 %vm112_vm0, %v6965_v1 }
 0x74d   :  { %v8242_v55 = vpop.f32.mrf.mxu1 }
 0x74e   :  { %v11664_v43 = vadd.f32 %v8242_v55, %v2258_v39 }
 0x74f   :  { %v11666_v25 = vpop.f32.mrf.mxu1 }
 0x750   :  { %13817 = vst [vmem:[#allocation11_spill] sm:$0xff] %v11664_v43  ;;  %13818 = vst [vmem:[#allocation12_spill] sm:$0xff] %v11666_v25 }
 0x751   :  { %v8249_v60 = vpop.f32.mrf.mxu1 }
 0x752   :  { %v3691_v22 = vadd.f32 %v8249_v60, %v11677_v23 }
 0x753   :  { %v11668_v7 = vpop.f32.mrf.mxu1 }
 0x754   :  { %v4061_v57 = vsel %vm112_vm0, %v3691_v22, 0.0  ;;  %v4205_v26 = vsel %vm112_vm0, %v3691_v22, -inf }
 0x755   :  { %v8252_v47 = vpop.f32.mrf.mxu1 }
 0x756   :  { %v3701_v17 = vadd.f32 %v8252_v47, %v11677_v23 }
 0x757   :  { %v11670_v33 = vpop.f32.mrf.mxu1 }
 0x758   :  { %v4095_v45 = vsel %vm112_vm0, %v3701_v17, 0.0  ;;  %v4239_v29 = vsel %vm112_vm0, %v3701_v17, -inf }
 0x759   :  { %v8255_v52 = vpop.f32.mrf.mxu1 }
 0x75a   :  { %v3711_v34 = vadd.f32 %v8255_v52, %v11677_v23 }
 0x75b   :  { %v11672_v58 = vpop.f32.mrf.mxu1 }
 0x75c   :  { %v4129_v10 = vsel %vm112_vm0, %v3711_v34, 0.0  ;;  %v4273_v28 = vsel %vm112_vm0, %v3711_v34, -inf }
 0x75d   :  { %v8258_v4 = vpop.f32.mrf.mxu1 }
 0x75e   :  { %v3721_v15 = vadd.f32 %v8258_v4, %v11677_v23 }
 0x75f   :  { %v11680_v63 = vpop.f32.mrf.mxu1 }
 0x760   :  { %v4163_v9 = vsel %vm112_vm0, %v3721_v15, 0.0  ;;  %v4307_v13 = vsel %vm112_vm0, %v3721_v15, -inf }
 0x761   :  { %v8261_v54 = vpop.f32.mrf.mxu1 }
 0x762   :  { %v3731_v3 = vadd.f32 %v8261_v54, %v11677_v23 }
 0x763   :  { %v11684_v20 = vpop.f32.mrf.mxu1 }
 0x764   :  { %v4062_v46 = vsel %vm112_vm0, %v3731_v3, 0.0  ;;  %v4206_v42 = vsel %vm112_vm0, %v3731_v3, -inf }
 0x765   :  { %v4063_v40 = vadd.f32 %v4062_v46, %v4061_v57  ;;  %v4207_v62 = vmax.f32 %v4205_v26, %v4206_v42  ;;  %v8264_v38 = vpop.f32.mrf.mxu1 }
 0x766   :  { %v3741_v2 = vadd.f32 %v8264_v38, %v11677_v23 }
 0x767   :  { %v11692_v48 = vpop.f32.mrf.mxu1 }
 0x768   :  { %v4096_v32 = vsel %vm112_vm0, %v3741_v2, 0.0  ;;  %v4240_v53 = vsel %vm112_vm0, %v3741_v2, -inf }
 0x769   :  { %v4097_v5 = vadd.f32 %v4096_v32, %v4095_v45  ;;  %v4241_v35 = vmax.f32 %v4239_v29, %v4240_v53  ;;  %v8267_v12 = vpop.f32.mrf.mxu1 }
 0x76a   :  { %v3751_v8 = vadd.f32 %v8267_v12, %v11677_v23 }
 0x76b   :  { %v11706_v6 = vpop.f32.mrf.mxu1 }
 0x76c   :  { %v4130_v30 = vsel %vm112_vm0, %v3751_v8, 0.0  ;;  %v4274_v59 = vsel %vm112_vm0, %v3751_v8, -inf }
 0x76d   :  { %v4131_v31 = vadd.f32 %v4130_v30, %v4129_v10  ;;  %v4275_v19 = vmax.f32 %v4273_v28, %v4274_v59  ;;  %v8270_v61 = vpop.f32.mrf.mxu1 }
 0x76e   :  { %v3761_v51 = vadd.f32 %v8270_v61, %v11677_v23 }
 0x76f   :  { %v11713_v41 = vpop.f32.mrf.mxu1 }
 0x770   :  { %v4164_v50 = vsel %vm112_vm0, %v3761_v51, 0.0  ;;  %v4308_v24 = vsel %vm112_vm0, %v3761_v51, -inf }
 0x771   :  { %v4165_v18 = vadd.f32 %v4164_v50, %v4163_v9  ;;  %v4309_v14 = vmax.f32 %v4307_v13, %v4308_v24  ;;  %v8273_v37 = vpop.f32.mrf.mxu1 }
 0x772   :  { %v3771_v16 = vadd.f32 %v8273_v37, %v11677_v23 }
 0x773   :  { %v11720_v44 = vpop.f32.mrf.mxu1 }
 0x774   :  { %v4064_v1 = vsel %vm112_vm0, %v3771_v16, 0.0  ;;  %v4208_v0 = vsel %vm112_vm0, %v3771_v16, -inf }
 0x775   :  { %v4065_v39 = vadd.f32 %v4064_v1, %v4063_v40  ;;  %v11724_v55 = vmax.f32 %v4207_v62, %v4208_v0  ;;  %v8276_v60 = vpop.f32.mrf.mxu1 }
 0x776   :  { %v3781_v47 = vadd.f32 %v8276_v60, %v11677_v23 }
 0x777   :  { %v11727_v52 = vpop.f32.mrf.mxu1 }
 0x778   :  { %v4098_v4 = vsel %vm112_vm0, %v3781_v47, 0.0  ;;  %v4242_v22 = vsel %vm112_vm0, %v3781_v47, -inf }
 0x779   :  { %v4099_v54 = vadd.f32 %v4098_v4, %v4097_v5  ;;  %v11731_v3 = vmax.f32 %v4241_v35, %v4242_v22  ;;  %v8279_v57 = vpop.f32.mrf.mxu1 }
 0x77a   :  { %v3791_v26 = vadd.f32 %v8279_v57, %v11677_v23 }
 0x77b   :  { %v11734_v17 = vpop.f32.mrf.mxu1 }
 0x77c   :  { %v4132_v46 = vsel %vm112_vm0, %v3791_v26, 0.0  ;;  %v4276_v42 = vsel %vm112_vm0, %v3791_v26, -inf }
 0x77d   :  { %v4133_v40 = vadd.f32 %v4132_v46, %v4131_v31  ;;  %v11738_v62 = vmax.f32 %v4275_v19, %v4276_v42  ;;  %v8282_v38 = vpop.f32.mrf.mxu1 }
 0x77e   :  { %v3801_v2 = vadd.f32 %v8282_v38, %v11677_v23  ;;  %v3726_v38 = vadd.f32 %v11677_v23, %v11684_v20  ;;  %v3736_v20 = vadd.f32 %v11677_v23, %v11692_v48 }
 0x77f   :  { %v11741_v34 = vpop.f32.mrf.mxu1 }
 0x780   :  { %v4166_v45 = vsel %vm112_vm0, %v3801_v2, 0.0  ;;  %v4310_v29 = vsel %vm112_vm0, %v3801_v2, -inf }
 0x781   :  { %v4167_v32 = vadd.f32 %v4166_v45, %v4165_v18  ;;  %v11745_v53 = vmax.f32 %v4309_v14, %v4310_v29  ;;  %v8285_v5 = vpop.f32.mrf.mxu1  ;;  %v3696_v45 = vadd.f32 %v11677_v23, %v11670_v33  ;;  %v3706_v29 = vadd.f32 %v11677_v23, %v11672_v58 }
 0x782   :  { %v3811_v35 = vadd.f32 %v8285_v5, %v11677_v23  ;;  %v3756_v58 = vadd.f32 %v11677_v23, %v11713_v41 }
 0x783   :  { %v11748_v12 = vpop.f32.mrf.mxu1  ;;  %v4112_v48 = vsel %vm112_vm0, %v3706_v29, 0.0 }
 0x784   :  { %v4066_v8 = vsel %vm112_vm0, %v3811_v35, 0.0  ;;  %v11752_v10 = vsel %vm112_vm0, %v3811_v35, -inf }
 0x785   :  { %v11754_v28 = vadd.f32 %v4066_v8, %v4065_v39  ;;  %v8288_v30 = vpop.f32.mrf.mxu1  ;;  %v3746_v8 = vadd.f32 %v11677_v23, %v11706_v6  ;;  %v3776_v6 = vadd.f32 %v11677_v23, %v11727_v52  ;;  %v4147_v52 = vsel %vm112_vm0, %v3756_v58, 0.0 }
 0x786   :  { %v3821_v59 = vadd.f32 %v8288_v30, %v11677_v23  ;;  %v4189_v30 = vsel %vm112_vm0, %v3726_v38, -inf }
 0x787   :  { %v11759_v31 = vpop.f32.mrf.mxu1 }
 0x788   :  { %v4100_v19 = vsel %vm112_vm0, %v3821_v59, 0.0  ;;  %v11763_v61 = vsel %vm112_vm0, %v3821_v59, -inf  ;;  %v3816_v43 = vadd.f32 %v11677_v23, %v11759_v31 }
 0x789   :  { %v11765_v51 = vadd.f32 %v4100_v19, %v4099_v54  ;;  %v8291_v13 = vpop.f32.mrf.mxu1  ;;  %v4078_v19 = vsel %vm112_vm0, %v3696_v45, 0.0 }
 0x78a   :  { %v3831_v50 = vadd.f32 %v8291_v13, %v11677_v23  ;;  %v4222_v13 = vsel %vm112_vm0, %v3696_v45, -inf  ;;  %v4257_v45 = vsel %vm112_vm0, %v3746_v8, -inf }
 0x78b   :  { %v11770_v24 = vpop.f32.mrf.mxu1 }
 0x78c   :  { %v4134_v18 = vsel %vm112_vm0, %v3831_v50, 0.0  ;;  %v11774_v14 = vsel %vm112_vm0, %v3831_v50, -inf  ;;  %v4256_v50 = vsel %vm112_vm0, %v3706_v29, -inf  ;;  %v4291_v29 = vsel %vm112_vm0, %v3756_v58, -inf }
 0x78d   :  { %v11776_v37 = vadd.f32 %v4134_v18, %v4133_v40  ;;  %v8294_v1 = vpop.f32.mrf.mxu1  ;;  %v3686_v40 = vadd.f32 %v11677_v23, %v11668_v7  ;;  %v4045_v7 = vsel %vm112_vm0, %v3726_v38, 0.0  ;;  %v4113_v38 = vsel %vm112_vm0, %v3746_v8, 0.0 }
 0x78e   :  { %v3841_v0 = vadd.f32 %v8294_v1, %v11677_v23  ;;  %v3806_v58 = vadd.f32 %v11677_v23, %v11748_v12  ;;  %v4258_v15 = vmax.f32 %v4256_v50, %v4257_v45 }
 0x78f   :  { %v11781_v39 = vpop.f32.mrf.mxu1  ;;  %v4044_v35 = vsel %vm112_vm0, %v3686_v40, 0.0  ;;  %v4188_v33 = vsel %vm112_vm0, %v3686_v40, -inf  ;;  %v4223_v40 = vsel %vm112_vm0, %v3736_v20, -inf }
 0x790   :  { %v4168_v60 = vsel %vm112_vm0, %v3841_v0, 0.0  ;;  %v11785_v47 = vsel %vm112_vm0, %v3841_v0, -inf  ;;  %v4046_v1 = vadd.f32 %v4045_v7, %v4044_v35  ;;  %v4081_v35 = vsel %vm112_vm0, %v3776_v6, 0.0 }
 0x791   :  { %v11787_v4 = vadd.f32 %v4168_v60, %v4167_v32  ;;  %v11791_v54 = vpop.f32.mrf.mxu1  ;;  %v3716_v32 = vadd.f32 %v11677_v23, %v11680_v63  ;;  %v3766_v63 = vadd.f32 %v11677_v23, %v11720_v44  ;;  %v4190_v44 = vmax.f32 %v4188_v33, %v4189_v30 }
 0x792   :  { %v4079_v60 = vsel %vm112_vm0, %v3736_v20, 0.0  ;;  %v3786_v7 = vadd.f32 %v11677_v23, %v11734_v17  ;;  %v3796_v20 = vadd.f32 %v11677_v23, %v11741_v34  ;;  %v4224_v8 = vmax.f32 %v4222_v13, %v4223_v40 }
 0x793   :  { %v11793_v57 = vpop.f32.mrf.mxu1  ;;  %v4146_v18 = vsel %vm112_vm0, %v3716_v32, 0.0  ;;  %v4290_v41 = vsel %vm112_vm0, %v3716_v32, -inf  ;;  %v4047_v22 = vsel %vm112_vm0, %v3766_v63, 0.0  ;;  %v4191_v32 = vsel %vm112_vm0, %v3766_v63, -inf }
 0x794   :  { %v4080_v33 = vadd.f32 %v4079_v60, %v4078_v19  ;;  %v4114_v30 = vadd.f32 %v4113_v38, %v4112_v48  ;;  %v4148_v21 = vadd.f32 %v4147_v52, %v4146_v18  ;;  %v4225_v63 = vsel %vm112_vm0, %v3776_v6, -inf }
 0x795   :  { %v11795_v26 = vpop.f32.mrf.mxu1  ;;  %v4292_v36 = vmax.f32 %v4290_v41, %v4291_v29  ;;  %v4048_v17 = vadd.f32 %v4047_v22, %v4046_v1  ;;  %v4192_v11 = vmax.f32 %v4190_v44, %v4191_v32  ;;  %v4115_v19 = vsel %vm112_vm0, %v3786_v7, 0.0 }
 0x796   :  { %v4082_v25 = vadd.f32 %v4081_v35, %v4080_v33  ;;  %v4259_v13 = vsel %vm112_vm0, %v3786_v7, -inf  ;;  %v4149_v12 = vsel %vm112_vm0, %v3796_v20, 0.0  ;;  %v3826_v48 = vadd.f32 %v11677_v23, %v11770_v24 }
 0x797   :  { %v11797_v46 = vpop.f32.mrf.mxu1  ;;  %v11868_v50 = vmax.f32 %v4224_v8, %v4225_v63  ;;  %v4293_v6 = vsel %vm112_vm0, %v3796_v20, -inf  ;;  %v4049_v31 = vsel %vm112_vm0, %v3806_v58, 0.0  ;;  %v4193_v22 = vsel %vm112_vm0, %v3806_v58, -inf }
 0x798   :  { %v4083_v41 = vsel %vm112_vm0, %v3816_v43, 0.0  ;;  %v4227_v1 = vsel %vm112_vm0, %v3816_v43, -inf  ;;  %v3836_v44 = vadd.f32 %v11677_v23, %v11781_v39  ;;  %v3851_v24 = vadd.f32 %v11791_v54, %v11677_v23 }
 0x799   :  { %v11799_v42 = vpop.f32.mrf.mxu1  ;;  %v4116_v60 = vadd.f32 %v4115_v19, %v4114_v30  ;;  %v4260_v40 = vmax.f32 %v4258_v15, %v4259_v13  ;;  %v4150_v38 = vadd.f32 %v4149_v12, %v4148_v21  ;;  %v3846_v45 = vadd.f32 %v11677_v23, %v11793_v57 }
 0x79a   :  { %v11885_v29 = vmax.f32 %v4292_v36, %v4293_v6  ;;  %v4117_v32 = vsel %vm112_vm0, %v3826_v48, 0.0  ;;  %v4261_v43 = vsel %vm112_vm0, %v3826_v48, -inf  ;;  %v3861_v39 = vadd.f32 %v11795_v26, %v11677_v23 }
 0x79b   :  { %v11805_v2 = vpop.f32.mrf.mxu1  ;;  %v4050_v35 = vadd.f32 %v4049_v31, %v4048_v17  ;;  %v4194_v7 = vmax.f32 %v4192_v11, %v4193_v22  ;;  %v4084_v54 = vadd.f32 %v4083_v41, %v4082_v25  ;;  %v4228_v15 = vmax.f32 %v11868_v50, %v4227_v1 }
 0x79c   :  { %v4151_v57 = vsel %vm112_vm0, %v3836_v44, 0.0  ;;  %v4295_v20 = vsel %vm112_vm0, %v3836_v44, -inf  ;;  %v4068_v36 = vsel %vm112_vm0, %v3851_v24, 0.0  ;;  %v3856_v33 = vadd.f32 %v11677_v23, %v11797_v46 }
 0x79d   :  { %v11813_v5 = vpop.f32.mrf.mxu1  ;;  %v4118_v8 = vadd.f32 %v4117_v32, %v4116_v60  ;;  %v4262_v30 = vmax.f32 %v4260_v40, %v4261_v43  ;;  %v4212_v26 = vsel %vm112_vm0, %v3851_v24, -inf  ;;  %v4051_v11 = vsel %vm112_vm0, %v3846_v45, 0.0 }
 0x79e   :  { %v4195_v58 = vsel %vm112_vm0, %v3846_v45, -inf  ;;  %v4102_v63 = vsel %vm112_vm0, %v3861_v39, 0.0  ;;  %v3871_v17 = vadd.f32 %v11799_v42, %v11677_v23  ;;  %v3866_v19 = vadd.f32 %v11677_v23, %v11805_v2 }
 0x79f   :  { %v11827_v59 = vpop.f32.mrf.mxu1  ;;  %v4152_v13 = vadd.f32 %v4151_v57, %v4150_v38  ;;  %v4296_v46 = vmax.f32 %v11885_v29, %v4295_v20  ;;  %v4069_v12 = vadd.f32 %v4068_v36, %v11754_v28  ;;  %v3881_v48 = vadd.f32 %v11813_v5, %v11677_v23 }
 0x7a0   :  { %v13819_v6 = vmax.f32 %v11724_v55, %v11752_v10  ;;  %v4246_v22 = vsel %vm112_vm0, %v3861_v39, -inf  ;;  %v4085_v42 = vsel %vm112_vm0, %v3856_v33, 0.0  ;;  %v3876_v2 = vadd.f32 %v11677_v23, %v11827_v59 }
 0x7a1   :  { %v11837_v0 = vpop.f32.mrf.mxu1  ;;  %v4052_v41 = vadd.f32 %v4051_v11, %v4050_v35  ;;  %v11920_v1 = vmax.f32 %v4194_v7, %v4195_v58  ;;  %v4103_v28 = vadd.f32 %v4102_v63, %v11765_v51  ;;  %v4229_v5 = vsel %vm112_vm0, %v3856_v33, -inf }
 0x7a2   :  { %v11914_v31 = vmax.f32 %v13819_v6, %v4212_v26  ;;  %v4136_v24 = vsel %vm112_vm0, %v3871_v17, 0.0  ;;  %v4280_v55 = vsel %vm112_vm0, %v3871_v17, -inf  ;;  %v4119_v10 = vsel %vm112_vm0, %v3866_v19, 0.0 }
 0x7a3   :  { %v11846_v16 = vpop.f32.mrf.mxu1  ;;  %v3891_v60 = vadd.f32 %v11837_v0, %v11677_v23  ;;  %v13820_v59 = vmax.f32 %v11731_v3, %v11763_v61  ;;  %v4086_v38 = vadd.f32 %v4085_v42, %v4084_v54  ;;  %v4263_v51 = vsel %vm112_vm0, %v3866_v19, -inf }
 0x7a4   :  { %v4170_v45 = vsel %vm112_vm0, %v3881_v48, 0.0  ;;  %v4314_v32 = vsel %vm112_vm0, %v3881_v48, -inf  ;;  %v4153_v43 = vsel %vm112_vm0, %v3876_v2, 0.0  ;;  %v3886_v39 = vadd.f32 %v11677_v23, %v11846_v16 }
 0x7a5   :  { %v11856_v9 = vpop.f32.mrf.mxu1  ;;  %v11932_v40 = vmax.f32 %v13820_v59, %v4246_v22  ;;  %v11942_v35 = vmax.f32 %v4228_v15, %v4229_v5  ;;  %v4137_v3 = vadd.f32 %v4136_v24, %v11776_v37  ;;  %v13821_v61 = vmax.f32 %v11738_v62, %v11774_v14 }
 0x7a6   :  { %v3901_v0 = vadd.f32 %v11856_v9, %v11677_v23  ;;  %v4120_v54 = vadd.f32 %v4119_v10, %v4118_v8  ;;  %v11950_v20 = vmax.f32 %v4262_v30, %v4263_v51  ;;  %v4297_v36 = vsel %vm112_vm0, %v3876_v2, -inf }
 0x7a7   :  { %v11861_v34 = vpop.f32.mrf.mxu1  ;;  %v11948_v7 = vmax.f32 %v13821_v61, %v4280_v55  ;;  %v4070_v16 = vsel %vm112_vm0, %v3891_v60, 0.0  ;;  %v4171_v15 = vadd.f32 %v4170_v45, %v11787_v4  ;;  %v13822_v37 = vmax.f32 %v11745_v53, %v11785_v47 }
 0x7a8   :  { %v3896_v9 = vadd.f32 %v11677_v23, %v11861_v34  ;;  %v4154_v62 = vadd.f32 %v4153_v43, %v4152_v13  ;;  %v4214_v14 = vsel %vm112_vm0, %v3891_v60, -inf  ;;  %v4053_v30 = vsel %vm112_vm0, %v3886_v39, 0.0 }
 0x7a9   :  { %v11873_v18 = vpop.f32.mrf.mxu1  ;;  %v11960_v33 = vmax.f32 %v13822_v37, %v4314_v32  ;;  %v4197_v26 = vsel %vm112_vm0, %v3886_v39, -inf  ;;  %v4104_v11 = vsel %vm112_vm0, %v3901_v0, 0.0  ;;  %v11968_v58 = vmax.f32 %v4296_v46, %v4297_v36 }
 0x7aa   :  { %v3911_v34 = vadd.f32 %v11873_v18, %v11677_v23  ;;  %v4071_v4 = vadd.f32 %v4070_v16, %v4069_v12  ;;  %v4248_v53 = vsel %vm112_vm0, %v3901_v0, -inf  ;;  %v4087_v17 = vsel %vm112_vm0, %v3896_v9, 0.0 }
 0x7ab   :  { %v11883_v52 = vpop.f32.mrf.mxu1  ;;  %v4231_v19 = vsel %vm112_vm0, %v3896_v9, -inf  ;;  %v4215_v18 = vmax.f32 %v11914_v31, %v4214_v14  ;;  %v4054_v46 = vadd.f32 %v4053_v30, %v4052_v41  ;;  %v4198_v12 = vmax.f32 %v11920_v1, %v4197_v26 }
 0x7ac   :  { %v3906_v47 = vadd.f32 %v11677_v23, %v11883_v52  ;;  %v4105_v6 = vadd.f32 %v4104_v11, %v4103_v28  ;;  %v4249_v42 = vmax.f32 %v11932_v40, %v4248_v53  ;;  %v4138_v52 = vsel %vm112_vm0, %v3911_v34, 0.0 }
 0x7ad   :  { %v11892_v21 = vpop.f32.mrf.mxu1  ;;  %v4282_v2 = vsel %vm112_vm0, %v3911_v34, -inf  ;;  %v4088_v24 = vadd.f32 %v4087_v17, %v4086_v38  ;;  %v4139_v60 = vadd.f32 %v4138_v52, %v4137_v3 }
 0x7ae   :  { %v3921_v13 = vadd.f32 %v11892_v21, %v11677_v23  ;;  %v4232_v21 = vmax.f32 %v11942_v35, %v4231_v19  ;;  %v4265_v31 = vsel %vm112_vm0, %v3906_v47, -inf  ;;  %v4283_v59 = vmax.f32 %v11948_v7, %v4282_v2 }
 0x7af   :  { %v3915_v25 = vpop.f32.mrf.mxu1  ;;  %v4266_v39 = vmax.f32 %v11950_v20, %v4265_v31 }
 0x7b0   :  { %v3916_v48 = vadd.f32 %v11677_v23, %v3915_v25  ;;  %v4121_v25 = vsel %vm112_vm0, %v3906_v47, 0.0  ;;  %v4172_v1 = vsel %vm112_vm0, %v3921_v13, 0.0  ;;  %v4316_v28 = vsel %vm112_vm0, %v3921_v13, -inf }
 0x7b1   :  { %v8321_v50 = vpop.f32.mrf.mxu1  ;;  %v4122_v51 = vadd.f32 %v4121_v25, %v4120_v54  ;;  %v4173_v0 = vadd.f32 %v4172_v1, %v4171_v15 }
 0x7b2   :  { %v3931_v5 = vadd.f32 %v8321_v50, %v11677_v23  ;;  %v4155_v55 = vsel %vm112_vm0, %v3916_v48, 0.0  ;;  %v4299_v50 = vsel %vm112_vm0, %v3916_v48, -inf }
 0x7b3   :  { %v3925_v44 = vpop.f32.mrf.mxu1  ;;  %v4156_v35 = vadd.f32 %v4155_v55, %v4154_v62  ;;  %v4300_v61 = vmax.f32 %v11968_v58, %v4299_v50 }
 0x7b4   :  { %v3926_v10 = vadd.f32 %v11677_v23, %v3925_v44  ;;  %v4072_v45 = vsel %vm112_vm0, %v3931_v5, 0.0  ;;  %v4317_v44 = vmax.f32 %v11960_v33, %v4316_v28  ;;  %v4216_v7 = vsel %vm112_vm0, %v3931_v5, -inf }
 0x7b5   :  { %v8324_v29 = vpop.f32.mrf.mxu1  ;;  %v4073_v36 = vadd.f32 %v4072_v45, %v4071_v4  ;;  %v12010_v14 = vmax.f32 %v4215_v18, %v4216_v7 }
 0x7b6   :  { %v3941_v40 = vadd.f32 %v8324_v29, %v11677_v23  ;;  %v4055_v29 = vsel %vm112_vm0, %v3926_v10, 0.0  ;;  %v4199_v54 = vsel %vm112_vm0, %v3926_v10, -inf }
 0x7b7   :  { %v3935_v57 = vpop.f32.mrf.mxu1  ;;  %v12012_v30 = vmax.f32 %v4198_v12, %v4199_v54 }
 0x7b8   :  { %v3936_v32 = vadd.f32 %v11677_v23, %v3935_v57  ;;  %v4106_v57 = vsel %vm112_vm0, %v3941_v40, 0.0  ;;  %v4250_v16 = vsel %vm112_vm0, %v3941_v40, -inf }
 0x7b9   :  { %v8327_v8 = vpop.f32.mrf.mxu1  ;;  %v4107_v34 = vadd.f32 %v4106_v57, %v4105_v6  ;;  %v12015_v58 = vmax.f32 %v4249_v42, %v4250_v16 }
 0x7ba   :  { %v3951_v43 = vadd.f32 %v8327_v8, %v11677_v23  ;;  %v4089_v15 = vsel %vm112_vm0, %v3936_v32, 0.0  ;;  %v4233_v37 = vsel %vm112_vm0, %v3936_v32, -inf  ;;  %v4056_v8 = vadd.f32 %v4055_v29, %v4054_v46 }
 0x7bb   :  { %v3945_v63 = vpop.f32.mrf.mxu1  ;;  %v4090_v47 = vadd.f32 %v4089_v15, %v4088_v24 }
 0x7bc   :  { %v3946_v20 = vadd.f32 %v11677_v23, %v3945_v63  ;;  %v4140_v33 = vsel %vm112_vm0, %v3951_v43, 0.0  ;;  %v4284_v4 = vsel %vm112_vm0, %v3951_v43, -inf  ;;  %v12019_v63 = vmax.f32 %v4232_v21, %v4233_v37 }
 0x7bd   :  { %v8330_v22 = vpop.f32.mrf.mxu1  ;;  %v4141_v17 = vadd.f32 %v4140_v33, %v4139_v60  ;;  %v12026_v6 = vmax.f32 %v4283_v59, %v4284_v4 }
 0x7be   :  { %v3961_v62 = vadd.f32 %v8330_v22, %v11677_v23  ;;  %v4123_v19 = vsel %vm112_vm0, %v3946_v20, 0.0  ;;  %v4267_v48 = vsel %vm112_vm0, %v3946_v20, -inf }
 0x7bf   :  { %v3955_v41 = vpop.f32.mrf.mxu1  ;;  %v4124_v31 = vadd.f32 %v4123_v19, %v4122_v51 }
 0x7c0   :  { %v3956_v26 = vadd.f32 %v11677_v23, %v3955_v41  ;;  %v4174_v18 = vsel %vm112_vm0, %v3961_v62, 0.0  ;;  %v4318_v46 = vsel %vm112_vm0, %v3961_v62, -inf  ;;  %v12035_v41 = vmax.f32 %v4266_v39, %v4267_v48 }
 0x7c1   :  { %v8333_v38 = vpop.f32.mrf.mxu1  ;;  %v4175_v1 = vadd.f32 %v4174_v18, %v4173_v0  ;;  %v12037_v28 = vmax.f32 %v4317_v44, %v4318_v46 }
 0x7c2   :  { %v3971_v53 = vadd.f32 %v8333_v38, %v11677_v23  ;;  %v4157_v22 = vsel %vm112_vm0, %v3956_v26, 0.0  ;;  %v4301_v42 = vsel %vm112_vm0, %v3956_v26, -inf }
 0x7c3   :  { %v3965_v3 = vpop.f32.mrf.mxu1  ;;  %v12039_v10 = vadd.f32 %v4157_v22, %v4156_v35  ;;  %v12044_v40 = vmax.f32 %v4300_v61, %v4301_v42 }
 0x7c4   :  { %v3966_v12 = vadd.f32 %v11677_v23, %v3965_v3  ;;  %v4074_v5 = vsel %vm112_vm0, %v3971_v53, 0.0  ;;  %v4218_v24 = vsel %vm112_vm0, %v3971_v53, -inf }
 0x7c5   :  { %v8336_v9 = vpop.f32.mrf.mxu1  ;;  %v4075_v38 = vadd.f32 %v4074_v5, %v4073_v36  ;;  %v4219_v45 = vmax.f32 %v12010_v14, %v4218_v24 }
 0x7c6   :  { %v3981_v52 = vadd.f32 %v8336_v9, %v11677_v23  ;;  %v4057_v60 = vsel %vm112_vm0, %v3966_v12, 0.0  ;;  %v4201_v59 = vsel %vm112_vm0, %v3966_v12, -inf }
 0x7c7   :  { %v3975_v11 = vpop.f32.mrf.mxu1  ;;  %v4058_v35 = vadd.f32 %v4057_v60, %v4056_v8  ;;  %v4202_v3 = vmax.f32 %v12012_v30, %v4201_v59 }
 0x7c8   :  { %v3976_v21 = vadd.f32 %v11677_v23, %v3975_v11  ;;  %v4108_v51 = vsel %vm112_vm0, %v3981_v52, 0.0  ;;  %v4252_v43 = vsel %vm112_vm0, %v3981_v52, -inf }
 0x7c9   :  { %v8339_v13 = vpop.f32.mrf.mxu1  ;;  %v4109_v54 = vadd.f32 %v4108_v51, %v4107_v34  ;;  %v4253_v20 = vmax.f32 %v12015_v58, %v4252_v43 }
 0x7ca   :  { %v3991_v25 = vadd.f32 %v8339_v13, %v11677_v23  ;;  %v4091_v39 = vsel %vm112_vm0, %v3976_v21, 0.0  ;;  %v4235_v0 = vsel %vm112_vm0, %v3976_v21, -inf }
 0x7cb   :  { %v3985_v2 = vpop.f32.mrf.mxu1  ;;  %v4092_v9 = vadd.f32 %v4091_v39, %v4090_v47  ;;  %v4236_v15 = vmax.f32 %v12019_v63, %v4235_v0 }
 0x7cc   :  { %v3986_v50 = vadd.f32 %v11677_v23, %v3985_v2  ;;  %v4142_v44 = vsel %vm112_vm0, %v3991_v25, 0.0  ;;  %v12054_v61 = vsel %vm112_vm0, %v3991_v25, -inf }
 0x7cd   :  { %v8342_v55 = vpop.f32.mrf.mxu1  ;;  %v4143_v37 = vadd.f32 %v4142_v44, %v4141_v17  ;;  %v4287_v62 = vmax.f32 %v12026_v6, %v12054_v61 }
 0x7ce   :  { %v4001_v7 = vadd.f32 %v8342_v55, %v11677_v23  ;;  %v4125_v36 = vsel %vm112_vm0, %v3986_v50, 0.0  ;;  %v12059_v57 = vsel %vm112_vm0, %v3986_v50, -inf }
 0x7cf   :  { %v3995_v32 = vpop.f32.mrf.mxu1  ;;  %v4126_v26 = vadd.f32 %v4125_v36, %v4124_v31  ;;  %v4270_v11 = vmax.f32 %v12035_v41, %v12059_v57 }
 0x7d0   :  { %v4176_v34 = vsel %vm112_vm0, %v4001_v7, 0.0  ;;  %v12073_v53 = vsel %vm112_vm0, %v4001_v7, -inf  ;;  %v3996_v19 = vadd.f32 %v11677_v23, %v3995_v32 }
 0x7d1   :  { %v8345_v29 = vpop.f32.mrf.mxu1  ;;  %v4177_v12 = vadd.f32 %v4176_v34, %v4175_v1  ;;  %v4321_v25 = vmax.f32 %v12037_v28, %v12073_v53 }
 0x7d2   :  { %v4011_v16 = vadd.f32 %v8345_v29, %v11677_v23  ;;  %v4303_v61 = vsel %vm112_vm0, %v3996_v19, -inf }
 0x7d3   :  { %v4005_v33 = vpop.f32.mrf.mxu1 }
 0x7d4   :  { %v4076_v14 = vsel %vm112_vm0, %v4011_v16, 0.0  ;;  %v4220_v8 = vsel %vm112_vm0, %v4011_v16, -inf  ;;  %v4006_v30 = vadd.f32 %v11677_v23, %v4005_v33 }
 0x7d5   :  { %v4077_v58 = vadd.f32 %v4076_v14, %v4075_v38  ;;  %v8348_v4 = vpop.f32.mrf.mxu1  ;;  %v4221_v48 = vmax.f32 %v4219_v45, %v4220_v8  ;;  %v4159_v45 = vsel %vm112_vm0, %v3996_v19, 0.0  ;;  %v8856_v19 = vld [vmem:[%s13790_s0 + $0x248] sm:$0xff] }
 0x7d6   :  { %v4059_v47 = vsel %vm112_vm0, %v4006_v30, 0.0  ;;  %v4203_v63 = vsel %vm112_vm0, %v4006_v30, -inf  ;;  %v4021_v17 = vadd.f32 %v8348_v4, %v11677_v23 }
 0x7d7   :  { %v4181_v13 = vmul.f32 0.11111111, %v4077_v58  ;;  %v4060_v18 = vadd.f32 %v4059_v47, %v4058_v35  ;;  %v4015_v46 = vpop.f32.mrf.mxu1  ;;  %v4204_v5 = vmax.f32 %v4202_v3, %v4203_v63  ;;  %v7048_v3 = vld [vmem:[%s13793_s3 + $0x10] sm:$0xff] }
 0x7d8   :  { %v4110_v6 = vsel %vm112_vm0, %v4021_v17, 0.0  ;;  %v4254_v22 = vsel %vm112_vm0, %v4021_v17, -inf  ;;  %v4016_v42 = vadd.f32 %v11677_v23, %v4015_v46  ;;  %v8860_v46 = vld [vmem:[%s13790_s0 + $0x268] sm:$0xff] }
 0x7d9   :  { %v4325_v52 = vadd.f32 %v4221_v48, %v4181_v13  ;;  %v4180_v2 = vmul.f32 0.11111111, %v4060_v18  ;;  %v4111_v24 = vadd.f32 %v4110_v6, %v4109_v54  ;;  %v8351_v21 = vpop.f32.mrf.mxu1  ;;  %v4255_v59 = vmax.f32 %v4253_v20, %v4254_v22  ;;  %v8857_v13 = vld [vmem:[%s13790_s0 + $0x250] sm:$0xff]  ;;  %v8858_v48 = vld [vmem:[%s13790_s0 + $0x258] sm:$0xff]  ;;  %v8859_v18 = vld [vmem:[%s13790_s0 + $0x260] sm:$0xff] }
 0x7da   :  { %v4093_v31 = vsel %vm112_vm0, %v4016_v42, 0.0  ;;  %v4237_v41 = vsel %vm112_vm0, %v4016_v42, -inf  ;;  %v4031_v1 = vadd.f32 %v8351_v21, %v11677_v23  ;;  %v8862_v6 = vld [vmem:[%s13790_s0 + $0x278] sm:$0xff]  ;;  %v8863_v22 = vld [vmem:[%s13790_s0 + $0x280] sm:$0xff]  ;;  %v8864_v42 = vld [vmem:[%s13790_s0 + $0x288] sm:$0xff] }
 0x7db   :  { %v4324_v55 = vadd.f32 %v4204_v5, %v4180_v2  ;;  %v4183_v60 = vmul.f32 0.11111111, %v4111_v24  ;;  %v4094_v50 = vadd.f32 %v4093_v31, %v4092_v9  ;;  %v4025_v38 = vpop.f32.mrf.mxu1  ;;  %v4238_v0 = vmax.f32 %v4236_v15, %v4237_v41  ;;  %v8866_v2 = vld [vmem:[%s13790_s0 + $0x298] sm:$0xff]  ;;  %v8867_v5 = vld [vmem:[%s13790_s0 + $0x2a0] sm:$0xff]  ;;  %v8868_v24 = vld [vmem:[%s13790_s0 + $0x2a8] sm:$0xff] }
 0x7dc   :  { %v4144_v51 = vsel %vm112_vm0, %v4031_v1, 0.0  ;;  %v4288_v32 = vsel %vm112_vm0, %v4031_v1, -inf  ;;  %v4026_v43 = vadd.f32 %v11677_v23, %v4025_v38  ;;  %v4160_v15 = vadd.f32 %v4159_v45, %v12039_v10  ;;  %v8869_v21 = vld [vmem:[%s13790_s0 + $0x2b0] sm:$0xff]  ;;  %v8871_v31 = vld [vmem:[%s13790_s0 + $0x2c0] sm:$0xff]  ;;  %v8872_v41 = vld [vmem:[%s13790_s0 + $0x2c8] sm:$0xff] }
 0x7dd   :  { %v4327_v28 = vadd.f32 %v4255_v59, %v4183_v60  ;;  %v4182_v39 = vmul.f32 0.11111111, %v4094_v50  ;;  %v4145_v44 = vadd.f32 %v4144_v51, %v4143_v37  ;;  %v8354_v35 = vpop.f32.mrf.mxu1  ;;  %8359 = vmatprep.mubr.msk.f32.mxu0 %vm112_vm0, %v4324_v55  ;;  %v4289_v16 = vmax.f32 %v4287_v62, %v4288_v32  ;;  %v8873_v1 = vld [vmem:[%s13790_s0 + $0x2d0] sm:$0xff]  ;;  %v8874_v55 = vld [vmem:[%s13790_s0 + $0x2d8] sm:$0xff]  ;;  %v8875_v60 = vld [vmem:[%s13790_s0 + $0x2e0] sm:$0xff] }
 0x7de   :  { %v4127_v7 = vsel %vm112_vm0, %v4026_v43, 0.0  ;;  %v4271_v29 = vsel %vm112_vm0, %v4026_v43, -inf  ;;  %v4041_v54 = vadd.f32 %v8354_v35, %v11677_v23  ;;  %8360 = vmatmul.mubr.msk.f32.vlgmr.msra.gmra.mxu0 %vm112_vm0, %v4325_v52  ;;  %v4304_v62 = vmax.f32 %v12044_v40, %v4303_v61  ;;  %v8855_v40 = vld [vmem:[%s13790_s0 + $0x240] sm:$0xff]  ;;  %v8865_v52 = vld [vmem:[%s13790_s0 + $0x290] sm:$0xff]  ;;  %v8876_v59 = vld [vmem:[%s13790_s0 + $0x2e8] sm:$0xff] }
 0x7df   :  { %v4326_v36 = vadd.f32 %v4238_v0, %v4182_v39  ;;  %v4185_v57 = vmul.f32 0.11111111, %v4145_v44  ;;  %v4128_v20 = vadd.f32 %v4127_v7, %v4126_v26  ;;  %v4035_v9 = vpop.f32.mrf.mxu1  ;;  %8372 = vmatpush3.msra.mxu0 %v11697_v49  ;;  %v4272_v34 = vmax.f32 %v4270_v11, %v4271_v29  ;;  %v8877_v50 = vld [vmem:[%s13790_s0 + $0x2f0] sm:$0xff]  ;;  %v8878_v38 = vld [vmem:[%s13790_s0 + $0x2f8] sm:$0xff]  ;;  %v8879_v45 = vld [vmem:[%s13790_s0 + $0x300] sm:$0xff] }
 0x7e0   :  { %v4178_v37 = vsel %vm112_vm0, %v4041_v54, 0.0  ;;  %v4322_v33 = vsel %vm112_vm0, %v4041_v54, -inf  ;;  %v4036_v14 = vadd.f32 %v11677_v23, %v4035_v9  ;;  %8373 = vmatprep.subr.mxu0 %v7048_v3  ;;  %v8880_v51 = vld [vmem:[%s13790_s0 + $0x308] sm:$0xff]  ;;  %v8881_v32 = vld [vmem:[%s13790_s0 + $0x310] sm:$0xff]  ;;  %v8882_v43 = vld [vmem:[%s13790_s0 + $0x318] sm:$0xff] }
 0x7e1   :  { %v4329_v8 = vadd.f32 %v4289_v16, %v4185_v57  ;;  %v4184_v30 = vmul.f32 0.11111111, %v4128_v20  ;;  %v4179_v58 = vadd.f32 %v4178_v37, %v4177_v12  ;;  %8362 = vmatprep.mubr.msk.f32.mxu0 %vm112_vm0, %v4326_v36  ;;  %8374 = vmatpush3.msra.mxu0 %v7048_v3  ;;  %v4323_v53 = vmax.f32 %v4321_v25, %v4322_v33  ;;  %v8861_v12 = vld [vmem:[%s13790_s0 + $0x270] sm:$0xff]  ;;  %v8870_v25 = vld [vmem:[%s13790_s0 + $0x2b8] sm:$0xff]  ;;  %v8884_v39 = vld [vmem:[%s13790_s0 + $0x328] sm:$0xff] }
 0x7e2   :  { %v4161_v49 = vsel %vm112_vm0, %v4036_v14, 0.0  ;;  %v4305_v10 = vsel %vm112_vm0, %v4036_v14, -inf  ;;  %8363 = vmatmul.mubr.msk.f32.gmra.mxu0 %vm112_vm0, %v4327_v28  ;;  %v8883_v28 = vld [vmem:[%s13790_s0 + $0x320] sm:$0xff]  ;;  %v8885_v0 = vld [vmem:[%s13790_s0 + $0x330] sm:$0xff]  ;;  %v8886_v44 = vld [vmem:[%s13790_s0 + $0x338] sm:$0xff] }
 0x7e3   :  { %v4328_v26 = vadd.f32 %v4272_v34, %v4184_v30  ;;  %v4187_v4 = vmul.f32 0.11111111, %v4179_v58  ;;  %v4162_v23 = vadd.f32 %v4161_v49, %v4160_v15  ;;  %v4306_v17 = vmax.f32 %v4304_v62, %v4305_v10  ;;  %v8887_v35 = vld [vmem:[%s13790_s0 + $0x340] sm:$0xff]  ;;  %v8888_v3 = vld [vmem:[%s13790_s0 + $0x348] sm:$0xff]  ;;  %v8889_v61 = vld [vmem:[%s13790_s0 + $0x350] sm:$0xff] }
 0x7e4   :  { %v8890_v7 = vld [vmem:[%s13790_s0 + $0x358] sm:$0xff]  ;;  %v8891_v29 = vld [vmem:[%s13790_s0 + $0x360] sm:$0xff]  ;;  %v8892_v54 = vld [vmem:[%s13790_s0 + $0x368] sm:$0xff] }
 0x7e5   :  { %v4331_v47 = vadd.f32 %v4323_v53, %v4187_v4  ;;  %v4186_v63 = vmul.f32 0.11111111, %v4162_v23  ;;  %8365 = vmatprep.mubr.msk.f32.mxu0 %vm112_vm0, %v4328_v26  ;;  %v8893_v36 = vld [vmem:[%s13790_s0 + $0x370] sm:$0xff]  ;;  %v8894_v57 = vld [vmem:[%s13790_s0 + $0x378] sm:$0xff]  ;;  %v8895_v16 = vld [vmem:[%s13790_s0 + $0x380] sm:$0xff] }
 0x7e6   :  { %8366 = vmatmul.mubr.msk.f32.gmra.mxu0 %vm112_vm0, %v4329_v8  ;;  %v8896_v20 = vld [vmem:[%s13790_s0 + $0x388] sm:$0xff]  ;;  %v8897_v9 = vld [vmem:[%s13790_s0 + $0x390] sm:$0xff]  ;;  %v8898_v15 = vld [vmem:[%s13790_s0 + $0x398] sm:$0xff] }
 0x7e7   :  { %v4330_v11 = vadd.f32 %v4306_v17, %v4186_v63  ;;  %v8899_v37 = vld [vmem:[%s13790_s0 + $0x3a0] sm:$0xff]  ;;  %v8900_v33 = vld [vmem:[%s13790_s0 + $0x3a8] sm:$0xff]  ;;  %v8901_v14 = vld [vmem:[%s13790_s0 + $0x3b0] sm:$0xff] }
 0x7e8   :  { %v8902_v8 = vld [vmem:[%s13790_s0 + $0x3b8] sm:$0xff]  ;;  %v8903_v30 = vld [vmem:[%s13790_s0 + $0x3c0] sm:$0xff]  ;;  %v8904_v34 = vld [vmem:[%s13790_s0 + $0x3c8] sm:$0xff] }
 0x7e9   :  { %8368 = vmatprep.mubr.msk.f32.mxu0 %vm112_vm0, %v4330_v11  ;;  %v8905_v58 = vld [vmem:[%s13790_s0 + $0x3d0] sm:$0xff]  ;;  %v8906_v62 = vld [vmem:[%s13790_s0 + $0x3d8] sm:$0xff]  ;;  %v8907_v49 = vld [vmem:[%s13790_s0 + $0x3e0] sm:$0xff] }
 0x7ea   :  { %8369 = vmatmul.mubr.msk.f32.gmra.mxu0 %vm112_vm0, %v4331_v47  ;;  %v8908_v10 = vld [vmem:[%s13790_s0 + $0x3e8] sm:$0xff]  ;;  %v8909_v26 = vld [vmem:[%s13790_s0 + $0x3f0] sm:$0xff]  ;;  %v8910_v4 = vld [vmem:[%s13790_s0 + $0x3f8] sm:$0xff] }
 0x7eb   :  { %8375 = vmatprep.mubr.msk.f32.mxu0 %vm112_vm0, %v8855_v40  ;;  %v8911_v53 = vld [vmem:[%s13790_s0 + $0x400] sm:$0xff]  ;;  %v8912_v23 = vld [vmem:[%s13790_s0 + $0x408] sm:$0xff]  ;;  %v8913_v47 = vld [vmem:[%s13790_s0 + $0x410] sm:$0xff] }
 0x7ec   :  { %v8914_v63 = vld [vmem:[%s13790_s0 + $0x418] sm:$0xff]  ;;  %v8915_v17 = vld [vmem:[%s13790_s0 + $0x420] sm:$0xff]  ;;  %v8916_v11 = vld [vmem:[%s13790_s0 + $0x428] sm:$0xff] }
 0x7ed   :  { %v8917_v40 = vld [vmem:[%s13790_s0 + $0x430] sm:$0xff] }
 0x7ee   :  { %8376 = vmatmul.mubr.msk.f32.vlgmr.msra.gmra.mxu0 %vm112_vm0, %v8856_v19  ;;  %v8918_v19 = vld [vmem:[%s13790_s0 + $0x438] sm:$0xff] }
 0x7ef   :  { %8378 = vmatprep.mubr.msk.f32.mxu0 %vm112_vm0, %v8857_v13  ;;  %v8919_v13 = vld [vmem:[%s13790_s0 + $0x440] sm:$0xff] }
 0x7f2   :  { %8379 = vmatmul.mubr.msk.f32.gmra.mxu0 %vm112_vm0, %v8858_v48  ;;  %v8920_v48 = vld [vmem:[%s13790_s0 + $0x448] sm:$0xff] }
 0x7f3   :  { %8381 = vmatprep.mubr.msk.f32.mxu0 %vm112_vm0, %v8859_v18  ;;  %v8921_v18 = vld [vmem:[%s13790_s0 + $0x450] sm:$0xff] }
 0x7f6   :  { %8382 = vmatmul.mubr.msk.f32.gmra.mxu0 %vm112_vm0, %v8860_v46  ;;  %v8922_v46 = vld [vmem:[%s13790_s0 + $0x458] sm:$0xff] }
 0x7f7   :  { %8384 = vmatprep.mubr.msk.f32.mxu0 %vm112_vm0, %v8861_v12  ;;  %v8923_v12 = vld [vmem:[%s13790_s0 + $0x460] sm:$0xff] }
 0x7fa   :  { %8385 = vmatmul.mubr.msk.f32.gmra.mxu0 %vm112_vm0, %v8862_v6  ;;  %v8924_v6 = vld [vmem:[%s13790_s0 + $0x468] sm:$0xff] }
 0x7fb   :  { %8387 = vmatprep.mubr.msk.f32.mxu0 %vm112_vm0, %v8863_v22  ;;  %v8925_v22 = vld [vmem:[%s13790_s0 + $0x470] sm:$0xff] }
 0x7fe   :  { %8388 = vmatmul.mubr.msk.f32.gmra.mxu0 %vm112_vm0, %v8864_v42  ;;  %v8926_v42 = vld [vmem:[%s13790_s0 + $0x478] sm:$0xff] }
 0x7ff   :  { %8390 = vmatprep.mubr.msk.f32.mxu0 %vm112_vm0, %v8865_v52 }
 0x802   :  { %8391 = vmatmul.mubr.msk.f32.gmra.mxu0 %vm112_vm0, %v8866_v2  ;;  %v7039_v2 = vld [vmem:[%s13796_s6] ss:$0 sm:$0xff] }
 0x803   :  { %8393 = vmatprep.mubr.msk.f32.mxu0 %vm112_vm0, %v8867_v5 }
 0x806   :  { %8394 = vmatmul.mubr.msk.f32.gmra.mxu0 %vm112_vm0, %v8868_v24 }
 0x807   :  { %8396 = vmatprep.mubr.msk.f32.mxu0 %vm112_vm0, %v8869_v21 }
 0x80a   :  { %8397 = vmatmul.mubr.msk.f32.gmra.mxu0 %vm112_vm0, %v8870_v25 }
 0x80b   :  { %8399 = vmatprep.mubr.msk.f32.mxu0 %vm112_vm0, %v8871_v31 }
 0x80e   :  { %8400 = vmatmul.mubr.msk.f32.gmra.mxu0 %vm112_vm0, %v8872_v41 }
 0x80f   :  { %8402 = vmatprep.mubr.msk.f32.mxu0 %vm112_vm0, %v8873_v1 }
 0x812   :  { %8403 = vmatmul.mubr.msk.f32.gmra.mxu0 %vm112_vm0, %v8874_v55 }
 0x813   :  { %8405 = vmatprep.mubr.msk.f32.mxu0 %vm112_vm0, %v8875_v60 }
 0x816   :  { %8406 = vmatmul.mubr.msk.f32.gmra.mxu0 %vm112_vm0, %v8876_v59 }
 0x817   :  { %8408 = vmatprep.mubr.msk.f32.mxu0 %vm112_vm0, %v8877_v50 }
 0x81a   :  { %8409 = vmatmul.mubr.msk.f32.gmra.mxu0 %vm112_vm0, %v8878_v38 }
 0x81b   :  { %8411 = vmatprep.mubr.msk.f32.mxu0 %vm112_vm0, %v8879_v45 }
 0x81e   :  { %8412 = vmatmul.mubr.msk.f32.gmra.mxu0 %vm112_vm0, %v8880_v51 }
 0x81f   :  { %8414 = vmatprep.mubr.msk.f32.mxu0 %vm112_vm0, %v8881_v32 }
 0x822   :  { %8415 = vmatmul.mubr.msk.f32.gmra.mxu0 %vm112_vm0, %v8882_v43 }
 0x823   :  { %8417 = vmatprep.mubr.msk.f32.mxu0 %vm112_vm0, %v8883_v28 }
 0x826   :  { %8418 = vmatmul.mubr.msk.f32.gmra.mxu0 %vm112_vm0, %v8884_v39 }
 0x827   :  { %8420 = vmatprep.mubr.msk.f32.mxu0 %vm112_vm0, %v8885_v0 }
 0x82a   :  { %8421 = vmatmul.mubr.msk.f32.gmra.mxu0 %vm112_vm0, %v8886_v44 }
 0x82b   :  { %8423 = vmatprep.mubr.msk.f32.mxu0 %vm112_vm0, %v8887_v35 }
 0x82e   :  { %8424 = vmatmul.mubr.msk.f32.gmra.mxu0 %vm112_vm0, %v8888_v3  ;;  %v12431_v3 = vld [vmem:[%s13794_s4 + $0x1] ss:$0 sm:$0xff] }
 0x82f   :  { %8426 = vmatprep.mubr.msk.f32.mxu0 %vm112_vm0, %v8889_v61 }
 0x832   :  { %8427 = vmatmul.mubr.msk.f32.gmra.mxu0 %vm112_vm0, %v8890_v7 }
 0x833   :  { %8429 = vmatprep.mubr.msk.f32.mxu0 %vm112_vm0, %v8891_v29 }
 0x836   :  { %8430 = vmatmul.mubr.msk.f32.gmra.mxu0 %vm112_vm0, %v8892_v54 }
 0x837   :  { %8432 = vmatprep.mubr.msk.f32.mxu0 %vm112_vm0, %v8893_v36 }
 0x83a   :  { %8433 = vmatmul.mubr.msk.f32.gmra.mxu0 %vm112_vm0, %v8894_v57 }
 0x83b   :  { %8435 = vmatprep.mubr.msk.f32.mxu0 %vm112_vm0, %v8895_v16 }
 0x83e   :  { %8436 = vmatmul.mubr.msk.f32.gmra.mxu0 %vm112_vm0, %v8896_v20 }
 0x83f   :  { %8438 = vmatprep.mubr.msk.f32.mxu0 %vm112_vm0, %v8897_v9 }
 0x842   :  { %8439 = vmatmul.mubr.msk.f32.gmra.mxu0 %vm112_vm0, %v8898_v15 }
 0x843   :  { %8441 = vmatprep.mubr.msk.f32.mxu0 %vm112_vm0, %v8899_v37 }
 0x846   :  { %8442 = vmatmul.mubr.msk.f32.gmra.mxu0 %vm112_vm0, %v8900_v33 }
 0x847   :  { %8444 = vmatprep.mubr.msk.f32.mxu0 %vm112_vm0, %v8901_v14 }
 0x84a   :  { %8445 = vmatmul.mubr.msk.f32.gmra.mxu0 %vm112_vm0, %v8902_v8 }
 0x84b   :  { %8447 = vmatprep.mubr.msk.f32.mxu0 %vm112_vm0, %v8903_v30 }
 0x84e   :  { %8448 = vmatmul.mubr.msk.f32.gmra.mxu0 %vm112_vm0, %v8904_v34 }
 0x84f   :  { %8450 = vmatprep.mubr.msk.f32.mxu0 %vm112_vm0, %v8905_v58 }
 0x852   :  { %8451 = vmatmul.mubr.msk.f32.gmra.mxu0 %vm112_vm0, %v8906_v62 }
 0x853   :  { %8453 = vmatprep.mubr.msk.f32.mxu0 %vm112_vm0, %v8907_v49 }
 0x856   :  { %8454 = vmatmul.mubr.msk.f32.gmra.mxu0 %vm112_vm0, %v8908_v10 }
 0x857   :  { %8456 = vmatprep.mubr.msk.f32.mxu0 %vm112_vm0, %v8909_v26 }
 0x85a   :  { %8457 = vmatmul.mubr.msk.f32.gmra.mxu0 %vm112_vm0, %v8910_v4 }
 0x85b   :  { %8459 = vmatprep.mubr.msk.f32.mxu0 %vm112_vm0, %v8911_v53 }
 0x85e   :  { %8460 = vmatmul.mubr.msk.f32.gmra.mxu0 %vm112_vm0, %v8912_v23 }
 0x85f   :  { %8462 = vmatprep.mubr.msk.f32.mxu0 %vm112_vm0, %v8913_v47 }
 0x862   :  { %8463 = vmatmul.mubr.msk.f32.gmra.mxu0 %vm112_vm0, %v8914_v63 }
 0x863   :  { %8465 = vmatprep.mubr.msk.f32.mxu0 %vm112_vm0, %v8915_v17 }
 0x866   :  { %8466 = vmatmul.mubr.msk.f32.gmra.mxu0 %vm112_vm0, %v8916_v11 }
 0x867   :  { %8468 = vmatprep.mubr.msk.f32.mxu0 %vm112_vm0, %v8917_v40 }
 0x86a   :  { %8469 = vmatmul.mubr.msk.f32.gmra.mxu0 %vm112_vm0, %v8918_v19 }
 0x86b   :  { %8471 = vmatprep.mubr.msk.f32.mxu0 %vm112_vm0, %v8919_v13 }
 0x86e   :  { %8472 = vmatmul.mubr.msk.f32.gmra.mxu0 %vm112_vm0, %v8920_v48 }
 0x86f   :  { %8474 = vmatprep.mubr.msk.f32.mxu0 %vm112_vm0, %v8921_v18 }
 0x872   :  { %8475 = vmatmul.mubr.msk.f32.gmra.mxu0 %vm112_vm0, %v8922_v46 }
 0x873   :  { %8477 = vmatprep.mubr.msk.f32.mxu0 %vm112_vm0, %v8923_v12 }
 0x876   :  { %8478 = vmatmul.mubr.msk.f32.gmra.mxu0 %vm112_vm0, %v8924_v6 }
 0x877   :  { %8480 = vmatprep.mubr.msk.f32.mxu0 %vm112_vm0, %v8925_v22 }
 0x87a   :  { %8481 = vmatmul.mubr.msk.f32.gmra.mxu0 %vm112_vm0, %v8926_v42 }
 0x89e   :  { %v8361_v52 = vpop.f32.mrf.mxu0 }
 0x89f   :  { %v12408_v31 = vadd.f32 %v8361_v52, %v7039_v2 }
 0x8a0   :  { %v4431_v5 = vpop.f32.mrf.mxu0 }
 0x8a1   :  { %v12405_v24 = vadd.f32 %v7039_v2, %v4431_v5 }
 0x8a2   :  { %v8364_v21 = vpop.f32.mrf.mxu0 }
 0x8a3   :  { %5434 = vxpose.xlu1.b32.start [1/8] (short) (narrow) %v12405_v24, 16  ;;  %v12416_v38 = vadd.f32 %v8364_v21, %v7039_v2 }
 0x8a4   :  { %v4441_v25 = vpop.f32.mrf.mxu0 }
 0x8a5   :  { %v12411_v55 = vadd.f32 %v7039_v2, %v4441_v25 }
 0x8a6   :  { %v8367_v41 = vpop.f32.mrf.mxu0 }
 0x8a7   :  { %5435 = vxpose.xlu1.b32.cont [2/8] (short) (narrow) %v12408_v31, 16  ;;  %v12423_v39 = vadd.f32 %v8367_v41, %v7039_v2 }
 0x8a8   :  { %v4451_v1 = vpop.f32.mrf.mxu0 }
 0x8a9   :  { %v12420_v32 = vadd.f32 %v7039_v2, %v4451_v1 }
 0x8aa   :  { %v8370_v60 = vpop.f32.mrf.mxu0 }
 0x8ab   :  { %v12413_v59 = vadd.f32 %v8370_v60, %v7039_v2  ;;  %5436 = vxpose.xlu1.b32.cont [3/8] (short) (narrow) %v12411_v55, 16 }
 0x8ac   :  { %v4461_v50 = vpop.f32.mrf.mxu0 }
 0x8ad   :  { %8518 = vmatprep.subr.mxu1 %v12413_v59  ;;  %v12426_v35 = vadd.f32 %v7039_v2, %v4461_v50 }
 0x8ae   :  { %v8377_v45 = vpop.f32.mrf.mxu0 }
 0x8af   :  { %5437 = vxpose.xlu1.b32.cont [4/8] (short) (narrow) %v12416_v38, 16  ;;  %v4551_v7 = vadd.f32 %v8377_v45, %v12431_v3 }
 0x8b0   :  { %v4545_v51 = vpop.f32.mrf.mxu0 }
 0x8b1   :  { %v4546_v54 = vadd.f32 %v12431_v3, %v4545_v51  ;;  %v4921_v16 = vsel %vm112_vm0, %v4551_v7, 0.0  ;;  %v12441_v15 = vsel %vm112_vm0, %v4551_v7, -inf }
 0x8b2   :  { %v8380_v43 = vpop.f32.mrf.mxu0 }
 0x8b3   :  { %5438 = vxpose.xlu1.b32.cont [5/8] (short) (narrow) %v12420_v32, 16  ;;  %v4561_v20 = vadd.f32 %v8380_v43, %v12431_v3  ;;  %v4904_v8 = vsel %vm112_vm0, %v4546_v54, 0.0  ;;  %v12455_v49 = vsel %vm112_vm0, %v4546_v54, -inf }
 0x8b4   :  { %v4555_v28 = vpop.f32.mrf.mxu0 }
 0x8b5   :  { %v4556_v30 = vadd.f32 %v12431_v3, %v4555_v28  ;;  %v4955_v53 = vsel %vm112_vm0, %v4561_v20, 0.0  ;;  %v12467_v11 = vsel %vm112_vm0, %v4561_v20, -inf }
 0x8b6   :  { %v8383_v0 = vpop.f32.mrf.mxu0 }
 0x8b7   :  { %5439 = vxpose.xlu1.b32.cont [6/8] (short) (narrow) %v12423_v39, 16  ;;  %v4571_v23 = vadd.f32 %v8383_v0, %v12431_v3  ;;  %v4938_v48 = vsel %vm112_vm0, %v4556_v30, 0.0  ;;  %v12479_v22 = vsel %vm112_vm0, %v4556_v30, -inf }
 0x8b8   :  { %v4565_v44 = vpop.f32.mrf.mxu0 }
 0x8b9   :  { %v4566_v18 = vadd.f32 %v12431_v3, %v4565_v44  ;;  %v4989_v5 = vsel %vm112_vm0, %v4571_v23, 0.0  ;;  %v5133_v60 = vsel %vm112_vm0, %v4571_v23, -inf }
 0x8ba   :  { %v8386_v61 = vpop.f32.mrf.mxu0 }
 0x8bb   :  { %5440 = vxpose.xlu1.b32.cont [7/8] (short) (narrow) %v12426_v35, 16  ;;  %v4581_v21 = vadd.f32 %v8386_v61, %v12431_v3  ;;  %v4972_v43 = vsel %vm112_vm0, %v4566_v18, 0.0  ;;  %v5116_v61 = vsel %vm112_vm0, %v4566_v18, -inf }
 0x8bc   :  { %v4575_v29 = vpop.f32.mrf.mxu0 }
 0x8bd   :  { %v4576_v28 = vadd.f32 %v12431_v3, %v4575_v29 }
 0x8be   :  { %v8389_v36 = vpop.f32.mrf.mxu0 }
 0x8bf   :  { %v4591_v57 = vadd.f32 %v8389_v36, %v12431_v3  ;;  %5441 = vxpose.xlu1.b32.end [8/8] (short) (narrow) %v12413_v59, 16 }
 0x8c0   :  { %v4585_v9 = vpop.f32.mrf.mxu0 }
 0x8c1   :  { %v4922_v37 = vsel %vm112_vm0, %v4591_v57, 0.0  ;;  %v12445_v33 = vsel %vm112_vm0, %v4591_v57, -inf  ;;  %v4586_v14 = vadd.f32 %v12431_v3, %v4585_v9 }
 0x8c2   :  { %v12450_v34 = vadd.f32 %v4922_v37, %v4921_v16  ;;  %v5067_v58 = vmax.f32 %v12441_v15, %v12445_v33  ;;  %v8392_v62 = vpop.f32.mrf.mxu0  ;;  %v5023_v16 = vsel %vm112_vm0, %v4581_v21, 0.0 }
 0x8c3   :  { %v4905_v10 = vsel %vm112_vm0, %v4586_v14, 0.0  ;;  %v12459_v26 = vsel %vm112_vm0, %v4586_v14, -inf  ;;  %v4601_v4 = vadd.f32 %v8392_v62, %v12431_v3  ;;  %v5167_v14 = vsel %vm112_vm0, %v4581_v21, -inf }
 0x8c4   :  { %v4906_v47 = vadd.f32 %v4905_v10, %v4904_v8  ;;  %v5050_v63 = vmax.f32 %v12455_v49, %v12459_v26  ;;  %v4595_v17 = vpop.f32.mrf.mxu0  ;;  %v5006_v62 = vsel %vm112_vm0, %v4576_v28, 0.0 }
 0x8c5   :  { %v4956_v40 = vsel %vm112_vm0, %v4601_v4, 0.0  ;;  %v12471_v19 = vsel %vm112_vm0, %v4601_v4, -inf  ;;  %v4596_v13 = vadd.f32 %v12431_v3, %v4595_v17  ;;  %v5150_v4 = vsel %vm112_vm0, %v4576_v28, -inf }
 0x8c6   :  { %v4957_v46 = vadd.f32 %v4956_v40, %v4955_v53  ;;  %v5101_v12 = vmax.f32 %v12467_v11, %v12471_v19  ;;  %v8395_v6 = vpop.f32.mrf.mxu0 }
 0x8c7   :  { %v4939_v42 = vsel %vm112_vm0, %v4596_v13, 0.0  ;;  %v5083_v52 = vsel %vm112_vm0, %v4596_v13, -inf  ;;  %v4611_v2 = vadd.f32 %v8395_v6, %v12431_v3 }
 0x8c8   :  { %v4940_v25 = vadd.f32 %v4939_v42, %v4938_v48  ;;  %v5084_v41 = vmax.f32 %v12479_v22, %v5083_v52  ;;  %v4605_v1 = vpop.f32.mrf.mxu0 }
 0x8c9   :  { %v4990_v50 = vsel %vm112_vm0, %v4611_v2, 0.0  ;;  %v5134_v45 = vsel %vm112_vm0, %v4611_v2, -inf  ;;  %v4606_v51 = vadd.f32 %v12431_v3, %v4605_v1 }
 0x8ca   :  { %v4991_v0 = vadd.f32 %v4990_v50, %v4989_v5  ;;  %v5135_v44 = vmax.f32 %v5133_v60, %v5134_v45  ;;  %v8398_v7 = vpop.f32.mrf.mxu0 }
 0x8cb   :  { %v4973_v54 = vsel %vm112_vm0, %v4606_v51, 0.0  ;;  %v5117_v36 = vsel %vm112_vm0, %v4606_v51, -inf  ;;  %v4621_v57 = vadd.f32 %v8398_v7, %v12431_v3 }
 0x8cc   :  { %v4974_v20 = vadd.f32 %v4973_v54, %v4972_v43  ;;  %v5118_v9 = vmax.f32 %v5116_v61, %v5117_v36  ;;  %v4615_v37 = vpop.f32.mrf.mxu0 }
 0x8cd   :  { %v5024_v29 = vsel %vm112_vm0, %v4621_v57, 0.0  ;;  %v5168_v8 = vsel %vm112_vm0, %v4621_v57, -inf  ;;  %v4616_v30 = vadd.f32 %v12431_v3, %v4615_v37 }
 0x8ce   :  { %v5025_v49 = vadd.f32 %v5024_v29, %v5023_v16  ;;  %v5169_v10 = vmax.f32 %v5167_v14, %v5168_v8  ;;  %v8401_v26 = vpop.f32.mrf.mxu0 }
 0x8cf   :  { %v5007_v53 = vsel %vm112_vm0, %v4616_v30, 0.0  ;;  %v5151_v23 = vsel %vm112_vm0, %v4616_v30, -inf  ;;  %v4631_v17 = vadd.f32 %v8401_v26, %v12431_v3 }
 0x8d0   :  { %v5008_v11 = vadd.f32 %v5007_v53, %v5006_v62  ;;  %v5152_v40 = vmax.f32 %v5150_v4, %v5151_v23  ;;  %v4625_v19 = vpop.f32.mrf.mxu0 }
 0x8d1   :  { %v4924_v13 = vsel %vm112_vm0, %v4631_v17, 0.0  ;;  %v5068_v48 = vsel %vm112_vm0, %v4631_v17, -inf  ;;  %v4626_v18 = vadd.f32 %v12431_v3, %v4625_v19 }
 0x8d2   :  { %v4925_v6 = vadd.f32 %v4924_v13, %v12450_v34  ;;  %v12514_v22 = vmax.f32 %v5067_v58, %v5068_v48  ;;  %v8404_v42 = vpop.f32.mrf.mxu0 }
 0x8d3   :  { %v4907_v52 = vsel %vm112_vm0, %v4626_v18, 0.0  ;;  %v5051_v2 = vsel %vm112_vm0, %v4626_v18, -inf  ;;  %v4641_v5 = vadd.f32 %v8404_v42, %v12431_v3 }
 0x8d4   :  { %v4908_v21 = vadd.f32 %v4907_v52, %v4906_v47  ;;  %v12519_v1 = vmax.f32 %v5050_v63, %v5051_v2  ;;  %v4635_v60 = vpop.f32.mrf.mxu0 }
 0x8d5   :  { %v4958_v50 = vsel %vm112_vm0, %v4641_v5, 0.0  ;;  %v5102_v34 = vsel %vm112_vm0, %v4641_v5, -inf  ;;  %v4636_v45 = vadd.f32 %v12431_v3, %v4635_v60 }
 0x8d6   :  { %v4959_v15 = vadd.f32 %v4958_v50, %v4957_v46  ;;  %v12524_v33 = vmax.f32 %v5101_v12, %v5102_v34  ;;  %v8407_v58 = vpop.f32.mrf.mxu0 }
 0x8d7   :  { %v4941_v51 = vsel %vm112_vm0, %v4636_v45, 0.0  ;;  %v5085_v43 = vsel %vm112_vm0, %v4636_v45, -inf  ;;  %v4651_v28 = vadd.f32 %v8407_v58, %v12431_v3 }
 0x8d8   :  { %v4942_v47 = vadd.f32 %v4941_v51, %v4940_v25  ;;  %v12529_v63 = vmax.f32 %v5084_v41, %v5085_v43  ;;  %v4645_v7 = vpop.f32.mrf.mxu0 }
 0x8d9   :  { %v4992_v61 = vsel %vm112_vm0, %v4651_v28, 0.0  ;;  %v5136_v54 = vsel %vm112_vm0, %v4651_v28, -inf  ;;  %v4646_v36 = vadd.f32 %v12431_v3, %v4645_v7 }
 0x8da   :  { %v4993_v46 = vadd.f32 %v4992_v61, %v4991_v0  ;;  %v12534_v12 = vmax.f32 %v5135_v44, %v5136_v54  ;;  %v8410_v57 = vpop.f32.mrf.mxu0 }
 0x8db   :  { %v4975_v16 = vsel %vm112_vm0, %v4646_v36, 0.0  ;;  %v5119_v37 = vsel %vm112_vm0, %v4646_v36, -inf  ;;  %v4661_v14 = vadd.f32 %v8410_v57, %v12431_v3 }
 0x8dc   :  { %v4976_v25 = vadd.f32 %v4975_v16, %v4974_v20  ;;  %v12539_v41 = vmax.f32 %v5118_v9, %v5119_v37  ;;  %v4655_v29 = vpop.f32.mrf.mxu0 }
 0x8dd   :  { %v5026_v8 = vsel %vm112_vm0, %v4661_v14, 0.0  ;;  %v5170_v30 = vsel %vm112_vm0, %v4661_v14, -inf  ;;  %v4656_v62 = vadd.f32 %v12431_v3, %v4655_v29 }
 0x8de   :  { %v5027_v0 = vadd.f32 %v5026_v8, %v5025_v49  ;;  %v12544_v44 = vmax.f32 %v5169_v10, %v5170_v30  ;;  %v8413_v26 = vpop.f32.mrf.mxu0 }
 0x8df   :  { %v5009_v4 = vsel %vm112_vm0, %v4656_v62, 0.0  ;;  %v5153_v53 = vsel %vm112_vm0, %v4656_v62, -inf  ;;  %v4671_v23 = vadd.f32 %v8413_v26, %v12431_v3 }
 0x8e0   :  { %v5010_v20 = vadd.f32 %v5009_v4, %v5008_v11  ;;  %v12549_v9 = vmax.f32 %v5152_v40, %v5153_v53  ;;  %v4665_v17 = vpop.f32.mrf.mxu0 }
 0x8e1   :  { %v4926_v19 = vsel %vm112_vm0, %v4671_v23, 0.0  ;;  %v12553_v13 = vsel %vm112_vm0, %v4671_v23, -inf  ;;  %v4666_v49 = vadd.f32 %v12431_v3, %v4665_v17 }
 0x8e2   :  { %v12556_v10 = vadd.f32 %v4926_v19, %v4925_v6  ;;  %v5071_v48 = vmax.f32 %v12514_v22, %v12553_v13  ;;  %v8416_v18 = vpop.f32.mrf.mxu0 }
 0x8e3   :  { %v4909_v42 = vsel %vm112_vm0, %v4666_v49, 0.0  ;;  %v12562_v11 = vsel %vm112_vm0, %v4666_v49, -inf  ;;  %v4681_v40 = vadd.f32 %v8416_v18, %v12431_v3 }
 0x8e4   :  { %v12565_v52 = vadd.f32 %v4909_v42, %v4908_v21  ;;  %v4675_v5 = vpop.f32.mrf.mxu0 }
 0x8e5   :  { %v4960_v6 = vsel %vm112_vm0, %v4681_v40, 0.0  ;;  %v12571_v60 = vsel %vm112_vm0, %v4681_v40, -inf  ;;  %v4676_v50 = vadd.f32 %v12431_v3, %v4675_v5 }
 0x8e6   :  { %v12574_v34 = vadd.f32 %v4960_v6, %v4959_v15  ;;  %v8419_v58 = vpop.f32.mrf.mxu0 }
 0x8e7   :  { %v4943_v21 = vsel %vm112_vm0, %v4676_v50, 0.0  ;;  %v12580_v51 = vsel %vm112_vm0, %v4676_v50, -inf  ;;  %v4691_v43 = vadd.f32 %v8419_v58, %v12431_v3 }
 0x8e8   :  { %v12583_v28 = vadd.f32 %v4943_v21, %v4942_v47  ;;  %v4685_v61 = vpop.f32.mrf.mxu0 }
 0x8e9   :  { %v4994_v15 = vsel %vm112_vm0, %v4691_v43, 0.0  ;;  %v12589_v54 = vsel %vm112_vm0, %v4691_v43, -inf  ;;  %v4686_v36 = vadd.f32 %v12431_v3, %v4685_v61 }
 0x8ea   :  { %v12592_v57 = vadd.f32 %v4994_v15, %v4993_v46  ;;  %v8422_v37 = vpop.f32.mrf.mxu0 }
 0x8eb   :  { %v4977_v47 = vsel %vm112_vm0, %v4686_v36, 0.0  ;;  %v12598_v14 = vsel %vm112_vm0, %v4686_v36, -inf  ;;  %v4701_v29 = vadd.f32 %v8422_v37, %v12431_v3 }
 0x8ec   :  { %v12601_v8 = vadd.f32 %v4977_v47, %v4976_v25  ;;  %v4695_v62 = vpop.f32.mrf.mxu0 }
 0x8ed   :  { %v5028_v46 = vsel %vm112_vm0, %v4701_v29, 0.0  ;;  %v12607_v26 = vsel %vm112_vm0, %v4701_v29, -inf  ;;  %v4696_v4 = vadd.f32 %v12431_v3, %v4695_v62 }
 0x8ee   :  { %v12610_v53 = vadd.f32 %v5028_v46, %v5027_v0  ;;  %v8425_v17 = vpop.f32.mrf.mxu0 }
 0x8ef   :  { %v5011_v25 = vsel %vm112_vm0, %v4696_v4, 0.0  ;;  %v12616_v19 = vsel %vm112_vm0, %v4696_v4, -inf  ;;  %v4711_v37 = vadd.f32 %v8425_v17, %v12431_v3 }
 0x8f0   :  { %v12618_v49 = vadd.f32 %v5011_v25, %v5010_v20  ;;  %v4705_v42 = vpop.f32.mrf.mxu0 }
 0x8f1   :  { %v4706_v20 = vadd.f32 %v12431_v3, %v4705_v42  ;;  %v4928_v46 = vsel %vm112_vm0, %v4711_v37, 0.0  ;;  %v5072_v25 = vsel %vm112_vm0, %v4711_v37, -inf }
 0x8f2   :  { %v8428_v40 = vpop.f32.mrf.mxu0 }
 0x8f3   :  { %v4721_v29 = vadd.f32 %v8428_v40, %v12431_v3  ;;  %v4911_v18 = vsel %vm112_vm0, %v4706_v20, 0.0  ;;  %v5055_v30 = vsel %vm112_vm0, %v4706_v20, -inf  ;;  %v4929_v40 = vadd.f32 %v4928_v46, %v12556_v10 }
 0x8f4   :  { %v4715_v5 = vpop.f32.mrf.mxu0 }
 0x8f5   :  { %v4716_v4 = vadd.f32 %v12431_v3, %v4715_v5  ;;  %v4962_v16 = vsel %vm112_vm0, %v4721_v29, 0.0  ;;  %v12638_v5 = vmax.f32 %v5071_v48, %v5072_v25  ;;  %v5106_v37 = vsel %vm112_vm0, %v4721_v29, -inf }
 0x8f6   :  { %v8431_v6 = vpop.f32.mrf.mxu0 }
 0x8f7   :  { %v4731_v17 = vadd.f32 %v8431_v6, %v12431_v3  ;;  %v4945_v20 = vsel %vm112_vm0, %v4716_v4, 0.0  ;;  %v4912_v6 = vadd.f32 %v4911_v18, %v12565_v52  ;;  %v5089_v46 = vsel %vm112_vm0, %v4716_v4, -inf }
 0x8f8   :  { %v4725_v0 = vpop.f32.mrf.mxu0  ;;  %v13824_v52 = vmax.f32 %v12524_v33, %v12571_v60  ;;  %v13825_v33 = vmax.f32 %v12529_v63, %v12580_v51 }
 0x8f9   :  { %v4726_v42 = vadd.f32 %v12431_v3, %v4725_v0  ;;  %v13823_v0 = vmax.f32 %v12519_v1, %v12562_v11  ;;  %v4996_v13 = vsel %vm112_vm0, %v4731_v17, 0.0  ;;  %v5140_v48 = vsel %vm112_vm0, %v4731_v17, -inf }
 0x8fa   :  { %v8434_v50 = vpop.f32.mrf.mxu0  ;;  %v12658_v18 = vmax.f32 %v13824_v52, %v5106_v37  ;;  %v4946_v1 = vadd.f32 %v4945_v20, %v12583_v28  ;;  %v12670_v60 = vmax.f32 %v13825_v33, %v5089_v46  ;;  %v4997_v28 = vadd.f32 %v4996_v13, %v12592_v57 }
 0x8fb   :  { %v4741_v7 = vadd.f32 %v8434_v50, %v12431_v3  ;;  %v12647_v10 = vmax.f32 %v13823_v0, %v5055_v30  ;;  %v4963_v50 = vadd.f32 %v4962_v16, %v12574_v34  ;;  %v4979_v29 = vsel %vm112_vm0, %v4726_v42, 0.0 }
 0x8fc   :  { %v4735_v58 = vpop.f32.mrf.mxu0  ;;  %v5123_v11 = vsel %vm112_vm0, %v4726_v42, -inf  ;;  %v13826_v17 = vmax.f32 %v12534_v12, %v12589_v54  ;;  %v13828_v12 = vmax.f32 %v12544_v44, %v12607_v26 }
 0x8fd   :  { %v4736_v2 = vadd.f32 %v12431_v3, %v4735_v58  ;;  %v5030_v34 = vsel %vm112_vm0, %v4741_v7, 0.0  ;;  %v5174_v30 = vsel %vm112_vm0, %v4741_v7, -inf  ;;  %v4980_v7 = vadd.f32 %v4979_v29, %v12601_v8 }
 0x8fe   :  { %v8437_v21 = vpop.f32.mrf.mxu0  ;;  %v12676_v42 = vmax.f32 %v13826_v17, %v5140_v48  ;;  %v5031_v57 = vadd.f32 %v5030_v34, %v12610_v53  ;;  %v12691_v54 = vmax.f32 %v13828_v12, %v5174_v30  ;;  %v13829_v53 = vmax.f32 %v12549_v9, %v12616_v19 }
 0x8ff   :  { %v4751_v58 = vadd.f32 %v8437_v21, %v12431_v3  ;;  %v5013_v4 = vsel %vm112_vm0, %v4736_v2, 0.0 }
 0x900   :  { %v4745_v43 = vpop.f32.mrf.mxu0  ;;  %v5014_v8 = vadd.f32 %v5013_v4, %v12618_v49 }
 0x901   :  { %v4746_v25 = vadd.f32 %v12431_v3, %v4745_v43  ;;  %v13827_v43 = vmax.f32 %v12539_v41, %v12598_v14  ;;  %v4930_v63 = vsel %vm112_vm0, %v4751_v58, 0.0  ;;  %v5074_v0 = vsel %vm112_vm0, %v4751_v58, -inf }
 0x902   :  { %v8440_v61 = vpop.f32.mrf.mxu0  ;;  %v4931_v44 = vadd.f32 %v4930_v63, %v4929_v40 }
 0x903   :  { %v4761_v21 = vadd.f32 %v8440_v61, %v12431_v3  ;;  %v12682_v20 = vmax.f32 %v13827_v43, %v5123_v11  ;;  %v5157_v61 = vsel %vm112_vm0, %v4736_v2, -inf  ;;  %v4913_v14 = vsel %vm112_vm0, %v4746_v25, 0.0 }
 0x904   :  { %v4755_v15 = vpop.f32.mrf.mxu0  ;;  %v5057_v2 = vsel %vm112_vm0, %v4746_v25, -inf  ;;  %v12702_v13 = vmax.f32 %v13829_v53, %v5157_v61  ;;  %v4914_v34 = vadd.f32 %v4913_v14, %v4912_v6 }
 0x905   :  { %v4756_v51 = vadd.f32 %v12431_v3, %v4755_v15  ;;  %v4964_v46 = vsel %vm112_vm0, %v4761_v21, 0.0  ;;  %v5108_v26 = vsel %vm112_vm0, %v4761_v21, -inf  ;;  %v5058_v9 = vmax.f32 %v12647_v10, %v5057_v2 }
 0x906   :  { %v8443_v36 = vpop.f32.mrf.mxu0  ;;  %v4965_v19 = vadd.f32 %v4964_v46, %v4963_v50  ;;  %v5109_v30 = vmax.f32 %v12658_v18, %v5108_v26 }
 0x907   :  { %v4771_v15 = vadd.f32 %v8443_v36, %v12431_v3  ;;  %v4947_v29 = vsel %vm112_vm0, %v4756_v51, 0.0  ;;  %v5091_v58 = vsel %vm112_vm0, %v4756_v51, -inf  ;;  %v5075_v36 = vmax.f32 %v12638_v5, %v5074_v0 }
 0x908   :  { %v4765_v47 = vpop.f32.mrf.mxu0  ;;  %v4948_v21 = vadd.f32 %v4947_v29, %v4946_v1 }
 0x909   :  { %v4766_v49 = vadd.f32 %v12431_v3, %v4765_v47  ;;  %v4998_v47 = vsel %vm112_vm0, %v4771_v15, 0.0  ;;  %v5142_v4 = vsel %vm112_vm0, %v4771_v15, -inf }
 0x90a   :  { %v8446_v62 = vpop.f32.mrf.mxu0  ;;  %v4999_v17 = vadd.f32 %v4998_v47, %v4997_v28  ;;  %v5143_v43 = vmax.f32 %v12676_v42, %v5142_v4 }
 0x90b   :  { %v4781_v52 = vadd.f32 %v8446_v62, %v12431_v3  ;;  %v5092_v62 = vmax.f32 %v12670_v60, %v5091_v58  ;;  %v5125_v5 = vsel %vm112_vm0, %v4766_v49, -inf }
 0x90c   :  { %v4775_v23 = vpop.f32.mrf.mxu0  ;;  %v5126_v0 = vmax.f32 %v12682_v20, %v5125_v5 }
 0x90d   :  { %v4776_v11 = vadd.f32 %v12431_v3, %v4775_v23  ;;  %v4981_v23 = vsel %vm112_vm0, %v4766_v49, 0.0  ;;  %v5032_v10 = vsel %vm112_vm0, %v4781_v52, 0.0  ;;  %v5176_v50 = vsel %vm112_vm0, %v4781_v52, -inf }
 0x90e   :  { %v8449_v45 = vpop.f32.mrf.mxu0  ;;  %v4982_v61 = vadd.f32 %v4981_v23, %v4980_v7  ;;  %v5033_v14 = vadd.f32 %v5032_v10, %v5031_v57 }
 0x90f   :  { %v4791_v25 = vadd.f32 %v8449_v45, %v12431_v3  ;;  %v5015_v18 = vsel %vm112_vm0, %v4776_v11, 0.0  ;;  %v5159_v45 = vsel %vm112_vm0, %v4776_v11, -inf }
 0x910   :  { %v4785_v22 = vpop.f32.mrf.mxu0  ;;  %v5016_v28 = vadd.f32 %v5015_v18, %v5014_v8  ;;  %v5160_v42 = vmax.f32 %v12702_v13, %v5159_v45 }
 0x911   :  { %v4786_v33 = vadd.f32 %v12431_v3, %v4785_v22  ;;  %v4932_v63 = vsel %vm112_vm0, %v4791_v25, 0.0  ;;  %v5177_v22 = vmax.f32 %v12691_v54, %v5176_v50  ;;  %v5076_v46 = vsel %vm112_vm0, %v4791_v25, -inf }
 0x912   :  { %v8452_v16 = vpop.f32.mrf.mxu0  ;;  %v4933_v15 = vadd.f32 %v4932_v63, %v4931_v44  ;;  %v12742_v26 = vmax.f32 %v5075_v36, %v5076_v46 }
 0x913   :  { %v4801_v1 = vadd.f32 %v8452_v16, %v12431_v3  ;;  %v4915_v16 = vsel %vm112_vm0, %v4786_v33, 0.0  ;;  %v5059_v7 = vsel %vm112_vm0, %v4786_v33, -inf }
 0x914   :  { %v4795_v37 = vpop.f32.mrf.mxu0  ;;  %v4916_v49 = vadd.f32 %v4915_v16, %v4914_v34  ;;  %v12744_v29 = vmax.f32 %v5058_v9, %v5059_v7 }
 0x915   :  { %v4796_v51 = vadd.f32 %v12431_v3, %v4795_v37  ;;  %v4966_v37 = vsel %vm112_vm0, %v4801_v1, 0.0 }
 0x916   :  { %v8455_v41 = vpop.f32.mrf.mxu0  ;;  %v4967_v52 = vadd.f32 %v4966_v37, %v4965_v19 }
 0x917   :  { %v4811_v12 = vadd.f32 %v8455_v41, %v12431_v3  ;;  %v5110_v41 = vsel %vm112_vm0, %v4801_v1, -inf  ;;  %v4949_v54 = vsel %vm112_vm0, %v4796_v51, 0.0  ;;  %v5093_v8 = vsel %vm112_vm0, %v4796_v51, -inf }
 0x918   :  { %v4805_v48 = vpop.f32.mrf.mxu0  ;;  %v12747_v11 = vmax.f32 %v5109_v30, %v5110_v41  ;;  %v4950_v4 = vadd.f32 %v4949_v54, %v4948_v21  ;;  %v12751_v25 = vmax.f32 %v5092_v62, %v5093_v8 }
 0x919   :  { %v4806_v20 = vadd.f32 %v12431_v3, %v4805_v48  ;;  %v5000_v53 = vsel %vm112_vm0, %v4811_v12, 0.0  ;;  %v5144_v48 = vsel %vm112_vm0, %v4811_v12, -inf }
 0x91a   :  { %v8458_v40 = vpop.f32.mrf.mxu0  ;;  %v5001_v23 = vadd.f32 %v5000_v53, %v4999_v17  ;;  %v12758_v30 = vmax.f32 %v5143_v43, %v5144_v48 }
 0x91b   :  { %v4821_v13 = vadd.f32 %v8458_v40, %v12431_v3  ;;  %v4983_v36 = vsel %vm112_vm0, %v4806_v20, 0.0  ;;  %v5127_v34 = vsel %vm112_vm0, %v4806_v20, -inf }
 0x91c   :  { %v4815_v6 = vpop.f32.mrf.mxu0  ;;  %v4984_v45 = vadd.f32 %v4983_v36, %v4982_v61  ;;  %v12767_v1 = vmax.f32 %v5126_v0, %v5127_v34 }
 0x91d   :  { %v4816_v44 = vadd.f32 %v12431_v3, %v4815_v6  ;;  %v5034_v9 = vsel %vm112_vm0, %v4821_v13, 0.0  ;;  %v5178_v5 = vsel %vm112_vm0, %v4821_v13, -inf }
 0x91e   :  { %v8461_v60 = vpop.f32.mrf.mxu0  ;;  %v5035_v43 = vadd.f32 %v5034_v9, %v5033_v14 }
 0x91f   :  { %v4831_v47 = vadd.f32 %v8461_v60, %v12431_v3  ;;  %v5017_v6 = vsel %vm112_vm0, %v4816_v44, 0.0  ;;  %v5161_v21 = vsel %vm112_vm0, %v4816_v44, -inf  ;;  %v12769_v60 = vmax.f32 %v5177_v22, %v5178_v5 }
 0x920   :  { %v4825_v2 = vpop.f32.mrf.mxu0  ;;  %v12771_v51 = vadd.f32 %v5017_v6, %v5016_v28  ;;  %v12776_v16 = vmax.f32 %v5160_v42, %v5161_v21 }
 0x921   :  { %v4826_v19 = vadd.f32 %v12431_v3, %v4825_v2  ;;  %v4934_v50 = vsel %vm112_vm0, %v4831_v47, 0.0  ;;  %v5078_v18 = vsel %vm112_vm0, %v4831_v47, -inf }
 0x922   :  { %v8464_v57 = vpop.f32.mrf.mxu0  ;;  %v4935_v7 = vadd.f32 %v4934_v50, %v4933_v15  ;;  %v5079_v37 = vmax.f32 %v12742_v26, %v5078_v18 }
 0x923   :  { %v4841_v62 = vadd.f32 %v8464_v57, %v12431_v3  ;;  %v4917_v12 = vsel %vm112_vm0, %v4826_v19, 0.0  ;;  %v5061_v2 = vsel %vm112_vm0, %v4826_v19, -inf }
 0x924   :  { %v4835_v58 = vpop.f32.mrf.mxu0  ;;  %v4918_v20 = vadd.f32 %v4917_v12, %v4916_v49  ;;  %v5062_v57 = vmax.f32 %v12744_v29, %v5061_v2 }
 0x925   :  { %v4836_v33 = vadd.f32 %v12431_v3, %v4835_v58  ;;  %v4968_v61 = vsel %vm112_vm0, %v4841_v62, 0.0  ;;  %v5112_v14 = vsel %vm112_vm0, %v4841_v62, -inf }
 0x926   :  { %v8467_v40 = vpop.f32.mrf.mxu0  ;;  %v4969_v8 = vadd.f32 %v4968_v61, %v4967_v52  ;;  %v5113_v44 = vmax.f32 %v12747_v11, %v5112_v14 }
 0x927   :  { %v4851_v17 = vadd.f32 %v8467_v40, %v12431_v3  ;;  %v4951_v22 = vsel %vm112_vm0, %v4836_v33, 0.0  ;;  %v5095_v28 = vsel %vm112_vm0, %v4836_v33, -inf }
 0x928   :  { %v4845_v10 = vpop.f32.mrf.mxu0  ;;  %v4952_v58 = vadd.f32 %v4951_v22, %v4950_v4  ;;  %v5096_v49 = vmax.f32 %v12751_v25, %v5095_v28 }
 0x929   :  { %v4846_v46 = vadd.f32 %v12431_v3, %v4845_v10  ;;  %v5002_v41 = vsel %vm112_vm0, %v4851_v17, 0.0  ;;  %v12786_v42 = vsel %vm112_vm0, %v4851_v17, -inf }
 0x92a   :  { %v8470_v63 = vpop.f32.mrf.mxu0  ;;  %v5003_v29 = vadd.f32 %v5002_v41, %v5001_v23  ;;  %v5147_v47 = vmax.f32 %v12758_v30, %v12786_v42 }
 0x92b   :  { %v4861_v15 = vadd.f32 %v8470_v63, %v12431_v3  ;;  %v4985_v53 = vsel %vm112_vm0, %v4846_v46, 0.0  ;;  %v12791_v13 = vsel %vm112_vm0, %v4846_v46, -inf }
 0x92c   :  { %v4855_v0 = vpop.f32.mrf.mxu0  ;;  %v4986_v34 = vadd.f32 %v4985_v53, %v4984_v45  ;;  %v5130_v9 = vmax.f32 %v12767_v1, %v12791_v13 }
 0x92d   :  { %v5036_v11 = vsel %vm112_vm0, %v4861_v15, 0.0  ;;  %v12805_v25 = vsel %vm112_vm0, %v4861_v15, -inf  ;;  %v4856_v6 = vadd.f32 %v12431_v3, %v4855_v0 }
 0x92e   :  { %v8473_v54 = vpop.f32.mrf.mxu0  ;;  %v5037_v18 = vadd.f32 %v5036_v11, %v5035_v43 }
 0x92f   :  { %v4871_v26 = vadd.f32 %v8473_v54, %v12431_v3 }
 0x930   :  { %v4865_v48 = vpop.f32.mrf.mxu0 }
 0x931   :  { %v4936_v36 = vsel %vm112_vm0, %v4871_v26, 0.0  ;;  %v5080_v52 = vsel %vm112_vm0, %v4871_v26, -inf  ;;  %v4866_v40 = vadd.f32 %v12431_v3, %v4865_v48  ;;  %v5163_v26 = vsel %vm112_vm0, %v4856_v6, -inf }
 0x932   :  { %v4937_v4 = vadd.f32 %v4936_v36, %v4935_v7  ;;  %v8476_v5 = vpop.f32.mrf.mxu0  ;;  %v5081_v62 = vmax.f32 %v5079_v37, %v5080_v52  ;;  %v5181_v7 = vmax.f32 %v12769_v60, %v12805_v25 }
 0x933   :  { %v4919_v23 = vsel %vm112_vm0, %v4866_v40, 0.0  ;;  %v5063_v19 = vsel %vm112_vm0, %v4866_v40, -inf  ;;  %v4881_v30 = vadd.f32 %v8476_v5, %v12431_v3 }
 0x934   :  { %v5041_v21 = vmul.f32 0.11111111, %v4937_v4  ;;  %v4920_v10 = vadd.f32 %v4919_v23, %v4918_v20  ;;  %v4875_v50 = vpop.f32.mrf.mxu0  ;;  %v5064_v12 = vmax.f32 %v5062_v57, %v5063_v19  ;;  %v5019_v20 = vsel %vm112_vm0, %v4856_v6, 0.0 }
 0x935   :  { %v4970_v33 = vsel %vm112_vm0, %v4881_v30, 0.0  ;;  %v5114_v17 = vsel %vm112_vm0, %v4881_v30, -inf  ;;  %v4876_v45 = vadd.f32 %v12431_v3, %v4875_v50 }
 0x936   :  { %v5185_v1 = vadd.f32 %v5081_v62, %v5041_v21  ;;  %v5040_v63 = vmul.f32 0.11111111, %v4920_v10  ;;  %v4971_v2 = vadd.f32 %v4970_v33, %v4969_v8  ;;  %v8479_v46 = vpop.f32.mrf.mxu0  ;;  %v5115_v22 = vmax.f32 %v5113_v44, %v5114_v17  ;;  %v8931_v33 = vld [vmem:[%s13790_s0 + $0x260] sm:$0xff]  ;;  %v8932_v17 = vld [vmem:[%s13790_s0 + $0x268] sm:$0xff] }
 0x937   :  { %v4953_v61 = vsel %vm112_vm0, %v4876_v45, 0.0  ;;  %v5097_v37 = vsel %vm112_vm0, %v4876_v45, -inf  ;;  %v4891_v43 = vadd.f32 %v8479_v46, %v12431_v3  ;;  %v8933_v45 = vld [vmem:[%s13790_s0 + $0x270] sm:$0xff]  ;;  %v8938_v46 = vld [vmem:[%s13790_s0 + $0x298] sm:$0xff] }
 0x938   :  { %v5184_v0 = vadd.f32 %v5064_v12, %v5040_v63  ;;  %v5043_v14 = vmul.f32 0.11111111, %v4971_v2  ;;  %v4954_v28 = vadd.f32 %v4953_v61, %v4952_v58  ;;  %v4885_v41 = vpop.f32.mrf.mxu0  ;;  %v5098_v8 = vmax.f32 %v5096_v49, %v5097_v37  ;;  %v8935_v63 = vld [vmem:[%s13790_s0 + $0x280] sm:$0xff]  ;;  %v8936_v12 = vld [vmem:[%s13790_s0 + $0x288] sm:$0xff]  ;;  %v8937_v2 = vld [vmem:[%s13790_s0 + $0x290] sm:$0xff] }
 0x939   :  { %v5004_v57 = vsel %vm112_vm0, %v4891_v43, 0.0  ;;  %v5148_v42 = vsel %vm112_vm0, %v4891_v43, -inf  ;;  %v4886_v15 = vadd.f32 %v12431_v3, %v4885_v41  ;;  %v8940_v61 = vld [vmem:[%s13790_s0 + $0x2a8] sm:$0xff]  ;;  %v8941_v37 = vld [vmem:[%s13790_s0 + $0x2b0] sm:$0xff]  ;;  %v8942_v43 = vld [vmem:[%s13790_s0 + $0x2b8] sm:$0xff] }
 0x93a   :  { %v5187_v60 = vadd.f32 %v5115_v22, %v5043_v14  ;;  %v5042_v54 = vmul.f32 0.11111111, %v4954_v28  ;;  %v5005_v53 = vadd.f32 %v5004_v57, %v5003_v29  ;;  %v8482_v13 = vpop.f32.mrf.mxu0  ;;  %8487 = vmatprep.mubr.msk.f32.mxu1 %vm112_vm0, %v5184_v0  ;;  %v5149_v40 = vmax.f32 %v5147_v47, %v5148_v42  ;;  %v8943_v0 = vld [vmem:[%s13790_s0 + $0x2c0] sm:$0xff]  ;;  %v8944_v14 = vld [vmem:[%s13790_s0 + $0x2c8] sm:$0xff]  ;;  %v8945_v22 = vld [vmem:[%s13790_s0 + $0x2d0] sm:$0xff] }
 0x93b   :  { %v4987_v44 = vsel %vm112_vm0, %v4886_v15, 0.0  ;;  %v5131_v58 = vsel %vm112_vm0, %v4886_v15, -inf  ;;  %v4901_v48 = vadd.f32 %v8482_v13, %v12431_v3  ;;  %8488 = vmatmul.mubr.msk.f32.vlgmr.msra.gmra.mxu1 %vm112_vm0, %v5185_v1  ;;  %v5020_v29 = vadd.f32 %v5019_v20, %v12771_v51  ;;  %v8934_v1 = vld [vmem:[%s13790_s0 + $0x278] sm:$0xff]  ;;  %v8947_v41 = vld [vmem:[%s13790_s0 + $0x2e0] sm:$0xff]  ;;  %v8948_v20 = vld [vmem:[%s13790_s0 + $0x2e8] sm:$0xff] }
 0x93c   :  { %v5186_v36 = vadd.f32 %v5098_v8, %v5042_v54  ;;  %v5045_v52 = vmul.f32 0.11111111, %v5005_v53  ;;  %v4988_v11 = vadd.f32 %v4987_v44, %v4986_v34  ;;  %8519 = vmatpush3.msra.mxu1 %v12413_v59  ;;  %v4895_v49 = vpop.f32.mrf.mxu0  ;;  %v5132_v30 = vmax.f32 %v5130_v9, %v5131_v58  ;;  %v8946_v28 = vld [vmem:[%s13790_s0 + $0x2d8] sm:$0xff]  ;;  %v8949_v57 = vld [vmem:[%s13790_s0 + $0x2f0] sm:$0xff]  ;;  %v8951_v15 = vld [vmem:[%s13790_s0 + $0x300] sm:$0xff] }
 0x93d   :  { %v5038_v4 = vsel %vm112_vm0, %v4901_v48, 0.0  ;;  %v5182_v5 = vsel %vm112_vm0, %v4901_v48, -inf  ;;  %v4896_v25 = vadd.f32 %v12431_v3, %v4895_v49  ;;  %8520 = vmatprep.subr.mxu1 %v12426_v35  ;;  %v5164_v59 = vmax.f32 %v12776_v16, %v5163_v26  ;;  %v5450_v16 = vpop.trf.xlu1  ;;  %v8950_v42 = vld [vmem:[%s13790_s0 + $0x2f8] sm:$0xff]  ;;  %v8953_v54 = vld [vmem:[%s13790_s0 + $0x310] sm:$0xff]  ;;  %v8955_v53 = vld [vmem:[%s13790_s0 + $0x320] sm:$0xff] }
 0x93e   :  { %v5189_v23 = vadd.f32 %v5149_v40, %v5045_v52  ;;  %v5044_v19 = vmul.f32 0.11111111, %v4988_v11  ;;  %v5039_v6 = vadd.f32 %v5038_v4, %v5037_v18  ;;  %8521 = vmatpush3.msra.mxu1 %v12426_v35  ;;  %8490 = vmatprep.mubr.msk.f32.mxu1 %vm112_vm0, %v5186_v36  ;;  %v5183_v21 = vmax.f32 %v5181_v7, %v5182_v5  ;;  %v8930_v18 = vld [vmem:[%s13790_s0 + $0x258] sm:$0xff]  ;;  %v8939_v7 = vld [vmem:[%s13790_s0 + $0x2a0] sm:$0xff]  ;;  %v8956_v13 = vld [vmem:[%s13790_s0 + $0x328] sm:$0xff] }
 0x93f   :  { %v5021_v51 = vsel %vm112_vm0, %v4896_v25, 0.0  ;;  %v5165_v47 = vsel %vm112_vm0, %v4896_v25, -inf  ;;  %8522 = vmatprep.subr.mxu1 %v12423_v39  ;;  %8491 = vmatmul.mubr.msk.f32.gmra.mxu1 %vm112_vm0, %v5187_v60  ;;  %v8952_v60 = vld [vmem:[%s13790_s0 + $0x308] sm:$0xff]  ;;  %v8954_v8 = vld [vmem:[%s13790_s0 + $0x318] sm:$0xff]  ;;  %v8957_v26 = vld [vmem:[%s13790_s0 + $0x330] sm:$0xff] }
 0x940   :  { %v5188_v3 = vadd.f32 %v5132_v30, %v5044_v19  ;;  %v5047_v34 = vmul.f32 0.11111111, %v5039_v6  ;;  %v5022_v62 = vadd.f32 %v5021_v51, %v5020_v29  ;;  %8523 = vmatpush3.msra.mxu1 %v12423_v39  ;;  %v5166_v10 = vmax.f32 %v5164_v59, %v5165_v47  ;;  %v7137_v39 = vld [vmem:[%s13793_s3 + $0x28] sm:$0xff]  ;;  %v8958_v44 = vld [vmem:[%s13790_s0 + $0x338] sm:$0xff]  ;;  %v8959_v58 = vld [vmem:[%s13790_s0 + $0x340] sm:$0xff] }
 0x941   :  { %8524 = vmatprep.subr.mxu1 %v12420_v32  ;;  %v8960_v48 = vld [vmem:[%s13790_s0 + $0x348] sm:$0xff]  ;;  %v8961_v36 = vld [vmem:[%s13790_s0 + $0x350] sm:$0xff]  ;;  %v8962_v52 = vld [vmem:[%s13790_s0 + $0x358] sm:$0xff] }
 0x942   :  { %v5191_v35 = vadd.f32 %v5183_v21, %v5047_v34  ;;  %v5046_v9 = vmul.f32 0.11111111, %v5022_v62  ;;  %8525 = vmatpush3.msra.mxu1 %v12420_v32  ;;  %8493 = vmatprep.mubr.msk.f32.mxu1 %vm112_vm0, %v5188_v3  ;;  %v5451_v32 = vpop.trf.xlu1  ;;  %v8963_v40 = vld [vmem:[%s13790_s0 + $0x360] sm:$0xff]  ;;  %v8964_v11 = vld [vmem:[%s13790_s0 + $0x368] sm:$0xff]  ;;  %v8965_v49 = vld [vmem:[%s13790_s0 + $0x370] sm:$0xff] }
 0x943   :  { %8526 = vmatprep.subr.mxu1 %v12416_v38  ;;  %8494 = vmatmul.mubr.msk.f32.gmra.mxu1 %vm112_vm0, %v5189_v23  ;;  %v8966_v29 = vld [vmem:[%s13790_s0 + $0x378] sm:$0xff]  ;;  %v8967_v4 = vld [vmem:[%s13790_s0 + $0x380] sm:$0xff]  ;;  %v8968_v5 = vld [vmem:[%s13790_s0 + $0x388] sm:$0xff] }
 0x944   :  { %v5190_v50 = vadd.f32 %v5166_v10, %v5046_v9  ;;  %8527 = vmatpush3.msra.mxu1 %v12416_v38  ;;  %v8929_v38 = vld [vmem:[%s13790_s0 + $0x250] sm:$0xff]  ;;  %v8970_v23 = vld [vmem:[%s13790_s0 + $0x398] sm:$0xff]  ;;  %v8971_v19 = vld [vmem:[%s13790_s0 + $0x3a0] sm:$0xff] }
 0x945   :  { %8528 = vmatprep.subr.mxu1 %v12411_v55  ;;  %v8969_v25 = vld [vmem:[%s13790_s0 + $0x390] sm:$0xff]  ;;  %v8972_v30 = vld [vmem:[%s13790_s0 + $0x3a8] sm:$0xff]  ;;  %v8974_v59 = vld [vmem:[%s13790_s0 + $0x3b8] sm:$0xff] }
 0x946   :  { %8529 = vmatpush3.msra.mxu1 %v12411_v55  ;;  %8496 = vmatprep.mubr.msk.f32.mxu1 %vm112_vm0, %v5190_v50  ;;  %v7136_v55 = vld [vmem:[%s13793_s3 + $0x20] sm:$0xff]  ;;  %v8973_v6 = vld [vmem:[%s13790_s0 + $0x3b0] sm:$0xff]  ;;  %v8976_v47 = vld [vmem:[%s13790_s0 + $0x3c8] sm:$0xff] }
 0x947   :  { %8530 = vmatprep.subr.mxu1 %v12408_v31  ;;  %8497 = vmatmul.mubr.msk.f32.gmra.mxu1 %vm112_vm0, %v5191_v35  ;;  %v8975_v51 = vld [vmem:[%s13790_s0 + $0x3c0] sm:$0xff]  ;;  %v8977_v3 = vld [vmem:[%s13790_s0 + $0x3d0] sm:$0xff]  ;;  %v8978_v34 = vld [vmem:[%s13790_s0 + $0x3d8] sm:$0xff] }
 0x948   :  { %8531 = vmatpush3.msra.mxu1 %v12408_v31  ;;  %8534 = vmatprep.mubr.msk.f32.mxu1 %vm2066_vm1, %v5450_v16  ;;  %v8927_v31 = vld [vmem:[%s13790_s0 + $0x240] sm:$0xff]  ;;  %v8980_v62 = vld [vmem:[%s13790_s0 + $0x3e8] sm:$0xff]  ;;  %v8981_v35 = vld [vmem:[%s13790_s0 + $0x3f0] sm:$0xff] }
 0x949   :  { %8532 = vmatprep.subr.mxu1 %v12405_v24  ;;  %v8979_v21 = vld [vmem:[%s13790_s0 + $0x3e0] sm:$0xff]  ;;  %v8982_v9 = vld [vmem:[%s13790_s0 + $0x3f8] sm:$0xff]  ;;  %v8984_v16 = vld [vmem:[%s13790_s0 + $0x408] sm:$0xff] }
 0x94a   :  { %8533 = vmatpush3.msra.mxu1 %v12405_v24  ;;  %v8928_v24 = vld [vmem:[%s13790_s0 + $0x248] sm:$0xff]  ;;  %v8983_v10 = vld [vmem:[%s13790_s0 + $0x400] sm:$0xff]  ;;  %v8985_v50 = vld [vmem:[%s13790_s0 + $0x410] sm:$0xff] }
 0x94b   :  { %8535 = vmatmul.mubr.msk.f32.vlgmr.msra.gmra.mxu1 %vm2066_vm1, %v5451_v32  ;;  %8537 = vmatprep.subr.mxu1 %v7137_v39  ;;  %v8986_v32 = vld [vmem:[%s13790_s0 + $0x418] sm:$0xff] }
 0x94c   :  { %8538 = vmatpush3.msra.mxu1 %v7137_v39  ;;  %8541 = vmatprep.mubr.msk.f32.mxu1 %vm112_vm0, %v8927_v31  ;;  %v8987_v39 = vld [vmem:[%s13790_s0 + $0x420] sm:$0xff]  ;;  %v8989_v31 = vld [vmem:[%s13790_s0 + $0x430] sm:$0xff] }
 0x94d   :  { %8539 = vmatprep.subr.mxu1 %v7136_v55 }
 0x94e   :  { %8540 = vmatpush3.msra.mxu1 %v7136_v55  ;;  %v8988_v55 = vld [vmem:[%s13790_s0 + $0x428] sm:$0xff] }
 0x94f   :  { %8542 = vmatmul.mubr.msk.f32.vlgmr.msra.gmra.mxu1 %vm112_vm0, %v8928_v24  ;;  %v8990_v24 = vld [vmem:[%s13790_s0 + $0x438] sm:$0xff] }
 0x950   :  { %8544 = vmatprep.mubr.msk.f32.mxu1 %vm112_vm0, %v8929_v38  ;;  %v8991_v38 = vld [vmem:[%s13790_s0 + $0x440] sm:$0xff] }
 0x953   :  { %8545 = vmatmul.mubr.msk.f32.gmra.mxu1 %vm112_vm0, %v8930_v18  ;;  %v8992_v18 = vld [vmem:[%s13790_s0 + $0x448] sm:$0xff] }
 0x954   :  { %8547 = vmatprep.mubr.msk.f32.mxu1 %vm112_vm0, %v8931_v33  ;;  %v8993_v33 = vld [vmem:[%s13790_s0 + $0x450] sm:$0xff] }
 0x957   :  { %8548 = vmatmul.mubr.msk.f32.gmra.mxu1 %vm112_vm0, %v8932_v17  ;;  %v8994_v17 = vld [vmem:[%s13790_s0 + $0x458] sm:$0xff] }
 0x958   :  { %8550 = vmatprep.mubr.msk.f32.mxu1 %vm112_vm0, %v8933_v45  ;;  %v8995_v45 = vld [vmem:[%s13790_s0 + $0x460] sm:$0xff] }
 0x95b   :  { %8551 = vmatmul.mubr.msk.f32.gmra.mxu1 %vm112_vm0, %v8934_v1  ;;  %v8996_v1 = vld [vmem:[%s13790_s0 + $0x468] sm:$0xff] }
 0x95c   :  { %8553 = vmatprep.mubr.msk.f32.mxu1 %vm112_vm0, %v8935_v63  ;;  %v8997_v63 = vld [vmem:[%s13790_s0 + $0x470] sm:$0xff] }
 0x95f   :  { %8554 = vmatmul.mubr.msk.f32.gmra.mxu1 %vm112_vm0, %v8936_v12  ;;  %v8998_v12 = vld [vmem:[%s13790_s0 + $0x478] sm:$0xff] }
 0x960   :  { %8556 = vmatprep.mubr.msk.f32.mxu1 %vm112_vm0, %v8937_v2 }
 0x963   :  { %8557 = vmatmul.mubr.msk.f32.gmra.mxu1 %vm112_vm0, %v8938_v46 }
 0x964   :  { %8559 = vmatprep.mubr.msk.f32.mxu1 %vm112_vm0, %v8939_v7  ;;  %v8999_v7 = vld [vmem:[%s13796_s6] ss:$0 sm:$0xff] }
 0x967   :  { %8560 = vmatmul.mubr.msk.f32.gmra.mxu1 %vm112_vm0, %v8940_v61 }
 0x968   :  { %8562 = vmatprep.mubr.msk.f32.mxu1 %vm112_vm0, %v8941_v37 }
 0x96b   :  { %8563 = vmatmul.mubr.msk.f32.gmra.mxu1 %vm112_vm0, %v8942_v43 }
 0x96c   :  { %8565 = vmatprep.mubr.msk.f32.mxu1 %vm112_vm0, %v8943_v0 }
 0x96f   :  { %8566 = vmatmul.mubr.msk.f32.gmra.mxu1 %vm112_vm0, %v8944_v14 }
 0x970   :  { %8568 = vmatprep.mubr.msk.f32.mxu1 %vm112_vm0, %v8945_v22 }
 0x973   :  { %8569 = vmatmul.mubr.msk.f32.gmra.mxu1 %vm112_vm0, %v8946_v28 }
 0x974   :  { %8571 = vmatprep.mubr.msk.f32.mxu1 %vm112_vm0, %v8947_v41 }
 0x977   :  { %8572 = vmatmul.mubr.msk.f32.gmra.mxu1 %vm112_vm0, %v8948_v20 }
 0x978   :  { %8574 = vmatprep.mubr.msk.f32.mxu1 %vm112_vm0, %v8949_v57 }
 0x97b   :  { %8575 = vmatmul.mubr.msk.f32.gmra.mxu1 %vm112_vm0, %v8950_v42 }
 0x97c   :  { %8577 = vmatprep.mubr.msk.f32.mxu1 %vm112_vm0, %v8951_v15 }
 0x97f   :  { %8578 = vmatmul.mubr.msk.f32.gmra.mxu1 %vm112_vm0, %v8952_v60 }
 0x980   :  { %8580 = vmatprep.mubr.msk.f32.mxu1 %vm112_vm0, %v8953_v54 }
 0x983   :  { %8581 = vmatmul.mubr.msk.f32.gmra.mxu1 %vm112_vm0, %v8954_v8 }
 0x984   :  { %8583 = vmatprep.mubr.msk.f32.mxu1 %vm112_vm0, %v8955_v53 }
 0x987   :  { %8584 = vmatmul.mubr.msk.f32.gmra.mxu1 %vm112_vm0, %v8956_v13 }
 0x988   :  { %8586 = vmatprep.mubr.msk.f32.mxu1 %vm112_vm0, %v8957_v26 }
 0x98b   :  { %8587 = vmatmul.mubr.msk.f32.gmra.mxu1 %vm112_vm0, %v8958_v44 }
 0x98c   :  { %8589 = vmatprep.mubr.msk.f32.mxu1 %vm112_vm0, %v8959_v58 }
 0x98f   :  { %8590 = vmatmul.mubr.msk.f32.gmra.mxu1 %vm112_vm0, %v8960_v48 }
 0x990   :  { %8592 = vmatprep.mubr.msk.f32.mxu1 %vm112_vm0, %v8961_v36 }
 0x993   :  { %8593 = vmatmul.mubr.msk.f32.gmra.mxu1 %vm112_vm0, %v8962_v52  ;;  %v13163_v52 = vld [vmem:[%s13794_s4 + $0x2] ss:$0 sm:$0xff] }
 0x994   :  { %8595 = vmatprep.mubr.msk.f32.mxu1 %vm112_vm0, %v8963_v40  ;;  %v13168_v40 = vld [vmem:[%s13795_s5 + $0x8] sm:$0xff] }
 0x997   :  { %8596 = vmatmul.mubr.msk.f32.gmra.mxu1 %vm112_vm0, %v8964_v11 }
 0x998   :  { %8598 = vmatprep.mubr.msk.f32.mxu1 %vm112_vm0, %v8965_v49 }
 0x99b   :  { %8599 = vmatmul.mubr.msk.f32.gmra.mxu1 %vm112_vm0, %v8966_v29 }
 0x99c   :  { %8601 = vmatprep.mubr.msk.f32.mxu1 %vm112_vm0, %v8967_v4 }
 0x99f   :  { %8602 = vmatmul.mubr.msk.f32.gmra.mxu1 %vm112_vm0, %v8968_v5 }
 0x9a0   :  { %8604 = vmatprep.mubr.msk.f32.mxu1 %vm112_vm0, %v8969_v25 }
 0x9a3   :  { %8605 = vmatmul.mubr.msk.f32.gmra.mxu1 %vm112_vm0, %v8970_v23 }
 0x9a4   :  { %8607 = vmatprep.mubr.msk.f32.mxu1 %vm112_vm0, %v8971_v19 }
 0x9a7   :  { %8608 = vmatmul.mubr.msk.f32.gmra.mxu1 %vm112_vm0, %v8972_v30 }
 0x9a8   :  { %8610 = vmatprep.mubr.msk.f32.mxu1 %vm112_vm0, %v8973_v6 }
 0x9ab   :  { %8611 = vmatmul.mubr.msk.f32.gmra.mxu1 %vm112_vm0, %v8974_v59 }
 0x9ac   :  { %8613 = vmatprep.mubr.msk.f32.mxu1 %vm112_vm0, %v8975_v51 }
 0x9af   :  { %8614 = vmatmul.mubr.msk.f32.gmra.mxu1 %vm112_vm0, %v8976_v47 }
 0x9b0   :  { %8616 = vmatprep.mubr.msk.f32.mxu1 %vm112_vm0, %v8977_v3 }
 0x9b3   :  { %8617 = vmatmul.mubr.msk.f32.gmra.mxu1 %vm112_vm0, %v8978_v34 }
 0x9b4   :  { %8619 = vmatprep.mubr.msk.f32.mxu1 %vm112_vm0, %v8979_v21 }
 0x9b7   :  { %8620 = vmatmul.mubr.msk.f32.gmra.mxu1 %vm112_vm0, %v8980_v62 }
 0x9b8   :  { %8622 = vmatprep.mubr.msk.f32.mxu1 %vm112_vm0, %v8981_v35 }
 0x9bb   :  { %8623 = vmatmul.mubr.msk.f32.gmra.mxu1 %vm112_vm0, %v8982_v9 }
 0x9bc   :  { %8625 = vmatprep.mubr.msk.f32.mxu1 %vm112_vm0, %v8983_v10 }
 0x9bf   :  { %8626 = vmatmul.mubr.msk.f32.gmra.mxu1 %vm112_vm0, %v8984_v16 }
 0x9c0   :  { %8628 = vmatprep.mubr.msk.f32.mxu1 %vm112_vm0, %v8985_v50 }
 0x9c3   :  { %8629 = vmatmul.mubr.msk.f32.gmra.mxu1 %vm112_vm0, %v8986_v32 }
 0x9c4   :  { %8631 = vmatprep.mubr.msk.f32.mxu1 %vm112_vm0, %v8987_v39 }
 0x9c7   :  { %8632 = vmatmul.mubr.msk.f32.gmra.mxu1 %vm112_vm0, %v8988_v55 }
 0x9c8   :  { %8634 = vmatprep.mubr.msk.f32.mxu1 %vm112_vm0, %v8989_v31 }
 0x9cb   :  { %8635 = vmatmul.mubr.msk.f32.gmra.mxu1 %vm112_vm0, %v8990_v24 }
 0x9cc   :  { %8637 = vmatprep.mubr.msk.f32.mxu1 %vm112_vm0, %v8991_v38 }
 0x9cf   :  { %8638 = vmatmul.mubr.msk.f32.gmra.mxu1 %vm112_vm0, %v8992_v18 }
 0x9d0   :  { %8640 = vmatprep.mubr.msk.f32.mxu1 %vm112_vm0, %v8993_v33 }
 0x9d3   :  { %8641 = vmatmul.mubr.msk.f32.gmra.mxu1 %vm112_vm0, %v8994_v17 }
 0x9d4   :  { %8643 = vmatprep.mubr.msk.f32.mxu1 %vm112_vm0, %v8995_v45 }
 0x9d7   :  { %8644 = vmatmul.mubr.msk.f32.gmra.mxu1 %vm112_vm0, %v8996_v1 }
 0x9d8   :  { %8646 = vmatprep.mubr.msk.f32.mxu1 %vm112_vm0, %v8997_v63 }
 0x9db   :  { %8647 = vmatmul.mubr.msk.f32.gmra.mxu1 %vm112_vm0, %v8998_v12 }
 0x9fb   :  { %v8489_v2 = vpop.f32.mrf.mxu1 }
 0x9fc   :  { %v5288_v0 = vadd.f32 %v8999_v7, %v8489_v2 }
 0x9fd   :  { %v5282_v46 = vpop.f32.mrf.mxu1 }
 0x9fe   :  { %v5283_v61 = vadd.f32 %v8999_v7, %v5282_v46 }
 0x9ff   :  { %v8492_v37 = vpop.f32.mrf.mxu1 }
 0xa00   :  { %5321 = vxpose.xlu0.b32.start [1/8] (short) (narrow) %v5283_v61, 16  ;;  %v5298_v42 = vadd.f32 %v8999_v7, %v8492_v37 }
 0xa01   :  { %v5292_v43 = vpop.f32.mrf.mxu1 }
 0xa02   :  { %v5293_v28 = vadd.f32 %v8999_v7, %v5292_v43 }
 0xa03   :  { %v8495_v14 = vpop.f32.mrf.mxu1 }
 0xa04   :  { %5322 = vxpose.xlu0.b32.cont [2/8] (short) (narrow) %v5288_v0, 16  ;;  %v5308_v54 = vadd.f32 %v8999_v7, %v8495_v14 }
 0xa05   :  { %v5302_v22 = vpop.f32.mrf.mxu1 }
 0xa06   :  { %v5303_v53 = vadd.f32 %v8999_v7, %v5302_v22 }
 0xa07   :  { %v8498_v41 = vpop.f32.mrf.mxu1 }
 0xa08   :  { %v5318_v20 = vadd.f32 %v8999_v7, %v8498_v41  ;;  %5323 = vxpose.xlu0.b32.cont [3/8] (short) (narrow) %v5293_v28, 16 }
 0xa09   :  { %v5312_v57 = vpop.f32.mrf.mxu1 }
 0xa0a   :  { %v5313_v15 = vadd.f32 %v8999_v7, %v5312_v57  ;;  %8499 = vmatprep.subr.mxu0 %v5318_v20 }
 0xa0b   :  { %8500 = vmatpush3.msra.mxu0 %v5318_v20  ;;  %v13156_v60 = vpop.f32.mrf.mxu1 }
 0xa0c   :  { %8501 = vmatprep.subr.mxu0 %v5313_v15  ;;  %5324 = vxpose.xlu0.b32.cont [4/8] (short) (narrow) %v5298_v42, 16 }
 0xa0d   :  { %8502 = vmatpush3.msra.mxu0 %v5313_v15  ;;  %v13158_v8 = vpop.f32.mrf.mxu1 }
 0xa0e   :  { %8503 = vmatprep.subr.mxu0 %v5308_v54 }
 0xa0f   :  { %8504 = vmatpush3.msra.mxu0 %v5308_v54  ;;  %v8543_v13 = vpop.f32.mrf.mxu1 }
 0xa10   :  { %8505 = vmatprep.subr.mxu0 %v5303_v53  ;;  %5325 = vxpose.xlu0.b32.cont [5/8] (short) (narrow) %v5303_v53, 16  ;;  %v5628_v49 = vadd.f32 %v8543_v13, %v13163_v52 }
 0xa11   :  { %8506 = vmatpush3.msra.mxu0 %v5303_v53  ;;  %v5622_v26 = vpop.f32.mrf.mxu1 }
 0xa12   :  { %8507 = vmatprep.subr.mxu0 %v5298_v42  ;;  %v5623_v4 = vadd.f32 %v13163_v52, %v5622_v26  ;;  %v5998_v23 = vsel %vm112_vm0, %v5628_v49, 0.0  ;;  %v13177_v6 = vsel %vm112_vm0, %v5628_v49, -inf }
 0xa13   :  { %8508 = vmatpush3.msra.mxu0 %v5298_v42  ;;  %v8546_v44 = vpop.f32.mrf.mxu1 }
 0xa14   :  { %8509 = vmatprep.subr.mxu0 %v5293_v28  ;;  %5326 = vxpose.xlu0.b32.cont [6/8] (short) (narrow) %v5308_v54, 16  ;;  %v5638_v19 = vadd.f32 %v8546_v44, %v13163_v52  ;;  %v5981_v3 = vsel %vm112_vm0, %v5623_v4, 0.0  ;;  %v13191_v9 = vsel %vm112_vm0, %v5623_v4, -inf }
 0xa15   :  { %8510 = vmatpush3.msra.mxu0 %v5293_v28  ;;  %v5632_v58 = vpop.f32.mrf.mxu1 }
 0xa16   :  { %8511 = vmatprep.subr.mxu0 %v5288_v0  ;;  %v5633_v34 = vadd.f32 %v13163_v52, %v5632_v58  ;;  %v6032_v32 = vsel %vm112_vm0, %v5638_v19, 0.0  ;;  %v13203_v38 = vsel %vm112_vm0, %v5638_v19, -inf }
 0xa17   :  { %8512 = vmatpush3.msra.mxu0 %v5288_v0  ;;  %v8549_v48 = vpop.f32.mrf.mxu1 }
 0xa18   :  { %5327 = vxpose.xlu0.b32.cont [7/8] (short) (narrow) %v5313_v15, 16  ;;  %8513 = vmatprep.subr.mxu0 %v5283_v61  ;;  %v5648_v39 = vadd.f32 %v8549_v48, %v13163_v52  ;;  %v6015_v45 = vsel %vm112_vm0, %v5633_v34, 0.0  ;;  %v13215_v46 = vsel %vm112_vm0, %v5633_v34, -inf }
 0xa19   :  { %8514 = vmatpush3.msra.mxu0 %v5283_v61  ;;  %v5642_v36 = vpop.f32.mrf.mxu1 }
 0xa1a   :  { %8649 = vmatprep.subr.mxu0 %v13168_v40  ;;  %v5643_v1 = vadd.f32 %v13163_v52, %v5642_v36  ;;  %v6066_v43 = vsel %vm112_vm0, %v5648_v39, 0.0  ;;  %v6210_v41 = vsel %vm112_vm0, %v5648_v39, -inf }
 0xa1b   :  { %v8552_v11 = vpop.f32.mrf.mxu1 }
 0xa1c   :  { %5328 = vxpose.xlu0.b32.end [8/8] (short) (narrow) %v5318_v20, 16  ;;  %v5658_v0 = vadd.f32 %v8552_v11, %v13163_v52  ;;  %v6049_v15 = vsel %vm112_vm0, %v5643_v1, 0.0  ;;  %v6193_v44 = vsel %vm112_vm0, %v5643_v1, -inf }
 0xa1d   :  { %v5652_v29 = vpop.f32.mrf.mxu1 }
 0xa1e   :  { %v5653_v54 = vadd.f32 %v13163_v52, %v5652_v29  ;;  %v6100_v11 = vsel %vm112_vm0, %v5658_v0, 0.0 }
 0xa1f   :  { %v8555_v5 = vpop.f32.mrf.mxu1 }
 0xa20   :  { %v5668_v25 = vadd.f32 %v8555_v5, %v13163_v52  ;;  %v6227_v34 = vsel %vm112_vm0, %v5653_v54, -inf }
 0xa21   :  { %v5662_v30 = vpop.f32.mrf.mxu1 }
 0xa22   :  { %v5999_v59 = vsel %vm112_vm0, %v5668_v25, 0.0  ;;  %v13181_v51 = vsel %vm112_vm0, %v5668_v25, -inf  ;;  %v5663_v47 = vadd.f32 %v13163_v52, %v5662_v30  ;;  %v6244_v25 = vsel %vm112_vm0, %v5658_v0, -inf }
 0xa23   :  { %v13186_v21 = vadd.f32 %v5999_v59, %v5998_v23  ;;  %v6144_v62 = vmax.f32 %v13177_v6, %v13181_v51  ;;  %v8558_v35 = vpop.f32.mrf.mxu1  ;;  %v6083_v30 = vsel %vm112_vm0, %v5653_v54, 0.0 }
 0xa24   :  { %v5982_v10 = vsel %vm112_vm0, %v5663_v47, 0.0  ;;  %v13195_v16 = vsel %vm112_vm0, %v5663_v47, -inf  ;;  %v5678_v50 = vadd.f32 %v8558_v35, %v13163_v52 }
 0xa25   :  { %v5983_v55 = vadd.f32 %v5982_v10, %v5981_v3  ;;  %v6127_v31 = vmax.f32 %v13191_v9, %v13195_v16  ;;  %v5672_v24 = vpop.f32.mrf.mxu1 }
 0xa26   :  { %v6033_v18 = vsel %vm112_vm0, %v5678_v50, 0.0  ;;  %v13207_v33 = vsel %vm112_vm0, %v5678_v50, -inf  ;;  %v5673_v17 = vadd.f32 %v13163_v52, %v5672_v24 }
 0xa27   :  { %v6034_v63 = vadd.f32 %v6033_v18, %v6032_v32  ;;  %v6178_v12 = vmax.f32 %v13203_v38, %v13207_v33  ;;  %v8561_v2 = vpop.f32.mrf.mxu1 }
 0xa28   :  { %v6016_v7 = vsel %vm112_vm0, %v5673_v17, 0.0  ;;  %v6160_v61 = vsel %vm112_vm0, %v5673_v17, -inf  ;;  %v5688_v37 = vadd.f32 %v8561_v2, %v13163_v52 }
 0xa29   :  { %v6017_v14 = vadd.f32 %v6016_v7, %v6015_v45  ;;  %v6161_v22 = vmax.f32 %v13215_v46, %v6160_v61  ;;  %v5682_v28 = vpop.f32.mrf.mxu1 }
 0xa2a   :  { %v6067_v20 = vsel %vm112_vm0, %v5688_v37, 0.0  ;;  %v6211_v57 = vsel %vm112_vm0, %v5688_v37, -inf  ;;  %v5683_v42 = vadd.f32 %v13163_v52, %v5682_v28 }
 0xa2b   :  { %v6068_v53 = vadd.f32 %v6067_v20, %v6066_v43  ;;  %v6212_v13 = vmax.f32 %v6210_v41, %v6211_v57  ;;  %v8564_v26 = vpop.f32.mrf.mxu1 }
 0xa2c   :  { %v6050_v58 = vsel %vm112_vm0, %v5683_v42, 0.0  ;;  %v6194_v48 = vsel %vm112_vm0, %v5683_v42, -inf  ;;  %v5698_v36 = vadd.f32 %v8564_v26, %v13163_v52 }
 0xa2d   :  { %v6051_v49 = vadd.f32 %v6050_v58, %v6049_v15  ;;  %v6195_v4 = vmax.f32 %v6193_v44, %v6194_v48  ;;  %v5692_v5 = vpop.f32.mrf.mxu1  ;;  %v13830_v58 = vld [vmem:[#allocation12_spill] sm:$0xff] }
 0xa2e   :  { %v6101_v29 = vsel %vm112_vm0, %v5698_v36, 0.0  ;;  %v6245_v23 = vsel %vm112_vm0, %v5698_v36, -inf  ;;  %v5693_v19 = vadd.f32 %v13163_v52, %v5692_v5 }
 0xa2f   :  { %v6102_v59 = vadd.f32 %v6101_v29, %v6100_v11  ;;  %v6246_v47 = vmax.f32 %v6244_v25, %v6245_v23  ;;  %v8567_v3 = vpop.f32.mrf.mxu1 }
 0xa30   :  { %v6084_v35 = vsel %vm112_vm0, %v5693_v19, 0.0  ;;  %v6228_v9 = vsel %vm112_vm0, %v5693_v19, -inf  ;;  %v5708_v10 = vadd.f32 %v8567_v3, %v13163_v52 }
 0xa31   :  { %v6085_v16 = vadd.f32 %v6084_v35, %v6083_v30  ;;  %v6229_v50 = vmax.f32 %v6227_v34, %v6228_v9  ;;  %v5702_v32 = vpop.f32.mrf.mxu1 }
 0xa32   :  { %v6001_v39 = vsel %vm112_vm0, %v5708_v10, 0.0  ;;  %v6145_v24 = vsel %vm112_vm0, %v5708_v10, -inf  ;;  %v5703_v38 = vadd.f32 %v13163_v52, %v5702_v32 }
 0xa33   :  { %v6002_v18 = vadd.f32 %v6001_v39, %v13186_v21  ;;  %v13250_v33 = vmax.f32 %v6144_v62, %v6145_v24  ;;  %v8570_v17 = vpop.f32.mrf.mxu1 }
 0xa34   :  { %v5984_v45 = vsel %vm112_vm0, %v5703_v38, 0.0  ;;  %v6128_v1 = vsel %vm112_vm0, %v5703_v38, -inf  ;;  %v5718_v2 = vadd.f32 %v8570_v17, %v13163_v52 }
 0xa35   :  { %v5985_v46 = vadd.f32 %v5984_v45, %v5983_v55  ;;  %v13255_v7 = vmax.f32 %v6127_v31, %v6128_v1  ;;  %v5712_v61 = vpop.f32.mrf.mxu1 }
 0xa36   :  { %v6035_v37 = vsel %vm112_vm0, %v5718_v2, 0.0  ;;  %v6179_v21 = vsel %vm112_vm0, %v5718_v2, -inf  ;;  %v5713_v43 = vadd.f32 %v13163_v52, %v5712_v61 }
 0xa37   :  { %v6036_v6 = vadd.f32 %v6035_v37, %v6034_v63  ;;  %v13260_v51 = vmax.f32 %v6178_v12, %v6179_v21  ;;  %v8573_v62 = vpop.f32.mrf.mxu1  ;;  %v2253_v63 = vadd.f32 %v11346_v27, %v10906_v56 }
 0xa38   :  { %v6018_v0 = vsel %vm112_vm0, %v5713_v43, 0.0  ;;  %v6162_v28 = vsel %vm112_vm0, %v5713_v43, -inf  ;;  %v5728_v41 = vadd.f32 %v8573_v62, %v13163_v52 }
 0xa39   :  { %v6019_v55 = vadd.f32 %v6018_v0, %v6017_v14  ;;  %v13265_v31 = vmax.f32 %v6161_v22, %v6162_v28  ;;  %v5722_v20 = vpop.f32.mrf.mxu1  ;;  %v3227_v48 = vadd.f32 %v13830_v58, %v2253_v63 }
 0xa3a   :  { %v6069_v57 = vsel %vm112_vm0, %v5728_v41, 0.0  ;;  %v6213_v42 = vsel %vm112_vm0, %v5728_v41, -inf  ;;  %v5723_v15 = vadd.f32 %v13163_v52, %v5722_v20 }
 0xa3b   :  { %v6070_v12 = vadd.f32 %v6069_v57, %v6068_v53  ;;  %v13272_v54 = vmax.f32 %v6212_v13, %v6213_v42  ;;  %v8576_v26 = vpop.f32.mrf.mxu1  ;;  %v13831_v53 = vld [vmem:[#allocation10_spill] sm:$0xff]  ;;  %v13832_v13 = vld [vmem:[#allocation8_spill] sm:$0xff] }
 0xa3c   :  { %v6052_v44 = vsel %vm112_vm0, %v5723_v15, 0.0  ;;  %v6196_v14 = vsel %vm112_vm0, %v5723_v15, -inf  ;;  %v5738_v22 = vadd.f32 %v8576_v26, %v13163_v52  ;;  %vm3234_vm3 = vcmp.eq.s32.totalorder %v13832_v13, %v13831_v53  ;;  %v7224_v13 = vld [vmem:[%s13791_s1 + $0x50] sm:$0xff]  ;;  %v7227_v53 = vld [vmem:[%s13791_s1 + $0x68] sm:$0xff] }
 0xa3d   :  { %v6053_v36 = vadd.f32 %v6052_v44, %v6051_v49  ;;  %v13278_v11 = vmax.f32 %v6195_v4, %v6196_v14  ;;  %v5732_v5 = vpop.f32.mrf.mxu1  ;;  %v13295_v9 = vsel %vm3234_vm3, 0.0, %v3227_v48 }
 0xa3e   :  { %v6103_v25 = vsel %vm112_vm0, %v5738_v22, 0.0  ;;  %v6247_v56 = vsel %vm112_vm0, %v5738_v22, -inf  ;;  %v5733_v27 = vadd.f32 %v13163_v52, %v5732_v5  ;;  %v3238_v17 = vmul.f32 %v13295_v9, %v13295_v9 }
 0xa3f   :  { %v6104_v29 = vadd.f32 %v6103_v25, %v6102_v59  ;;  %v13285_v23 = vmax.f32 %v6246_v47, %v6247_v56  ;;  %v8579_v19 = vpop.f32.mrf.mxu1 }
 0xa40   :  { %v6086_v30 = vsel %vm112_vm0, %v5733_v27, 0.0  ;;  %v6230_v49 = vsel %vm112_vm0, %v5733_v27, -inf  ;;  %v5748_v4 = vadd.f32 %v8579_v19, %v13163_v52  ;;  %v3240_v41 = vsel %vm112_vm0, %v3238_v17, 0.0 }
 0xa41   :  { %v6087_v3 = vadd.f32 %v6086_v30, %v6085_v16  ;;  %v13290_v34 = vmax.f32 %v6229_v50, %v6230_v49  ;;  %v5742_v35 = vpop.f32.mrf.mxu1 }
 0xa42   :  { %v6003_v59 = vsel %vm112_vm0, %v5748_v4, 0.0  ;;  %v13299_v47 = vsel %vm112_vm0, %v5748_v4, -inf  ;;  %v5743_v10 = vadd.f32 %v13163_v52, %v5742_v35 }
 0xa43   :  { %v13302_v32 = vadd.f32 %v6003_v59, %v6002_v18  ;;  %v6148_v16 = vmax.f32 %v13250_v33, %v13299_v47  ;;  %v8582_v50 = vpop.f32.mrf.mxu1 }
 0xa44   :  { %v5986_v39 = vsel %vm112_vm0, %v5743_v10, 0.0  ;;  %v13308_v24 = vsel %vm112_vm0, %v5743_v10, -inf  ;;  %v5758_v38 = vadd.f32 %v8582_v50, %v13163_v52 }
 0xa45   :  { %v13313_v45 = vadd.f32 %v5986_v39, %v5985_v46  ;;  %v6131_v18 = vmax.f32 %v13255_v7, %v13308_v24  ;;  %v5752_v1 = vpop.f32.mrf.mxu1 }
 0xa46   :  { %v6037_v2 = vsel %vm112_vm0, %v5758_v38, 0.0  ;;  %v13319_v61 = vsel %vm112_vm0, %v5758_v38, -inf  ;;  %v5753_v37 = vadd.f32 %v13163_v52, %v5752_v1 }
 0xa47   :  { %v13322_v21 = vadd.f32 %v6037_v2, %v6036_v6  ;;  %v6182_v43 = vmax.f32 %v13260_v51, %v13319_v61  ;;  %v8585_v62 = vpop.f32.mrf.mxu1 }
 0xa48   :  { %v6020_v46 = vsel %vm112_vm0, %v5753_v37, 0.0  ;;  %v13328_v0 = vsel %vm112_vm0, %v5753_v37, -inf  ;;  %v5768_v28 = vadd.f32 %v8585_v62, %v13163_v52 }
 0xa49   :  { %v13332_v20 = vadd.f32 %v6020_v46, %v6019_v55  ;;  %v6165_v57 = vmax.f32 %v13265_v31, %v13328_v0  ;;  %v5762_v6 = vpop.f32.mrf.mxu1  ;;  %3241 = vadd.xlane.f32.xlu0 %v3240_v41 }
 0xa4a   :  { %v6071_v42 = vsel %vm112_vm0, %v5768_v28, 0.0  ;;  %v13338_v15 = vsel %vm112_vm0, %v5768_v28, -inf  ;;  %v5763_v63 = vadd.f32 %v13163_v52, %v5762_v6 }
 0xa4b   :  { %v13341_v26 = vadd.f32 %v6071_v42, %v6070_v12  ;;  %v6216_v44 = vmax.f32 %v13272_v54, %v13338_v15  ;;  %v8588_v14 = vpop.f32.mrf.mxu1 }
 0xa4c   :  { %v6054_v55 = vsel %vm112_vm0, %v5763_v63, 0.0  ;;  %v13347_v22 = vsel %vm112_vm0, %v5763_v63, -inf  ;;  %v5778_v58 = vadd.f32 %v8588_v14, %v13163_v52 }
 0xa4d   :  { %v13350_v48 = vadd.f32 %v6054_v55, %v6053_v36  ;;  %v5772_v25 = vpop.f32.mrf.mxu1 }
 0xa4e   :  { %v6105_v12 = vsel %vm112_vm0, %v5778_v58, 0.0  ;;  %v13356_v56 = vsel %vm112_vm0, %v5778_v58, -inf  ;;  %v5773_v27 = vadd.f32 %v13163_v52, %v5772_v25 }
 0xa4f   :  { %v13359_v19 = vadd.f32 %v6105_v12, %v6104_v29  ;;  %v8591_v49 = vpop.f32.mrf.mxu1  ;;  %v13834_v54 = vmax.f32 %v13285_v23, %v13356_v56 }
 0xa50   :  { %v6088_v36 = vsel %vm112_vm0, %v5773_v27, 0.0  ;;  %v13365_v4 = vsel %vm112_vm0, %v5773_v27, -inf  ;;  %v5788_v41 = vadd.f32 %v8591_v49, %v13163_v52 }
 0xa51   :  { %v13367_v35 = vadd.f32 %v6088_v36, %v6087_v3  ;;  %v5782_v10 = vpop.f32.mrf.mxu1  ;;  %v13835_v23 = vmax.f32 %v13290_v34, %v13365_v4 }
 0xa52   :  { %v5783_v3 = vadd.f32 %v13163_v52, %v5782_v10  ;;  %v6005_v14 = vsel %vm112_vm0, %v5788_v41, 0.0  ;;  %v6149_v58 = vsel %vm112_vm0, %v5788_v41, -inf }
 0xa53   :  { %v8594_v50 = vpop.f32.mrf.mxu1 }
 0xa54   :  { %v5798_v42 = vadd.f32 %v8594_v50, %v13163_v52  ;;  %v5988_v25 = vsel %vm112_vm0, %v5783_v3, 0.0  ;;  %v6132_v27 = vsel %vm112_vm0, %v5783_v3, -inf  ;;  %v6006_v50 = vadd.f32 %v6005_v14, %v13302_v32 }
 0xa55   :  { %v5792_v39 = vpop.f32.mrf.mxu1  ;;  %v13396_v32 = vmax.f32 %v6131_v18, %v6132_v27 }
 0xa56   :  { %v5793_v55 = vadd.f32 %v13163_v52, %v5792_v39  ;;  %v6039_v36 = vsel %vm112_vm0, %v5798_v42, 0.0  ;;  %v13387_v39 = vmax.f32 %v6148_v16, %v6149_v58  ;;  %v6183_v41 = vsel %vm112_vm0, %v5798_v42, -inf }
 0xa57   :  { %v8597_v38 = vpop.f32.mrf.mxu1 }
 0xa58   :  { %v5808_v49 = vadd.f32 %v8597_v38, %v13163_v52  ;;  %v6022_v3 = vsel %vm112_vm0, %v5793_v55, 0.0  ;;  %v5989_v38 = vadd.f32 %v5988_v25, %v13313_v45  ;;  %v13407_v45 = vmax.f32 %v6182_v43, %v6183_v41 }
 0xa59   :  { %v5802_v29 = vpop.f32.mrf.mxu1  ;;  %v6023_v7 = vadd.f32 %v6022_v3, %v13332_v20 }
 0xa5a   :  { %v5803_v10 = vadd.f32 %v13163_v52, %v5802_v29  ;;  %v6040_v29 = vadd.f32 %v6039_v36, %v13322_v21  ;;  %v6073_v47 = vsel %vm112_vm0, %v5808_v49, 0.0  ;;  %v6217_v16 = vsel %vm112_vm0, %v5808_v49, -inf }
 0xa5b   :  { %v8600_v17 = vpop.f32.mrf.mxu1  ;;  %v6074_v61 = vadd.f32 %v6073_v47, %v13341_v26  ;;  %v13425_v43 = vmax.f32 %v6216_v44, %v6217_v16 }
 0xa5c   :  { %v5818_v59 = vadd.f32 %v8600_v17, %v13163_v52  ;;  %v6166_v17 = vsel %vm112_vm0, %v5793_v55, -inf  ;;  %v6056_v42 = vsel %vm112_vm0, %v5803_v10, 0.0  ;;  %v6200_v24 = vsel %vm112_vm0, %v5803_v10, -inf }
 0xa5d   :  { %v5812_v1 = vpop.f32.mrf.mxu1  ;;  %v13419_v51 = vmax.f32 %v6165_v57, %v6166_v17  ;;  %v6057_v20 = vadd.f32 %v6056_v42, %v13350_v48 }
 0xa5e   :  { %v5813_v5 = vadd.f32 %v13163_v52, %v5812_v1  ;;  %v6107_v18 = vsel %vm112_vm0, %v5818_v59, 0.0  ;;  %v6251_v14 = vsel %vm112_vm0, %v5818_v59, -inf }
 0xa5f   :  { %v8603_v2 = vpop.f32.mrf.mxu1  ;;  %v6108_v57 = vadd.f32 %v6107_v18, %v13359_v19  ;;  %v13440_v15 = vmax.f32 %v13834_v54, %v6251_v14 }
 0xa60   :  { %v5828_v1 = vadd.f32 %v8603_v2, %v13163_v52  ;;  %v6090_v55 = vsel %vm112_vm0, %v5813_v5, 0.0 }
 0xa61   :  { %v5822_v37 = vpop.f32.mrf.mxu1  ;;  %v6091_v26 = vadd.f32 %v6090_v55, %v13367_v35 }
 0xa62   :  { %v5823_v58 = vadd.f32 %v13163_v52, %v5822_v37  ;;  %v13833_v37 = vmax.f32 %v13278_v11, %v13347_v22  ;;  %v6007_v31 = vsel %vm112_vm0, %v5828_v1, 0.0  ;;  %v13444_v44 = vsel %vm112_vm0, %v5828_v1, -inf }
 0xa63   :  { %v8606_v62 = vpop.f32.mrf.mxu1  ;;  %v6152_v34 = vmax.f32 %v13387_v39, %v13444_v44 }
 0xa64   :  { %v5838_v2 = vadd.f32 %v8606_v62, %v13163_v52  ;;  %v13431_v25 = vmax.f32 %v13833_v37, %v6200_v24  ;;  %v6234_v62 = vsel %vm112_vm0, %v5813_v5, -inf  ;;  %v5990_v22 = vsel %vm112_vm0, %v5823_v58, 0.0 }
 0xa65   :  { %v5832_v46 = vpop.f32.mrf.mxu1  ;;  %v13448_v48 = vsel %vm112_vm0, %v5823_v58, -inf  ;;  %v13455_v56 = vmax.f32 %v13835_v23, %v6234_v62  ;;  %v5991_v4 = vadd.f32 %v5990_v22, %v5989_v38  ;;  %v9001_v22 = vld [vmem:[%s13795_s5] sm:$0xff] }
 0xa66   :  { %v5833_v0 = vadd.f32 %v13163_v52, %v5832_v46  ;;  %v6041_v5 = vsel %vm112_vm0, %v5838_v2, 0.0  ;;  %v6008_v46 = vadd.f32 %v6007_v31, %v6006_v50  ;;  %v13458_v35 = vsel %vm112_vm0, %v5838_v2, -inf }
 0xa67   :  { %v8609_v28 = vpop.f32.mrf.mxu1  ;;  %v6135_v50 = vmax.f32 %v13396_v32, %v13448_v48  ;;  %v6042_v3 = vadd.f32 %v6041_v5, %v6040_v29 }
 0xa68   :  { %v5848_v19 = vadd.f32 %v8609_v28, %v13163_v52  ;;  %v6024_v49 = vsel %vm112_vm0, %v5833_v0, 0.0  ;;  %v13463_v10 = vsel %vm112_vm0, %v5833_v0, -inf }
 0xa69   :  { %v5842_v6 = vpop.f32.mrf.mxu1  ;;  %v6025_v42 = vadd.f32 %v6024_v49, %v6023_v7  ;;  %v6169_v39 = vmax.f32 %v13419_v51, %v13463_v10 }
 0xa6a   :  { %v5843_v27 = vadd.f32 %v13163_v52, %v5842_v6  ;;  %v6186_v6 = vmax.f32 %v13407_v45, %v13458_v35  ;;  %v6075_v47 = vsel %vm112_vm0, %v5848_v19, 0.0  ;;  %v13475_v16 = vsel %vm112_vm0, %v5848_v19, -inf }
 0xa6b   :  { %v8612_v63 = vpop.f32.mrf.mxu1  ;;  %v6076_v24 = vadd.f32 %v6075_v47, %v6074_v61  ;;  %v6220_v18 = vmax.f32 %v13425_v43, %v13475_v16 }
 0xa6c   :  { %v5858_v41 = vadd.f32 %v8612_v63, %v13163_v52  ;;  %v6058_v38 = vsel %vm112_vm0, %v5843_v27, 0.0  ;;  %v13482_v32 = vsel %vm112_vm0, %v5843_v27, -inf }
 0xa6d   :  { %v5852_v12 = vpop.f32.mrf.mxu1  ;;  %v6059_v2 = vadd.f32 %v6058_v38, %v6057_v20 }
 0xa6e   :  { %v5853_v28 = vadd.f32 %v13163_v52, %v5852_v12  ;;  %v6109_v1 = vsel %vm112_vm0, %v5858_v41, 0.0  ;;  %v13487_v45 = vsel %vm112_vm0, %v5858_v41, -inf }
 0xa6f   :  { %v8615_v30 = vpop.f32.mrf.mxu1  ;;  %v6110_v61 = vadd.f32 %v6109_v1, %v6108_v57  ;;  %v6254_v43 = vmax.f32 %v13440_v15, %v13487_v45 }
 0xa70   :  { %v5868_v63 = vadd.f32 %v8615_v30, %v13163_v52  ;;  %v6092_v30 = vsel %vm112_vm0, %v5853_v28, 0.0  ;;  %v13494_v14 = vsel %vm112_vm0, %v5853_v28, -inf }
 0xa71   :  { %v5862_v33 = vpop.f32.mrf.mxu1  ;;  %v6093_v0 = vadd.f32 %v6092_v30, %v6091_v26  ;;  %v6237_v20 = vmax.f32 %v13455_v56, %v13494_v14 }
 0xa72   :  { %v5863_v7 = vadd.f32 %v13163_v52, %v5862_v33  ;;  %v6009_v51 = vsel %vm112_vm0, %v5868_v63, 0.0  ;;  %v6203_v33 = vmax.f32 %v13431_v25, %v13482_v32  ;;  %v6153_v54 = vsel %vm112_vm0, %v5868_v63, -inf }
 0xa73   :  { %v8618_v21 = vpop.f32.mrf.mxu1  ;;  %v6010_v25 = vadd.f32 %v6009_v51, %v6008_v46  ;;  %v13521_v23 = vmax.f32 %v6152_v34, %v6153_v54 }
 0xa74   :  { %v5878_v55 = vadd.f32 %v8618_v21, %v13163_v52  ;;  %v6136_v44 = vsel %vm112_vm0, %v5863_v7, -inf }
 0xa75   :  { %v5872_v59 = vpop.f32.mrf.mxu1  ;;  %v13523_v46 = vmax.f32 %v6135_v50, %v6136_v44 }
 0xa76   :  { %v5873_v37 = vadd.f32 %v13163_v52, %v5872_v59  ;;  %v5992_v59 = vsel %vm112_vm0, %v5863_v7, 0.0  ;;  %v6043_v57 = vsel %vm112_vm0, %v5878_v55, 0.0  ;;  %v6187_v15 = vsel %vm112_vm0, %v5878_v55, -inf }
 0xa77   :  { %v8621_v11 = vpop.f32.mrf.mxu1  ;;  %v5993_v56 = vadd.f32 %v5992_v59, %v5991_v4  ;;  %v13526_v49 = vmax.f32 %v6186_v6, %v6187_v15 }
 0xa78   :  { %v5888_v62 = vadd.f32 %v8621_v11, %v13163_v52  ;;  %v6026_v48 = vsel %vm112_vm0, %v5873_v37, 0.0  ;;  %v6170_v5 = vsel %vm112_vm0, %v5873_v37, -inf }
 0xa79   :  { %v5882_v36 = vpop.f32.mrf.mxu1  ;;  %v6027_v28 = vadd.f32 %v6026_v48, %v6025_v42  ;;  %v13530_v47 = vmax.f32 %v6169_v39, %v6170_v5 }
 0xa7a   :  { %v5883_v26 = vadd.f32 %v13163_v52, %v5882_v36  ;;  %v6077_v19 = vsel %vm112_vm0, %v5888_v62, 0.0  ;;  %v6044_v36 = vadd.f32 %v6043_v57, %v6042_v3  ;;  %v6221_v10 = vsel %vm112_vm0, %v5888_v62, -inf }
 0xa7b   :  { %v8624_v17 = vpop.f32.mrf.mxu1  ;;  %v13537_v6 = vmax.f32 %v6220_v18, %v6221_v10 }
 0xa7c   :  { %v5337_v12 = vpop.trf.xlu0  ;;  %v6060_v34 = vsel %vm112_vm0, %v5883_v26, 0.0  ;;  %v6204_v4 = vsel %vm112_vm0, %v5883_v26, -inf }
 0xa7d   :  { %v5892_v29 = vpop.f32.mrf.mxu1  ;;  %8515 = vmatprep.mubr.msk.f32.mxu0 %vm2066_vm1, %v5337_v12  ;;  %v6061_v30 = vadd.f32 %v6060_v34, %v6059_v2  ;;  %v13546_v7 = vmax.f32 %v6203_v33, %v6204_v4 }
 0xa7e   :  { %v5893_v35 = vadd.f32 %v13163_v52, %v5892_v29 }
 0xa7f   :  { %v8627_v58 = vpop.f32.mrf.mxu1 }
 0xa80   :  { %v5338_v31 = vpop.trf.xlu0  ;;  %v5908_v41 = vadd.f32 %v8627_v58, %v13163_v52  ;;  %v6094_v12 = vsel %vm112_vm0, %v5893_v35, 0.0  ;;  %v6238_v42 = vsel %vm112_vm0, %v5893_v35, -inf }
 0xa81   :  { %8516 = vmatmul.mubr.msk.f32.vlgmr.msra.gmra.mxu0 %vm2066_vm1, %v5338_v31  ;;  %v5902_v21 = vpop.f32.mrf.mxu1  ;;  %v13550_v55 = vadd.f32 %v6094_v12, %v6093_v0  ;;  %v13555_v62 = vmax.f32 %v6237_v20, %v6238_v42 }
 0xa82   :  { %8650 = vmatpush3.msra.mxu0 %v13168_v40  ;;  %v5898_v40 = vadd.f32 %v8624_v17, %v13163_v52  ;;  %v6078_v17 = vadd.f32 %v6077_v19, %v6076_v24  ;;  %v5903_v3 = vadd.f32 %v13163_v52, %v5902_v21  ;;  %v6011_v32 = vsel %vm112_vm0, %v5908_v41, 0.0 }
 0xa83   :  { %v8630_v11 = vpop.f32.mrf.mxu1  ;;  %8651 = vmatprep.subr.mxu0 %v9001_v22  ;;  %v6155_v29 = vsel %vm112_vm0, %v5908_v41, -inf  ;;  %v6012_v31 = vadd.f32 %v6011_v32, %v6010_v25 }
 0xa84   :  { %8652 = vmatpush3.msra.mxu0 %v9001_v22  ;;  %v6111_v50 = vsel %vm112_vm0, %v5898_v40, 0.0  ;;  %v6255_v63 = vsel %vm112_vm0, %v5898_v40, -inf  ;;  %v5918_v39 = vadd.f32 %v8630_v11, %v13163_v52  ;;  %v5994_v58 = vsel %vm112_vm0, %v5903_v3, 0.0 }
 0xa85   :  { %v5912_v27 = vpop.f32.mrf.mxu1  ;;  %v6112_v24 = vadd.f32 %v6111_v50, %v6110_v61  ;;  %v13548_v18 = vmax.f32 %v6254_v43, %v6255_v63  ;;  %v6138_v51 = vsel %vm112_vm0, %v5903_v3, -inf  ;;  %v6156_v21 = vmax.f32 %v13521_v23, %v6155_v29 }
 0xa86   :  { %v5913_v1 = vadd.f32 %v13163_v52, %v5912_v27  ;;  %v6045_v2 = vsel %vm112_vm0, %v5918_v39, 0.0  ;;  %v6189_v61 = vsel %vm112_vm0, %v5918_v39, -inf  ;;  %v5995_v59 = vadd.f32 %v5994_v58, %v5993_v56 }
 0xa87   :  { %v8633_v16 = vpop.f32.mrf.mxu1  ;;  %v6139_v44 = vmax.f32 %v13523_v46, %v6138_v51  ;;  %v6046_v15 = vadd.f32 %v6045_v2, %v6044_v36  ;;  %v6190_v48 = vmax.f32 %v13526_v49, %v6189_v61 }
 0xa88   :  { %v5928_v45 = vadd.f32 %v8633_v16, %v13163_v52  ;;  %v6028_v43 = vsel %vm112_vm0, %v5913_v1, 0.0  ;;  %v6172_v0 = vsel %vm112_vm0, %v5913_v1, -inf }
 0xa89   :  { %v5922_v38 = vpop.f32.mrf.mxu1  ;;  %v6029_v5 = vadd.f32 %v6028_v43, %v6027_v28  ;;  %v6173_v19 = vmax.f32 %v13530_v47, %v6172_v0 }
 0xa8a   :  { %v5923_v37 = vadd.f32 %v13163_v52, %v5922_v38  ;;  %v6079_v54 = vsel %vm112_vm0, %v5928_v45, 0.0  ;;  %v13565_v20 = vsel %vm112_vm0, %v5928_v45, -inf }
 0xa8b   :  { %v8636_v14 = vpop.f32.mrf.mxu1  ;;  %v6080_v40 = vadd.f32 %v6079_v54, %v6078_v17  ;;  %v6224_v56 = vmax.f32 %v13537_v6, %v13565_v20 }
 0xa8c   :  { %v5938_v25 = vadd.f32 %v8636_v14, %v13163_v52  ;;  %v6062_v26 = vsel %vm112_vm0, %v5923_v37, 0.0  ;;  %v13570_v11 = vsel %vm112_vm0, %v5923_v37, -inf }
 0xa8d   :  { %v5932_v33 = vpop.f32.mrf.mxu1  ;;  %v6063_v36 = vadd.f32 %v6062_v26, %v6061_v30  ;;  %v6207_v10 = vmax.f32 %v13546_v7, %v13570_v11 }
 0xa8e   :  { %v6113_v49 = vsel %vm112_vm0, %v5938_v25, 0.0  ;;  %v13584_v47 = vsel %vm112_vm0, %v5938_v25, -inf  ;;  %v5933_v4 = vadd.f32 %v13163_v52, %v5932_v33 }
 0xa8f   :  { %v8639_v57 = vpop.f32.mrf.mxu1  ;;  %v6114_v12 = vadd.f32 %v6113_v49, %v6112_v24  ;;  %v6258_v7 = vmax.f32 %v13548_v18, %v13584_v47 }
 0xa90   :  { %v5948_v22 = vadd.f32 %v8639_v57, %v13163_v52  ;;  %v6096_v33 = vsel %vm112_vm0, %v5933_v4, 0.0  ;;  %v6240_v25 = vsel %vm112_vm0, %v5933_v4, -inf }
 0xa91   :  { %v5942_v23 = vpop.f32.mrf.mxu1  ;;  %v6241_v47 = vmax.f32 %v13555_v62, %v6240_v25  ;;  %v3280_v25 = vld [vmem:[%s13791_s1 + $0x8] sm:$0xff] }
 0xa92   :  { %v6013_v46 = vsel %vm112_vm0, %v5948_v22, 0.0  ;;  %v6157_v35 = vsel %vm112_vm0, %v5948_v22, -inf  ;;  %v5943_v27 = vadd.f32 %v13163_v52, %v5942_v23 }
 0xa93   :  { %v6014_v41 = vadd.f32 %v6013_v46, %v6012_v31  ;;  %v8642_v28 = vpop.f32.mrf.mxu1  ;;  %v6158_v63 = vmax.f32 %v6156_v21, %v6157_v35 }
 0xa94   :  { %v5996_v17 = vsel %vm112_vm0, %v5943_v27, 0.0  ;;  %v6140_v34 = vsel %vm112_vm0, %v5943_v27, -inf  ;;  %v5958_v16 = vadd.f32 %v8642_v28, %v13163_v52 }
 0xa95   :  { %v6118_v50 = vmul.f32 0.11111111, %v6014_v41  ;;  %v5997_v3 = vadd.f32 %v5996_v17, %v5995_v59  ;;  %v5952_v6 = vpop.f32.mrf.mxu1  ;;  %v6141_v1 = vmax.f32 %v6139_v44, %v6140_v34 }
 0xa96   :  { %v6047_v42 = vsel %vm112_vm0, %v5958_v16, 0.0  ;;  %v6191_v39 = vsel %vm112_vm0, %v5958_v16, -inf  ;;  %v5953_v38 = vadd.f32 %v13163_v52, %v5952_v6 }
 0xa97   :  { %v6262_v32 = vadd.f32 %v6158_v63, %v6118_v50  ;;  %v6117_v29 = vmul.f32 0.11111111, %v5997_v3  ;;  %v6048_v45 = vadd.f32 %v6047_v42, %v6046_v15  ;;  %v8645_v30 = vpop.f32.mrf.mxu1  ;;  %v6192_v31 = vmax.f32 %v6190_v48, %v6191_v39 }
 0xa98   :  { %v6030_v14 = vsel %vm112_vm0, %v5953_v38, 0.0  ;;  %v6174_v58 = vsel %vm112_vm0, %v5953_v38, -inf  ;;  %v5968_v24 = vadd.f32 %v8645_v30, %v13163_v52 }
 0xa99   :  { %v6261_v51 = vadd.f32 %v6141_v1, %v6117_v29  ;;  %v6120_v37 = vmul.f32 0.11111111, %v6048_v45  ;;  %v6031_v21 = vadd.f32 %v6030_v14, %v6029_v5  ;;  %v5962_v2 = vpop.f32.mrf.mxu1  ;;  %v6175_v59 = vmax.f32 %v6173_v19, %v6174_v58 }
 0xa9a   :  { %v6081_v61 = vsel %vm112_vm0, %v5968_v24, 0.0  ;;  %v6225_v43 = vsel %vm112_vm0, %v5968_v24, -inf  ;;  %v5963_v0 = vadd.f32 %v13163_v52, %v5962_v2  ;;  %v6097_v19 = vadd.f32 %v6096_v33, %v13550_v55  ;;  %v9002_v24 = vld [vmem:[%s13796_s6] ss:$0 sm:$0xff] }
 0xa9b   :  { %v6264_v18 = vadd.f32 %v6192_v31, %v6120_v37  ;;  %v6119_v54 = vmul.f32 0.11111111, %v6031_v21  ;;  %v6082_v44 = vadd.f32 %v6081_v61, %v6080_v40  ;;  %v8648_v20 = vpop.f32.mrf.mxu1  ;;  %8653 = vmatprep.mubr.msk.f32.mxu0 %vm112_vm0, %v6261_v51  ;;  %v6226_v48 = vmax.f32 %v6224_v56, %v6225_v43 }
 0xa9c   :  { %v6064_v57 = vsel %vm112_vm0, %v5963_v0, 0.0  ;;  %v6208_v15 = vsel %vm112_vm0, %v5963_v0, -inf  ;;  %v5978_v26 = vadd.f32 %v8648_v20, %v13163_v52  ;;  %8654 = vmatmul.mubr.msk.f32.vlgmr.msra.gmra.mxu0 %vm112_vm0, %v6262_v32  ;;  %v3279_v20 = vld [vmem:[%s13791_s1] sm:$0xff] }
 0xa9d   :  { %v6263_v11 = vadd.f32 %v6175_v59, %v6119_v54  ;;  %v6122_v22 = vmul.f32 0.11111111, %v6082_v44  ;;  %v6065_v5 = vadd.f32 %v6064_v57, %v6063_v36  ;;  %v5972_v23 = vpop.f32.mrf.mxu1  ;;  %v6209_v41 = vmax.f32 %v6207_v10, %v6208_v15  ;;  %v3281_v57 = vld [vmem:[%s13791_s1 + $0x10] sm:$0xff]  ;;  %v3282_v15 = vld [vmem:[%s13791_s1 + $0x18] sm:$0xff] }
 0xa9e   :  { %v6115_v40 = vsel %vm112_vm0, %v5978_v26, 0.0  ;;  %v6259_v46 = vsel %vm112_vm0, %v5978_v26, -inf  ;;  %v5973_v35 = vadd.f32 %v13163_v52, %v5972_v23  ;;  %v3283_v26 = vld [vmem:[%s13791_s1 + $0x20] sm:$0xff] }
 0xa9f   :  { %v6266_v27 = vadd.f32 %v6226_v48, %v6122_v22  ;;  %v6121_v49 = vmul.f32 0.11111111, %v6065_v5  ;;  %v6116_v28 = vadd.f32 %v6115_v40, %v6114_v12  ;;  %8656 = vmatprep.mubr.msk.f32.mxu0 %vm112_vm0, %v6263_v11  ;;  %v6260_v34 = vmax.f32 %v6258_v7, %v6259_v46  ;;  %v3309_v11 = vld [vmem:[%s13792_s2] sm:$0xff]  ;;  %v3310_v22 = vld [vmem:[%s13792_s2 + $0x8] sm:$0xff] }
 0xaa0   :  { %v6098_v56 = vsel %vm112_vm0, %v5973_v35, 0.0  ;;  %v6242_v36 = vsel %vm112_vm0, %v5973_v35, -inf  ;;  %8657 = vmatmul.mubr.msk.f32.gmra.mxu0 %vm112_vm0, %v6264_v18 }
 0xaa1   :  { %v6265_v55 = vadd.f32 %v6209_v41, %v6121_v49  ;;  %v6124_v17 = vmul.f32 0.11111111, %v6116_v28  ;;  %v6099_v16 = vadd.f32 %v6098_v56, %v6097_v19  ;;  %v6243_v50 = vmax.f32 %v6241_v47, %v6242_v36  ;;  %v13836_v49 = vld [vmem:[#allocation11_spill] sm:$0xff]  ;;  %v7228_v41 = vld [vmem:[%s13791_s1 + $0x70] sm:$0xff] }
 0xaa2   :  { %v3237_v28 = vsel %vm3235_vm2, 0.0, %v13836_v49 }
 0xaa3   :  { %v6268_v4 = vadd.f32 %v6260_v34, %v6124_v17  ;;  %v6123_v52 = vmul.f32 0.11111111, %v6099_v16  ;;  %8659 = vmatprep.mubr.msk.f32.mxu0 %vm112_vm0, %v6265_v55  ;;  %v3239_v47 = vmul.f32 %v3237_v28, %v3237_v28 }
 0xaa4   :  { %8660 = vmatmul.mubr.msk.f32.gmra.mxu0 %vm112_vm0, %v6266_v27 }
 0xaa5   :  { %v6267_v10 = vadd.f32 %v6243_v50, %v6123_v52  ;;  %v3243_v56 = vsel %vm112_vm0, %v3239_v47, 0.0 }
 0xaa7   :  { %8662 = vmatprep.mubr.msk.f32.mxu0 %vm112_vm0, %v6267_v10 }
 0xaa8   :  { %8663 = vmatmul.mubr.msk.f32.gmra.mxu0 %vm112_vm0, %v6268_v4 }
 0xad2   :  { %v3242_v62 = vpop.xlane.xlu0 %3241 }
 0xad3   :  { %8691 = vrsqrt.f32 %v3242_v62  ;;  %vm3248_vm4 = vcmp.eq.f32.partialorder %v3242_v62, inf  ;;  %v3251_v6 = vand.u32 2147483648, %v3242_v62  ;;  %vm3250_vm5 = vcmp.eq.f32.partialorder %v3242_v62, 0.0 }
 0xae0   :  { %v8692_v63 = vpop.eup %8691 }
 0xae1   :  { %v3247_v3 = vmul.f32 %v8692_v63, %v3242_v62 }
 0xae3   :  { %v3249_v12 = vsel %vm3248_vm4, %v3242_v62, %v3247_v3 }
 0xae4   :  { %v3252_v42 = vsel %vm3250_vm5, %v3251_v6, %v3249_v12 }
 0xae5   :  { %v3260_v39 = vmax.f32 %v3252_v42, 1e-12 }
 0xae7   :  { %8693 = vrcp.f32 %v3260_v39 }
 0xaf4   :  { %v8694_v38 = vpop.eup %8693 }
 0xaf5   :  { %v3263_v32 = vmul.f32 %v8694_v38, %v13295_v9 }
 0xaf7   :  { %v3266_v29 = vsel %vm3234_vm3, 0.0, %v3263_v32 }
 0xaf8   :  { %v3268_v1 = vand.u32 2147483647, %v3266_v29 }
 0xafa   :  { %v3270_v45 = vsel %vm112_vm0, %v3268_v1, 0.0 }
 0xafb   :  { %3271 = vadd.xlane.f32.xlu0 %v3270_v45 }
 0xb41   :  { %v13626_v30 = vpop.f32.mrf.mxu0 }
 0xb42   :  { %v5544_v62 = vadd.f32 %v13156_v60, %v13626_v30 }
 0xb43   :  { %v13628_v7 = vpop.f32.mrf.mxu0 }
 0xb44   :  { %v5539_v3 = vadd.f32 %v13158_v8, %v13628_v7 }
 0xb5c   :  { %v8655_v14 = vpop.f32.mrf.mxu0 }
 0xb5d   :  { %v6365_v31 = vadd.f32 %v9002_v24, %v8655_v14 }
 0xb5e   :  { %v6359_v58 = vpop.f32.mrf.mxu0 }
 0xb5f   :  { %v6360_v51 = vadd.f32 %v9002_v24, %v6359_v58 }
 0xb60   :  { %v8658_v9 = vpop.f32.mrf.mxu0 }
 0xb61   :  { %6398 = vxpose.xlu1.b32.start [1/8] (short) (narrow) %v6360_v51, 16  ;;  %v6375_v18 = vadd.f32 %v9002_v24, %v8658_v9  ;;  %v3285_v9 = vld [vmem:[%s13791_s1 + $0x30] sm:$0xff] }
 0xb62   :  { %v6369_v37 = vpop.f32.mrf.mxu0 }
 0xb63   :  { %v6370_v33 = vadd.f32 %v9002_v24, %v6369_v37  ;;  %v3286_v37 = vld [vmem:[%s13791_s1 + $0x38] sm:$0xff] }
 0xb64   :  { %v8661_v21 = vpop.f32.mrf.mxu0 }
 0xb65   :  { %6399 = vxpose.xlu1.b32.cont [2/8] (short) (narrow) %v6365_v31, 16  ;;  %v6385_v59 = vadd.f32 %v9002_v24, %v8661_v21  ;;  %v3288_v21 = vld [vmem:[%s13791_s1 + $0x48] sm:$0xff] }
 0xb66   :  { %v6379_v2 = vpop.f32.mrf.mxu0 }
 0xb67   :  { %v6380_v44 = vadd.f32 %v9002_v24, %v6379_v2  ;;  %v3311_v2 = vld [vmem:[%s13792_s2 + $0x10] sm:$0xff] }
 0xb68   :  { %v8664_v61 = vpop.f32.mrf.mxu0 }
 0xb69   :  { %v6395_v43 = vadd.f32 %v9002_v24, %v8664_v61  ;;  %6400 = vxpose.xlu1.b32.cont [3/8] (short) (narrow) %v6370_v33, 16 }
 0xb6a   :  { %v6389_v0 = vpop.f32.mrf.mxu0 }
 0xb6b   :  { %v6390_v54 = vadd.f32 %v9002_v24, %v6389_v0  ;;  %8665 = vmatprep.subr.mxu0 %v6395_v43 }
 0xb6c   :  { %8666 = vmatpush3.msra.mxu0 %v6395_v43 }
 0xb6d   :  { %8667 = vmatprep.subr.mxu0 %v6390_v54  ;;  %6401 = vxpose.xlu1.b32.cont [4/8] (short) (narrow) %v6375_v18, 16 }
 0xb6e   :  { %8668 = vmatpush3.msra.mxu0 %v6390_v54 }
 0xb6f   :  { %8669 = vmatprep.subr.mxu0 %v6385_v59 }
 0xb70   :  { %8670 = vmatpush3.msra.mxu0 %v6385_v59 }
 0xb71   :  { %8671 = vmatprep.subr.mxu0 %v6380_v44  ;;  %6402 = vxpose.xlu1.b32.cont [5/8] (short) (narrow) %v6380_v44, 16 }
 0xb72   :  { %8672 = vmatpush3.msra.mxu0 %v6380_v44 }
 0xb73   :  { %8673 = vmatprep.subr.mxu0 %v6375_v18 }
 0xb74   :  { %8674 = vmatpush3.msra.mxu0 %v6375_v18 }
 0xb75   :  { %8675 = vmatprep.subr.mxu0 %v6370_v33  ;;  %6403 = vxpose.xlu1.b32.cont [6/8] (short) (narrow) %v6385_v59, 16 }
 0xb76   :  { %8676 = vmatpush3.msra.mxu0 %v6370_v33  ;;  %v3312_v33 = vld [vmem:[%s13792_s2 + $0x18] sm:$0xff] }
 0xb77   :  { %8677 = vmatprep.subr.mxu0 %v6365_v31 }
 0xb78   :  { %8678 = vmatpush3.msra.mxu0 %v6365_v31  ;;  %v3287_v31 = vld [vmem:[%s13791_s1 + $0x40] sm:$0xff] }
 0xb79   :  { %6404 = vxpose.xlu1.b32.cont [7/8] (short) (narrow) %v6390_v54, 16  ;;  %8679 = vmatprep.subr.mxu0 %v6360_v51 }
 0xb7a   :  { %8680 = vmatpush3.msra.mxu0 %v6360_v51  ;;  %v3284_v51 = vld [vmem:[%s13791_s1 + $0x28] sm:$0xff] }
 0xb7d   :  { %6405 = vxpose.xlu1.b32.end [8/8] (short) (narrow) %v6395_v43, 16 }
 0xb84   :  { %v3272_v48 = vpop.xlane.xlu0 %3271 }
 0xb85   :  { %v3289_v5 = vmul.f32 %v3279_v20, %v3272_v48  ;;  %v3290_v23 = vmul.f32 %v3280_v25, %v3272_v48  ;;  %v3291_v19 = vmul.f32 %v3281_v57, %v3272_v48  ;;  %v3292_v40 = vmul.f32 %v3282_v15, %v3272_v48  ;;  %3277 = vst.msk [vmem:[%s13797_s7] sm:$0xff] %vm3276_vm6, %v3272_v48 }
 0xb86   :  { %v3293_v46 = vmul.f32 %v3283_v26, %v3272_v48  ;;  %v3313_v35 = vmul.f32 %v3309_v11, %v3272_v48  ;;  %v3314_v27 = vmul.f32 %v3310_v22, %v3272_v48 }
 0xb87   :  { %3299 = vst [vmem:[#allocation2] sm:$0xff] %v3289_v5  ;;  %3300 = vst [vmem:[#allocation2 + $0x8] sm:$0xff] %v3290_v23 }
 0xb88   :  { %3301 = vst [vmem:[#allocation2 + $0x10] sm:$0xff] %v3291_v19  ;;  %3302 = vst [vmem:[#allocation2 + $0x18] sm:$0xff] %v3292_v40 }
 0xb89   :  { %3303 = vst.msk [vmem:[#allocation2 + $0x20] sm:$0xff] %vm2066_vm1, %v3293_v46  ;;  %3317 = vst [vmem:[#allocation4] sm:$0xff] %v3313_v35 }
 0xb8a   :  { %3318 = vst.msk [vmem:[#allocation4 + $0x8] sm:$0xff] %vm112_vm0, %v3314_v27 }
 0xba4   :  { %3244 = vadd.xlane.f32.xlu1 %v3243_v56 }
 0xbdd   :  { %v6414_v36 = vpop.trf.xlu1 }
 0xbde   :  { %8681 = vmatprep.mubr.msk.f32.mxu0 %vm2066_vm1, %v6414_v36 }
 0xbe1   :  { %v6415_v55 = vpop.trf.xlu1 }
 0xbe2   :  { %8682 = vmatmul.mubr.msk.f32.vlgmr.msra.gmra.mxu0 %vm2066_vm1, %v6415_v55 }
 0xc2d   :  { %v3245_v17 = vpop.xlane.xlu1 %3244 }
 0xc2e   :  { %8695 = vrsqrt.f32 %v3245_v17  ;;  %vm3255_vm7 = vcmp.eq.f32.partialorder %v3245_v17, inf  ;;  %v3258_v52 = vand.u32 2147483648, %v3245_v17  ;;  %vm3257_vm8 = vcmp.eq.f32.partialorder %v3245_v17, 0.0 }
 0xc3b   :  { %v8696_v34 = vpop.eup %8695 }
 0xc3c   :  { %v3254_v16 = vmul.f32 %v8696_v34, %v3245_v17 }
 0xc3e   :  { %v3256_v4 = vsel %vm3255_vm7, %v3245_v17, %v3254_v16  ;;  %v7225_v16 = vld [vmem:[%s13791_s1 + $0x58] sm:$0xff] }
 0xc3f   :  { %v3259_v50 = vsel %vm3257_vm8, %v3258_v52, %v3256_v4  ;;  %v7226_v4 = vld [vmem:[%s13791_s1 + $0x60] sm:$0xff] }
 0xc40   :  { %v3261_v10 = vmax.f32 %v3259_v50, 1e-12  ;;  %v7234_v52 = vld [vmem:[%s13792_s2 + $0x20] sm:$0xff]  ;;  %v7235_v50 = vld [vmem:[%s13792_s2 + $0x28] sm:$0xff] }
 0xc42   :  { %8697 = vrcp.f32 %v3261_v10 }
 0xc4f   :  { %v8698_v12 = vpop.eup %8697 }
 0xc50   :  { %v3265_v29 = vmul.f32 %v8698_v12, %v3237_v28  ;;  %v7229_v12 = vld [vmem:[%s13791_s1 + $0x78] sm:$0xff] }
 0xc52   :  { %v3267_v45 = vsel %vm3235_vm2, 0.0, %v3265_v29  ;;  %v7231_v29 = vld [vmem:[%s13791_s1 + $0x88] sm:$0xff] }
 0xc53   :  { %v3269_v7 = vand.u32 2147483647, %v3267_v45  ;;  %v7237_v45 = vld [vmem:[%s13792_s2 + $0x38] sm:$0xff] }
 0xc55   :  { %v3273_v14 = vsel %vm112_vm0, %v3269_v7, 0.0 }
 0xca2   :  { %v8683_v63 = vpop.f32.mrf.mxu0 }
 0xca3   :  { %v6512_v6 = vadd.f32 %v8683_v63, %v5544_v62 }
 0xca4   :  { %v6502_v42 = vpop.f32.mrf.mxu0 }
 0xca5   :  { %v6511_v39 = vadd.f32 %v6502_v42, %v5539_v3  ;;  %v13674_v38 = vsel %vm3235_vm2, 0.0, %v6512_v6 }
 0xca6   :  { %v6516_v8 = vmul.f32 %v13674_v38, %v13674_v38 }
 0xca7   :  { %v6513_v32 = vsel %vm3234_vm3, 0.0, %v6511_v39 }
 0xca8   :  { %v6515_v1 = vmul.f32 %v6513_v32, %v6513_v32  ;;  %v6520_v30 = vsel %vm112_vm0, %v6516_v8, 0.0  ;;  %v7236_v8 = vld [vmem:[%s13792_s2 + $0x30] sm:$0xff] }
 0xcaa   :  { %v6517_v60 = vsel %vm112_vm0, %v6515_v1, 0.0  ;;  %v7232_v1 = vld [vmem:[%s13791_s1 + $0x90] sm:$0xff] }
 0xcab   :  { %6518 = vadd.xlane.f32.xlu1 %v6517_v60  ;;  %v7233_v60 = vld [vmem:[%s13791_s1 + $0x98] sm:$0xff] }
 0xcaf   :  { %6521 = vadd.xlane.f32.xlu1 %v6520_v30 }
 0xcb3   :  { %3274 = vadd.xlane.f32.xlu1 %v3273_v14 }
 0xd34   :  { %v6519_v58 = vpop.xlane.xlu1 %6518 }
 0xd35   :  { %8699 = vrsqrt.f32 %v6519_v58  ;;  %vm6525_vm9 = vcmp.eq.f32.partialorder %v6519_v58, inf  ;;  %v6528_v15 = vand.u32 2147483648, %v6519_v58  ;;  %vm6527_vm10 = vcmp.eq.f32.partialorder %v6519_v58, 0.0 }
 0xd38   :  { %v6522_v24 = vpop.xlane.xlu1 %6521 }
 0xd39   :  { %8701 = vrsqrt.f32 %v6522_v24  ;;  %vm6532_vm11 = vcmp.eq.f32.partialorder %v6522_v24, inf  ;;  %v6535_v23 = vand.u32 2147483648, %v6522_v24  ;;  %vm6534_vm12 = vcmp.eq.f32.partialorder %v6522_v24, 0.0 }
 0xd3c   :  { %v3275_v61 = vpop.xlane.xlu1 %3274 }
 0xd3d   :  { %v3294_v43 = vmul.f32 %v3284_v51, %v3275_v61  ;;  %v3295_v0 = vmul.f32 %v3285_v9, %v3275_v61  ;;  %v3296_v18 = vmul.f32 %v3286_v37, %v3275_v61  ;;  %v3297_v54 = vmul.f32 %v3287_v31, %v3275_v61  ;;  %3278 = vst.msk [vmem:[%s13797_s7 + $0x8] sm:$0xff] %vm3276_vm6, %v3275_v61 }
 0xd3e   :  { %v3298_v59 = vmul.f32 %v3288_v21, %v3275_v61  ;;  %v3315_v44 = vmul.f32 %v3311_v2, %v3275_v61  ;;  %v3316_v20 = vmul.f32 %v3312_v33, %v3275_v61 }
 0xd3f   :  { %3304 = vst [vmem:[#allocation2 + $0x28] sm:$0xff] %v3294_v43  ;;  %3305 = vst [vmem:[#allocation2 + $0x30] sm:$0xff] %v3295_v0 }
 0xd40   :  { %3306 = vst [vmem:[#allocation2 + $0x38] sm:$0xff] %v3296_v18  ;;  %3307 = vst [vmem:[#allocation2 + $0x40] sm:$0xff] %v3297_v54 }
 0xd41   :  { %3308 = vst.msk [vmem:[#allocation2 + $0x48] sm:$0xff] %vm2066_vm1, %v3298_v59  ;;  %3319 = vst [vmem:[#allocation4 + $0x10] sm:$0xff] %v3315_v44 }
 0xd42   :  { %3320 = vst.msk [vmem:[#allocation4 + $0x18] sm:$0xff] %vm112_vm0, %v3316_v20  ;;  %v8700_v25 = vpop.eup %8699 }
 0xd43   :  { %v6524_v57 = vmul.f32 %v8700_v25, %v6519_v58 }
 0xd45   :  { %v6526_v26 = vsel %vm6525_vm9, %v6519_v58, %v6524_v57 }
 0xd46   :  { %v8702_v11 = vpop.eup %8701  ;;  %v6529_v22 = vsel %vm6527_vm10, %v6528_v15, %v6526_v26 }
 0xd47   :  { %v6537_v48 = vmax.f32 %v6529_v22, 1e-12  ;;  %v6531_v5 = vmul.f32 %v8702_v11, %v6522_v24 }
 0xd49   :  { %8703 = vrcp.f32 %v6537_v48  ;;  %v6533_v19 = vsel %vm6532_vm11, %v6522_v24, %v6531_v5 }
 0xd4a   :  { %v6536_v40 = vsel %vm6534_vm12, %v6535_v23, %v6533_v19 }
 0xd4b   :  { %v6538_v46 = vmax.f32 %v6536_v40, 1e-12 }
 0xd4d   :  { %8705 = vrcp.f32 %v6538_v46 }
 0xd56   :  { %v8704_v35 = vpop.eup %8703 }
 0xd57   :  { %v6540_v27 = vmul.f32 %v8704_v35, %v6513_v32  ;;  %v7230_v32 = vld [vmem:[%s13791_s1 + $0x80] sm:$0xff]  ;;  %s9003_s1 = scalar_lea.vmem %s6610_s28, 2560 }
 0xd58   :  { %p9004_p0 = scmp.ne.s32.totalorder %s6610_s28, %s9003_s1  ;;  %p9009_p2 = scmp.lt.s32.totalorder %s9003_s1, %s9003_s1 }
 0xd59   :  { %v6543_v49 = vsel %vm3234_vm3, 0.0, %v6540_v27 }
 0xd5a   :  { %v8706_v28 = vpop.eup %8705  ;;  %v6545_v47 = vand.u32 2147483647, %v6543_v49  ;;  %p9010_p3 = por %p9009_p2, %p9008_p1 }
 0xd5b   :  { %v6542_v56 = vmul.f32 %v8706_v28, %v13674_v38 }
 0xd5c   :  { %v6547_v36 = vsel %vm112_vm0, %v6545_v47, 0.0  ;;  %p9011_p4 = pnand %p9010_p3, %p9004_p0 }
 0xd5d   :  { %6548 = vadd.xlane.f32.xlu0 %v6547_v36  ;;  %v6544_v55 = vsel %vm3235_vm2, 0.0, %v6542_v56 }
 0xd5e   :  { %v6546_v17 = vand.u32 2147483647, %v6544_v55 }
 0xd60   :  { %v6550_v34 = vsel %vm112_vm0, %v6546_v17, 0.0 }
 0xd61   :  { %6551 = vadd.xlane.f32.xlu1 %v6550_v34 }
 0xde6   :  { %v6549_v10 = vpop.xlane.xlu0 %6548 }
 0xde7   :  { %7222 = vst.msk [vmem:[%s13797_s7 + $0x10] sm:$0xff] %vm3276_vm6, %v6549_v10  ;;  %v6567_v62 = vmul.f32 %v7224_v13, %v6549_v10  ;;  %v6568_v63 = vmul.f32 %v7225_v16, %v6549_v10  ;;  %v6569_v3 = vmul.f32 %v7226_v4, %v6549_v10  ;;  %v6570_v6 = vmul.f32 %v7227_v53, %v6549_v10 }
 0xde8   :  { %v6571_v42 = vmul.f32 %v7228_v41, %v6549_v10  ;;  %v6593_v39 = vmul.f32 %v7234_v52, %v6549_v10  ;;  %v6594_v38 = vmul.f32 %v7235_v50, %v6549_v10 }
 0xde9   :  { %6578 = vst [vmem:[#allocation2 + $0x50] sm:$0xff] %v6567_v62  ;;  %6579 = vst [vmem:[#allocation2 + $0x58] sm:$0xff] %v6568_v63 }
 0xdea   :  { %6580 = vst [vmem:[#allocation2 + $0x60] sm:$0xff] %v6569_v3  ;;  %6581 = vst [vmem:[#allocation2 + $0x68] sm:$0xff] %v6570_v6  ;;  %v6552_v30 = vpop.xlane.xlu1 %6551 }
 0xdeb   :  { %6582 = vst.msk [vmem:[#allocation2 + $0x70] sm:$0xff] %vm2066_vm1, %v6571_v42  ;;  %6598 = vst [vmem:[#allocation4 + $0x20] sm:$0xff] %v6593_v39  ;;  %v6572_v7 = vmul.f32 %v7229_v12, %v6552_v30  ;;  %v6573_v14 = vmul.f32 %v7230_v32, %v6552_v30  ;;  %v6574_v58 = vmul.f32 %v7231_v29, %v6552_v30 }
 0xdec   :  { %6599 = vst.msk [vmem:[#allocation4 + $0x28] sm:$0xff] %vm112_vm0, %v6594_v38  ;;  %v6575_v24 = vmul.f32 %v7232_v1, %v6552_v30  ;;  %v6576_v51 = vmul.f32 %v7233_v60, %v6552_v30  ;;  %v6595_v9 = vmul.f32 %v7236_v8, %v6552_v30  ;;  %v6596_v37 = vmul.f32 %v7237_v45, %v6552_v30 }
 0xded   :  { %7223 = vst.msk [vmem:[%s13797_s7 + $0x18] sm:$0xff] %vm3276_vm6, %v6552_v30  ;;  %6583 = vst [vmem:[#allocation2 + $0x78] sm:$0xff] %v6572_v7 }
 0xdee   :  { %6584 = vst [vmem:[#allocation2 + $0x80] sm:$0xff] %v6573_v14  ;;  %6585 = vst [vmem:[#allocation2 + $0x88] sm:$0xff] %v6574_v58 }
 0xdef   :  { %6586 = vst [vmem:[#allocation2 + $0x90] sm:$0xff] %v6575_v24  ;;  %6587 = vst.msk [vmem:[#allocation2 + $0x98] sm:$0xff] %vm2066_vm1, %v6576_v51 }
 0xdf0   :  { %6600 = vst [vmem:[#allocation4 + $0x30] sm:$0xff] %v6595_v9  ;;  %6601 = vst.msk [vmem:[#allocation4 + $0x38] sm:$0xff] %vm112_vm0, %v6596_v37 }
 0xdf1   :  { %9014 = shalt.err (!%p9011_p4)
}
 0xdf2   :  { %s9049_s2 = smov 640   ;;  %s9050_s7 = smov 40  }
 0xdf3   :  { %6615 = dma.vmem_to_hbm [thread:$0]  %s6610_s28, 2560, %s13798_s8, [#allocation3], %s9049_s2, %s9049_s2, %s9050_s7  }
 0xdf4   :  { %s9023_s0 = scalar_lea.vmem %s13775_s14, 1024  ;;  %p9028_p6 = scmp.lt.s32.totalorder %s13775_s14, %s13775_s14 }
 0xdf5   :  { %p9024_p5 = scmp.ne.s32.totalorder %s13775_s14, %s9023_s0  ;;  %p9029_p7 = scmp.lt.s32.totalorder %s9023_s0, %s9023_s0 }
 0xdf7   :  { %p9030_p8 = por %p9029_p7, %p9028_p6 }
 0xdf9   :  { %p9031_p9 = pnand %p9030_p8, %p9024_p5 }
 0xdfb   :  { %9034 = shalt.err (!%p9031_p9)
}
 0xdfc   :  { %s9051_s19 = smov 256   ;;  %s9052_s20 = smov 16  }
 0xdfd   :  { %6627 = dma.vmem_to_hbm [thread:$0]  %s13775_s14, 1024, %s13799_s9, [#allocation5], %s9051_s19, %s9051_s19, %s9052_s20  }
 0xdfe   :  { %9043 = dma.done.wait [#allocation3], 2560  }
 0xdff   :  { %9044 = vsyncadd [#allocation3], 4294964736 }
 0xe00   :  { %9045 = dma.done.wait [#allocation5], 1024  }
 0xe01   :  { %9046 = vsyncadd [#allocation5], 4294966272 }
 0xe02   :  { %6636 = vsyncpa [#allocation3], 1 }
 0xe03   :  { %6637 = vsyncpa [#allocation5], 1 }

</bundles_post_ra>
